<compile_context>
chip_gen: v5e
topology: v5e:2x2
jax: 0.10.0
libtpu: 0.0.40
codegen_flags: <defaults>
</compile_context>

<pallas_src>
import jax
import jax.numpy as jnp
from jax import lax
from jax.experimental import pallas as pl
from jax.experimental.pallas import tpu as pltpu

LRELU_SLOPE = 0.2
BN_EPS = 1e-5
LANE = 128
MAX_BAND_ROWS = 256     # output rows per in-kernel MXU band

_PARALLEL = pltpu.CompilerParams(dimension_semantics=("parallel",))


def _ceil_to(x, m):
    return -(-x // m) * m


# ----------------------------- Pallas kernels --------------------------------

def _make_conv_kernel(mode, ho, wo, kp, cout):
    """Per-image k4/s2 conv on a space-to-depth block.

    mode: 'bias_lrelu' | 'stats' | 'bias_sigmoid'
    Input block (1, ho+1, wo+1, kp) bf16 (s2d layout, K zero-padded to a lane
    multiple); weight block (4, kp, cout) bf16, tap order (a, b), feature
    order (dy, dx, cin).
    """
    path_a = (wo % 8 == 0)
    if path_a:
        toh = 1
        for d in range(1, ho + 1):
            if ho % d == 0 and d * wo <= MAX_BAND_ROWS:
                toh = d
        n_bands = ho // toh
        band_rows = toh * wo
    else:
        # tiny spatial tail (wo in {4, 1} here): one output row per band
        toh = 1
        n_bands = ho
        band_rows = wo

    def conv_band(x_ref, w_ref, g):
        """f32 conv result (band_rows, cout) for output-row band g."""
        acc = None
        for t in range(4):
            a, b = divmod(t, 2)
            if path_a:
                tap = x_ref[0, pl.ds(g * toh + a, toh), pl.ds(b, wo), :]
                # Merge (toh, wo) -> rows through f32 so the sublane regrouping
                # is an 8-aligned no-op shape cast for any wo % 8 == 0.
                tap = tap.astype(jnp.float32).reshape(band_rows, kp)
                tap = tap.astype(jnp.bfloat16)
            else:
                tap = x_ref[0, g + a, pl.ds(b, wo), :]
            part = jnp.dot(tap, w_ref[t], preferred_element_type=jnp.float32)
            acc = part if acc is None else acc + part
        return acc

    if mode == "stats":
        def kernel(x_ref, w_ref, y_ref, s_ref, q_ref):
            srows = 8 if path_a else 1
            s_acc = jnp.zeros((srows, cout), jnp.float32)
            q_acc = jnp.zeros((srows, cout), jnp.float32)
            for g in range(n_bands):
                acc = conv_band(x_ref, w_ref, g)
                # stats from the f32 accumulator; y stored as bf16
                y_ref[0, pl.ds(g * band_rows, band_rows), :] = acc.astype(y_ref.dtype)
                if path_a:
                    s_acc = s_acc + acc.reshape(band_rows // 8, 8, cout).sum(axis=0)
                    q_acc = q_acc + (acc * acc).reshape(band_rows // 8, 8, cout).sum(axis=0)
                else:
                    s_acc = s_acc + acc.sum(axis=0, keepdims=True)
                    q_acc = q_acc + (acc * acc).sum(axis=0, keepdims=True)
            if path_a:
                s_ref[0] = s_acc
                q_ref[0] = q_acc
            else:
                # spread the total over 8 sublanes so the XLA finalize
                # (sum over all partial rows) is uniform across paths
                s_ref[0] = jnp.broadcast_to(s_acc * 0.125, (8, cout))
                q_ref[0] = jnp.broadcast_to(q_acc * 0.125, (8, cout))
        return kernel

    def kernel(x_ref, w_ref, b_ref, o_ref):
        bias = b_ref[...]                                   # (1, cout) f32
        for g in range(n_bands):
            z = conv_band(x_ref, w_ref, g) + bias
            if mode == "bias_lrelu":
                z = jnp.maximum(z, LRELU_SLOPE * z)
            else:                                           # bias_sigmoid
                z = 1.0 / (1.0 + jnp.exp(-z))
            o_ref[0, pl.ds(g * band_rows, band_rows), :] = z.astype(o_ref.dtype)
    return kernel


def _conv_pallas(xs, w4, mode, ho, wo, cout, bias=None):
    """xs: (N, ho+1, wo+1, kp) bf16; w4: (4, kp, cout) bf16."""
    n, p, q, kp = xs.shape
    rows = ho * wo
    kernel = _make_conv_kernel(mode, ho, wo, kp, cout)

    x_spec = pl.BlockSpec((1, p, q, kp), lambda i: (i, 0, 0, 0))     # per image
    w_spec = pl.BlockSpec((4, kp, cout), lambda i: (0, 0, 0))        # resident
    y_spec = pl.BlockSpec((1, rows, cout), lambda i: (i, 0, 0))      # true cout

    if mode == "stats":
        stat_spec = pl.BlockSpec((1, 8, cout), lambda i: (i, 0, 0))
        return pl.pallas_call(
            kernel,
            grid=(n,),
            in_specs=[x_spec, w_spec],
            out_specs=[y_spec, stat_spec, stat_spec],
            out_shape=(
                jax.ShapeDtypeStruct((n, rows, cout), jnp.bfloat16),
                jax.ShapeDtypeStruct((n, 8, cout), jnp.float32),
                jax.ShapeDtypeStruct((n, 8, cout), jnp.float32),
            ),
            compiler_params=_PARALLEL,
        )(xs, w4)

    out_dtype = jnp.bfloat16 if mode == "bias_lrelu" else jnp.float32
    b_spec = pl.BlockSpec((1, cout), lambda i: (0, 0))
    b2d = bias.astype(jnp.float32).reshape(1, cout)
    return pl.pallas_call(
        kernel,
        grid=(n,),
        in_specs=[x_spec, w_spec, b_spec],
        out_specs=y_spec,
        out_shape=jax.ShapeDtypeStruct((n, rows, cout), out_dtype),
        compiler_params=_PARALLEL,
    )(xs, w4, b2d)


# ------------------------- XLA glue (layout only) -----------------------------

def _pad_s2d(x_nhwc, pad):
    """Zero-pad spatially and space-to-depth by 2 -> (N, P, Q, 4C) bf16.

    A k=4/s=2 conv on the padded input equals a 2x2/s=1 conv on this tensor,
    so the kernel's im2col is 4 contiguous taps (no 16x patch materialization).
    The K dim is zero-padded to a lane multiple so the MXU contraction never
    touches undefined lanes.
    """
    n, h, w, c = x_nhwc.shape
    xp = x_nhwc
    if pad:
        xp = jnp.pad(xp, ((0, 0), (pad, pad), (pad, pad), (0, 0)))
    hp, wp = h + 2 * pad, w + 2 * pad
    p, q = hp // 2, wp // 2
    xs = xp.reshape(n, p, 2, q, 2, c)
    xs = xs.transpose(0, 1, 3, 2, 4, 5).reshape(n, p, q, 4 * c)
    kp = _ceil_to(4 * c, LANE)
    if kp != 4 * c:
        xs = jnp.pad(xs, ((0, 0), (0, 0), (0, 0), (0, kp - 4 * c)))
    return xs.astype(jnp.bfloat16), p - 1, q - 1            # ho = P-1, wo = Q-1


def _prep_weight(w_oihw):
    """PyTorch (Cout, Cin, 4, 4) -> (4, ceil(4*Cin,128), Cout) bf16,
    tap order (a, b), feature order (dy, dx, cin) matching the s2d layout."""
    co, ci, _, _ = w_oihw.shape
    w = w_oihw.reshape(co, ci, 2, 2, 2, 2)        # (co, ci, a, dy, b, dx)
    w = w.transpose(2, 4, 3, 5, 1, 0)             # (a, b, dy, dx, ci, co)
    w = w.reshape(4, 4 * ci, co)
    kp = _ceil_to(4 * ci, LANE)
    if kp != 4 * ci:
        w = jnp.pad(w, ((0, 0), (0, kp - 4 * ci), (0, 0)))
    return w.astype(jnp.bfloat16)


def discriminator_forward(x_nchw, params):
    n = x_nchw.shape[0]
    x = jnp.transpose(x_nchw, (0, 2, 3, 1))        # NCHW -> NHWC, f32

    # Conv(3 -> f, k4 s2 p1) + bias + LeakyReLU(0.2)
    w4 = _prep_weight(params["w0"])
    cout = w4.shape[-1]
    xs, ho, wo = _pad_s2d(x, 1)
    a = _conv_pallas(xs, w4, "bias_lrelu", ho, wo, cout, bias=params["b0"])
    x = a.reshape(n, ho, wo, cout)                 # bf16 NHWC

    # 3 conv blocks: Conv(no bias) + BatchNorm2d(batch stats) + LeakyReLU(0.2).
    # The per-channel BN affine + LeakyReLU is folded into the pad + s2d copy
    # that prepares the next layer's input (one fused XLA pointwise+transpose),
    # so each block is a single pallas_call.
    for i in (1, 2, 3):
        w4 = _prep_weight(params[f"w{i}"])
        cout = w4.shape[-1]
        xs, ho, wo = _pad_s2d(x, 1)
        y, s_part, q_part = _conv_pallas(xs, w4, "stats", ho, wo, cout)
        count = n * ho * wo
        s = s_part.sum(axis=(0, 1))
        q = q_part.sum(axis=(0, 1))
        mean = s / count
        var = jnp.maximum(q / count - mean * mean, 0.0)      # biased, training
        scale = params[f"g{i}"].astype(jnp.float32) * lax.rsqrt(var + BN_EPS)
        shift = params[f"beta{i}"].astype(jnp.float32) - mean * scale
        z = y.astype(jnp.float32) * scale + shift
        z = jnp.maximum(z, LRELU_SLOPE * z)
        x = z.astype(jnp.bfloat16).reshape(n, ho, wo, cout)

    # Conv(8f -> 1, k4 s2 p0) + bias + Sigmoid
    w4 = _prep_weight(params["w4"])
    xs, ho, wo = _pad_s2d(x, 0)
    out = _conv_pallas(xs, w4, "bias_sigmoid", ho, wo, 1, bias=params["b4"])
    return out.reshape(n, 1, 1, 1)                 # (N, 1, 1, 1) == NCHW


# --------------------------- Deterministic parameters -------------------------

def init_params(key, img_channels, f):
    ks = jax.random.split(key, 7)

    def w(k, o, i):
        return (0.02 * jax.random.normal(k, (o, i, 4, 4))).astype(jnp.float32)

    return {
        "w0": w(ks[0], f, img_channels),
        "b0": (0.02 * jax.random.normal(ks[1], (f,))).astype(jnp.float32),
        "w1": w(ks[2], 2 * f, f),
        "g1": jnp.ones((2 * f,), jnp.float32),
        "beta1": jnp.zeros((2 * f,), jnp.float32),
        "w2": w(ks[3], 4 * f, 2 * f),
        "g2": jnp.ones((4 * f,), jnp.float32),
        "beta2": jnp.zeros((4 * f,), jnp.float32),
        "w3": w(ks[4], 8 * f, 4 * f),
        "g3": jnp.ones((8 * f,), jnp.float32),
        "beta3": jnp.zeros((8 * f,), jnp.float32),
        "w4": w(ks[5], 1, 8 * f),
        "b4": (0.02 * jax.random.normal(ks[6], (1,))).astype(jnp.float32),
    }


if __name__ == "__main__":
    dsc_features = 8      # small, but preserves the architecture's channel ratios
    img_channels = 3
    batch = 2

    key = jax.random.PRNGKey(0)
    kx, kp = jax.random.split(key)
    # 64x64 input so the k=4/s=2 stack ends at a (N,1,1,1) sigmoid score,
    # exactly like the DCGAN discriminator.
    x = jax.random.normal(kx, (batch, img_channels, 64, 64), dtype=jnp.float32)
    params = init_params(kp, img_channels, dsc_features)

    fwd = jax.jit(discriminator_forward)
    out = jax.block_until_ready(fwd(x, params))
    assert out.shape == (batch, 1, 1, 1), out.shape
    assert bool(jnp.all((out >= 0.0) & (out <= 1.0)))
    print("KERNEL_OK")
</pallas_src>

<mosaic_0001>
module attributes {stable_mosaic.version = 11 : i64} {
  func.func @kernel(%arg0: i32, %arg1: memref<1x33x33x128xbf16, #tpu.memory_space<vmem>>, %arg2: memref<4x128x8xbf16, #tpu.memory_space<vmem>>, %arg3: memref<1x8xf32, #tpu.memory_space<vmem>>, %arg4: memref<1x1024x8xbf16, #tpu.memory_space<vmem>>) attributes {dimension_semantics = [#tpu.dimension_semantics<parallel>], iteration_bounds = array<i64: 2>, scalar_prefetch = 0 : i64, scratch_operands = 0 : i64, tpu.core_type = #tpu.core_type<tc>, window_params = [{transform_indices = @transform_0, window_bounds = array<i64: 1, 33, 33, 128>}, {pipeline_mode = #tpu.pipeline_mode<synchronous>, transform_indices = @transform_1, window_bounds = array<i64: 4, 128, 8>}, {pipeline_mode = #tpu.pipeline_mode<synchronous>, transform_indices = @transform_2, window_bounds = array<i64: 1, 8>}, {transform_indices = @transform_3, window_bounds = array<i64: 1, 1024, 8>}]} {
    %c0 = arith.constant 0 : index
    %c0_0 = arith.constant 0 : index
    %0 = vector.load %arg3[%c0, %c0_0] : memref<1x8xf32, #tpu.memory_space<vmem>>, vector<1x8xf32>
    %c0_1 = arith.constant 0 : index
    %c0_2 = arith.constant 0 : index
    %c0_3 = arith.constant 0 : index
    %c0_4 = arith.constant 0 : index
    %1 = vector.load %arg1[%c0_1, %c0_2, %c0_3, %c0_4] : memref<1x33x33x128xbf16, #tpu.memory_space<vmem>>, vector<1x8x32x128xbf16>
    %2 = vector.shape_cast %1 : vector<1x8x32x128xbf16> to vector<8x32x128xbf16>
    %3 = arith.extf %2 : vector<8x32x128xbf16> to vector<8x32x128xf32>
    %4 = vector.shape_cast %3 : vector<8x32x128xf32> to vector<256x128xf32>
    %5 = arith.truncf %4 : vector<256x128xf32> to vector<256x128xbf16>
    %c0_5 = arith.constant 0 : index
    %c0_6 = arith.constant 0 : index
    %c0_7 = arith.constant 0 : index
    %6 = vector.load %arg2[%c0_5, %c0_6, %c0_7] : memref<4x128x8xbf16, #tpu.memory_space<vmem>>, vector<1x128x8xbf16>
    %7 = vector.shape_cast %6 : vector<1x128x8xbf16> to vector<128x8xbf16>
    %cst = arith.constant dense<0.000000e+00> : vector<256x8xf32>
    %8 = tpu.matmul %5, %7, %cst {dimension_numbers = #tpu.dot_dimension_numbers<[1], [0], [0], [1], [0, 0, 1, 1], [], []>} : vector<256x128xbf16>, vector<128x8xbf16>, vector<256x8xf32> -> vector<256x8xf32>
    %c0_8 = arith.constant 0 : index
    %c0_9 = arith.constant 0 : index
    %c1 = arith.constant 1 : index
    %c0_10 = arith.constant 0 : index
    %9 = vector.load %arg1[%c0_8, %c0_9, %c1, %c0_10] : memref<1x33x33x128xbf16, #tpu.memory_space<vmem>>, vector<1x8x32x128xbf16>
    %10 = vector.shape_cast %9 : vector<1x8x32x128xbf16> to vector<8x32x128xbf16>
    %11 = arith.extf %10 : vector<8x32x128xbf16> to vector<8x32x128xf32>
    %12 = vector.shape_cast %11 : vector<8x32x128xf32> to vector<256x128xf32>
    %13 = arith.truncf %12 : vector<256x128xf32> to vector<256x128xbf16>
    %c1_11 = arith.constant 1 : index
    %c0_12 = arith.constant 0 : index
    %c0_13 = arith.constant 0 : index
    %14 = vector.load %arg2[%c1_11, %c0_12, %c0_13] : memref<4x128x8xbf16, #tpu.memory_space<vmem>>, vector<1x128x8xbf16>
    %15 = vector.shape_cast %14 : vector<1x128x8xbf16> to vector<128x8xbf16>
    %cst_14 = arith.constant dense<0.000000e+00> : vector<256x8xf32>
    %16 = tpu.matmul %13, %15, %cst_14 {dimension_numbers = #tpu.dot_dimension_numbers<[1], [0], [0], [1], [0, 0, 1, 1], [], []>} : vector<256x128xbf16>, vector<128x8xbf16>, vector<256x8xf32> -> vector<256x8xf32>
    %17 = arith.addf %8, %16 : vector<256x8xf32>
    %c0_15 = arith.constant 0 : index
    %c1_16 = arith.constant 1 : index
    %c0_17 = arith.constant 0 : index
    %c0_18 = arith.constant 0 : index
    %18 = vector.load %arg1[%c0_15, %c1_16, %c0_17, %c0_18] : memref<1x33x33x128xbf16, #tpu.memory_space<vmem>>, vector<1x8x32x128xbf16>
    %19 = vector.shape_cast %18 : vector<1x8x32x128xbf16> to vector<8x32x128xbf16>
    %20 = arith.extf %19 : vector<8x32x128xbf16> to vector<8x32x128xf32>
    %21 = vector.shape_cast %20 : vector<8x32x128xf32> to vector<256x128xf32>
    %22 = arith.truncf %21 : vector<256x128xf32> to vector<256x128xbf16>
    %c2 = arith.constant 2 : index
    %c0_19 = arith.constant 0 : index
    %c0_20 = arith.constant 0 : index
    %23 = vector.load %arg2[%c2, %c0_19, %c0_20] : memref<4x128x8xbf16, #tpu.memory_space<vmem>>, vector<1x128x8xbf16>
    %24 = vector.shape_cast %23 : vector<1x128x8xbf16> to vector<128x8xbf16>
    %cst_21 = arith.constant dense<0.000000e+00> : vector<256x8xf32>
    %25 = tpu.matmul %22, %24, %cst_21 {dimension_numbers = #tpu.dot_dimension_numbers<[1], [0], [0], [1], [0, 0, 1, 1], [], []>} : vector<256x128xbf16>, vector<128x8xbf16>, vector<256x8xf32> -> vector<256x8xf32>
    %26 = arith.addf %17, %25 : vector<256x8xf32>
    %c0_22 = arith.constant 0 : index
    %c1_23 = arith.constant 1 : index
    %c1_24 = arith.constant 1 : index
    %c0_25 = arith.constant 0 : index
    %27 = vector.load %arg1[%c0_22, %c1_23, %c1_24, %c0_25] : memref<1x33x33x128xbf16, #tpu.memory_space<vmem>>, vector<1x8x32x128xbf16>
    %28 = vector.shape_cast %27 : vector<1x8x32x128xbf16> to vector<8x32x128xbf16>
    %29 = arith.extf %28 : vector<8x32x128xbf16> to vector<8x32x128xf32>
    %30 = vector.shape_cast %29 : vector<8x32x128xf32> to vector<256x128xf32>
    %31 = arith.truncf %30 : vector<256x128xf32> to vector<256x128xbf16>
    %c3 = arith.constant 3 : index
    %c0_26 = arith.constant 0 : index
    %c0_27 = arith.constant 0 : index
    %32 = vector.load %arg2[%c3, %c0_26, %c0_27] : memref<4x128x8xbf16, #tpu.memory_space<vmem>>, vector<1x128x8xbf16>
    %33 = vector.shape_cast %32 : vector<1x128x8xbf16> to vector<128x8xbf16>
    %cst_28 = arith.constant dense<0.000000e+00> : vector<256x8xf32>
    %34 = tpu.matmul %31, %33, %cst_28 {dimension_numbers = #tpu.dot_dimension_numbers<[1], [0], [0], [1], [0, 0, 1, 1], [], []>} : vector<256x128xbf16>, vector<128x8xbf16>, vector<256x8xf32> -> vector<256x8xf32>
    %35 = arith.addf %26, %34 : vector<256x8xf32>
    %36 = vector.broadcast %0 : vector<1x8xf32> to vector<256x8xf32>
    %37 = arith.addf %35, %36 : vector<256x8xf32>
    %cst_29 = arith.constant 2.000000e-01 : f32
    %38 = vector.broadcast %cst_29 : f32 to vector<256x8xf32>
    %39 = arith.mulf %38, %37 : vector<256x8xf32>
    %40 = arith.maximumf %37, %39 : vector<256x8xf32>
    %41 = arith.truncf %40 : vector<256x8xf32> to vector<256x8xbf16>
    %c0_30 = arith.constant 0 : index
    %c0_31 = arith.constant 0 : index
    %c0_32 = arith.constant 0 : index
    %42 = vector.load %arg4[%c0_30, %c0_31, %c0_32] : memref<1x1024x8xbf16, #tpu.memory_space<vmem>>, vector<1x256x8xbf16>
    %43 = vector.shape_cast %42 : vector<1x256x8xbf16> to vector<256x8xbf16>
    %44 = vector.shape_cast %41 : vector<256x8xbf16> to vector<1x256x8xbf16>
    tpu.vector_store %arg4[%c0_30, %c0_31, %c0_32], %44 {strides = array<i32>} : memref<1x1024x8xbf16, #tpu.memory_space<vmem>>, vector<1x256x8xbf16>,
    %c0_33 = arith.constant 0 : index
    %c8 = arith.constant 8 : index
    %c0_34 = arith.constant 0 : index
    %c0_35 = arith.constant 0 : index
    %45 = vector.load %arg1[%c0_33, %c8, %c0_34, %c0_35] : memref<1x33x33x128xbf16, #tpu.memory_space<vmem>>, vector<1x8x32x128xbf16>
    %46 = vector.shape_cast %45 : vector<1x8x32x128xbf16> to vector<8x32x128xbf16>
    %47 = arith.extf %46 : vector<8x32x128xbf16> to vector<8x32x128xf32>
    %48 = vector.shape_cast %47 : vector<8x32x128xf32> to vector<256x128xf32>
    %49 = arith.truncf %48 : vector<256x128xf32> to vector<256x128xbf16>
    %c0_36 = arith.constant 0 : index
    %c0_37 = arith.constant 0 : index
    %c0_38 = arith.constant 0 : index
    %50 = vector.load %arg2[%c0_36, %c0_37, %c0_38] : memref<4x128x8xbf16, #tpu.memory_space<vmem>>, vector<1x128x8xbf16>
    %51 = vector.shape_cast %50 : vector<1x128x8xbf16> to vector<128x8xbf16>
    %cst_39 = arith.constant dense<0.000000e+00> : vector<256x8xf32>
    %52 = tpu.matmul %49, %51, %cst_39 {dimension_numbers = #tpu.dot_dimension_numbers<[1], [0], [0], [1], [0, 0, 1, 1], [], []>} : vector<256x128xbf16>, vector<128x8xbf16>, vector<256x8xf32> -> vector<256x8xf32>
    %c0_40 = arith.constant 0 : index
    %c8_41 = arith.constant 8 : index
    %c1_42 = arith.constant 1 : index
    %c0_43 = arith.constant 0 : index
    %53 = vector.load %arg1[%c0_40, %c8_41, %c1_42, %c0_43] : memref<1x33x33x128xbf16, #tpu.memory_space<vmem>>, vector<1x8x32x128xbf16>
    %54 = vector.shape_cast %53 : vector<1x8x32x128xbf16> to vector<8x32x128xbf16>
    %55 = arith.extf %54 : vector<8x32x128xbf16> to vector<8x32x128xf32>
    %56 = vector.shape_cast %55 : vector<8x32x128xf32> to vector<256x128xf32>
    %57 = arith.truncf %56 : vector<256x128xf32> to vector<256x128xbf16>
    %c1_44 = arith.constant 1 : index
    %c0_45 = arith.constant 0 : index
    %c0_46 = arith.constant 0 : index
    %58 = vector.load %arg2[%c1_44, %c0_45, %c0_46] : memref<4x128x8xbf16, #tpu.memory_space<vmem>>, vector<1x128x8xbf16>
    %59 = vector.shape_cast %58 : vector<1x128x8xbf16> to vector<128x8xbf16>
    %cst_47 = arith.constant dense<0.000000e+00> : vector<256x8xf32>
    %60 = tpu.matmul %57, %59, %cst_47 {dimension_numbers = #tpu.dot_dimension_numbers<[1], [0], [0], [1], [0, 0, 1, 1], [], []>} : vector<256x128xbf16>, vector<128x8xbf16>, vector<256x8xf32> -> vector<256x8xf32>
    %61 = arith.addf %52, %60 : vector<256x8xf32>
    %c0_48 = arith.constant 0 : index
    %c9 = arith.constant 9 : index
    %c0_49 = arith.constant 0 : index
    %c0_50 = arith.constant 0 : index
    %62 = vector.load %arg1[%c0_48, %c9, %c0_49, %c0_50] : memref<1x33x33x128xbf16, #tpu.memory_space<vmem>>, vector<1x8x32x128xbf16>
    %63 = vector.shape_cast %62 : vector<1x8x32x128xbf16> to vector<8x32x128xbf16>
    %64 = arith.extf %63 : vector<8x32x128xbf16> to vector<8x32x128xf32>
    %65 = vector.shape_cast %64 : vector<8x32x128xf32> to vector<256x128xf32>
    %66 = arith.truncf %65 : vector<256x128xf32> to vector<256x128xbf16>
    %c2_51 = arith.constant 2 : index
    %c0_52 = arith.constant 0 : index
    %c0_53 = arith.constant 0 : index
    %67 = vector.load %arg2[%c2_51, %c0_52, %c0_53] : memref<4x128x8xbf16, #tpu.memory_space<vmem>>, vector<1x128x8xbf16>
    %68 = vector.shape_cast %67 : vector<1x128x8xbf16> to vector<128x8xbf16>
    %cst_54 = arith.constant dense<0.000000e+00> : vector<256x8xf32>
    %69 = tpu.matmul %66, %68, %cst_54 {dimension_numbers = #tpu.dot_dimension_numbers<[1], [0], [0], [1], [0, 0, 1, 1], [], []>} : vector<256x128xbf16>, vector<128x8xbf16>, vector<256x8xf32> -> vector<256x8xf32>
    %70 = arith.addf %61, %69 : vector<256x8xf32>
    %c0_55 = arith.constant 0 : index
    %c9_56 = arith.constant 9 : index
    %c1_57 = arith.constant 1 : index
    %c0_58 = arith.constant 0 : index
    %71 = vector.load %arg1[%c0_55, %c9_56, %c1_57, %c0_58] : memref<1x33x33x128xbf16, #tpu.memory_space<vmem>>, vector<1x8x32x128xbf16>
    %72 = vector.shape_cast %71 : vector<1x8x32x128xbf16> to vector<8x32x128xbf16>
    %73 = arith.extf %72 : vector<8x32x128xbf16> to vector<8x32x128xf32>
    %74 = vector.shape_cast %73 : vector<8x32x128xf32> to vector<256x128xf32>
    %75 = arith.truncf %74 : vector<256x128xf32> to vector<256x128xbf16>
    %c3_59 = arith.constant 3 : index
    %c0_60 = arith.constant 0 : index
    %c0_61 = arith.constant 0 : index
    %76 = vector.load %arg2[%c3_59, %c0_60, %c0_61] : memref<4x128x8xbf16, #tpu.memory_space<vmem>>, vector<1x128x8xbf16>
    %77 = vector.shape_cast %76 : vector<1x128x8xbf16> to vector<128x8xbf16>
    %cst_62 = arith.constant dense<0.000000e+00> : vector<256x8xf32>
    %78 = tpu.matmul %75, %77, %cst_62 {dimension_numbers = #tpu.dot_dimension_numbers<[1], [0], [0], [1], [0, 0, 1, 1], [], []>} : vector<256x128xbf16>, vector<128x8xbf16>, vector<256x8xf32> -> vector<256x8xf32>
    %79 = arith.addf %70, %78 : vector<256x8xf32>
    %80 = vector.broadcast %0 : vector<1x8xf32> to vector<256x8xf32>
    %81 = arith.addf %79, %80 : vector<256x8xf32>
    %cst_63 = arith.constant 2.000000e-01 : f32
    %82 = vector.broadcast %cst_63 : f32 to vector<256x8xf32>
    %83 = arith.mulf %82, %81 : vector<256x8xf32>
    %84 = arith.maximumf %81, %83 : vector<256x8xf32>
    %85 = arith.truncf %84 : vector<256x8xf32> to vector<256x8xbf16>
    %c0_64 = arith.constant 0 : index
    %c256 = arith.constant 256 : index
    %c0_65 = arith.constant 0 : index
    %86 = vector.load %arg4[%c0_64, %c256, %c0_65] : memref<1x1024x8xbf16, #tpu.memory_space<vmem>>, vector<1x256x8xbf16>
    %87 = vector.shape_cast %86 : vector<1x256x8xbf16> to vector<256x8xbf16>
    %88 = vector.shape_cast %85 : vector<256x8xbf16> to vector<1x256x8xbf16>
    tpu.vector_store %arg4[%c0_64, %c256, %c0_65], %88 {strides = array<i32>} : memref<1x1024x8xbf16, #tpu.memory_space<vmem>>, vector<1x256x8xbf16>,
    %c0_66 = arith.constant 0 : index
    %c16 = arith.constant 16 : index
    %c0_67 = arith.constant 0 : index
    %c0_68 = arith.constant 0 : index
    %89 = vector.load %arg1[%c0_66, %c16, %c0_67, %c0_68] : memref<1x33x33x128xbf16, #tpu.memory_space<vmem>>, vector<1x8x32x128xbf16>
    %90 = vector.shape_cast %89 : vector<1x8x32x128xbf16> to vector<8x32x128xbf16>
    %91 = arith.extf %90 : vector<8x32x128xbf16> to vector<8x32x128xf32>
    %92 = vector.shape_cast %91 : vector<8x32x128xf32> to vector<256x128xf32>
    %93 = arith.truncf %92 : vector<256x128xf32> to vector<256x128xbf16>
    %c0_69 = arith.constant 0 : index
    %c0_70 = arith.constant 0 : index
    %c0_71 = arith.constant 0 : index
    %94 = vector.load %arg2[%c0_69, %c0_70, %c0_71] : memref<4x128x8xbf16, #tpu.memory_space<vmem>>, vector<1x128x8xbf16>
    %95 = vector.shape_cast %94 : vector<1x128x8xbf16> to vector<128x8xbf16>
    %cst_72 = arith.constant dense<0.000000e+00> : vector<256x8xf32>
    %96 = tpu.matmul %93, %95, %cst_72 {dimension_numbers = #tpu.dot_dimension_numbers<[1], [0], [0], [1], [0, 0, 1, 1], [], []>} : vector<256x128xbf16>, vector<128x8xbf16>, vector<256x8xf32> -> vector<256x8xf32>
    %c0_73 = arith.constant 0 : index
    %c16_74 = arith.constant 16 : index
    %c1_75 = arith.constant 1 : index
    %c0_76 = arith.constant 0 : index
    %97 = vector.load %arg1[%c0_73, %c16_74, %c1_75, %c0_76] : memref<1x33x33x128xbf16, #tpu.memory_space<vmem>>, vector<1x8x32x128xbf16>
    %98 = vector.shape_cast %97 : vector<1x8x32x128xbf16> to vector<8x32x128xbf16>
    %99 = arith.extf %98 : vector<8x32x128xbf16> to vector<8x32x128xf32>
    %100 = vector.shape_cast %99 : vector<8x32x128xf32> to vector<256x128xf32>
    %101 = arith.truncf %100 : vector<256x128xf32> to vector<256x128xbf16>
    %c1_77 = arith.constant 1 : index
    %c0_78 = arith.constant 0 : index
    %c0_79 = arith.constant 0 : index
    %102 = vector.load %arg2[%c1_77, %c0_78, %c0_79] : memref<4x128x8xbf16, #tpu.memory_space<vmem>>, vector<1x128x8xbf16>
    %103 = vector.shape_cast %102 : vector<1x128x8xbf16> to vector<128x8xbf16>
    %cst_80 = arith.constant dense<0.000000e+00> : vector<256x8xf32>
    %104 = tpu.matmul %101, %103, %cst_80 {dimension_numbers = #tpu.dot_dimension_numbers<[1], [0], [0], [1], [0, 0, 1, 1], [], []>} : vector<256x128xbf16>, vector<128x8xbf16>, vector<256x8xf32> -> vector<256x8xf32>
    %105 = arith.addf %96, %104 : vector<256x8xf32>
    %c0_81 = arith.constant 0 : index
    %c17 = arith.constant 17 : index
    %c0_82 = arith.constant 0 : index
    %c0_83 = arith.constant 0 : index
    %106 = vector.load %arg1[%c0_81, %c17, %c0_82, %c0_83] : memref<1x33x33x128xbf16, #tpu.memory_space<vmem>>, vector<1x8x32x128xbf16>
    %107 = vector.shape_cast %106 : vector<1x8x32x128xbf16> to vector<8x32x128xbf16>
    %108 = arith.extf %107 : vector<8x32x128xbf16> to vector<8x32x128xf32>
    %109 = vector.shape_cast %108 : vector<8x32x128xf32> to vector<256x128xf32>
    %110 = arith.truncf %109 : vector<256x128xf32> to vector<256x128xbf16>
    %c2_84 = arith.constant 2 : index
    %c0_85 = arith.constant 0 : index
    %c0_86 = arith.constant 0 : index
    %111 = vector.load %arg2[%c2_84, %c0_85, %c0_86] : memref<4x128x8xbf16, #tpu.memory_space<vmem>>, vector<1x128x8xbf16>
    %112 = vector.shape_cast %111 : vector<1x128x8xbf16> to vector<128x8xbf16>
    %cst_87 = arith.constant dense<0.000000e+00> : vector<256x8xf32>
    %113 = tpu.matmul %110, %112, %cst_87 {dimension_numbers = #tpu.dot_dimension_numbers<[1], [0], [0], [1], [0, 0, 1, 1], [], []>} : vector<256x128xbf16>, vector<128x8xbf16>, vector<256x8xf32> -> vector<256x8xf32>
    %114 = arith.addf %105, %113 : vector<256x8xf32>
    %c0_88 = arith.constant 0 : index
    %c17_89 = arith.constant 17 : index
    %c1_90 = arith.constant 1 : index
    %c0_91 = arith.constant 0 : index
    %115 = vector.load %arg1[%c0_88, %c17_89, %c1_90, %c0_91] : memref<1x33x33x128xbf16, #tpu.memory_space<vmem>>, vector<1x8x32x128xbf16>
    %116 = vector.shape_cast %115 : vector<1x8x32x128xbf16> to vector<8x32x128xbf16>
    %117 = arith.extf %116 : vector<8x32x128xbf16> to vector<8x32x128xf32>
    %118 = vector.shape_cast %117 : vector<8x32x128xf32> to vector<256x128xf32>
    %119 = arith.truncf %118 : vector<256x128xf32> to vector<256x128xbf16>
    %c3_92 = arith.constant 3 : index
    %c0_93 = arith.constant 0 : index
    %c0_94 = arith.constant 0 : index
    %120 = vector.load %arg2[%c3_92, %c0_93, %c0_94] : memref<4x128x8xbf16, #tpu.memory_space<vmem>>, vector<1x128x8xbf16>
    %121 = vector.shape_cast %120 : vector<1x128x8xbf16> to vector<128x8xbf16>
    %cst_95 = arith.constant dense<0.000000e+00> : vector<256x8xf32>
    %122 = tpu.matmul %119, %121, %cst_95 {dimension_numbers = #tpu.dot_dimension_numbers<[1], [0], [0], [1], [0, 0, 1, 1], [], []>} : vector<256x128xbf16>, vector<128x8xbf16>, vector<256x8xf32> -> vector<256x8xf32>
    %123 = arith.addf %114, %122 : vector<256x8xf32>
    %124 = vector.broadcast %0 : vector<1x8xf32> to vector<256x8xf32>
    %125 = arith.addf %123, %124 : vector<256x8xf32>
    %cst_96 = arith.constant 2.000000e-01 : f32
    %126 = vector.broadcast %cst_96 : f32 to vector<256x8xf32>
    %127 = arith.mulf %126, %125 : vector<256x8xf32>
    %128 = arith.maximumf %125, %127 : vector<256x8xf32>
    %129 = arith.truncf %128 : vector<256x8xf32> to vector<256x8xbf16>
    %c0_97 = arith.constant 0 : index
    %c512 = arith.constant 512 : index
    %c0_98 = arith.constant 0 : index
    %130 = vector.load %arg4[%c0_97, %c512, %c0_98] : memref<1x1024x8xbf16, #tpu.memory_space<vmem>>, vector<1x256x8xbf16>
    %131 = vector.shape_cast %130 : vector<1x256x8xbf16> to vector<256x8xbf16>
    %132 = vector.shape_cast %129 : vector<256x8xbf16> to vector<1x256x8xbf16>
    tpu.vector_store %arg4[%c0_97, %c512, %c0_98], %132 {strides = array<i32>} : memref<1x1024x8xbf16, #tpu.memory_space<vmem>>, vector<1x256x8xbf16>,
    %c0_99 = arith.constant 0 : index
    %c24 = arith.constant 24 : index
    %c0_100 = arith.constant 0 : index
    %c0_101 = arith.constant 0 : index
    %133 = vector.load %arg1[%c0_99, %c24, %c0_100, %c0_101] : memref<1x33x33x128xbf16, #tpu.memory_space<vmem>>, vector<1x8x32x128xbf16>
    %134 = vector.shape_cast %133 : vector<1x8x32x128xbf16> to vector<8x32x128xbf16>
    %135 = arith.extf %134 : vector<8x32x128xbf16> to vector<8x32x128xf32>
    %136 = vector.shape_cast %135 : vector<8x32x128xf32> to vector<256x128xf32>
    %137 = arith.truncf %136 : vector<256x128xf32> to vector<256x128xbf16>
    %c0_102 = arith.constant 0 : index
    %c0_103 = arith.constant 0 : index
    %c0_104 = arith.constant 0 : index
    %138 = vector.load %arg2[%c0_102, %c0_103, %c0_104] : memref<4x128x8xbf16, #tpu.memory_space<vmem>>, vector<1x128x8xbf16>
    %139 = vector.shape_cast %138 : vector<1x128x8xbf16> to vector<128x8xbf16>
    %cst_105 = arith.constant dense<0.000000e+00> : vector<256x8xf32>
    %140 = tpu.matmul %137, %139, %cst_105 {dimension_numbers = #tpu.dot_dimension_numbers<[1], [0], [0], [1], [0, 0, 1, 1], [], []>} : vector<256x128xbf16>, vector<128x8xbf16>, vector<256x8xf32> -> vector<256x8xf32>
    %c0_106 = arith.constant 0 : index
    %c24_107 = arith.constant 24 : index
    %c1_108 = arith.constant 1 : index
    %c0_109 = arith.constant 0 : index
    %141 = vector.load %arg1[%c0_106, %c24_107, %c1_108, %c0_109] : memref<1x33x33x128xbf16, #tpu.memory_space<vmem>>, vector<1x8x32x128xbf16>
    %142 = vector.shape_cast %141 : vector<1x8x32x128xbf16> to vector<8x32x128xbf16>
    %143 = arith.extf %142 : vector<8x32x128xbf16> to vector<8x32x128xf32>
    %144 = vector.shape_cast %143 : vector<8x32x128xf32> to vector<256x128xf32>
    %145 = arith.truncf %144 : vector<256x128xf32> to vector<256x128xbf16>
    %c1_110 = arith.constant 1 : index
    %c0_111 = arith.constant 0 : index
    %c0_112 = arith.constant 0 : index
    %146 = vector.load %arg2[%c1_110, %c0_111, %c0_112] : memref<4x128x8xbf16, #tpu.memory_space<vmem>>, vector<1x128x8xbf16>
    %147 = vector.shape_cast %146 : vector<1x128x8xbf16> to vector<128x8xbf16>
    %cst_113 = arith.constant dense<0.000000e+00> : vector<256x8xf32>
    %148 = tpu.matmul %145, %147, %cst_113 {dimension_numbers = #tpu.dot_dimension_numbers<[1], [0], [0], [1], [0, 0, 1, 1], [], []>} : vector<256x128xbf16>, vector<128x8xbf16>, vector<256x8xf32> -> vector<256x8xf32>
    %149 = arith.addf %140, %148 : vector<256x8xf32>
    %c0_114 = arith.constant 0 : index
    %c25 = arith.constant 25 : index
    %c0_115 = arith.constant 0 : index
    %c0_116 = arith.constant 0 : index
    %150 = vector.load %arg1[%c0_114, %c25, %c0_115, %c0_116] : memref<1x33x33x128xbf16, #tpu.memory_space<vmem>>, vector<1x8x32x128xbf16>
    %151 = vector.shape_cast %150 : vector<1x8x32x128xbf16> to vector<8x32x128xbf16>
    %152 = arith.extf %151 : vector<8x32x128xbf16> to vector<8x32x128xf32>
    %153 = vector.shape_cast %152 : vector<8x32x128xf32> to vector<256x128xf32>
    %154 = arith.truncf %153 : vector<256x128xf32> to vector<256x128xbf16>
    %c2_117 = arith.constant 2 : index
    %c0_118 = arith.constant 0 : index
    %c0_119 = arith.constant 0 : index
    %155 = vector.load %arg2[%c2_117, %c0_118, %c0_119] : memref<4x128x8xbf16, #tpu.memory_space<vmem>>, vector<1x128x8xbf16>
    %156 = vector.shape_cast %155 : vector<1x128x8xbf16> to vector<128x8xbf16>
    %cst_120 = arith.constant dense<0.000000e+00> : vector<256x8xf32>
    %157 = tpu.matmul %154, %156, %cst_120 {dimension_numbers = #tpu.dot_dimension_numbers<[1], [0], [0], [1], [0, 0, 1, 1], [], []>} : vector<256x128xbf16>, vector<128x8xbf16>, vector<256x8xf32> -> vector<256x8xf32>
    %158 = arith.addf %149, %157 : vector<256x8xf32>
    %c0_121 = arith.constant 0 : index
    %c25_122 = arith.constant 25 : index
    %c1_123 = arith.constant 1 : index
    %c0_124 = arith.constant 0 : index
    %159 = vector.load %arg1[%c0_121, %c25_122, %c1_123, %c0_124] : memref<1x33x33x128xbf16, #tpu.memory_space<vmem>>, vector<1x8x32x128xbf16>
    %160 = vector.shape_cast %159 : vector<1x8x32x128xbf16> to vector<8x32x128xbf16>
    %161 = arith.extf %160 : vector<8x32x128xbf16> to vector<8x32x128xf32>
    %162 = vector.shape_cast %161 : vector<8x32x128xf32> to vector<256x128xf32>
    %163 = arith.truncf %162 : vector<256x128xf32> to vector<256x128xbf16>
    %c3_125 = arith.constant 3 : index
    %c0_126 = arith.constant 0 : index
    %c0_127 = arith.constant 0 : index
    %164 = vector.load %arg2[%c3_125, %c0_126, %c0_127] : memref<4x128x8xbf16, #tpu.memory_space<vmem>>, vector<1x128x8xbf16>
    %165 = vector.shape_cast %164 : vector<1x128x8xbf16> to vector<128x8xbf16>
    %cst_128 = arith.constant dense<0.000000e+00> : vector<256x8xf32>
    %166 = tpu.matmul %163, %165, %cst_128 {dimension_numbers = #tpu.dot_dimension_numbers<[1], [0], [0], [1], [0, 0, 1, 1], [], []>} : vector<256x128xbf16>, vector<128x8xbf16>, vector<256x8xf32> -> vector<256x8xf32>
    %167 = arith.addf %158, %166 : vector<256x8xf32>
    %168 = vector.broadcast %0 : vector<1x8xf32> to vector<256x8xf32>
    %169 = arith.addf %167, %168 : vector<256x8xf32>
    %cst_129 = arith.constant 2.000000e-01 : f32
    %170 = vector.broadcast %cst_129 : f32 to vector<256x8xf32>
    %171 = arith.mulf %170, %169 : vector<256x8xf32>
    %172 = arith.maximumf %169, %171 : vector<256x8xf32>
    %173 = arith.truncf %172 : vector<256x8xf32> to vector<256x8xbf16>
    %c0_130 = arith.constant 0 : index
    %c768 = arith.constant 768 : index
    %c0_131 = arith.constant 0 : index
    %174 = vector.load %arg4[%c0_130, %c768, %c0_131] : memref<1x1024x8xbf16, #tpu.memory_space<vmem>>, vector<1x256x8xbf16>
    %175 = vector.shape_cast %174 : vector<1x256x8xbf16> to vector<256x8xbf16>
    %176 = vector.shape_cast %173 : vector<256x8xbf16> to vector<1x256x8xbf16>
    tpu.vector_store %arg4[%c0_130, %c768, %c0_131], %176 {strides = array<i32>} : memref<1x1024x8xbf16, #tpu.memory_space<vmem>>, vector<1x256x8xbf16>,
    return
  }
  func.func @transform_0(%arg0: i32) -> (i32, i32, i32, i32) {
    %c0_i32 = arith.constant 0 : i32
    %c0_i32_0 = arith.constant 0 : i32
    %c0_i32_1 = arith.constant 0 : i32
    %c0_i32_2 = arith.constant 0 : i32
    return %arg0, %c0_i32, %c0_i32_0, %c0_i32_1 : i32, i32, i32, i32
  }
  func.func @transform_1(%arg0: i32) -> (i32, i32, i32) {
    %c0_i32 = arith.constant 0 : i32
    %c0_i32_0 = arith.constant 0 : i32
    %c0_i32_1 = arith.constant 0 : i32
    %c0_i32_2 = arith.constant 0 : i32
    return %c0_i32, %c0_i32_0, %c0_i32_1 : i32, i32, i32
  }
  func.func @transform_2(%arg0: i32) -> (i32, i32) {
    %c0_i32 = arith.constant 0 : i32
    %c0_i32_0 = arith.constant 0 : i32
    %c0_i32_1 = arith.constant 0 : i32
    return %c0_i32, %c0_i32_0 : i32, i32
  }
  func.func @transform_3(%arg0: i32) -> (i32, i32, i32) {
    %c0_i32 = arith.constant 0 : i32
    %c0_i32_0 = arith.constant 0 : i32
    %c0_i32_1 = arith.constant 0 : i32
    return %arg0, %c0_i32, %c0_i32_0 : i32, i32, i32
  }
}

module attributes {stable_mosaic.version = 11 : i64} {
  func.func @kernel(%arg0: i32, %arg1: memref<1x17x17x128xbf16, #tpu.memory_space<vmem>>, %arg2: memref<4x128x16xbf16, #tpu.memory_space<vmem>>, %arg3: memref<1x256x16xbf16, #tpu.memory_space<vmem>>, %arg4: memref<1x8x16xf32, #tpu.memory_space<vmem>>, %arg5: memref<1x8x16xf32, #tpu.memory_space<vmem>>) attributes {dimension_semantics = [#tpu.dimension_semantics<parallel>], iteration_bounds = array<i64: 2>, scalar_prefetch = 0 : i64, scratch_operands = 0 : i64, tpu.core_type = #tpu.core_type<tc>, window_params = [{transform_indices = @transform_0, window_bounds = array<i64: 1, 17, 17, 128>}, {pipeline_mode = #tpu.pipeline_mode<synchronous>, transform_indices = @transform_1, window_bounds = array<i64: 4, 128, 16>}, {transform_indices = @transform_2, window_bounds = array<i64: 1, 256, 16>}, {transform_indices = @transform_3, window_bounds = array<i64: 1, 8, 16>}, {transform_indices = @transform_4, window_bounds = array<i64: 1, 8, 16>}]} {
    %cst = arith.constant 0.000000e+00 : f32
    %0 = vector.broadcast %cst : f32 to vector<8x16xf32>
    %cst_0 = arith.constant 0.000000e+00 : f32
    %1 = vector.broadcast %cst_0 : f32 to vector<8x16xf32>
    %c0 = arith.constant 0 : index
    %c0_1 = arith.constant 0 : index
    %c0_2 = arith.constant 0 : index
    %c0_3 = arith.constant 0 : index
    %2 = vector.load %arg1[%c0, %c0_1, %c0_2, %c0_3] : memref<1x17x17x128xbf16, #tpu.memory_space<vmem>>, vector<1x16x16x128xbf16>
    %3 = vector.shape_cast %2 : vector<1x16x16x128xbf16> to vector<16x16x128xbf16>
    %4 = arith.extf %3 : vector<16x16x128xbf16> to vector<16x16x128xf32>
    %5 = vector.shape_cast %4 : vector<16x16x128xf32> to vector<256x128xf32>
    %6 = arith.truncf %5 : vector<256x128xf32> to vector<256x128xbf16>
    %c0_4 = arith.constant 0 : index
    %c0_5 = arith.constant 0 : index
    %c0_6 = arith.constant 0 : index
    %7 = vector.load %arg2[%c0_4, %c0_5, %c0_6] : memref<4x128x16xbf16, #tpu.memory_space<vmem>>, vector<1x128x16xbf16>
    %8 = vector.shape_cast %7 : vector<1x128x16xbf16> to vector<128x16xbf16>
    %cst_7 = arith.constant dense<0.000000e+00> : vector<256x16xf32>
    %9 = tpu.matmul %6, %8, %cst_7 {dimension_numbers = #tpu.dot_dimension_numbers<[1], [0], [0], [1], [0, 0, 1, 1], [], []>} : vector<256x128xbf16>, vector<128x16xbf16>, vector<256x16xf32> -> vector<256x16xf32>
    %c0_8 = arith.constant 0 : index
    %c0_9 = arith.constant 0 : index
    %c1 = arith.constant 1 : index
    %c0_10 = arith.constant 0 : index
    %10 = vector.load %arg1[%c0_8, %c0_9, %c1, %c0_10] : memref<1x17x17x128xbf16, #tpu.memory_space<vmem>>, vector<1x16x16x128xbf16>
    %11 = vector.shape_cast %10 : vector<1x16x16x128xbf16> to vector<16x16x128xbf16>
    %12 = arith.extf %11 : vector<16x16x128xbf16> to vector<16x16x128xf32>
    %13 = vector.shape_cast %12 : vector<16x16x128xf32> to vector<256x128xf32>
    %14 = arith.truncf %13 : vector<256x128xf32> to vector<256x128xbf16>
    %c1_11 = arith.constant 1 : index
    %c0_12 = arith.constant 0 : index
    %c0_13 = arith.constant 0 : index
    %15 = vector.load %arg2[%c1_11, %c0_12, %c0_13] : memref<4x128x16xbf16, #tpu.memory_space<vmem>>, vector<1x128x16xbf16>
    %16 = vector.shape_cast %15 : vector<1x128x16xbf16> to vector<128x16xbf16>
    %cst_14 = arith.constant dense<0.000000e+00> : vector<256x16xf32>
    %17 = tpu.matmul %14, %16, %cst_14 {dimension_numbers = #tpu.dot_dimension_numbers<[1], [0], [0], [1], [0, 0, 1, 1], [], []>} : vector<256x128xbf16>, vector<128x16xbf16>, vector<256x16xf32> -> vector<256x16xf32>
    %18 = arith.addf %9, %17 : vector<256x16xf32>
    %c0_15 = arith.constant 0 : index
    %c1_16 = arith.constant 1 : index
    %c0_17 = arith.constant 0 : index
    %c0_18 = arith.constant 0 : index
    %19 = vector.load %arg1[%c0_15, %c1_16, %c0_17, %c0_18] : memref<1x17x17x128xbf16, #tpu.memory_space<vmem>>, vector<1x16x16x128xbf16>
    %20 = vector.shape_cast %19 : vector<1x16x16x128xbf16> to vector<16x16x128xbf16>
    %21 = arith.extf %20 : vector<16x16x128xbf16> to vector<16x16x128xf32>
    %22 = vector.shape_cast %21 : vector<16x16x128xf32> to vector<256x128xf32>
    %23 = arith.truncf %22 : vector<256x128xf32> to vector<256x128xbf16>
    %c2 = arith.constant 2 : index
    %c0_19 = arith.constant 0 : index
    %c0_20 = arith.constant 0 : index
    %24 = vector.load %arg2[%c2, %c0_19, %c0_20] : memref<4x128x16xbf16, #tpu.memory_space<vmem>>, vector<1x128x16xbf16>
    %25 = vector.shape_cast %24 : vector<1x128x16xbf16> to vector<128x16xbf16>
    %cst_21 = arith.constant dense<0.000000e+00> : vector<256x16xf32>
    %26 = tpu.matmul %23, %25, %cst_21 {dimension_numbers = #tpu.dot_dimension_numbers<[1], [0], [0], [1], [0, 0, 1, 1], [], []>} : vector<256x128xbf16>, vector<128x16xbf16>, vector<256x16xf32> -> vector<256x16xf32>
    %27 = arith.addf %18, %26 : vector<256x16xf32>
    %c0_22 = arith.constant 0 : index
    %c1_23 = arith.constant 1 : index
    %c1_24 = arith.constant 1 : index
    %c0_25 = arith.constant 0 : index
    %28 = vector.load %arg1[%c0_22, %c1_23, %c1_24, %c0_25] : memref<1x17x17x128xbf16, #tpu.memory_space<vmem>>, vector<1x16x16x128xbf16>
    %29 = vector.shape_cast %28 : vector<1x16x16x128xbf16> to vector<16x16x128xbf16>
    %30 = arith.extf %29 : vector<16x16x128xbf16> to vector<16x16x128xf32>
    %31 = vector.shape_cast %30 : vector<16x16x128xf32> to vector<256x128xf32>
    %32 = arith.truncf %31 : vector<256x128xf32> to vector<256x128xbf16>
    %c3 = arith.constant 3 : index
    %c0_26 = arith.constant 0 : index
    %c0_27 = arith.constant 0 : index
    %33 = vector.load %arg2[%c3, %c0_26, %c0_27] : memref<4x128x16xbf16, #tpu.memory_space<vmem>>, vector<1x128x16xbf16>
    %34 = vector.shape_cast %33 : vector<1x128x16xbf16> to vector<128x16xbf16>
    %cst_28 = arith.constant dense<0.000000e+00> : vector<256x16xf32>
    %35 = tpu.matmul %32, %34, %cst_28 {dimension_numbers = #tpu.dot_dimension_numbers<[1], [0], [0], [1], [0, 0, 1, 1], [], []>} : vector<256x128xbf16>, vector<128x16xbf16>, vector<256x16xf32> -> vector<256x16xf32>
    %36 = arith.addf %27, %35 : vector<256x16xf32>
    %37 = arith.truncf %36 : vector<256x16xf32> to vector<256x16xbf16>
    %c0_29 = arith.constant 0 : index
    %c0_30 = arith.constant 0 : index
    %c0_31 = arith.constant 0 : index
    %38 = vector.load %arg3[%c0_29, %c0_30, %c0_31] : memref<1x256x16xbf16, #tpu.memory_space<vmem>>, vector<1x256x16xbf16>
    %39 = vector.shape_cast %38 : vector<1x256x16xbf16> to vector<256x16xbf16>
    %40 = vector.shape_cast %37 : vector<256x16xbf16> to vector<1x256x16xbf16>
    tpu.vector_store %arg3[%c0_29, %c0_30, %c0_31], %40 {strides = array<i32>} : memref<1x256x16xbf16, #tpu.memory_space<vmem>>, vector<1x256x16xbf16>,
    %41 = vector.shape_cast %36 : vector<256x16xf32> to vector<32x8x16xf32>
    %cst_32 = arith.constant dense<0.000000e+00> : vector<8x16xf32>
    %42 = vector.multi_reduction <add>, %41, %cst_32 [0] : vector<32x8x16xf32> to vector<8x16xf32>
    %43 = arith.addf %0, %42 : vector<8x16xf32>
    %44 = arith.mulf %36, %36 : vector<256x16xf32>
    %45 = vector.shape_cast %44 : vector<256x16xf32> to vector<32x8x16xf32>
    %cst_33 = arith.constant dense<0.000000e+00> : vector<8x16xf32>
    %46 = vector.multi_reduction <add>, %45, %cst_33 [0] : vector<32x8x16xf32> to vector<8x16xf32>
    %47 = arith.addf %1, %46 : vector<8x16xf32>
    %c0_34 = arith.constant 0 : index
    %c0_35 = arith.constant 0 : index
    %c0_36 = arith.constant 0 : index
    %48 = vector.load %arg4[%c0_34, %c0_35, %c0_36] : memref<1x8x16xf32, #tpu.memory_space<vmem>>, vector<1x8x16xf32>
    %49 = vector.shape_cast %48 : vector<1x8x16xf32> to vector<8x16xf32>
    %50 = vector.shape_cast %43 : vector<8x16xf32> to vector<1x8x16xf32>
    tpu.vector_store %arg4[%c0_34, %c0_35, %c0_36], %50 {strides = array<i32>} : memref<1x8x16xf32, #tpu.memory_space<vmem>>, vector<1x8x16xf32>,
    %c0_37 = arith.constant 0 : index
    %c0_38 = arith.constant 0 : index
    %c0_39 = arith.constant 0 : index
    %51 = vector.load %arg5[%c0_37, %c0_38, %c0_39] : memref<1x8x16xf32, #tpu.memory_space<vmem>>, vector<1x8x16xf32>
    %52 = vector.shape_cast %51 : vector<1x8x16xf32> to vector<8x16xf32>
    %53 = vector.shape_cast %47 : vector<8x16xf32> to vector<1x8x16xf32>
    tpu.vector_store %arg5[%c0_37, %c0_38, %c0_39], %53 {strides = array<i32>} : memref<1x8x16xf32, #tpu.memory_space<vmem>>, vector<1x8x16xf32>,
    return
  }
  func.func @transform_0(%arg0: i32) -> (i32, i32, i32, i32) {
    %c0_i32 = arith.constant 0 : i32
    %c0_i32_0 = arith.constant 0 : i32
    %c0_i32_1 = arith.constant 0 : i32
    %c0_i32_2 = arith.constant 0 : i32
    return %arg0, %c0_i32, %c0_i32_0, %c0_i32_1 : i32, i32, i32, i32
  }
  func.func @transform_1(%arg0: i32) -> (i32, i32, i32) {
    %c0_i32 = arith.constant 0 : i32
    %c0_i32_0 = arith.constant 0 : i32
    %c0_i32_1 = arith.constant 0 : i32
    %c0_i32_2 = arith.constant 0 : i32
    return %c0_i32, %c0_i32_0, %c0_i32_1 : i32, i32, i32
  }
  func.func @transform_2(%arg0: i32) -> (i32, i32, i32) {
    %c0_i32 = arith.constant 0 : i32
    %c0_i32_0 = arith.constant 0 : i32
    %c0_i32_1 = arith.constant 0 : i32
    return %arg0, %c0_i32, %c0_i32_0 : i32, i32, i32
  }
  func.func @transform_3(%arg0: i32) -> (i32, i32, i32) {
    %c0_i32 = arith.constant 0 : i32
    %c0_i32_0 = arith.constant 0 : i32
    %c0_i32_1 = arith.constant 0 : i32
    return %arg0, %c0_i32, %c0_i32_0 : i32, i32, i32
  }
  func.func @transform_4(%arg0: i32) -> (i32, i32, i32) {
    %c0_i32 = arith.constant 0 : i32
    %c0_i32_0 = arith.constant 0 : i32
    %c0_i32_1 = arith.constant 0 : i32
    return %arg0, %c0_i32, %c0_i32_0 : i32, i32, i32
  }
}

module attributes {stable_mosaic.version = 11 : i64} {
  func.func @kernel(%arg0: i32, %arg1: memref<1x9x9x128xbf16, #tpu.memory_space<vmem>>, %arg2: memref<4x128x32xbf16, #tpu.memory_space<vmem>>, %arg3: memref<1x64x32xbf16, #tpu.memory_space<vmem>>, %arg4: memref<1x8x32xf32, #tpu.memory_space<vmem>>, %arg5: memref<1x8x32xf32, #tpu.memory_space<vmem>>) attributes {dimension_semantics = [#tpu.dimension_semantics<parallel>], iteration_bounds = array<i64: 2>, scalar_prefetch = 0 : i64, scratch_operands = 0 : i64, tpu.core_type = #tpu.core_type<tc>, window_params = [{transform_indices = @transform_0, window_bounds = array<i64: 1, 9, 9, 128>}, {pipeline_mode = #tpu.pipeline_mode<synchronous>, transform_indices = @transform_1, window_bounds = array<i64: 4, 128, 32>}, {transform_indices = @transform_2, window_bounds = array<i64: 1, 64, 32>}, {transform_indices = @transform_3, window_bounds = array<i64: 1, 8, 32>}, {transform_indices = @transform_4, window_bounds = array<i64: 1, 8, 32>}]} {
    %cst = arith.constant 0.000000e+00 : f32
    %0 = vector.broadcast %cst : f32 to vector<8x32xf32>
    %cst_0 = arith.constant 0.000000e+00 : f32
    %1 = vector.broadcast %cst_0 : f32 to vector<8x32xf32>
    %c0 = arith.constant 0 : index
    %c0_1 = arith.constant 0 : index
    %c0_2 = arith.constant 0 : index
    %c0_3 = arith.constant 0 : index
    %2 = vector.load %arg1[%c0, %c0_1, %c0_2, %c0_3] : memref<1x9x9x128xbf16, #tpu.memory_space<vmem>>, vector<1x8x8x128xbf16>
    %3 = vector.shape_cast %2 : vector<1x8x8x128xbf16> to vector<8x8x128xbf16>
    %4 = arith.extf %3 : vector<8x8x128xbf16> to vector<8x8x128xf32>
    %5 = vector.shape_cast %4 : vector<8x8x128xf32> to vector<64x128xf32>
    %6 = arith.truncf %5 : vector<64x128xf32> to vector<64x128xbf16>
    %c0_4 = arith.constant 0 : index
    %c0_5 = arith.constant 0 : index
    %c0_6 = arith.constant 0 : index
    %7 = vector.load %arg2[%c0_4, %c0_5, %c0_6] : memref<4x128x32xbf16, #tpu.memory_space<vmem>>, vector<1x128x32xbf16>
    %8 = vector.shape_cast %7 : vector<1x128x32xbf16> to vector<128x32xbf16>
    %cst_7 = arith.constant dense<0.000000e+00> : vector<64x32xf32>
    %9 = tpu.matmul %6, %8, %cst_7 {dimension_numbers = #tpu.dot_dimension_numbers<[1], [0], [0], [1], [0, 0, 1, 1], [], []>} : vector<64x128xbf16>, vector<128x32xbf16>, vector<64x32xf32> -> vector<64x32xf32>
    %c0_8 = arith.constant 0 : index
    %c0_9 = arith.constant 0 : index
    %c1 = arith.constant 1 : index
    %c0_10 = arith.constant 0 : index
    %10 = vector.load %arg1[%c0_8, %c0_9, %c1, %c0_10] : memref<1x9x9x128xbf16, #tpu.memory_space<vmem>>, vector<1x8x8x128xbf16>
    %11 = vector.shape_cast %10 : vector<1x8x8x128xbf16> to vector<8x8x128xbf16>
    %12 = arith.extf %11 : vector<8x8x128xbf16> to vector<8x8x128xf32>
    %13 = vector.shape_cast %12 : vector<8x8x128xf32> to vector<64x128xf32>
    %14 = arith.truncf %13 : vector<64x128xf32> to vector<64x128xbf16>
    %c1_11 = arith.constant 1 : index
    %c0_12 = arith.constant 0 : index
    %c0_13 = arith.constant 0 : index
    %15 = vector.load %arg2[%c1_11, %c0_12, %c0_13] : memref<4x128x32xbf16, #tpu.memory_space<vmem>>, vector<1x128x32xbf16>
    %16 = vector.shape_cast %15 : vector<1x128x32xbf16> to vector<128x32xbf16>
    %cst_14 = arith.constant dense<0.000000e+00> : vector<64x32xf32>
    %17 = tpu.matmul %14, %16, %cst_14 {dimension_numbers = #tpu.dot_dimension_numbers<[1], [0], [0], [1], [0, 0, 1, 1], [], []>} : vector<64x128xbf16>, vector<128x32xbf16>, vector<64x32xf32> -> vector<64x32xf32>
    %18 = arith.addf %9, %17 : vector<64x32xf32>
    %c0_15 = arith.constant 0 : index
    %c1_16 = arith.constant 1 : index
    %c0_17 = arith.constant 0 : index
    %c0_18 = arith.constant 0 : index
    %19 = vector.load %arg1[%c0_15, %c1_16, %c0_17, %c0_18] : memref<1x9x9x128xbf16, #tpu.memory_space<vmem>>, vector<1x8x8x128xbf16>
    %20 = vector.shape_cast %19 : vector<1x8x8x128xbf16> to vector<8x8x128xbf16>
    %21 = arith.extf %20 : vector<8x8x128xbf16> to vector<8x8x128xf32>
    %22 = vector.shape_cast %21 : vector<8x8x128xf32> to vector<64x128xf32>
    %23 = arith.truncf %22 : vector<64x128xf32> to vector<64x128xbf16>
    %c2 = arith.constant 2 : index
    %c0_19 = arith.constant 0 : index
    %c0_20 = arith.constant 0 : index
    %24 = vector.load %arg2[%c2, %c0_19, %c0_20] : memref<4x128x32xbf16, #tpu.memory_space<vmem>>, vector<1x128x32xbf16>
    %25 = vector.shape_cast %24 : vector<1x128x32xbf16> to vector<128x32xbf16>
    %cst_21 = arith.constant dense<0.000000e+00> : vector<64x32xf32>
    %26 = tpu.matmul %23, %25, %cst_21 {dimension_numbers = #tpu.dot_dimension_numbers<[1], [0], [0], [1], [0, 0, 1, 1], [], []>} : vector<64x128xbf16>, vector<128x32xbf16>, vector<64x32xf32> -> vector<64x32xf32>
    %27 = arith.addf %18, %26 : vector<64x32xf32>
    %c0_22 = arith.constant 0 : index
    %c1_23 = arith.constant 1 : index
    %c1_24 = arith.constant 1 : index
    %c0_25 = arith.constant 0 : index
    %28 = vector.load %arg1[%c0_22, %c1_23, %c1_24, %c0_25] : memref<1x9x9x128xbf16, #tpu.memory_space<vmem>>, vector<1x8x8x128xbf16>
    %29 = vector.shape_cast %28 : vector<1x8x8x128xbf16> to vector<8x8x128xbf16>
    %30 = arith.extf %29 : vector<8x8x128xbf16> to vector<8x8x128xf32>
    %31 = vector.shape_cast %30 : vector<8x8x128xf32> to vector<64x128xf32>
    %32 = arith.truncf %31 : vector<64x128xf32> to vector<64x128xbf16>
    %c3 = arith.constant 3 : index
    %c0_26 = arith.constant 0 : index
    %c0_27 = arith.constant 0 : index
    %33 = vector.load %arg2[%c3, %c0_26, %c0_27] : memref<4x128x32xbf16, #tpu.memory_space<vmem>>, vector<1x128x32xbf16>
    %34 = vector.shape_cast %33 : vector<1x128x32xbf16> to vector<128x32xbf16>
    %cst_28 = arith.constant dense<0.000000e+00> : vector<64x32xf32>
    %35 = tpu.matmul %32, %34, %cst_28 {dimension_numbers = #tpu.dot_dimension_numbers<[1], [0], [0], [1], [0, 0, 1, 1], [], []>} : vector<64x128xbf16>, vector<128x32xbf16>, vector<64x32xf32> -> vector<64x32xf32>
    %36 = arith.addf %27, %35 : vector<64x32xf32>
    %37 = arith.truncf %36 : vector<64x32xf32> to vector<64x32xbf16>
    %c0_29 = arith.constant 0 : index
    %c0_30 = arith.constant 0 : index
    %c0_31 = arith.constant 0 : index
    %38 = vector.load %arg3[%c0_29, %c0_30, %c0_31] : memref<1x64x32xbf16, #tpu.memory_space<vmem>>, vector<1x64x32xbf16>
    %39 = vector.shape_cast %38 : vector<1x64x32xbf16> to vector<64x32xbf16>
    %40 = vector.shape_cast %37 : vector<64x32xbf16> to vector<1x64x32xbf16>
    tpu.vector_store %arg3[%c0_29, %c0_30, %c0_31], %40 {strides = array<i32>} : memref<1x64x32xbf16, #tpu.memory_space<vmem>>, vector<1x64x32xbf16>,
    %41 = vector.shape_cast %36 : vector<64x32xf32> to vector<8x8x32xf32>
    %cst_32 = arith.constant dense<0.000000e+00> : vector<8x32xf32>
    %42 = vector.multi_reduction <add>, %41, %cst_32 [0] : vector<8x8x32xf32> to vector<8x32xf32>
    %43 = arith.addf %0, %42 : vector<8x32xf32>
    %44 = arith.mulf %36, %36 : vector<64x32xf32>
    %45 = vector.shape_cast %44 : vector<64x32xf32> to vector<8x8x32xf32>
    %cst_33 = arith.constant dense<0.000000e+00> : vector<8x32xf32>
    %46 = vector.multi_reduction <add>, %45, %cst_33 [0] : vector<8x8x32xf32> to vector<8x32xf32>
    %47 = arith.addf %1, %46 : vector<8x32xf32>
    %c0_34 = arith.constant 0 : index
    %c0_35 = arith.constant 0 : index
    %c0_36 = arith.constant 0 : index
    %48 = vector.load %arg4[%c0_34, %c0_35, %c0_36] : memref<1x8x32xf32, #tpu.memory_space<vmem>>, vector<1x8x32xf32>
    %49 = vector.shape_cast %48 : vector<1x8x32xf32> to vector<8x32xf32>
    %50 = vector.shape_cast %43 : vector<8x32xf32> to vector<1x8x32xf32>
    tpu.vector_store %arg4[%c0_34, %c0_35, %c0_36], %50 {strides = array<i32>} : memref<1x8x32xf32, #tpu.memory_space<vmem>>, vector<1x8x32xf32>,
    %c0_37 = arith.constant 0 : index
    %c0_38 = arith.constant 0 : index
    %c0_39 = arith.constant 0 : index
    %51 = vector.load %arg5[%c0_37, %c0_38, %c0_39] : memref<1x8x32xf32, #tpu.memory_space<vmem>>, vector<1x8x32xf32>
    %52 = vector.shape_cast %51 : vector<1x8x32xf32> to vector<8x32xf32>
    %53 = vector.shape_cast %47 : vector<8x32xf32> to vector<1x8x32xf32>
    tpu.vector_store %arg5[%c0_37, %c0_38, %c0_39], %53 {strides = array<i32>} : memref<1x8x32xf32, #tpu.memory_space<vmem>>, vector<1x8x32xf32>,
    return
  }
  func.func @transform_0(%arg0: i32) -> (i32, i32, i32, i32) {
    %c0_i32 = arith.constant 0 : i32
    %c0_i32_0 = arith.constant 0 : i32
    %c0_i32_1 = arith.constant 0 : i32
    %c0_i32_2 = arith.constant 0 : i32
    return %arg0, %c0_i32, %c0_i32_0, %c0_i32_1 : i32, i32, i32, i32
  }
  func.func @transform_1(%arg0: i32) -> (i32, i32, i32) {
    %c0_i32 = arith.constant 0 : i32
    %c0_i32_0 = arith.constant 0 : i32
    %c0_i32_1 = arith.constant 0 : i32
    %c0_i32_2 = arith.constant 0 : i32
    return %c0_i32, %c0_i32_0, %c0_i32_1 : i32, i32, i32
  }
  func.func @transform_2(%arg0: i32) -> (i32, i32, i32) {
    %c0_i32 = arith.constant 0 : i32
    %c0_i32_0 = arith.constant 0 : i32
    %c0_i32_1 = arith.constant 0 : i32
    return %arg0, %c0_i32, %c0_i32_0 : i32, i32, i32
  }
  func.func @transform_3(%arg0: i32) -> (i32, i32, i32) {
    %c0_i32 = arith.constant 0 : i32
    %c0_i32_0 = arith.constant 0 : i32
    %c0_i32_1 = arith.constant 0 : i32
    return %arg0, %c0_i32, %c0_i32_0 : i32, i32, i32
  }
  func.func @transform_4(%arg0: i32) -> (i32, i32, i32) {
    %c0_i32 = arith.constant 0 : i32
    %c0_i32_0 = arith.constant 0 : i32
    %c0_i32_1 = arith.constant 0 : i32
    return %arg0, %c0_i32, %c0_i32_0 : i32, i32, i32
  }
}

module attributes {stable_mosaic.version = 11 : i64} {
  func.func @kernel(%arg0: i32, %arg1: memref<1x5x5x128xbf16, #tpu.memory_space<vmem>>, %arg2: memref<4x128x64xbf16, #tpu.memory_space<vmem>>, %arg3: memref<1x16x64xbf16, #tpu.memory_space<vmem>>, %arg4: memref<1x8x64xf32, #tpu.memory_space<vmem>>, %arg5: memref<1x8x64xf32, #tpu.memory_space<vmem>>) attributes {dimension_semantics = [#tpu.dimension_semantics<parallel>], iteration_bounds = array<i64: 2>, scalar_prefetch = 0 : i64, scratch_operands = 0 : i64, tpu.core_type = #tpu.core_type<tc>, window_params = [{transform_indices = @transform_0, window_bounds = array<i64: 1, 5, 5, 128>}, {pipeline_mode = #tpu.pipeline_mode<synchronous>, transform_indices = @transform_1, window_bounds = array<i64: 4, 128, 64>}, {transform_indices = @transform_2, window_bounds = array<i64: 1, 16, 64>}, {transform_indices = @transform_3, window_bounds = array<i64: 1, 8, 64>}, {transform_indices = @transform_4, window_bounds = array<i64: 1, 8, 64>}]} {
    %cst = arith.constant 0.000000e+00 : f32
    %0 = vector.broadcast %cst : f32 to vector<1x64xf32>
    %cst_0 = arith.constant 0.000000e+00 : f32
    %1 = vector.broadcast %cst_0 : f32 to vector<1x64xf32>
    %c0 = arith.constant 0 : index
    %c0_1 = arith.constant 0 : index
    %c0_2 = arith.constant 0 : index
    %c0_3 = arith.constant 0 : index
    %2 = vector.load %arg1[%c0, %c0_1, %c0_2, %c0_3] : memref<1x5x5x128xbf16, #tpu.memory_space<vmem>>, vector<1x1x4x128xbf16>
    %3 = vector.shape_cast %2 : vector<1x1x4x128xbf16> to vector<4x128xbf16>
    %c0_4 = arith.constant 0 : index
    %c0_5 = arith.constant 0 : index
    %c0_6 = arith.constant 0 : index
    %4 = vector.load %arg2[%c0_4, %c0_5, %c0_6] : memref<4x128x64xbf16, #tpu.memory_space<vmem>>, vector<1x128x64xbf16>
    %5 = vector.shape_cast %4 : vector<1x128x64xbf16> to vector<128x64xbf16>
    %cst_7 = arith.constant dense<0.000000e+00> : vector<4x64xf32>
    %6 = tpu.matmul %3, %5, %cst_7 {dimension_numbers = #tpu.dot_dimension_numbers<[1], [0], [0], [1], [0, 0, 1, 1], [], []>} : vector<4x128xbf16>, vector<128x64xbf16>, vector<4x64xf32> -> vector<4x64xf32>
    %c0_8 = arith.constant 0 : index
    %c0_9 = arith.constant 0 : index
    %c1 = arith.constant 1 : index
    %c0_10 = arith.constant 0 : index
    %7 = vector.load %arg1[%c0_8, %c0_9, %c1, %c0_10] : memref<1x5x5x128xbf16, #tpu.memory_space<vmem>>, vector<1x1x4x128xbf16>
    %8 = vector.shape_cast %7 : vector<1x1x4x128xbf16> to vector<4x128xbf16>
    %c1_11 = arith.constant 1 : index
    %c0_12 = arith.constant 0 : index
    %c0_13 = arith.constant 0 : index
    %9 = vector.load %arg2[%c1_11, %c0_12, %c0_13] : memref<4x128x64xbf16, #tpu.memory_space<vmem>>, vector<1x128x64xbf16>
    %10 = vector.shape_cast %9 : vector<1x128x64xbf16> to vector<128x64xbf16>
    %cst_14 = arith.constant dense<0.000000e+00> : vector<4x64xf32>
    %11 = tpu.matmul %8, %10, %cst_14 {dimension_numbers = #tpu.dot_dimension_numbers<[1], [0], [0], [1], [0, 0, 1, 1], [], []>} : vector<4x128xbf16>, vector<128x64xbf16>, vector<4x64xf32> -> vector<4x64xf32>
    %12 = arith.addf %6, %11 : vector<4x64xf32>
    %c0_15 = arith.constant 0 : index
    %c1_16 = arith.constant 1 : index
    %c0_17 = arith.constant 0 : index
    %c0_18 = arith.constant 0 : index
    %13 = vector.load %arg1[%c0_15, %c1_16, %c0_17, %c0_18] : memref<1x5x5x128xbf16, #tpu.memory_space<vmem>>, vector<1x1x4x128xbf16>
    %14 = vector.shape_cast %13 : vector<1x1x4x128xbf16> to vector<4x128xbf16>
    %c2 = arith.constant 2 : index
    %c0_19 = arith.constant 0 : index
    %c0_20 = arith.constant 0 : index
    %15 = vector.load %arg2[%c2, %c0_19, %c0_20] : memref<4x128x64xbf16, #tpu.memory_space<vmem>>, vector<1x128x64xbf16>
    %16 = vector.shape_cast %15 : vector<1x128x64xbf16> to vector<128x64xbf16>
    %cst_21 = arith.constant dense<0.000000e+00> : vector<4x64xf32>
    %17 = tpu.matmul %14, %16, %cst_21 {dimension_numbers = #tpu.dot_dimension_numbers<[1], [0], [0], [1], [0, 0, 1, 1], [], []>} : vector<4x128xbf16>, vector<128x64xbf16>, vector<4x64xf32> -> vector<4x64xf32>
    %18 = arith.addf %12, %17 : vector<4x64xf32>
    %c0_22 = arith.constant 0 : index
    %c1_23 = arith.constant 1 : index
    %c1_24 = arith.constant 1 : index
    %c0_25 = arith.constant 0 : index
    %19 = vector.load %arg1[%c0_22, %c1_23, %c1_24, %c0_25] : memref<1x5x5x128xbf16, #tpu.memory_space<vmem>>, vector<1x1x4x128xbf16>
    %20 = vector.shape_cast %19 : vector<1x1x4x128xbf16> to vector<4x128xbf16>
    %c3 = arith.constant 3 : index
    %c0_26 = arith.constant 0 : index
    %c0_27 = arith.constant 0 : index
    %21 = vector.load %arg2[%c3, %c0_26, %c0_27] : memref<4x128x64xbf16, #tpu.memory_space<vmem>>, vector<1x128x64xbf16>
    %22 = vector.shape_cast %21 : vector<1x128x64xbf16> to vector<128x64xbf16>
    %cst_28 = arith.constant dense<0.000000e+00> : vector<4x64xf32>
    %23 = tpu.matmul %20, %22, %cst_28 {dimension_numbers = #tpu.dot_dimension_numbers<[1], [0], [0], [1], [0, 0, 1, 1], [], []>} : vector<4x128xbf16>, vector<128x64xbf16>, vector<4x64xf32> -> vector<4x64xf32>
    %24 = arith.addf %18, %23 : vector<4x64xf32>
    %25 = arith.truncf %24 : vector<4x64xf32> to vector<4x64xbf16>
    %c0_29 = arith.constant 0 : index
    %c0_30 = arith.constant 0 : index
    %c0_31 = arith.constant 0 : index
    %26 = vector.load %arg3[%c0_29, %c0_30, %c0_31] : memref<1x16x64xbf16, #tpu.memory_space<vmem>>, vector<1x4x64xbf16>
    %27 = vector.shape_cast %26 : vector<1x4x64xbf16> to vector<4x64xbf16>
    %28 = vector.shape_cast %25 : vector<4x64xbf16> to vector<1x4x64xbf16>
    tpu.vector_store %arg3[%c0_29, %c0_30, %c0_31], %28 {strides = array<i32>} : memref<1x16x64xbf16, #tpu.memory_space<vmem>>, vector<1x4x64xbf16>,
    %cst_32 = arith.constant dense<0.000000e+00> : vector<64xf32>
    %29 = vector.multi_reduction <add>, %24, %cst_32 [0] : vector<4x64xf32> to vector<64xf32>
    %30 = vector.shape_cast %29 : vector<64xf32> to vector<1x64xf32>
    %31 = arith.addf %0, %30 : vector<1x64xf32>
    %32 = arith.mulf %24, %24 : vector<4x64xf32>
    %cst_33 = arith.constant dense<0.000000e+00> : vector<64xf32>
    %33 = vector.multi_reduction <add>, %32, %cst_33 [0] : vector<4x64xf32> to vector<64xf32>
    %34 = vector.shape_cast %33 : vector<64xf32> to vector<1x64xf32>
    %35 = arith.addf %1, %34 : vector<1x64xf32>
    %c0_34 = arith.constant 0 : index
    %c1_35 = arith.constant 1 : index
    %c0_36 = arith.constant 0 : index
    %c0_37 = arith.constant 0 : index
    %36 = vector.load %arg1[%c0_34, %c1_35, %c0_36, %c0_37] : memref<1x5x5x128xbf16, #tpu.memory_space<vmem>>, vector<1x1x4x128xbf16>
    %37 = vector.shape_cast %36 : vector<1x1x4x128xbf16> to vector<4x128xbf16>
    %c0_38 = arith.constant 0 : index
    %c0_39 = arith.constant 0 : index
    %c0_40 = arith.constant 0 : index
    %38 = vector.load %arg2[%c0_38, %c0_39, %c0_40] : memref<4x128x64xbf16, #tpu.memory_space<vmem>>, vector<1x128x64xbf16>
    %39 = vector.shape_cast %38 : vector<1x128x64xbf16> to vector<128x64xbf16>
    %cst_41 = arith.constant dense<0.000000e+00> : vector<4x64xf32>
    %40 = tpu.matmul %37, %39, %cst_41 {dimension_numbers = #tpu.dot_dimension_numbers<[1], [0], [0], [1], [0, 0, 1, 1], [], []>} : vector<4x128xbf16>, vector<128x64xbf16>, vector<4x64xf32> -> vector<4x64xf32>
    %c0_42 = arith.constant 0 : index
    %c1_43 = arith.constant 1 : index
    %c1_44 = arith.constant 1 : index
    %c0_45 = arith.constant 0 : index
    %41 = vector.load %arg1[%c0_42, %c1_43, %c1_44, %c0_45] : memref<1x5x5x128xbf16, #tpu.memory_space<vmem>>, vector<1x1x4x128xbf16>
    %42 = vector.shape_cast %41 : vector<1x1x4x128xbf16> to vector<4x128xbf16>
    %c1_46 = arith.constant 1 : index
    %c0_47 = arith.constant 0 : index
    %c0_48 = arith.constant 0 : index
    %43 = vector.load %arg2[%c1_46, %c0_47, %c0_48] : memref<4x128x64xbf16, #tpu.memory_space<vmem>>, vector<1x128x64xbf16>
    %44 = vector.shape_cast %43 : vector<1x128x64xbf16> to vector<128x64xbf16>
    %cst_49 = arith.constant dense<0.000000e+00> : vector<4x64xf32>
    %45 = tpu.matmul %42, %44, %cst_49 {dimension_numbers = #tpu.dot_dimension_numbers<[1], [0], [0], [1], [0, 0, 1, 1], [], []>} : vector<4x128xbf16>, vector<128x64xbf16>, vector<4x64xf32> -> vector<4x64xf32>
    %46 = arith.addf %40, %45 : vector<4x64xf32>
    %c0_50 = arith.constant 0 : index
    %c2_51 = arith.constant 2 : index
    %c0_52 = arith.constant 0 : index
    %c0_53 = arith.constant 0 : index
    %47 = vector.load %arg1[%c0_50, %c2_51, %c0_52, %c0_53] : memref<1x5x5x128xbf16, #tpu.memory_space<vmem>>, vector<1x1x4x128xbf16>
    %48 = vector.shape_cast %47 : vector<1x1x4x128xbf16> to vector<4x128xbf16>
    %c2_54 = arith.constant 2 : index
    %c0_55 = arith.constant 0 : index
    %c0_56 = arith.constant 0 : index
    %49 = vector.load %arg2[%c2_54, %c0_55, %c0_56] : memref<4x128x64xbf16, #tpu.memory_space<vmem>>, vector<1x128x64xbf16>
    %50 = vector.shape_cast %49 : vector<1x128x64xbf16> to vector<128x64xbf16>
    %cst_57 = arith.constant dense<0.000000e+00> : vector<4x64xf32>
    %51 = tpu.matmul %48, %50, %cst_57 {dimension_numbers = #tpu.dot_dimension_numbers<[1], [0], [0], [1], [0, 0, 1, 1], [], []>} : vector<4x128xbf16>, vector<128x64xbf16>, vector<4x64xf32> -> vector<4x64xf32>
    %52 = arith.addf %46, %51 : vector<4x64xf32>
    %c0_58 = arith.constant 0 : index
    %c2_59 = arith.constant 2 : index
    %c1_60 = arith.constant 1 : index
    %c0_61 = arith.constant 0 : index
    %53 = vector.load %arg1[%c0_58, %c2_59, %c1_60, %c0_61] : memref<1x5x5x128xbf16, #tpu.memory_space<vmem>>, vector<1x1x4x128xbf16>
    %54 = vector.shape_cast %53 : vector<1x1x4x128xbf16> to vector<4x128xbf16>
    %c3_62 = arith.constant 3 : index
    %c0_63 = arith.constant 0 : index
    %c0_64 = arith.constant 0 : index
    %55 = vector.load %arg2[%c3_62, %c0_63, %c0_64] : memref<4x128x64xbf16, #tpu.memory_space<vmem>>, vector<1x128x64xbf16>
    %56 = vector.shape_cast %55 : vector<1x128x64xbf16> to vector<128x64xbf16>
    %cst_65 = arith.constant dense<0.000000e+00> : vector<4x64xf32>
    %57 = tpu.matmul %54, %56, %cst_65 {dimension_numbers = #tpu.dot_dimension_numbers<[1], [0], [0], [1], [0, 0, 1, 1], [], []>} : vector<4x128xbf16>, vector<128x64xbf16>, vector<4x64xf32> -> vector<4x64xf32>
    %58 = arith.addf %52, %57 : vector<4x64xf32>
    %59 = arith.truncf %58 : vector<4x64xf32> to vector<4x64xbf16>
    %c0_66 = arith.constant 0 : index
    %c4 = arith.constant 4 : index
    %c0_67 = arith.constant 0 : index
    %60 = vector.load %arg3[%c0_66, %c4, %c0_67] : memref<1x16x64xbf16, #tpu.memory_space<vmem>>, vector<1x4x64xbf16>
    %61 = vector.shape_cast %60 : vector<1x4x64xbf16> to vector<4x64xbf16>
    %62 = vector.shape_cast %59 : vector<4x64xbf16> to vector<1x4x64xbf16>
    tpu.vector_store %arg3[%c0_66, %c4, %c0_67], %62 {strides = array<i32>} : memref<1x16x64xbf16, #tpu.memory_space<vmem>>, vector<1x4x64xbf16>,
    %cst_68 = arith.constant dense<0.000000e+00> : vector<64xf32>
    %63 = vector.multi_reduction <add>, %58, %cst_68 [0] : vector<4x64xf32> to vector<64xf32>
    %64 = vector.shape_cast %63 : vector<64xf32> to vector<1x64xf32>
    %65 = arith.addf %31, %64 : vector<1x64xf32>
    %66 = arith.mulf %58, %58 : vector<4x64xf32>
    %cst_69 = arith.constant dense<0.000000e+00> : vector<64xf32>
    %67 = vector.multi_reduction <add>, %66, %cst_69 [0] : vector<4x64xf32> to vector<64xf32>
    %68 = vector.shape_cast %67 : vector<64xf32> to vector<1x64xf32>
    %69 = arith.addf %35, %68 : vector<1x64xf32>
    %c0_70 = arith.constant 0 : index
    %c2_71 = arith.constant 2 : index
    %c0_72 = arith.constant 0 : index
    %c0_73 = arith.constant 0 : index
    %70 = vector.load %arg1[%c0_70, %c2_71, %c0_72, %c0_73] : memref<1x5x5x128xbf16, #tpu.memory_space<vmem>>, vector<1x1x4x128xbf16>
    %71 = vector.shape_cast %70 : vector<1x1x4x128xbf16> to vector<4x128xbf16>
    %c0_74 = arith.constant 0 : index
    %c0_75 = arith.constant 0 : index
    %c0_76 = arith.constant 0 : index
    %72 = vector.load %arg2[%c0_74, %c0_75, %c0_76] : memref<4x128x64xbf16, #tpu.memory_space<vmem>>, vector<1x128x64xbf16>
    %73 = vector.shape_cast %72 : vector<1x128x64xbf16> to vector<128x64xbf16>
    %cst_77 = arith.constant dense<0.000000e+00> : vector<4x64xf32>
    %74 = tpu.matmul %71, %73, %cst_77 {dimension_numbers = #tpu.dot_dimension_numbers<[1], [0], [0], [1], [0, 0, 1, 1], [], []>} : vector<4x128xbf16>, vector<128x64xbf16>, vector<4x64xf32> -> vector<4x64xf32>
    %c0_78 = arith.constant 0 : index
    %c2_79 = arith.constant 2 : index
    %c1_80 = arith.constant 1 : index
    %c0_81 = arith.constant 0 : index
    %75 = vector.load %arg1[%c0_78, %c2_79, %c1_80, %c0_81] : memref<1x5x5x128xbf16, #tpu.memory_space<vmem>>, vector<1x1x4x128xbf16>
    %76 = vector.shape_cast %75 : vector<1x1x4x128xbf16> to vector<4x128xbf16>
    %c1_82 = arith.constant 1 : index
    %c0_83 = arith.constant 0 : index
    %c0_84 = arith.constant 0 : index
    %77 = vector.load %arg2[%c1_82, %c0_83, %c0_84] : memref<4x128x64xbf16, #tpu.memory_space<vmem>>, vector<1x128x64xbf16>
    %78 = vector.shape_cast %77 : vector<1x128x64xbf16> to vector<128x64xbf16>
    %cst_85 = arith.constant dense<0.000000e+00> : vector<4x64xf32>
    %79 = tpu.matmul %76, %78, %cst_85 {dimension_numbers = #tpu.dot_dimension_numbers<[1], [0], [0], [1], [0, 0, 1, 1], [], []>} : vector<4x128xbf16>, vector<128x64xbf16>, vector<4x64xf32> -> vector<4x64xf32>
    %80 = arith.addf %74, %79 : vector<4x64xf32>
    %c0_86 = arith.constant 0 : index
    %c3_87 = arith.constant 3 : index
    %c0_88 = arith.constant 0 : index
    %c0_89 = arith.constant 0 : index
    %81 = vector.load %arg1[%c0_86, %c3_87, %c0_88, %c0_89] : memref<1x5x5x128xbf16, #tpu.memory_space<vmem>>, vector<1x1x4x128xbf16>
    %82 = vector.shape_cast %81 : vector<1x1x4x128xbf16> to vector<4x128xbf16>
    %c2_90 = arith.constant 2 : index
    %c0_91 = arith.constant 0 : index
    %c0_92 = arith.constant 0 : index
    %83 = vector.load %arg2[%c2_90, %c0_91, %c0_92] : memref<4x128x64xbf16, #tpu.memory_space<vmem>>, vector<1x128x64xbf16>
    %84 = vector.shape_cast %83 : vector<1x128x64xbf16> to vector<128x64xbf16>
    %cst_93 = arith.constant dense<0.000000e+00> : vector<4x64xf32>
    %85 = tpu.matmul %82, %84, %cst_93 {dimension_numbers = #tpu.dot_dimension_numbers<[1], [0], [0], [1], [0, 0, 1, 1], [], []>} : vector<4x128xbf16>, vector<128x64xbf16>, vector<4x64xf32> -> vector<4x64xf32>
    %86 = arith.addf %80, %85 : vector<4x64xf32>
    %c0_94 = arith.constant 0 : index
    %c3_95 = arith.constant 3 : index
    %c1_96 = arith.constant 1 : index
    %c0_97 = arith.constant 0 : index
    %87 = vector.load %arg1[%c0_94, %c3_95, %c1_96, %c0_97] : memref<1x5x5x128xbf16, #tpu.memory_space<vmem>>, vector<1x1x4x128xbf16>
    %88 = vector.shape_cast %87 : vector<1x1x4x128xbf16> to vector<4x128xbf16>
    %c3_98 = arith.constant 3 : index
    %c0_99 = arith.constant 0 : index
    %c0_100 = arith.constant 0 : index
    %89 = vector.load %arg2[%c3_98, %c0_99, %c0_100] : memref<4x128x64xbf16, #tpu.memory_space<vmem>>, vector<1x128x64xbf16>
    %90 = vector.shape_cast %89 : vector<1x128x64xbf16> to vector<128x64xbf16>
    %cst_101 = arith.constant dense<0.000000e+00> : vector<4x64xf32>
    %91 = tpu.matmul %88, %90, %cst_101 {dimension_numbers = #tpu.dot_dimension_numbers<[1], [0], [0], [1], [0, 0, 1, 1], [], []>} : vector<4x128xbf16>, vector<128x64xbf16>, vector<4x64xf32> -> vector<4x64xf32>
    %92 = arith.addf %86, %91 : vector<4x64xf32>
    %93 = arith.truncf %92 : vector<4x64xf32> to vector<4x64xbf16>
    %c0_102 = arith.constant 0 : index
    %c8 = arith.constant 8 : index
    %c0_103 = arith.constant 0 : index
    %94 = vector.load %arg3[%c0_102, %c8, %c0_103] : memref<1x16x64xbf16, #tpu.memory_space<vmem>>, vector<1x4x64xbf16>
    %95 = vector.shape_cast %94 : vector<1x4x64xbf16> to vector<4x64xbf16>
    %96 = vector.shape_cast %93 : vector<4x64xbf16> to vector<1x4x64xbf16>
    tpu.vector_store %arg3[%c0_102, %c8, %c0_103], %96 {strides = array<i32>} : memref<1x16x64xbf16, #tpu.memory_space<vmem>>, vector<1x4x64xbf16>,
    %cst_104 = arith.constant dense<0.000000e+00> : vector<64xf32>
    %97 = vector.multi_reduction <add>, %92, %cst_104 [0] : vector<4x64xf32> to vector<64xf32>
    %98 = vector.shape_cast %97 : vector<64xf32> to vector<1x64xf32>
    %99 = arith.addf %65, %98 : vector<1x64xf32>
    %100 = arith.mulf %92, %92 : vector<4x64xf32>
    %cst_105 = arith.constant dense<0.000000e+00> : vector<64xf32>
    %101 = vector.multi_reduction <add>, %100, %cst_105 [0] : vector<4x64xf32> to vector<64xf32>
    %102 = vector.shape_cast %101 : vector<64xf32> to vector<1x64xf32>
    %103 = arith.addf %69, %102 : vector<1x64xf32>
    %c0_106 = arith.constant 0 : index
    %c3_107 = arith.constant 3 : index
    %c0_108 = arith.constant 0 : index
    %c0_109 = arith.constant 0 : index
    %104 = vector.load %arg1[%c0_106, %c3_107, %c0_108, %c0_109] : memref<1x5x5x128xbf16, #tpu.memory_space<vmem>>, vector<1x1x4x128xbf16>
    %105 = vector.shape_cast %104 : vector<1x1x4x128xbf16> to vector<4x128xbf16>
    %c0_110 = arith.constant 0 : index
    %c0_111 = arith.constant 0 : index
    %c0_112 = arith.constant 0 : index
    %106 = vector.load %arg2[%c0_110, %c0_111, %c0_112] : memref<4x128x64xbf16, #tpu.memory_space<vmem>>, vector<1x128x64xbf16>
    %107 = vector.shape_cast %106 : vector<1x128x64xbf16> to vector<128x64xbf16>
    %cst_113 = arith.constant dense<0.000000e+00> : vector<4x64xf32>
    %108 = tpu.matmul %105, %107, %cst_113 {dimension_numbers = #tpu.dot_dimension_numbers<[1], [0], [0], [1], [0, 0, 1, 1], [], []>} : vector<4x128xbf16>, vector<128x64xbf16>, vector<4x64xf32> -> vector<4x64xf32>
    %c0_114 = arith.constant 0 : index
    %c3_115 = arith.constant 3 : index
    %c1_116 = arith.constant 1 : index
    %c0_117 = arith.constant 0 : index
    %109 = vector.load %arg1[%c0_114, %c3_115, %c1_116, %c0_117] : memref<1x5x5x128xbf16, #tpu.memory_space<vmem>>, vector<1x1x4x128xbf16>
    %110 = vector.shape_cast %109 : vector<1x1x4x128xbf16> to vector<4x128xbf16>
    %c1_118 = arith.constant 1 : index
    %c0_119 = arith.constant 0 : index
    %c0_120 = arith.constant 0 : index
    %111 = vector.load %arg2[%c1_118, %c0_119, %c0_120] : memref<4x128x64xbf16, #tpu.memory_space<vmem>>, vector<1x128x64xbf16>
    %112 = vector.shape_cast %111 : vector<1x128x64xbf16> to vector<128x64xbf16>
    %cst_121 = arith.constant dense<0.000000e+00> : vector<4x64xf32>
    %113 = tpu.matmul %110, %112, %cst_121 {dimension_numbers = #tpu.dot_dimension_numbers<[1], [0], [0], [1], [0, 0, 1, 1], [], []>} : vector<4x128xbf16>, vector<128x64xbf16>, vector<4x64xf32> -> vector<4x64xf32>
    %114 = arith.addf %108, %113 : vector<4x64xf32>
    %c0_122 = arith.constant 0 : index
    %c4_123 = arith.constant 4 : index
    %c0_124 = arith.constant 0 : index
    %c0_125 = arith.constant 0 : index
    %115 = vector.load %arg1[%c0_122, %c4_123, %c0_124, %c0_125] : memref<1x5x5x128xbf16, #tpu.memory_space<vmem>>, vector<1x1x4x128xbf16>
    %116 = vector.shape_cast %115 : vector<1x1x4x128xbf16> to vector<4x128xbf16>
    %c2_126 = arith.constant 2 : index
    %c0_127 = arith.constant 0 : index
    %c0_128 = arith.constant 0 : index
    %117 = vector.load %arg2[%c2_126, %c0_127, %c0_128] : memref<4x128x64xbf16, #tpu.memory_space<vmem>>, vector<1x128x64xbf16>
    %118 = vector.shape_cast %117 : vector<1x128x64xbf16> to vector<128x64xbf16>
    %cst_129 = arith.constant dense<0.000000e+00> : vector<4x64xf32>
    %119 = tpu.matmul %116, %118, %cst_129 {dimension_numbers = #tpu.dot_dimension_numbers<[1], [0], [0], [1], [0, 0, 1, 1], [], []>} : vector<4x128xbf16>, vector<128x64xbf16>, vector<4x64xf32> -> vector<4x64xf32>
    %120 = arith.addf %114, %119 : vector<4x64xf32>
    %c0_130 = arith.constant 0 : index
    %c4_131 = arith.constant 4 : index
    %c1_132 = arith.constant 1 : index
    %c0_133 = arith.constant 0 : index
    %121 = vector.load %arg1[%c0_130, %c4_131, %c1_132, %c0_133] : memref<1x5x5x128xbf16, #tpu.memory_space<vmem>>, vector<1x1x4x128xbf16>
    %122 = vector.shape_cast %121 : vector<1x1x4x128xbf16> to vector<4x128xbf16>
    %c3_134 = arith.constant 3 : index
    %c0_135 = arith.constant 0 : index
    %c0_136 = arith.constant 0 : index
    %123 = vector.load %arg2[%c3_134, %c0_135, %c0_136] : memref<4x128x64xbf16, #tpu.memory_space<vmem>>, vector<1x128x64xbf16>
    %124 = vector.shape_cast %123 : vector<1x128x64xbf16> to vector<128x64xbf16>
    %cst_137 = arith.constant dense<0.000000e+00> : vector<4x64xf32>
    %125 = tpu.matmul %122, %124, %cst_137 {dimension_numbers = #tpu.dot_dimension_numbers<[1], [0], [0], [1], [0, 0, 1, 1], [], []>} : vector<4x128xbf16>, vector<128x64xbf16>, vector<4x64xf32> -> vector<4x64xf32>
    %126 = arith.addf %120, %125 : vector<4x64xf32>
    %127 = arith.truncf %126 : vector<4x64xf32> to vector<4x64xbf16>
    %c0_138 = arith.constant 0 : index
    %c12 = arith.constant 12 : index
    %c0_139 = arith.constant 0 : index
    %128 = vector.load %arg3[%c0_138, %c12, %c0_139] : memref<1x16x64xbf16, #tpu.memory_space<vmem>>, vector<1x4x64xbf16>
    %129 = vector.shape_cast %128 : vector<1x4x64xbf16> to vector<4x64xbf16>
    %130 = vector.shape_cast %127 : vector<4x64xbf16> to vector<1x4x64xbf16>
    tpu.vector_store %arg3[%c0_138, %c12, %c0_139], %130 {strides = array<i32>} : memref<1x16x64xbf16, #tpu.memory_space<vmem>>, vector<1x4x64xbf16>,
    %cst_140 = arith.constant dense<0.000000e+00> : vector<64xf32>
    %131 = vector.multi_reduction <add>, %126, %cst_140 [0] : vector<4x64xf32> to vector<64xf32>
    %132 = vector.shape_cast %131 : vector<64xf32> to vector<1x64xf32>
    %133 = arith.addf %99, %132 : vector<1x64xf32>
    %134 = arith.mulf %126, %126 : vector<4x64xf32>
    %cst_141 = arith.constant dense<0.000000e+00> : vector<64xf32>
    %135 = vector.multi_reduction <add>, %134, %cst_141 [0] : vector<4x64xf32> to vector<64xf32>
    %136 = vector.shape_cast %135 : vector<64xf32> to vector<1x64xf32>
    %137 = arith.addf %103, %136 : vector<1x64xf32>
    %cst_142 = arith.constant 1.250000e-01 : f32
    %138 = vector.broadcast %cst_142 : f32 to vector<1x64xf32>
    %139 = arith.mulf %133, %138 : vector<1x64xf32>
    %140 = vector.shape_cast %139 : vector<1x64xf32> to vector<1x64xf32>
    %141 = vector.broadcast %140 : vector<1x64xf32> to vector<8x64xf32>
    %c0_143 = arith.constant 0 : index
    %c0_144 = arith.constant 0 : index
    %c0_145 = arith.constant 0 : index
    %142 = vector.load %arg4[%c0_143, %c0_144, %c0_145] : memref<1x8x64xf32, #tpu.memory_space<vmem>>, vector<1x8x64xf32>
    %143 = vector.shape_cast %142 : vector<1x8x64xf32> to vector<8x64xf32>
    %144 = vector.shape_cast %141 : vector<8x64xf32> to vector<1x8x64xf32>
    tpu.vector_store %arg4[%c0_143, %c0_144, %c0_145], %144 {strides = array<i32>} : memref<1x8x64xf32, #tpu.memory_space<vmem>>, vector<1x8x64xf32>,
    %cst_146 = arith.constant 1.250000e-01 : f32
    %145 = vector.broadcast %cst_146 : f32 to vector<1x64xf32>
    %146 = arith.mulf %137, %145 : vector<1x64xf32>
    %147 = vector.shape_cast %146 : vector<1x64xf32> to vector<1x64xf32>
    %148 = vector.broadcast %147 : vector<1x64xf32> to vector<8x64xf32>
    %c0_147 = arith.constant 0 : index
    %c0_148 = arith.constant 0 : index
    %c0_149 = arith.constant 0 : index
    %149 = vector.load %arg5[%c0_147, %c0_148, %c0_149] : memref<1x8x64xf32, #tpu.memory_space<vmem>>, vector<1x8x64xf32>
    %150 = vector.shape_cast %149 : vector<1x8x64xf32> to vector<8x64xf32>
    %151 = vector.shape_cast %148 : vector<8x64xf32> to vector<1x8x64xf32>
    tpu.vector_store %arg5[%c0_147, %c0_148, %c0_149], %151 {strides = array<i32>} : memref<1x8x64xf32, #tpu.memory_space<vmem>>, vector<1x8x64xf32>,
    return
  }
  func.func @transform_0(%arg0: i32) -> (i32, i32, i32, i32) {
    %c0_i32 = arith.constant 0 : i32
    %c0_i32_0 = arith.constant 0 : i32
    %c0_i32_1 = arith.constant 0 : i32
    %c0_i32_2 = arith.constant 0 : i32
    return %arg0, %c0_i32, %c0_i32_0, %c0_i32_1 : i32, i32, i32, i32
  }
  func.func @transform_1(%arg0: i32) -> (i32, i32, i32) {
    %c0_i32 = arith.constant 0 : i32
    %c0_i32_0 = arith.constant 0 : i32
    %c0_i32_1 = arith.constant 0 : i32
    %c0_i32_2 = arith.constant 0 : i32
    return %c0_i32, %c0_i32_0, %c0_i32_1 : i32, i32, i32
  }
  func.func @transform_2(%arg0: i32) -> (i32, i32, i32) {
    %c0_i32 = arith.constant 0 : i32
    %c0_i32_0 = arith.constant 0 : i32
    %c0_i32_1 = arith.constant 0 : i32
    return %arg0, %c0_i32, %c0_i32_0 : i32, i32, i32
  }
  func.func @transform_3(%arg0: i32) -> (i32, i32, i32) {
    %c0_i32 = arith.constant 0 : i32
    %c0_i32_0 = arith.constant 0 : i32
    %c0_i32_1 = arith.constant 0 : i32
    return %arg0, %c0_i32, %c0_i32_0 : i32, i32, i32
  }
  func.func @transform_4(%arg0: i32) -> (i32, i32, i32) {
    %c0_i32 = arith.constant 0 : i32
    %c0_i32_0 = arith.constant 0 : i32
    %c0_i32_1 = arith.constant 0 : i32
    return %arg0, %c0_i32, %c0_i32_0 : i32, i32, i32
  }
}

module attributes {stable_mosaic.version = 11 : i64} {
  func.func @kernel(%arg0: i32, %arg1: memref<1x2x2x256xbf16, #tpu.memory_space<vmem>>, %arg2: memref<4x256x1xbf16, #tpu.memory_space<vmem>>, %arg3: memref<1x1xf32, #tpu.memory_space<vmem>>, %arg4: memref<1x1x1xf32, #tpu.memory_space<vmem>>) attributes {dimension_semantics = [#tpu.dimension_semantics<parallel>], iteration_bounds = array<i64: 2>, scalar_prefetch = 0 : i64, scratch_operands = 0 : i64, tpu.core_type = #tpu.core_type<tc>, window_params = [{transform_indices = @transform_0, window_bounds = array<i64: 1, 2, 2, 256>}, {pipeline_mode = #tpu.pipeline_mode<synchronous>, transform_indices = @transform_1, window_bounds = array<i64: 4, 256, 1>}, {pipeline_mode = #tpu.pipeline_mode<synchronous>, transform_indices = @transform_2, window_bounds = array<i64: 1, 1>}, {transform_indices = @transform_3, window_bounds = array<i64: 1, 1, 1>}]} {
    %c0 = arith.constant 0 : index
    %c0_0 = arith.constant 0 : index
    %0 = vector.load %arg3[%c0, %c0_0] : memref<1x1xf32, #tpu.memory_space<vmem>>, vector<1x1xf32>
    %c0_1 = arith.constant 0 : index
    %c0_2 = arith.constant 0 : index
    %c0_3 = arith.constant 0 : index
    %c0_4 = arith.constant 0 : index
    %1 = vector.load %arg1[%c0_1, %c0_2, %c0_3, %c0_4] : memref<1x2x2x256xbf16, #tpu.memory_space<vmem>>, vector<1x1x1x256xbf16>
    %2 = vector.shape_cast %1 : vector<1x1x1x256xbf16> to vector<1x256xbf16>
    %c0_5 = arith.constant 0 : index
    %c0_6 = arith.constant 0 : index
    %c0_7 = arith.constant 0 : index
    %3 = vector.load %arg2[%c0_5, %c0_6, %c0_7] : memref<4x256x1xbf16, #tpu.memory_space<vmem>>, vector<1x256x1xbf16>
    %4 = vector.shape_cast %3 : vector<1x256x1xbf16> to vector<256x1xbf16>
    %cst = arith.constant dense<0.000000e+00> : vector<1x1xf32>
    %5 = tpu.matmul %2, %4, %cst {dimension_numbers = #tpu.dot_dimension_numbers<[1], [0], [0], [1], [0, 0, 1, 1], [], []>} : vector<1x256xbf16>, vector<256x1xbf16>, vector<1x1xf32> -> vector<1x1xf32>
    %c0_8 = arith.constant 0 : index
    %c0_9 = arith.constant 0 : index
    %c1 = arith.constant 1 : index
    %c0_10 = arith.constant 0 : index
    %6 = vector.load %arg1[%c0_8, %c0_9, %c1, %c0_10] : memref<1x2x2x256xbf16, #tpu.memory_space<vmem>>, vector<1x1x1x256xbf16>
    %7 = vector.shape_cast %6 : vector<1x1x1x256xbf16> to vector<1x256xbf16>
    %c1_11 = arith.constant 1 : index
    %c0_12 = arith.constant 0 : index
    %c0_13 = arith.constant 0 : index
    %8 = vector.load %arg2[%c1_11, %c0_12, %c0_13] : memref<4x256x1xbf16, #tpu.memory_space<vmem>>, vector<1x256x1xbf16>
    %9 = vector.shape_cast %8 : vector<1x256x1xbf16> to vector<256x1xbf16>
    %cst_14 = arith.constant dense<0.000000e+00> : vector<1x1xf32>
    %10 = tpu.matmul %7, %9, %cst_14 {dimension_numbers = #tpu.dot_dimension_numbers<[1], [0], [0], [1], [0, 0, 1, 1], [], []>} : vector<1x256xbf16>, vector<256x1xbf16>, vector<1x1xf32> -> vector<1x1xf32>
    %11 = arith.addf %5, %10 : vector<1x1xf32>
    %c0_15 = arith.constant 0 : index
    %c1_16 = arith.constant 1 : index
    %c0_17 = arith.constant 0 : index
    %c0_18 = arith.constant 0 : index
    %12 = vector.load %arg1[%c0_15, %c1_16, %c0_17, %c0_18] : memref<1x2x2x256xbf16, #tpu.memory_space<vmem>>, vector<1x1x1x256xbf16>
    %13 = vector.shape_cast %12 : vector<1x1x1x256xbf16> to vector<1x256xbf16>
    %c2 = arith.constant 2 : index
    %c0_19 = arith.constant 0 : index
    %c0_20 = arith.constant 0 : index
    %14 = vector.load %arg2[%c2, %c0_19, %c0_20] : memref<4x256x1xbf16, #tpu.memory_space<vmem>>, vector<1x256x1xbf16>
    %15 = vector.shape_cast %14 : vector<1x256x1xbf16> to vector<256x1xbf16>
    %cst_21 = arith.constant dense<0.000000e+00> : vector<1x1xf32>
    %16 = tpu.matmul %13, %15, %cst_21 {dimension_numbers = #tpu.dot_dimension_numbers<[1], [0], [0], [1], [0, 0, 1, 1], [], []>} : vector<1x256xbf16>, vector<256x1xbf16>, vector<1x1xf32> -> vector<1x1xf32>
    %17 = arith.addf %11, %16 : vector<1x1xf32>
    %c0_22 = arith.constant 0 : index
    %c1_23 = arith.constant 1 : index
    %c1_24 = arith.constant 1 : index
    %c0_25 = arith.constant 0 : index
    %18 = vector.load %arg1[%c0_22, %c1_23, %c1_24, %c0_25] : memref<1x2x2x256xbf16, #tpu.memory_space<vmem>>, vector<1x1x1x256xbf16>
    %19 = vector.shape_cast %18 : vector<1x1x1x256xbf16> to vector<1x256xbf16>
    %c3 = arith.constant 3 : index
    %c0_26 = arith.constant 0 : index
    %c0_27 = arith.constant 0 : index
    %20 = vector.load %arg2[%c3, %c0_26, %c0_27] : memref<4x256x1xbf16, #tpu.memory_space<vmem>>, vector<1x256x1xbf16>
    %21 = vector.shape_cast %20 : vector<1x256x1xbf16> to vector<256x1xbf16>
    %cst_28 = arith.constant dense<0.000000e+00> : vector<1x1xf32>
    %22 = tpu.matmul %19, %21, %cst_28 {dimension_numbers = #tpu.dot_dimension_numbers<[1], [0], [0], [1], [0, 0, 1, 1], [], []>} : vector<1x256xbf16>, vector<256x1xbf16>, vector<1x1xf32> -> vector<1x1xf32>
    %23 = arith.addf %17, %22 : vector<1x1xf32>
    %24 = arith.addf %23, %0 : vector<1x1xf32>
    %cst_29 = arith.constant 0.000000e+00 : f32
    %25 = vector.broadcast %cst_29 : f32 to vector<1x1xf32>
    %26 = arith.subf %25, %24 : vector<1x1xf32>
    %27 = math.exp %26 : vector<1x1xf32>
    %cst_30 = arith.constant 1.000000e+00 : f32
    %28 = vector.broadcast %cst_30 : f32 to vector<1x1xf32>
    %29 = arith.addf %28, %27 : vector<1x1xf32>
    %cst_31 = arith.constant 1.000000e+00 : f32
    %30 = vector.broadcast %cst_31 : f32 to vector<1x1xf32>
    %31 = arith.divf %30, %29 : vector<1x1xf32>
    %c0_32 = arith.constant 0 : index
    %c0_33 = arith.constant 0 : index
    %c0_34 = arith.constant 0 : index
    %32 = vector.load %arg4[%c0_32, %c0_33, %c0_34] : memref<1x1x1xf32, #tpu.memory_space<vmem>>, vector<1x1x1xf32>
    %33 = vector.shape_cast %32 : vector<1x1x1xf32> to vector<1x1xf32>
    %34 = vector.shape_cast %31 : vector<1x1xf32> to vector<1x1x1xf32>
    tpu.vector_store %arg4[%c0_32, %c0_33, %c0_34], %34 {strides = array<i32>} : memref<1x1x1xf32, #tpu.memory_space<vmem>>, vector<1x1x1xf32>,
    return
  }
  func.func @transform_0(%arg0: i32) -> (i32, i32, i32, i32) {
    %c0_i32 = arith.constant 0 : i32
    %c0_i32_0 = arith.constant 0 : i32
    %c0_i32_1 = arith.constant 0 : i32
    %c0_i32_2 = arith.constant 0 : i32
    return %arg0, %c0_i32, %c0_i32_0, %c0_i32_1 : i32, i32, i32, i32
  }
  func.func @transform_1(%arg0: i32) -> (i32, i32, i32) {
    %c0_i32 = arith.constant 0 : i32
    %c0_i32_0 = arith.constant 0 : i32
    %c0_i32_1 = arith.constant 0 : i32
    %c0_i32_2 = arith.constant 0 : i32
    return %c0_i32, %c0_i32_0, %c0_i32_1 : i32, i32, i32
  }
  func.func @transform_2(%arg0: i32) -> (i32, i32) {
    %c0_i32 = arith.constant 0 : i32
    %c0_i32_0 = arith.constant 0 : i32
    %c0_i32_1 = arith.constant 0 : i32
    return %c0_i32, %c0_i32_0 : i32, i32
  }
  func.func @transform_3(%arg0: i32) -> (i32, i32, i32) {
    %c0_i32 = arith.constant 0 : i32
    %c0_i32_0 = arith.constant 0 : i32
    %c0_i32_1 = arith.constant 0 : i32
    return %arg0, %c0_i32, %c0_i32_0 : i32, i32, i32
  }
}

</mosaic_0001>

<bundles_post_ra>
// kernel: discriminator_forward.5
= control target key start
LH: loop header
LB: loop body
LE: loop exit
PB: predicated region body
PF: predicated region fallthrough
CT: control target
= control target key end

     0   :  { %s7983_s12 = smov 0   ;;  %s9978_s0 = inlined_call_operand.vmem [shape: bf16[2,33,33,128], index: 0, kind: input, shape index: {}]   ;;  %s9979_s1 = inlined_call_operand.vmem [shape: bf16[4,128,8], index: 1, kind: input, shape index: {}]   ;;  %s9980_s2 = inlined_call_operand.vmem [shape: f32[1,8], index: 2, kind: input, shape index: {}]   ;;  %s9981_s3 = inlined_call_operand.vmem [shape: bf16[2,1024,8], index: 3, kind: output, shape index: {}]  }
   0x1 LB: > { %s5890_s13 = sadd.s32 4294967295, %s7961_s12   ;;  %p5894_p0 = scmp.ge.s32.totalorder %s7961_s12, 1  ;;  %s7961_s12 = sphi %s7983_s12, %s13_s12  }
   0x2   : > { %p137_p1 = scmp.lt.s32.totalorder %s7961_s12, 3 }
   0x4   : > { %p138_p2 = pnand %p5894_p0, %p137_p1 }
   0x5   : > { %p161_p3 = scmp.lt.s32.totalorder (!%p138_p2), %s5890_s13, 1 }
   0x6   : > { %141 = sbr.rel (%p138_p2) target bundleno = 1206 (0x4b6), region = 32 }
   0xb   : > { %v7284_v0 = vld [vmem:[%s9979_s1 + $0x78] sm:$0xff]  ;;  %v7283_v4 = vld [vmem:[%s9979_s1 + $0x70] sm:$0xff]  ;;  %s9983_s13 = smov (!%p161_p3, %s5890_s13), 1  ;;  %v7282_v8 = vld [vmem:[%s9979_s1 + $0x68] sm:$0xff]  ;;  %vm324_vm0 = vcmask 1046528   ;;  %vm1560_vm1 = vcmask 60416  }
   0xc   : > { %v7276_v1 = vld [vmem:[%s9979_s1 + $0x38] sm:$0xff]  ;;  %510 = vmatpush.bf16.msra.mxu0 %v7284_v0  ;;  %v7275_v5 = vld [vmem:[%s9979_s1 + $0x30] sm:$0xff]  ;;  %v7274_v9 = vld [vmem:[%s9979_s1 + $0x28] sm:$0xff]  ;;  %s7940_s11 = smul.u32 660, %s9983_s13  ;;  %s7268_s4 = sshll.u32 %s9983_s13, 9 }
   0xd   : > { %v7308_v2 = vld [vmem:[%s9979_s1 + $0xb8] sm:$0xff]  ;;  %647 = vmatpush.bf16.msra.mxu1 %v7276_v1  ;;  %v7307_v6 = vld [vmem:[%s9979_s1 + $0xb0] sm:$0xff]  ;;  %v7306_v10 = vld [vmem:[%s9979_s1 + $0xa8] sm:$0xff]  ;;  %s8328_s13 = scalar_lea.vmem %s9981_s3, %s7268_s4 }
   0xe   : > { %v7316_v3 = vld [vmem:[%s9979_s1 + $0xf8] sm:$0xff]  ;;  %882 = vmatpush.bf16.msra.mxu2 %v7308_v2  ;;  %v7315_v7 = vld [vmem:[%s9979_s1 + $0xf0] sm:$0xff]  ;;  %v7314_v11 = vld [vmem:[%s9979_s1 + $0xe8] sm:$0xff]  ;;  %s8045_s24 = scalar_lea.vmem %s9978_s0, %s7940_s11 }
   0xf   : > { %1308 = vmatpush.bf16.msra.mxu3 %v7316_v3  ;;  %v7281_v12 = vld [vmem:[%s9979_s1 + $0x60] sm:$0xff]  ;;  %v7280_v16 = vld [vmem:[%s9979_s1 + $0x58] sm:$0xff]  ;;  %v8061_v21 = vld [vmem:[%s8045_s24 + $0x8] sm:$0xff]  }
  0x10   : > { %511 = vmatpush.bf16.msra.mxu0 %v7283_v4  ;;  %v7273_v13 = vld [vmem:[%s9979_s1 + $0x20] sm:$0xff]  ;;  %v7272_v17 = vld [vmem:[%s9979_s1 + $0x18] sm:$0xff]  ;;  %v6122_v22 = vld [vmem:[%s8045_s24 + $0x14] sm:$0xf]  ;;  %v7467_v28 = vunpack.c.l.bf16 %v8061_v21  ;;  %v7468_v62 = vunpack.c.h.bf16 %v8061_v21 }
  0x11   : > { %648 = vmatpush.bf16.msra.mxu1 %v7275_v5  ;;  %v7305_v14 = vld [vmem:[%s9979_s1 + $0xa0] sm:$0xff]  ;;  %v7304_v18 = vld [vmem:[%s9979_s1 + $0x98] sm:$0xff]  ;;  %v7279_v24 = vld [vmem:[%s9979_s1 + $0x50] sm:$0xff]  ;;  %v1043_v33 = vunpack.c.l.bf16 %v6122_v22 }
  0x12   : > { %883 = vmatpush.bf16.msra.mxu2 %v7307_v6  ;;  %v7313_v15 = vld [vmem:[%s9979_s1 + $0xe0] sm:$0xff]  ;;  %v7312_v19 = vld [vmem:[%s9979_s1 + $0xd8] sm:$0xff]  ;;  %v7271_v25 = vld [vmem:[%s9979_s1 + $0x10] sm:$0xff]  ;;  %v328_v38 = vrot.slane %v7467_v28, 1  ;;  %v330_v6 = vrot.slane %v7468_v62, 1 }
  0x13   : > { %1309 = vmatpush.bf16.msra.mxu3 %v7315_v7  ;;  %v7462_v20 = vld [vmem:[%s8045_s24] sm:$0xff]   ;;  %v8065_v23 = vld [vmem:[%s8045_s24 + $0x18] sm:$0xff]   ;;  %v7303_v29 = vld [vmem:[%s9979_s1 + $0x90] sm:$0xff]  ;;  %v1123_v41 = vrot.slane %v1043_v33, 1 }
  0x14   : > { %512 = vmatpush.bf16.msra.mxu0 %v7282_v8  ;;  %v7463_v26 = vunpack.c.l.bf16 %v7462_v20  ;;  %v7464_v27 = vunpack.c.h.bf16 %v7462_v20  ;;  %v7311_v30 = vld [vmem:[%s9979_s1 + $0xd0] sm:$0xff]  ;;  %v7511_v31 = vunpack.c.l.bf16 %v8065_v23  ;;  %v7512_v32 = vunpack.c.h.bf16 %v8065_v23  ;;  %v7278_v34 = vld [vmem:[%s9979_s1 + $0x48] sm:$0xff]  ;;  %v7277_v44 = vld [vmem:[%s9979_s1 + $0x40] sm:$0xff] }
  0x15   : > { %649 = vmatpush.bf16.msra.mxu1 %v7274_v9  ;;  %v7270_v35 = vld [vmem:[%s9979_s1 + $0x8] sm:$0xff]  ;;  %v7269_v45 = vld [vmem:[%s9979_s1] sm:$0xff]  ;;  %v7356_v52 = vld [vmem:[%s9979_s1 + $0xb8] sm:$0xff] }
  0x16   : > { %884 = vmatpush.bf16.msra.mxu2 %v7306_v10  ;;  %v325_v36 = vrot.slane %v7463_v26, 1  ;;  %v326_v37 = vrot.slane %v7464_v27, 1  ;;  %v7302_v39 = vld [vmem:[%s9979_s1 + $0x88] sm:$0xff]  ;;  %v8096_v42 = vrot.slane %v7511_v31, 1  ;;  %v8100_v43 = vrot.slane %v7512_v32, 1  ;;  %v7301_v48 = vld [vmem:[%s9979_s1 + $0x80] sm:$0xff] }
  0x17   : > { %1310 = vmatpush.bf16.msra.mxu3 %v7314_v11  ;;  %v7310_v40 = vld [vmem:[%s9979_s1 + $0xc8] sm:$0xff]  ;;  %v7309_v49 = vld [vmem:[%s9979_s1 + $0xc0] sm:$0xff]  ;;  %v7364_v53 = vld [vmem:[%s9979_s1 + $0xf8] sm:$0xff]  ;;  %v331_v10 = vsel %vm324_vm0, %v328_v38, %v330_v6 }
  0x18   : > { %513 = vmatpush.bf16.msra.mxu0 %v7281_v12  ;;  %v327_v46 = vsel %vm324_vm0, %v325_v36, %v326_v37  ;;  %v329_v47 = vsel %vm324_vm0, %v326_v37, %v328_v38  ;;  %v1125_v50 = vsel %vm324_vm0, %v1123_v41, %v8096_v42  ;;  %v8121_v51 = vsel %vm324_vm0, %v8096_v42, %v8100_v43  ;;  %v7285_v55 = vld [vmem:[%s8045_s24 + $0x14] sm:$0xff]  ;;  %v268_v59 = vld [vmem:[%s8045_s24 + $0x10] sm:$0x1]  ;;  %v6125_v60 = vld [vmem:[%s8045_s24 + $0x20] sm:$0xf] }
  0x19   : > { %650 = vmatpush.bf16.msra.mxu1 %v7273_v13  ;;  %v429_v54 = vpack.c.bf16 %v329_v47, %v327_v46  ;;  %v1227_v56 = vpack.c.bf16 %v8121_v51, %v1125_v50  ;;  %v7332_v57 = vld [vmem:[%s9979_s1 + $0x78] sm:$0xff]  ;;  %v6126_v61 = vld [vmem:[%s8045_s24 + $0x24] sm:$0x1]  ;;  %v276_v63 = vunpack.c.l.bf16 %v268_v59  ;;  %v7355_v0 = vld [vmem:[%s9979_s1 + $0xb0] sm:$0xff]  ;;  %v1046_v2 = vunpack.c.l.bf16 %v6125_v60 }
  0x1a   : > { %885 = vmatpush.bf16.msra.mxu2 %v7305_v14  ;;  %v7324_v58 = vld [vmem:[%s9979_s1 + $0x38] sm:$0xff]  ;;  %v7363_v1 = vld [vmem:[%s9979_s1 + $0xf0] sm:$0xff]  ;;  %v1047_v3 = vunpack.c.l.bf16 %v6126_v61  ;;  %v7287_v36 = vld [vmem:[%s8045_s24 + $0x28] sm:$0xff] }
  0x1b   : > { %1311 = vmatpush.bf16.msra.mxu3 %v7313_v15  ;;  %v7331_v4 = vld [vmem:[%s9979_s1 + $0x70] sm:$0xff]  ;;  %v332_v7 = vrot.slane %v276_v63, 1  ;;  %v1128_v8 = vrot.slane %v1046_v2, 1  ;;  %v7286_v15 = vld [vmem:[%s8045_s24 + $0x1c] sm:$0xff] }
  0x1c   : > { %514 = vmatpush.bf16.msra.mxu0 %v7280_v16  ;;  %v7323_v5 = vld [vmem:[%s9979_s1 + $0x30] sm:$0xff]  ;;  %v1130_v9 = vrot.slane %v1047_v3, 1  ;;  %v179_v38 = vld [vmem:[%s8045_s24 + $0x20] sm:$0xf]  ;;  %v6132_v61 = vld [vmem:[%s8045_s24 + $0x3c] sm:$0xf] }
  0x1d   : > { %651 = vmatpush.bf16.msra.mxu1 %v7272_v17  ;;  %v333_v11 = vsel %vm324_vm0, %v330_v6, %v332_v7  ;;  %v1129_v12 = vsel %vm324_vm0, %v8100_v43, %v1128_v8  ;;  %v176_v17 = vld [vmem:[%s8045_s24 + $0x14] sm:$0xf]  ;;  %v211_v41 = vunpack.c.l.bf16 %v179_v38  ;;  %v8204_v62 = vld [vmem:[%s8045_s24 + $0x40] sm:$0xff]   ;;  %v270_v6 = vld [vmem:[%s8045_s24 + $0x38] sm:$0x1] }
  0x1e   : > { %886 = vmatpush.bf16.msra.mxu2 %v7304_v18  ;;  %v1131_v13 = vsel %vm324_vm0, %v1128_v8, %v1130_v9  ;;  %v430_v14 = vpack.c.bf16 %v333_v11, %v331_v10  ;;  %v8161_v18 = vld [vmem:[%s8045_s24 + $0x28] sm:$0xff]   ;;  %v7288_v59 = vld [vmem:[%s8045_s24 + $0x30] sm:$0xff]  ;;  %v7524_v63 = vunpack.c.h.bf16 %v8204_v62  ;;  %v278_v9 = vunpack.c.l.bf16 %v270_v6  ;;  %v7353_v10 = vld [vmem:[%s9979_s1 + $0xa0] sm:$0xff] }
  0x1f   : > { %1312 = vmatpush.bf16.msra.mxu3 %v7312_v19  ;;  %v1228_v16 = vpack.c.bf16 %v1131_v13, %v1129_v12  ;;  %v8164_v19 = vld [vmem:[%s8045_s24 + $0x30] sm:$0xff]   ;;  %v7515_v22 = vunpack.c.l.bf16 %v8161_v18  ;;  %v6135_v7 = vld [vmem:[%s8045_s24 + $0x48] sm:$0xf]  ;;  %v6136_v8 = vld [vmem:[%s8045_s24 + $0x4c] sm:$0x1] }
  0x20   : > { %515 = vmatpush.bf16.msra.mxu0 %v7279_v24  ;;  %v7516_v24 = vunpack.c.h.bf16 %v8161_v18  ;;  %v7520_v46 = vunpack.c.h.bf16 %v8164_v19  ;;  %v7361_v11 = vld [vmem:[%s9979_s1 + $0xe0] sm:$0xff]  ;;  %v1056_v13 = vunpack.c.l.bf16 %v6135_v7 }
  0x21   : > { %652 = vmatpush.bf16.msra.mxu1 %v7271_v25  ;;  %v7519_v25 = vunpack.c.l.bf16 %v8164_v19  ;;  %v1132_v27 = vrot.slane %v7515_v22, 1  ;;  %v7329_v12 = vld [vmem:[%s9979_s1 + $0x60] sm:$0xff] }
  0x22   : > { %887 = vmatpush.bf16.msra.mxu2 %v7303_v29  ;;  %v1133_v28 = vrot.slane %v7516_v24, 1 }
  0x23   : > { %1313 = vmatpush.bf16.msra.mxu3 %v7311_v30  ;;  %v1135_v29 = vrot.slane %v7519_v25, 1 }
  0x24   : > { %516 = vmatpush.bf16.msra.mxu0 %v7278_v34  ;;  %v1134_v30 = vsel %vm324_vm0, %v1132_v27, %v1133_v28 }
  0x25   : > { %653 = vmatpush.bf16.msra.mxu1 %v7270_v35  ;;  %v1136_v33 = vsel %vm324_vm0, %v1133_v28, %v1135_v29  ;;  %v184_v28 = vld [vmem:[%s8045_s24 + $0x3c] sm:$0xf] }
  0x26   : > { %888 = vmatpush.bf16.msra.mxu2 %v7302_v39  ;;  %v1229_v37 = vpack.c.bf16 %v1136_v33, %v1134_v30  ;;  %v269_v39 = vld [vmem:[%s8045_s24 + $0x24] sm:$0x1]  ;;  %v216_v30 = vunpack.c.l.bf16 %v184_v28 }
  0x27   : > { %1314 = vmatpush.bf16.msra.mxu3 %v7310_v40  ;;  %v6131_v40 = vld [vmem:[%s8045_s24 + $0x38] sm:$0x1] }
  0x28   : > { %517 = vmatpush.bf16.msra.mxu0 %v7277_v44  ;;  %v7354_v44 = vld [vmem:[%s9979_s1 + $0xa8] sm:$0xff]  ;;  %v1052_v47 = vunpack.c.l.bf16 %v6131_v40 }
  0x29   : > { %654 = vmatpush.bf16.msra.mxu1 %v7269_v45  ;;  %v7362_v45 = vld [vmem:[%s9979_s1 + $0xe8] sm:$0xff] }
  0x2a   : > { %889 = vmatpush.bf16.msra.mxu2 %v7301_v48  ;;  %v7322_v48 = vld [vmem:[%s9979_s1 + $0x28] sm:$0xff] }
  0x2b   : > { %1315 = vmatpush.bf16.msra.mxu3 %v7309_v49  ;;  %518 = vmatmul.bf16.vlgmr.msra.gmra.mxu0 %v429_v54  ;;  %v339_v49 = vrot.slane %v211_v41, 1 }
  0x2c   : > { %655 = vmatmul.bf16.vlgmr.msra.gmra.mxu1 %v7462_v20  ;;  %1930 = vmatpush.bf16.msrb.mxu0 %v7332_v57  ;;  %v208_v20 = vunpack.c.l.bf16 %v176_v17  ;;  %v1146_v17 = vrot.slane %v1056_v13, 1 }
  0x2d   : > { %890 = vmatmul.bf16.vlgmr.msra.gmra.mxu2 %v7285_v55  ;;  %2067 = vmatpush.bf16.msrb.mxu1 %v7324_v58  ;;  %v239_v58 = vpack.c.bf16 %v211_v41, %v7512_v32 }
  0x2e   : > { %2301 = vmatpush.bf16.msrb.mxu2 %v7356_v52  ;;  %1316 = vmatmul.bf16.vlgmr.msra.gmra.mxu3 %v1227_v56  ;;  %v334_v26 = vrot.slane %v208_v20, 1  ;;  %v238_v35 = vpack.c.bf16 %v7511_v31, %v208_v20  ;;  %v7330_v31 = vld [vmem:[%s9979_s1 + $0x68] sm:$0xff]  ;;  %v1139_v52 = vrot.slane %v1052_v47, 1 }
  0x2f   : > { %2726 = vmatpush.bf16.msrb.mxu3 %v7364_v53  ;;  %v340_v53 = vsel %vm324_vm0, %v8100_v43, %v339_v49  ;;  %v7523_v43 = vunpack.c.l.bf16 %v8204_v62  ;;  %v271_v47 = vld [vmem:[%s8045_s24 + $0x4c] sm:$0x1]  ;;  %v7320_v62 = vld [vmem:[%s9979_s1 + $0x18] sm:$0xff] }
  0x30   : > { %1931 = vmatpush.bf16.msrb.mxu0 %v7331_v4  ;;  %v7289_v4 = vld [vmem:[%s8045_s24 + $0x3c] sm:$0xff] }
  0x31   : > { %2068 = vmatpush.bf16.msrb.mxu1 %v7323_v5  ;;  %v1142_v32 = vrot.slane %v7523_v43, 1 }
  0x32   : > { %2302 = vmatpush.bf16.msrb.mxu2 %v7355_v0  ;;  %v1053_v0 = vunpack.c.l.bf16 %v6132_v61 }
  0x33   : > { %2727 = vmatpush.bf16.msrb.mxu3 %v7363_v1  ;;  %v8210_v1 = vrot.slane %v7524_v63, 1 }
  0x34   : > { %1932 = vmatpush.bf16.msrb.mxu0 %v7330_v31  ;;  %v1141_v23 = vrot.slane %v1053_v0, 1 }
  0x35   : > { %2069 = vmatpush.bf16.msrb.mxu1 %v7322_v48  ;;  %v1145_v3 = vsel %vm324_vm0, %v1142_v32, %v8210_v1  ;;  %v1147_v22 = vsel %vm324_vm0, %v8210_v1, %v1146_v17  ;;  %v6141_v48 = vld [vmem:[%s8045_s24 + $0x60] sm:$0x1] }
  0x36   : > { %2303 = vmatpush.bf16.msrb.mxu2 %v7354_v44  ;;  %v1143_v2 = vsel %vm324_vm0, %v1141_v23, %v1142_v32  ;;  %v242_v44 = vpack.c.bf16 %v7523_v43, %v216_v30 }
  0x37   : > { %2728 = vmatpush.bf16.msrb.mxu3 %v7362_v45  ;;  %v1231_v5 = vpack.c.bf16 %v1145_v3, %v1143_v2  ;;  %v7291_v45 = vld [vmem:[%s8045_s24 + $0x50] sm:$0xff] }
  0x38   : > { %1933 = vmatpush.bf16.msrb.mxu0 %v7329_v12 }
  0x3a   : > { %2304 = vmatpush.bf16.msrb.mxu2 %v7353_v10 }
  0x3b   : > { %523 = vmatmul.bf16.gmra.mxu0 %v430_v14  ;;  %v1057_v14 = vunpack.c.l.bf16 %v6136_v8  ;;  %2729 = vmatpush.bf16.msrb.mxu3 %v7361_v11 }
  0x3c   : > { %660 = vmatmul.bf16.gmra.mxu1 %v8061_v21  ;;  %v336_v21 = vsel %vm324_vm0, %v334_v26, %v8096_v42  ;;  %v277_v42 = vunpack.c.l.bf16 %v269_v39  ;;  %v7290_v26 = vld [vmem:[%s8045_s24 + $0x44] sm:$0xff] }
  0x3d   : > { %895 = vmatmul.bf16.gmra.mxu2 %v7286_v15  ;;  %v431_v34 = vpack.c.bf16 %v8121_v51, %v336_v21  ;;  %v1137_v51 = vrot.slane %v7520_v46, 1  ;;  %v7321_v15 = vld [vmem:[%s9979_s1 + $0x20] sm:$0xff]  ;;  %v8242_v21 = vld [vmem:[%s8045_s24 + $0x58] sm:$0xff]   ;;  %v187_v46 = vld [vmem:[%s8045_s24 + $0x48] sm:$0xf] }
  0x3e   : > { %1321 = vmatmul.bf16.gmra.mxu3 %v1228_v16  ;;  %v341_v50 = vrot.slane %v277_v42, 1  ;;  %2070 = vmatpush.bf16.msrb.mxu1 %v7321_v15  ;;  %v350_v16 = vrot.slane %v278_v9, 1 }
  0x3f   : > { %v1138_v55 = vsel %vm324_vm0, %v1135_v29, %v1137_v51  ;;  %v1140_v56 = vsel %vm324_vm0, %v1137_v51, %v1139_v52  ;;  %v8239_v29 = vld [vmem:[%s8045_s24 + $0x50] sm:$0xff]   ;;  %v7360_v52 = vld [vmem:[%s9979_s1 + $0xd8] sm:$0xff] }
  0x40   : > { %v342_v54 = vsel %vm324_vm0, %v339_v49, %v341_v50  ;;  %v1230_v60 = vpack.c.bf16 %v1140_v56, %v1138_v55  ;;  %v351_v20 = vsel %vm324_vm0, %v1137_v51, %v350_v16  ;;  %v7527_v33 = vunpack.c.l.bf16 %v8239_v29  ;;  %v7352_v51 = vld [vmem:[%s9979_s1 + $0x98] sm:$0xff]  ;;  %2730 = vmatpush.bf16.msrb.mxu3 %v7360_v52  ;;  %v272_v16 = vld [vmem:[%s8045_s24 + $0x60] sm:$0x1]  ;;  %v7294_v52 = vld [vmem:[%s8045_s24 + $0x6c] sm:$0xff] }
  0x41   : > { %v432_v57 = vpack.c.bf16 %v342_v54, %v340_v53  ;;  %v434_v25 = vpack.c.bf16 %v351_v20, %v1138_v55  ;;  %v219_v49 = vunpack.c.l.bf16 %v187_v46  ;;  %v279_v50 = vunpack.c.l.bf16 %v271_v47  ;;  %2305 = vmatpush.bf16.msrb.mxu2 %v7352_v51 }
  0x42   : > { %v7532_v53 = vunpack.c.h.bf16 %v8242_v21  ;;  %v1062_v54 = vunpack.c.l.bf16 %v6141_v48  ;;  %2071 = vmatpush.bf16.msrb.mxu1 %v7320_v62 }
  0x43   : > { %v357_v55 = vrot.slane %v219_v49, 1  ;;  %v359_v56 = vrot.slane %v279_v50, 1  ;;  %v243_v23 = vpack.c.bf16 %v219_v49, %v7524_v63 }
  0x4b   : > { %528 = vmatmul.bf16.gmra.mxu0 %v431_v34  ;;  %v7528_v34 = vunpack.c.h.bf16 %v8239_v29 }
  0x4c   : > { %665 = vmatmul.bf16.gmra.mxu1 %v238_v35  ;;  %v7531_v35 = vunpack.c.l.bf16 %v8242_v21 }
  0x4d   : > { %900 = vmatmul.bf16.gmra.mxu2 %v7287_v36  ;;  %v352_v36 = vrot.slane %v216_v30, 1  ;;  %v1151_v38 = vrot.slane %v7528_v34, 1  ;;  %v8309_v30 = vld [vmem:[%s9980_s2] ss:$0 sm:$0xff] }
  0x4e   : > { %1326 = vmatmul.bf16.gmra.mxu3 %v1229_v37  ;;  %v1153_v39 = vrot.slane %v7531_v35, 1 }
  0x4f   : > { %v354_v40 = vsel %vm324_vm0, %v352_v36, %v1142_v32  ;;  %v7292_v32 = vld [vmem:[%s8045_s24 + $0x58] sm:$0xff] }
  0x50   : > { %v1154_v41 = vsel %vm324_vm0, %v1151_v38, %v1153_v39  ;;  %v435_v42 = vpack.c.bf16 %v1145_v3, %v354_v40  ;;  %v6142_v3 = vld [vmem:[%s8045_s24 + $0x64] sm:$0xf]  ;;  %v7351_v40 = vld [vmem:[%s9979_s1 + $0x90] sm:$0xff] }
  0x51   : > { %v1063_v6 = vunpack.c.l.bf16 %v6142_v3  ;;  %2306 = vmatpush.bf16.msrb.mxu2 %v7351_v40  ;;  %v273_v40 = vld [vmem:[%s8045_s24 + $0x74] sm:$0x1] }
  0x53   : > { %v1159_v7 = vrot.slane %v1063_v6, 1 }
  0x5b   : > { %533 = vmatmul.bf16.gmra.mxu0 %v432_v57  ;;  %v1155_v57 = vrot.slane %v7532_v53, 1 }
  0x5c   : > { %670 = vmatmul.bf16.gmra.mxu1 %v239_v58  ;;  %v1157_v58 = vrot.slane %v1062_v54, 1  ;;  %v192_v54 = vld [vmem:[%s8045_s24 + $0x64] sm:$0xf] }
  0x5d   : > { %905 = vmatmul.bf16.gmra.mxu2 %v7288_v59  ;;  %v358_v59 = vsel %vm324_vm0, %v8210_v1, %v357_v55  ;;  %v8266_v61 = vsel %vm324_vm0, %v1153_v39, %v1155_v57  ;;  %v7328_v1 = vld [vmem:[%s9979_s1 + $0x58] sm:$0xff] }
  0x5e   : > { %1331 = vmatmul.bf16.gmra.mxu3 %v1230_v60  ;;  %v360_v60 = vsel %vm324_vm0, %v357_v55, %v359_v56  ;;  %v1158_v43 = vsel %vm324_vm0, %v1155_v57, %v1157_v58  ;;  %1934 = vmatpush.bf16.msrb.mxu0 %v7328_v1  ;;  %v8335_v58 = vld [vmem:[%s8045_s24 + $0x80] sm:$0xff]  }
  0x5f   : > { %v436_v0 = vpack.c.bf16 %v360_v60, %v358_v59  ;;  %v1234_v2 = vpack.c.bf16 %v1158_v43, %v8266_v61  ;;  %v7327_v43 = vld [vmem:[%s9979_s1 + $0x50] sm:$0xff] }
  0x62   : > { %1935 = vmatpush.bf16.msrb.mxu0 %v7327_v43 }
  0x6b   : > { %538 = vmatmul.bf16.gmra.mxu0 %v1229_v37  ;;  %v1150_v37 = vrot.slane %v7527_v33, 1 }
  0x6c   : > { %675 = vmatmul.bf16.gmra.mxu1 %v8161_v18  ;;  %v1148_v18 = vrot.slane %v1057_v14, 1  ;;  %v7293_v14 = vld [vmem:[%s8045_s24 + $0x64] sm:$0xff] }
  0x6d   : > { %910 = vmatmul.bf16.gmra.mxu2 %v7289_v4  ;;  %v8275_v4 = vld [vmem:[%s8045_s24 + $0x68] sm:$0xff]  }
  0x6e   : > { %1336 = vmatmul.bf16.gmra.mxu3 %v1231_v5  ;;  %v1149_v24 = vsel %vm324_vm0, %v1146_v17, %v1148_v18  ;;  %v7535_v63 = vunpack.c.l.bf16 %v8275_v4  ;;  %v7536_v5 = vunpack.c.h.bf16 %v8275_v4  ;;  %v6145_v17 = vld [vmem:[%s8045_s24 + $0x70] sm:$0xf]  ;;  %v6146_v18 = vld [vmem:[%s8045_s24 + $0x74] sm:$0x1] }
  0x6f   : > { %v1232_v27 = vpack.c.bf16 %v1149_v24, %v1147_v22  ;;  %v280_v22 = vunpack.c.l.bf16 %v272_v16  ;;  %v1066_v24 = vunpack.c.l.bf16 %v6145_v17 }
  0x70   : > { %v8287_v8 = vrot.slane %v7535_v63, 1  ;;  %v8291_v9 = vrot.slane %v7536_v5, 1 }
  0x71   : > { %v368_v35 = vrot.slane %v280_v22, 1  ;;  %v1164_v36 = vrot.slane %v1066_v24, 1 }
  0x72   : > { %v1161_v10 = vsel %vm324_vm0, %v1159_v7, %v8287_v8  ;;  %v8298_v11 = vsel %vm324_vm0, %v8287_v8, %v8291_v9 }
  0x73   : > { %v1235_v15 = vpack.c.bf16 %v8298_v11, %v1161_v10  ;;  %v369_v39 = vsel %vm324_vm0, %v1155_v57, %v368_v35  ;;  %v8332_v57 = vld [vmem:[%s8045_s24 + $0x78] sm:$0xff]  }
  0x74   : > { %v438_v47 = vpack.c.bf16 %v369_v39, %v8266_v61  ;;  %v224_v61 = vunpack.c.l.bf16 %v192_v54  ;;  %v195_v39 = vld [vmem:[%s8045_s24 + $0x70] sm:$0xf] }
  0x7b   : > { %543 = vmatmul.bf16.gmra.mxu0 %v434_v25  ;;  %v1067_v25 = vunpack.c.l.bf16 %v6146_v18 }
  0x7c   : > { %680 = vmatmul.bf16.gmra.mxu1 %v8164_v19  ;;  %v1152_v19 = vsel %vm324_vm0, %v1150_v37, %v1151_v38 }
  0x7d   : > { %915 = vmatmul.bf16.gmra.mxu2 %v7290_v26  ;;  %v1233_v31 = vpack.c.bf16 %v1154_v41, %v1152_v19  ;;  %v7359_v19 = vld [vmem:[%s9979_s1 + $0xd0] sm:$0xff]  ;;  %v1165_v41 = vsel %vm324_vm0, %v8291_v9, %v1164_v36 }
  0x7e   : > { %1341 = vmatmul.bf16.gmra.mxu3 %v1232_v27 }
  0x7f   : > { %2731 = vmatpush.bf16.msrb.mxu3 %v7359_v19 }
  0x8b   : > { %548 = vmatmul.bf16.gmra.mxu0 %v435_v42 }
  0x8c   : > { %685 = vmatmul.bf16.gmra.mxu1 %v242_v44 }
  0x8d   : > { %920 = vmatmul.bf16.gmra.mxu2 %v7291_v45 }
  0x8e   : > { %1346 = vmatmul.bf16.gmra.mxu3 %v1233_v31 }
  0x9b   : > { %553 = vmatmul.bf16.gmra.mxu0 %v436_v0  ;;  %v7319_v0 = vld [vmem:[%s9979_s1 + $0x10] sm:$0xff] }
  0x9c   : > { %690 = vmatmul.bf16.gmra.mxu1 %v243_v23  ;;  %v7539_v23 = vunpack.c.l.bf16 %v8332_v57 }
  0x9d   : > { %925 = vmatmul.bf16.gmra.mxu2 %v7292_v32  ;;  %v7543_v32 = vunpack.c.l.bf16 %v8335_v58  ;;  %2072 = vmatpush.bf16.msrb.mxu1 %v7319_v0 }
  0x9e   : > { %1351 = vmatmul.bf16.gmra.mxu3 %v1234_v2 }
  0xa8   : > { %v519_v12 = vpop.f32.mrf.mxu0 }
  0xa9   : > { %v656_v13 = vpop.f32.mrf.mxu1 }
  0xaa   : > { %v657_v20 = vadd.f32 %v656_v13, %v519_v12  ;;  %v370_v12 = vrot.slane %v224_v61, 1  ;;  %v1168_v13 = vrot.slane %v7539_v23, 1 }
  0xab   : > { %558 = vmatmul.bf16.gmra.mxu0 %v1233_v31 }
  0xac   : > { %695 = vmatmul.bf16.gmra.mxu1 %v8239_v29  ;;  %v1166_v29 = vrot.slane %v1067_v25, 1 }
  0xad   : > { %930 = vmatmul.bf16.gmra.mxu2 %v7293_v14 }
  0xae   : > { %1356 = vmatmul.bf16.gmra.mxu3 %v1235_v15  ;;  %v1167_v42 = vsel %vm324_vm0, %v1164_v36, %v1166_v29  ;;  %v1171_v15 = vrot.slane %v7543_v32, 1  ;;  %v7358_v32 = vld [vmem:[%s9979_s1 + $0xc8] sm:$0xff] }
  0xaf   : > { %v1236_v53 = vpack.c.bf16 %v1167_v42, %v1165_v41  ;;  %v6151_v42 = vld [vmem:[%s8045_s24 + $0x88] sm:$0x1]  ;;  %2732 = vmatpush.bf16.msrb.mxu3 %v7358_v32 }
  0xb0   : > { %v891_v26 = vpop.f32.mrf.mxu2  ;;  %v521_v33 = vpop.f32.mrf.mxu0 }
  0xb1   : > { %v1317_v27 = vpop.f32.mrf.mxu3  ;;  %v971_v28 = vadd.f32 %v891_v26, %v657_v20  ;;  %v658_v34 = vpop.f32.mrf.mxu1  ;;  %v372_v20 = vsel %vm324_vm0, %v370_v12, %v8287_v8 }
  0xb2   : > { %v659_v45 = vadd.f32 %v658_v34, %v521_v33  ;;  %v439_v33 = vpack.c.bf16 %v8298_v11, %v372_v20  ;;  %v246_v34 = vpack.c.bf16 %v7535_v63, %v224_v61  ;;  %v227_v63 = vunpack.c.l.bf16 %v195_v39 }
  0xb3   : > { %v1397_v37 = vadd.f32 %v1317_v27, %v971_v28 }
  0xb4   : > { %v375_v54 = vrot.slane %v227_v63, 1 }
  0xb5   : > { %v1432_v38 = vadd.f32 %v8309_v30, %v1397_v37  ;;  %v7295_v37 = vld [vmem:[%s8045_s24 + $0x78] sm:$0xff] }
  0xb6   : > { %v376_v0 = vsel %vm324_vm0, %v8291_v9, %v375_v54 }
  0xb7   : > { %v1464_v44 = vmul.f32 0.2, %v1432_v38 }
  0xb8   : > { %v893_v31 = vpop.f32.mrf.mxu2  ;;  %v524_v50 = vpop.f32.mrf.mxu0 }
  0xb9   : > { %v1319_v46 = vpop.f32.mrf.mxu3  ;;  %v1496_v48 = vmax.f32 %v1432_v38, %v1464_v44  ;;  %v972_v49 = vadd.f32 %v893_v31, %v659_v45  ;;  %v661_v51 = vpop.f32.mrf.mxu1  ;;  %v281_v45 = vunpack.c.l.bf16 %v273_v40  ;;  %v7544_v31 = vunpack.c.h.bf16 %v8335_v58 }
  0xba   : > { %v662_v60 = vadd.f32 %v661_v51, %v524_v50 }
  0xbb   : > { %v1528_v55 = vpack.c.bf16 %v1496_v48, %v1496_v48  ;;  %v1398_v56 = vadd.f32 %v1319_v46, %v972_v49  ;;  %563 = vmatmul.bf16.gmra.mxu0 %v438_v47  ;;  %v1072_v46 = vunpack.c.l.bf16 %v6151_v42 }
  0xbc   : > { %700 = vmatmul.bf16.gmra.mxu1 %v8242_v21  ;;  %v7540_v21 = vunpack.c.h.bf16 %v8332_v57 }
  0xbd   : > { %1561 = vst.msk [vmem:[%s8328_s13] sm:$0xf] %vm1560_vm1, %v1528_v55  ;;  %v1433_v59 = vadd.f32 %v8309_v30, %v1398_v56  ;;  %935 = vmatmul.bf16.gmra.mxu2 %v7294_v52  ;;  %v377_v55 = vrot.slane %v281_v45, 1  ;;  %v8371_v56 = vrot.slane %v7544_v31, 1 }
  0xbe   : > { %1361 = vmatmul.bf16.gmra.mxu3 %v1236_v53  ;;  %v1169_v14 = vrot.slane %v7540_v21, 1  ;;  %v7350_v21 = vld [vmem:[%s9979_s1 + $0x88] sm:$0xff] }
  0xbf   : > { %v1465_v2 = vmul.f32 0.2, %v1433_v59  ;;  %v378_v23 = vsel %vm324_vm0, %v375_v54, %v377_v55  ;;  %2307 = vmatpush.bf16.msrb.mxu2 %v7350_v21  ;;  %v274_v55 = vld [vmem:[%s8045_s24 + $0x88] sm:$0x1] }
  0xc0   : > { %v896_v3 = vpop.f32.mrf.mxu2  ;;  %v526_v7 = vpop.f32.mrf.mxu0  ;;  %v1170_v22 = vsel %vm324_vm0, %v1168_v13, %v1169_v14  ;;  %v1172_v24 = vsel %vm324_vm0, %v1169_v14, %v1171_v15  ;;  %v282_v21 = vunpack.c.l.bf16 %v274_v55 }
  0xc1   : > { %v1322_v1 = vpop.f32.mrf.mxu3  ;;  %v1497_v62 = vmax.f32 %v1433_v59, %v1465_v2  ;;  %v973_v6 = vadd.f32 %v896_v3, %v662_v60  ;;  %v663_v10 = vpop.f32.mrf.mxu1  ;;  %v8361_v38 = vpack.c.bf16 %v1172_v24, %v1170_v22  ;;  %v1175_v59 = vrot.slane %v1072_v46, 1  ;;  %v6152_v22 = vld [vmem:[%s8045_s24 + $0x8c] sm:$0xf]  ;;  %v8397_v24 = vld [vmem:[%s8045_s24 + $0x90] sm:$0xff]  }
  0xc2   : > { %v664_v26 = vadd.f32 %v663_v10, %v526_v7  ;;  %v8387_v2 = vsel %vm324_vm0, %v1171_v15, %v8371_v56  ;;  %v440_v7 = vpack.c.bf16 %v378_v23, %v376_v0  ;;  %v247_v10 = vpack.c.bf16 %v227_v63, %v7536_v5  ;;  %v7326_v5 = vld [vmem:[%s9979_s1 + $0x48] sm:$0xff] }
  0xc3   : > { %v1529_v16 = vpack.c.bf16 %v1497_v62, %v1497_v62  ;;  %v1399_v17 = vadd.f32 %v1322_v1, %v973_v6  ;;  %v1176_v3 = vsel %vm324_vm0, %v8371_v56, %v1175_v59  ;;  %1936 = vmatpush.bf16.msrb.mxu0 %v7326_v5 }
  0xc5   : > { %1562 = vst.msk [vmem:[%s8328_s13 + $0x4] sm:$0xf] %vm1560_vm1, %v1529_v16  ;;  %v1434_v18 = vadd.f32 %v8309_v30, %v1399_v17  ;;  %v7296_v16 = vld [vmem:[%s8045_s24 + $0x80] sm:$0xff]  ;;  %v1238_v17 = vpack.c.bf16 %v1176_v3, %v8387_v2 }
  0xc7   : > { %v1466_v25 = vmul.f32 0.2, %v1434_v18 }
  0xc8   : > { %v898_v27 = vpop.f32.mrf.mxu2  ;;  %v529_v29 = vpop.f32.mrf.mxu0 }
  0xc9   : > { %v1324_v28 = vpop.f32.mrf.mxu3  ;;  %v1498_v35 = vmax.f32 %v1434_v18, %v1466_v25  ;;  %v974_v36 = vadd.f32 %v898_v27, %v664_v26  ;;  %v666_v8 = vpop.f32.mrf.mxu1  ;;  %v7318_v26 = vld [vmem:[%s9979_s1 + $0x8] sm:$0xff]  ;;  %v7547_v27 = vunpack.c.l.bf16 %v8397_v24 }
  0xca   : > { %v667_v44 = vadd.f32 %v666_v8, %v529_v29  ;;  %2073 = vmatpush.bf16.msrb.mxu1 %v7318_v26 }
  0xcb   : > { %v1530_v19 = vpack.c.bf16 %v1498_v35, %v1498_v35  ;;  %v1400_v41 = vadd.f32 %v1324_v28, %v974_v36  ;;  %568 = vmatmul.bf16.gmra.mxu0 %v439_v33  ;;  %v7548_v28 = vunpack.c.h.bf16 %v8397_v24  ;;  %v1073_v33 = vunpack.c.l.bf16 %v6152_v22 }
  0xcc   : > { %705 = vmatmul.bf16.gmra.mxu1 %v246_v34 }
  0xcd   : > { %1563 = vst.msk [vmem:[%s8328_s13 + $0x8] sm:$0xf] %vm1560_vm1, %v1530_v19  ;;  %v1435_v11 = vadd.f32 %v8309_v30, %v1400_v41  ;;  %940 = vmatmul.bf16.gmra.mxu2 %v7295_v37  ;;  %v1177_v40 = vrot.slane %v1073_v33, 1  ;;  %v8412_v19 = vrot.slane %v7547_v27, 1  ;;  %v8416_v41 = vrot.slane %v7548_v28, 1 }
  0xce   : > { %1366 = vmatmul.bf16.gmra.mxu3 %v8361_v38 }
  0xcf   : > { %v1467_v47 = vmul.f32 0.2, %v1435_v11  ;;  %v1179_v63 = vsel %vm324_vm0, %v1177_v40, %v8412_v19  ;;  %v8426_v45 = vsel %vm324_vm0, %v8412_v19, %v8416_v41 }
  0xd0   : > { %v901_v48 = vpop.f32.mrf.mxu2  ;;  %v531_v52 = vpop.f32.mrf.mxu0  ;;  %v1239_v54 = vpack.c.bf16 %v8426_v45, %v1179_v63 }
  0xd1   : > { %v1327_v49 = vpop.f32.mrf.mxu3  ;;  %v1499_v50 = vmax.f32 %v1435_v11, %v1467_v47  ;;  %v975_v51 = vadd.f32 %v901_v48, %v667_v44  ;;  %v668_v53 = vpop.f32.mrf.mxu1 }
  0xd2   : > { %v669_v9 = vadd.f32 %v668_v53, %v531_v52  ;;  %v7297_v53 = vld [vmem:[%s8045_s24 + $0x8c] sm:$0xff] }
  0xd3   : > { %v1531_v60 = vpack.c.bf16 %v1499_v50, %v1499_v50  ;;  %v1401_v61 = vadd.f32 %v1327_v49, %v975_v51 }
  0xd5   : > { %1564 = vst.msk [vmem:[%s8328_s13 + $0xc] sm:$0xf] %vm1560_vm1, %v1531_v60  ;;  %v1436_v43 = vadd.f32 %v8309_v30, %v1401_v61  ;;  %v6155_v61 = vld [vmem:[%s8045_s24 + $0x98] sm:$0xf] }
  0xd6   : > { %v1076_v32 = vunpack.c.l.bf16 %v6155_v61 }
  0xd7   : > { %v1468_v1 = vmul.f32 0.2, %v1436_v43 }
  0xd8   : > { %v903_v62 = vpop.f32.mrf.mxu2  ;;  %v534_v14 = vpop.f32.mrf.mxu0 }
  0xd9   : > { %v1329_v6 = vpop.f32.mrf.mxu3  ;;  %v1500_v12 = vmax.f32 %v1436_v43, %v1468_v1  ;;  %v976_v13 = vadd.f32 %v903_v62, %v669_v9  ;;  %v671_v15 = vpop.f32.mrf.mxu1  ;;  %v6156_v43 = vld [vmem:[%s8045_s24 + $0x9c] sm:$0x1] }
  0xda   : > { %v672_v4 = vadd.f32 %v671_v15, %v534_v14  ;;  %v1077_v3 = vunpack.c.l.bf16 %v6156_v43 }
  0xdb   : > { %v1532_v18 = vpack.c.bf16 %v1500_v12, %v1500_v12  ;;  %v1402_v20 = vadd.f32 %v1329_v6, %v976_v13  ;;  %573 = vmatmul.bf16.gmra.mxu0 %v440_v7  ;;  %v386_v12 = vrot.slane %v282_v21, 1 }
  0xdc   : > { %710 = vmatmul.bf16.gmra.mxu1 %v247_v10  ;;  %v1184_v13 = vrot.slane %v1077_v3, 1 }
  0xdd   : > { %1565 = vst.msk [vmem:[%s8328_s13 + $0x10] sm:$0xf] %vm1560_vm1, %v1532_v18  ;;  %v1437_v25 = vadd.f32 %v8309_v30, %v1402_v20  ;;  %945 = vmatmul.bf16.gmra.mxu2 %v7296_v16  ;;  %v7349_v18 = vld [vmem:[%s9979_s1 + $0x80] sm:$0xff] }
  0xde   : > { %1371 = vmatmul.bf16.gmra.mxu3 %v1238_v17  ;;  %v387_v17 = vsel %vm324_vm0, %v8371_v56, %v386_v12  ;;  %v7357_v20 = vld [vmem:[%s9979_s1 + $0xc0] sm:$0xff]  ;;  %2308 = vmatpush.bf16.msrb.mxu2 %v7349_v18  ;;  %v275_v18 = vld [vmem:[%s8045_s24 + $0x9c] sm:$0x1] }
  0xdf   : > { %v1469_v34 = vmul.f32 0.2, %v1437_v25  ;;  %2733 = vmatpush.bf16.msrb.mxu3 %v7357_v20  ;;  %v442_v33 = vpack.c.bf16 %v387_v17, %v8387_v2  ;;  %v203_v17 = vld [vmem:[%s8045_s24 + $0x98] sm:$0xf] }
  0xe0   : > { %v906_v35 = vpop.f32.mrf.mxu2  ;;  %v536_v37 = vpop.f32.mrf.mxu0 }
  0xe1   : > { %v1332_v36 = vpop.f32.mrf.mxu3  ;;  %v1501_v29 = vmax.f32 %v1437_v25, %v1469_v34  ;;  %v977_v8 = vadd.f32 %v906_v35, %v672_v4  ;;  %v673_v39 = vpop.f32.mrf.mxu1 }
  0xe2   : > { %v674_v46 = vadd.f32 %v673_v39, %v536_v37  ;;  %v200_v39 = vld [vmem:[%s8045_s24 + $0x8c] sm:$0xf] }
  0xe3   : > { %v1533_v42 = vpack.c.bf16 %v1501_v29, %v1501_v29  ;;  %v1403_v11 = vadd.f32 %v1332_v36, %v977_v8  ;;  %v7298_v8 = vld [vmem:[%s8045_s24 + $0x94] sm:$0xff] }
  0xe5   : > { %1566 = vst.msk [vmem:[%s8328_s13 + $0x14] sm:$0xf] %vm1560_vm1, %v1533_v42  ;;  %v1438_v44 = vadd.f32 %v8309_v30, %v1403_v11  ;;  %v8456_v11 = vld [vmem:[%s8045_s24 + $0xa0] sm:$0xff]  }
  0xe7   : > { %v1470_v31 = vmul.f32 0.2, %v1438_v44 }
  0xe8   : > { %v908_v47 = vpop.f32.mrf.mxu2  ;;  %v539_v51 = vpop.f32.mrf.mxu0 }
  0xe9   : > { %v1334_v48 = vpop.f32.mrf.mxu3  ;;  %v1502_v49 = vmax.f32 %v1438_v44, %v1470_v31  ;;  %v978_v50 = vadd.f32 %v908_v47, %v674_v46  ;;  %v676_v52 = vpop.f32.mrf.mxu1  ;;  %v8459_v44 = vld [vmem:[%s8045_s24 + $0xa8] sm:$0xff]   ;;  %v232_v31 = vunpack.c.l.bf16 %v200_v39  ;;  %v7325_v46 = vld [vmem:[%s9979_s1 + $0x40] sm:$0xff] }
  0xea   : > { %v677_v23 = vadd.f32 %v676_v52, %v539_v51  ;;  %v7317_v47 = vld [vmem:[%s9979_s1] sm:$0xff]  ;;  %1937 = vmatpush.bf16.msrb.mxu0 %v7325_v46 }
  0xeb   : > { %v1534_v59 = vpack.c.bf16 %v1502_v49, %v1502_v49  ;;  %v1404_v60 = vadd.f32 %v1334_v48, %v978_v50  ;;  %578 = vmatmul.bf16.gmra.mxu0 %v8361_v38  ;;  %v7551_v48 = vunpack.c.l.bf16 %v8456_v11  ;;  %v7555_v49 = vunpack.c.l.bf16 %v8459_v44  ;;  %2074 = vmatpush.bf16.msrb.mxu1 %v7317_v47 }
  0xec   : > { %715 = vmatmul.bf16.gmra.mxu1 %v8332_v57  ;;  %v1182_v57 = vrot.slane %v1076_v32, 1  ;;  %v250_v12 = vpack.c.bf16 %v7547_v27, %v232_v31  ;;  %v235_v27 = vunpack.c.l.bf16 %v203_v17 }
  0xed   : > { %1567 = vst.msk [vmem:[%s8328_s13 + $0x18] sm:$0xf] %vm1560_vm1, %v1534_v59  ;;  %v1439_v0 = vadd.f32 %v8309_v30, %v1404_v60  ;;  %950 = vmatmul.bf16.gmra.mxu2 %v7297_v53  ;;  %v388_v60 = vrot.slane %v232_v31, 1  ;;  %v1186_v61 = vrot.slane %v7551_v48, 1 }
  0xee   : > { %1376 = vmatmul.bf16.gmra.mxu3 %v1239_v54  ;;  %v1183_v22 = vsel %vm324_vm0, %v8416_v41, %v1182_v57  ;;  %v1185_v25 = vsel %vm324_vm0, %v1182_v57, %v1184_v13  ;;  %v393_v39 = vrot.slane %v235_v27, 1 }
  0xef   : > { %v1471_v1 = vmul.f32 0.2, %v1439_v0  ;;  %v1240_v37 = vpack.c.bf16 %v1185_v25, %v1183_v22  ;;  %v390_v3 = vsel %vm324_vm0, %v388_v60, %v8412_v19  ;;  %v6161_v25 = vld [vmem:[%s8045_s24 + $0xb0] sm:$0x1] }
  0xf0   : > { %v911_v9 = vpop.f32.mrf.mxu2  ;;  %v541_v10 = vpop.f32.mrf.mxu0  ;;  %v394_v47 = vsel %vm324_vm0, %v8416_v41, %v393_v39 }
  0xf1   : > { %v1337_v62 = vpop.f32.mrf.mxu3  ;;  %v1503_v6 = vmax.f32 %v1439_v0, %v1471_v1  ;;  %v979_v7 = vadd.f32 %v911_v9, %v677_v23  ;;  %v678_v38 = vpop.f32.mrf.mxu1  ;;  %v1189_v0 = vrot.slane %v7555_v49, 1  ;;  %v7412_v49 = vld [vmem:[%s9979_s1 + $0xf8] sm:$0xff] }
  0xf2   : > { %v679_v5 = vadd.f32 %v678_v38, %v541_v10  ;;  %v443_v38 = vpack.c.bf16 %v8426_v45, %v390_v3  ;;  %4140 = vmatpush.bf16.msra.mxu3 %v7412_v49 }
  0xf3   : > { %v1535_v14 = vpack.c.bf16 %v1503_v6, %v1503_v6  ;;  %v1405_v15 = vadd.f32 %v1337_v62, %v979_v7 }
  0xf5   : > { %1568 = vst.msk [vmem:[%s8328_s13 + $0x1c] sm:$0xf] %vm1560_vm1, %v1535_v14  ;;  %v1440_v16 = vadd.f32 %v8309_v30, %v1405_v15  ;;  %v7299_v15 = vld [vmem:[%s8045_s24 + $0xa0] sm:$0xff] }
  0xf7   : > { %v1472_v4 = vmul.f32 0.2, %v1440_v16 }
  0xf8   : > { %v913_v56 = vpop.f32.mrf.mxu2  ;;  %v544_v36 = vpop.f32.mrf.mxu0 }
  0xf9   : > { %v1339_v26 = vpop.f32.mrf.mxu3  ;;  %v1504_v34 = vmax.f32 %v1440_v16, %v1472_v4  ;;  %v980_v35 = vadd.f32 %v913_v56, %v679_v5  ;;  %v681_v29 = vpop.f32.mrf.mxu1  ;;  %v283_v5 = vunpack.c.l.bf16 %v275_v18  ;;  %v7556_v56 = vunpack.c.h.bf16 %v8459_v44 }
  0xfa   : > { %v682_v63 = vadd.f32 %v681_v29, %v544_v36 }
  0xfb   : > { %v1536_v40 = vpack.c.bf16 %v1504_v34, %v1504_v34  ;;  %v1406_v42 = vadd.f32 %v1339_v26, %v980_v35  ;;  %583 = vmatmul.bf16.gmra.mxu0 %v442_v33  ;;  %v1082_v26 = vunpack.c.l.bf16 %v6161_v25 }
  0xfc   : > { %720 = vmatmul.bf16.gmra.mxu1 %v8335_v58  ;;  %v7552_v58 = vunpack.c.h.bf16 %v8456_v11 }
  0xfd   : > { %1569 = vst.msk [vmem:[%s8328_s13 + $0x20] sm:$0xf] %vm1560_vm1, %v1536_v40  ;;  %v1441_v2 = vadd.f32 %v8309_v30, %v1406_v42  ;;  %955 = vmatmul.bf16.gmra.mxu2 %v7298_v8  ;;  %v395_v40 = vrot.slane %v283_v5, 1  ;;  %v8495_v42 = vrot.slane %v7556_v56, 1 }
  0xfe   : > { %1381 = vmatmul.bf16.gmra.mxu3 %v1240_v37  ;;  %v1187_v43 = vrot.slane %v7552_v58, 1  ;;  %v7404_v58 = vld [vmem:[%s9979_s1 + $0xb8] sm:$0xff] }
  0xff   : > { %v1473_v50 = vmul.f32 0.2, %v1441_v2  ;;  %v396_v48 = vsel %vm324_vm0, %v393_v39, %v395_v40  ;;  %3715 = vmatpush.bf16.msra.mxu2 %v7404_v58  ;;  %v6242_v40 = vld [vmem:[%s8045_s24 + $0xb0] sm:$0x1] }
 0x100   : > { %v916_v51 = vpop.f32.mrf.mxu2  ;;  %v546_v55 = vpop.f32.mrf.mxu0  ;;  %v1188_v1 = vsel %vm324_vm0, %v1186_v61, %v1187_v43  ;;  %v1190_v9 = vsel %vm324_vm0, %v1187_v43, %v1189_v0  ;;  %v1698_v58 = vunpack.c.l.bf16 %v6242_v40 }
 0x101   : > { %v1342_v52 = vpop.f32.mrf.mxu3  ;;  %v1505_v53 = vmax.f32 %v1441_v2, %v1473_v50  ;;  %v981_v54 = vadd.f32 %v916_v51, %v682_v63  ;;  %v683_v59 = vpop.f32.mrf.mxu1  ;;  %v8485_v16 = vpack.c.bf16 %v1190_v9, %v1188_v1  ;;  %v1193_v2 = vrot.slane %v1082_v26, 1  ;;  %v6474_v1 = vld [vmem:[%s8045_s24 + $0xb4] sm:$0xf]  ;;  %v8521_v9 = vld [vmem:[%s8045_s24 + $0xb8] sm:$0xff]  }
 0x102   : > { %v684_v6 = vadd.f32 %v683_v59, %v546_v55  ;;  %v8511_v50 = vsel %vm324_vm0, %v1189_v0, %v8495_v42  ;;  %v444_v55 = vpack.c.bf16 %v396_v48, %v394_v47  ;;  %v251_v59 = vpack.c.bf16 %v235_v27, %v7548_v28  ;;  %v7380_v28 = vld [vmem:[%s9979_s1 + $0x78] sm:$0xff] }
 0x103   : > { %v1537_v23 = vpack.c.bf16 %v1505_v53, %v1505_v53  ;;  %v1407_v21 = vadd.f32 %v1342_v52, %v981_v54  ;;  %v1194_v51 = vsel %vm324_vm0, %v8495_v42, %v1193_v2  ;;  %3344 = vmatpush.bf16.msra.mxu0 %v7380_v28 }
 0x105   : > { %1570 = vst.msk [vmem:[%s8328_s13 + $0x24] sm:$0xf] %vm1560_vm1, %v1537_v23  ;;  %v1442_v32 = vadd.f32 %v8309_v30, %v1407_v21  ;;  %v7300_v23 = vld [vmem:[%s8045_s24 + $0xa8] sm:$0xff]  ;;  %v1242_v21 = vpack.c.bf16 %v1194_v51, %v8511_v50 }
 0x107   : > { %v1474_v62 = vmul.f32 0.2, %v1442_v32 }
 0x108   : > { %v918_v7 = vpop.f32.mrf.mxu2  ;;  %v549_v14 = vpop.f32.mrf.mxu0 }
 0x109   : > { %v1344_v10 = vpop.f32.mrf.mxu3  ;;  %v1506_v57 = vmax.f32 %v1442_v32, %v1474_v62  ;;  %v982_v13 = vadd.f32 %v918_v7, %v684_v6  ;;  %v686_v19 = vpop.f32.mrf.mxu1  ;;  %v7372_v6 = vld [vmem:[%s9979_s1 + $0x38] sm:$0xff]  ;;  %v7607_v7 = vunpack.c.l.bf16 %v8521_v9 }
 0x10a   : > { %v687_v4 = vadd.f32 %v686_v19, %v549_v14  ;;  %3481 = vmatpush.bf16.msra.mxu1 %v7372_v6 }
 0x10b   : > { %v1538_v20 = vpack.c.bf16 %v1506_v57, %v1506_v57  ;;  %v1408_v22 = vadd.f32 %v1344_v10, %v982_v13  ;;  %588 = vmatmul.bf16.gmra.mxu0 %v443_v38  ;;  %v7608_v10 = vunpack.c.h.bf16 %v8521_v9  ;;  %v2462_v38 = vunpack.c.l.bf16 %v6474_v1  ;;  %v8652_v9 = vld [vmem:[%s9980_s2] ss:$0 sm:$0xff] }
 0x10c   : > { %725 = vmatmul.bf16.gmra.mxu1 %v250_v12 }
 0x10d   : > { %1571 = vst.msk [vmem:[%s8328_s13 + $0x28] sm:$0xf] %vm1560_vm1, %v1538_v20  ;;  %v1443_v45 = vadd.f32 %v8309_v30, %v1408_v22  ;;  %960 = vmatmul.bf16.gmra.mxu2 %v7299_v15  ;;  %v2542_v18 = vrot.slane %v2462_v38, 1  ;;  %v8536_v20 = vrot.slane %v7607_v7, 1  ;;  %v8540_v22 = vrot.slane %v7608_v10, 1 }
 0x10e   : > { %1386 = vmatmul.bf16.gmra.mxu3 %v8485_v16 }
 0x10f   : > { %v1475_v33 = vmul.f32 0.2, %v1443_v45  ;;  %v2544_v27 = vsel %vm324_vm0, %v2542_v18, %v8536_v20  ;;  %v8550_v5 = vsel %vm324_vm0, %v8536_v20, %v8540_v22 }
 0x110   : > { %v921_v34 = vpop.f32.mrf.mxu2  ;;  %v551_v8 = vpop.f32.mrf.mxu0  ;;  %v2646_v39 = vpack.c.bf16 %v8550_v5, %v2544_v27 }
 0x111   : > { %v1347_v35 = vpop.f32.mrf.mxu3  ;;  %v1507_v36 = vmax.f32 %v1443_v45, %v1475_v33  ;;  %v983_v29 = vadd.f32 %v921_v34, %v687_v4  ;;  %v688_v37 = vpop.f32.mrf.mxu1 }
 0x112   : > { %v689_v41 = vadd.f32 %v688_v37, %v551_v8  ;;  %v7333_v37 = vld [vmem:[%s8045_s24 + $0xb4] sm:$0xff] }
 0x113   : > { %v1539_v63 = vpack.c.bf16 %v1507_v36, %v1507_v36  ;;  %v1409_v31 = vadd.f32 %v1347_v35, %v983_v29 }
 0x115   : > { %1572 = vst.msk [vmem:[%s8328_s13 + $0x2c] sm:$0xf] %vm1560_vm1, %v1539_v63  ;;  %v1444_v46 = vadd.f32 %v8309_v30, %v1409_v31  ;;  %v6477_v31 = vld [vmem:[%s8045_s24 + $0xc0] sm:$0xf] }
 0x116   : > { %v2465_v49 = vunpack.c.l.bf16 %v6477_v31 }
 0x117   : > { %v1476_v52 = vmul.f32 0.2, %v1444_v46 }
 0x118   : > { %v923_v53 = vpop.f32.mrf.mxu2  ;;  %v554_v43 = vpop.f32.mrf.mxu0 }
 0x119   : > { %v1349_v54 = vpop.f32.mrf.mxu3  ;;  %v1508_v60 = vmax.f32 %v1444_v46, %v1476_v52  ;;  %v984_v61 = vadd.f32 %v923_v53, %v689_v41  ;;  %v691_v0 = vpop.f32.mrf.mxu1  ;;  %v6478_v46 = vld [vmem:[%s8045_s24 + $0xc4] sm:$0x1] }
 0x11a   : > { %v692_v24 = vadd.f32 %v691_v0, %v554_v43  ;;  %v2466_v51 = vunpack.c.l.bf16 %v6478_v46 }
 0x11b   : > { %v1540_v32 = vpack.c.bf16 %v1508_v60, %v1508_v60  ;;  %v1410_v3 = vadd.f32 %v1349_v54, %v984_v61  ;;  %593 = vmatmul.bf16.gmra.mxu0 %v444_v55  ;;  %v1753_v60 = vrot.slane %v1698_v58, 1 }
 0x11c   : > { %730 = vmatmul.bf16.gmra.mxu1 %v251_v59  ;;  %v2549_v61 = vrot.slane %v2466_v51, 1 }
 0x11d   : > { %1573 = vst.msk [vmem:[%s8328_s13 + $0x30] sm:$0xf] %vm1560_vm1, %v1540_v32  ;;  %v1445_v62 = vadd.f32 %v8309_v30, %v1410_v3  ;;  %965 = vmatmul.bf16.gmra.mxu2 %v7300_v23  ;;  %v7403_v32 = vld [vmem:[%s9979_s1 + $0xb0] sm:$0xff] }
 0x11e   : > { %1391 = vmatmul.bf16.gmra.mxu3 %v1242_v21  ;;  %v1754_v21 = vsel %vm324_vm0, %v8495_v42, %v1753_v60  ;;  %v7411_v3 = vld [vmem:[%s9979_s1 + $0xf0] sm:$0xff]  ;;  %3716 = vmatpush.bf16.msra.mxu2 %v7403_v32  ;;  %v6243_v32 = vld [vmem:[%s8045_s24 + $0xc4] sm:$0x1] }
 0x11f   : > { %v1477_v12 = vmul.f32 0.2, %v1445_v62  ;;  %4141 = vmatpush.bf16.msra.mxu3 %v7411_v3  ;;  %v1851_v38 = vpack.c.bf16 %v1754_v21, %v8511_v50  ;;  %v6217_v21 = vld [vmem:[%s8045_s24 + $0xc0] sm:$0xf] }
 0x120   : > { %v926_v57 = vpop.f32.mrf.mxu2  ;;  %v556_v15 = vpop.f32.mrf.mxu0 }
 0x121   : > { %v1352_v13 = vpop.f32.mrf.mxu3  ;;  %v1509_v14 = vmax.f32 %v1445_v62, %v1477_v12  ;;  %v985_v19 = vadd.f32 %v926_v57, %v692_v24  ;;  %v693_v17 = vpop.f32.mrf.mxu1 }
 0x122   : > { %v694_v26 = vadd.f32 %v693_v17, %v556_v15  ;;  %v6214_v17 = vld [vmem:[%s8045_s24 + $0xb4] sm:$0xf] }
 0x123   : > { %v1541_v25 = vpack.c.bf16 %v1509_v14, %v1509_v14  ;;  %v1411_v45 = vadd.f32 %v1352_v13, %v985_v19  ;;  %v7334_v19 = vld [vmem:[%s8045_s24 + $0xbc] sm:$0xff] }
 0x125   : > { %1574 = vst.msk [vmem:[%s8328_s13 + $0x34] sm:$0xf] %vm1560_vm1, %v1541_v25  ;;  %v1446_v4 = vadd.f32 %v8309_v30, %v1411_v45  ;;  %v8580_v45 = vld [vmem:[%s8045_s24 + $0xc8] sm:$0xff]  }
 0x127   : > { %v1478_v56 = vmul.f32 0.2, %v1446_v4 }
 0x128   : > { %v928_v33 = vpop.f32.mrf.mxu2  ;;  %v559_v29 = vpop.f32.mrf.mxu0 }
 0x129   : > { %v1354_v34 = vpop.f32.mrf.mxu3  ;;  %v1510_v35 = vmax.f32 %v1446_v4, %v1478_v56  ;;  %v986_v36 = vadd.f32 %v928_v33, %v694_v26  ;;  %v696_v8 = vpop.f32.mrf.mxu1  ;;  %v8583_v4 = vld [vmem:[%s8045_s24 + $0xd0] sm:$0xff]   ;;  %v1630_v56 = vunpack.c.l.bf16 %v6214_v17 }
 0x12a   : > { %v697_v48 = vadd.f32 %v696_v8, %v559_v29  ;;  %v7379_v26 = vld [vmem:[%s9979_s1 + $0x70] sm:$0xff] }
 0x12b   : > { %v1542_v2 = vpack.c.bf16 %v1510_v35, %v1510_v35  ;;  %v1412_v63 = vadd.f32 %v1354_v34, %v986_v36  ;;  %1938 = vmatmul.bf16.vlgmr.msrb.gmra.mxu0 %v8485_v16  ;;  %v7371_v33 = vld [vmem:[%s9979_s1 + $0x30] sm:$0xff]  ;;  %v7611_v34 = vunpack.c.l.bf16 %v8580_v45  ;;  %v7615_v35 = vunpack.c.l.bf16 %v8583_v4 }
 0x12c   : > { %2075 = vmatmul.bf16.vlgmr.msrb.gmra.mxu1 %v8456_v11  ;;  %v2547_v11 = vrot.slane %v2465_v49, 1  ;;  %3345 = vmatpush.bf16.msra.mxu0 %v7379_v26  ;;  %v1660_v60 = vpack.c.bf16 %v7607_v7, %v1630_v56  ;;  %v1633_v7 = vunpack.c.l.bf16 %v6217_v21 }
 0x12d   : > { %1575 = vst.msk [vmem:[%s8328_s13 + $0x38] sm:$0xf] %vm1560_vm1, %v1542_v2  ;;  %v1447_v47 = vadd.f32 %v8309_v30, %v1412_v63  ;;  %2309 = vmatmul.bf16.vlgmr.msrb.gmra.mxu2 %v7333_v37  ;;  %3482 = vmatpush.bf16.msra.mxu1 %v7371_v33  ;;  %v1755_v63 = vrot.slane %v1630_v56, 1  ;;  %v2551_v31 = vrot.slane %v7611_v34, 1 }
 0x12e   : > { %2734 = vmatmul.bf16.vlgmr.msrb.gmra.mxu3 %v2646_v39  ;;  %v2548_v1 = vsel %vm324_vm0, %v8540_v22, %v2547_v11  ;;  %v2550_v62 = vsel %vm324_vm0, %v2547_v11, %v2549_v61  ;;  %v1760_v17 = vrot.slane %v1633_v7, 1 }
 0x12f   : > { %v1479_v52 = vmul.f32 0.2, %v1447_v47  ;;  %v2647_v15 = vpack.c.bf16 %v2550_v62, %v2548_v1  ;;  %v1757_v51 = vsel %vm324_vm0, %v1755_v63, %v8536_v20  ;;  %v6483_v62 = vld [vmem:[%s8045_s24 + $0xd8] sm:$0x1] }
 0x130   : > { %v931_v41 = vpop.f32.mrf.mxu2  ;;  %v561_v59 = vpop.f32.mrf.mxu0  ;;  %v1761_v33 = vsel %vm324_vm0, %v8540_v22, %v1760_v17 }
 0x131   : > { %v1357_v53 = vpop.f32.mrf.mxu3  ;;  %v1511_v54 = vmax.f32 %v1447_v47, %v1479_v52  ;;  %v987_v55 = vadd.f32 %v931_v41, %v697_v48  ;;  %v698_v16 = vpop.f32.mrf.mxu1  ;;  %v2554_v47 = vrot.slane %v7615_v35, 1  ;;  %v7410_v35 = vld [vmem:[%s9979_s1 + $0xe8] sm:$0xff] }
 0x132   : > { %v699_v28 = vadd.f32 %v698_v16, %v561_v59  ;;  %v1852_v16 = vpack.c.bf16 %v8550_v5, %v1757_v51  ;;  %4142 = vmatpush.bf16.msra.mxu3 %v7410_v35  ;;  %v6484_v51 = vld [vmem:[%s8045_s24 + $0xdc] sm:$0xf] }
 0x133   : > { %v1543_v43 = vpack.c.bf16 %v1511_v54, %v1511_v54  ;;  %v1413_v0 = vadd.f32 %v1357_v53, %v987_v55 }
 0x135   : > { %1576 = vst.msk [vmem:[%s8328_s13 + $0x3c] sm:$0xf] %vm1560_vm1, %v1543_v43  ;;  %v1448_v23 = vadd.f32 %v8309_v30, %v1413_v0  ;;  %v7335_v0 = vld [vmem:[%s8045_s24 + $0xc8] sm:$0xff] }
 0x137   : > { %v1480_v24 = vmul.f32 0.2, %v1448_v23 }
 0x138   : > { %v933_v42 = vpop.f32.mrf.mxu2  ;;  %v564_v13 = vpop.f32.mrf.mxu0 }
 0x139   : > { %v1359_v6 = vpop.f32.mrf.mxu3  ;;  %v1512_v12 = vmax.f32 %v1448_v23, %v1480_v24  ;;  %v988_v57 = vadd.f32 %v933_v42, %v699_v28  ;;  %v701_v14 = vpop.f32.mrf.mxu1  ;;  %v1699_v28 = vunpack.c.l.bf16 %v6243_v32  ;;  %v7616_v42 = vunpack.c.h.bf16 %v8583_v4 }
 0x13a   : > { %v702_v27 = vadd.f32 %v701_v14, %v564_v13 }
 0x13b   : > { %v1544_v18 = vpack.c.bf16 %v1512_v12, %v1512_v12  ;;  %v1414_v25 = vadd.f32 %v1359_v6, %v988_v57  ;;  %1943 = vmatmul.bf16.gmra.mxu0 %v1851_v38  ;;  %v2471_v6 = vunpack.c.l.bf16 %v6483_v62 }
 0x13c   : > { %2080 = vmatmul.bf16.gmra.mxu1 %v8459_v44  ;;  %v7612_v44 = vunpack.c.h.bf16 %v8580_v45 }
 0x13d   : > { %1577 = vst.msk [vmem:[%s8328_s13 + $0x40] sm:$0xf] %vm1560_vm1, %v1544_v18  ;;  %v1449_v50 = vadd.f32 %v8309_v30, %v1414_v25  ;;  %2314 = vmatmul.bf16.gmra.mxu2 %v7334_v19  ;;  %v1762_v18 = vrot.slane %v1699_v28, 1  ;;  %v8619_v25 = vrot.slane %v7616_v42, 1 }
 0x13e   : > { %2739 = vmatmul.bf16.gmra.mxu3 %v2647_v15  ;;  %v2552_v46 = vrot.slane %v7612_v44, 1  ;;  %v7402_v44 = vld [vmem:[%s9979_s1 + $0xa8] sm:$0xff] }
 0x13f   : > { %v1481_v36 = vmul.f32 0.2, %v1449_v50  ;;  %v1763_v34 = vsel %vm324_vm0, %v1760_v17, %v1762_v18  ;;  %3717 = vmatpush.bf16.msra.mxu2 %v7402_v44  ;;  %v6244_v18 = vld [vmem:[%s8045_s24 + $0xd8] sm:$0x1] }
 0x140   : > { %v936_v29 = vpop.f32.mrf.mxu2  ;;  %v566_v40 = vpop.f32.mrf.mxu0  ;;  %v2553_v52 = vsel %vm324_vm0, %v2551_v31, %v2552_v46  ;;  %v2555_v41 = vsel %vm324_vm0, %v2552_v46, %v2554_v47  ;;  %v1700_v44 = vunpack.c.l.bf16 %v6244_v18 }
 0x141   : > { %v1362_v8 = vpop.f32.mrf.mxu3  ;;  %v1513_v37 = vmax.f32 %v1449_v50, %v1481_v36  ;;  %v989_v39 = vadd.f32 %v936_v29, %v702_v27  ;;  %v703_v2 = vpop.f32.mrf.mxu1  ;;  %v8609_v23 = vpack.c.bf16 %v2555_v41, %v2553_v52  ;;  %v2558_v50 = vrot.slane %v2471_v6, 1  ;;  %v8645_v52 = vld [vmem:[%s8045_s24 + $0xe0] sm:$0xff]  }
 0x142   : > { %v704_v54 = vadd.f32 %v703_v2, %v566_v40  ;;  %v8635_v36 = vsel %vm324_vm0, %v2554_v47, %v8619_v25  ;;  %v1661_v40 = vpack.c.bf16 %v1633_v7, %v7608_v10  ;;  %v7336_v47 = vld [vmem:[%s8045_s24 + $0xd0] sm:$0xff] }
 0x143   : > { %v1545_v48 = vpack.c.bf16 %v1513_v37, %v1513_v37  ;;  %v1415_v58 = vadd.f32 %v1362_v8, %v989_v39  ;;  %v1853_v39 = vpack.c.bf16 %v1763_v34, %v1761_v33 }
 0x145   : > { %1578 = vst.msk [vmem:[%s8328_s13 + $0x44] sm:$0xf] %vm1560_vm1, %v1545_v48  ;;  %v1450_v49 = vadd.f32 %v8309_v30, %v1415_v58 }
 0x147   : > { %v1482_v53 = vmul.f32 0.2, %v1450_v49 }
 0x148   : > { %v938_v55 = vpop.f32.mrf.mxu2  ;;  %v569_v43 = vpop.f32.mrf.mxu0 }
 0x149   : > { %v1364_v59 = vpop.f32.mrf.mxu3  ;;  %v1514_v11 = vmax.f32 %v1450_v49, %v1482_v53  ;;  %v990_v61 = vadd.f32 %v938_v55, %v704_v54  ;;  %v706_v20 = vpop.f32.mrf.mxu1  ;;  %v7378_v53 = vld [vmem:[%s9979_s1 + $0x68] sm:$0xff]  ;;  %v7619_v55 = vunpack.c.l.bf16 %v8645_v52 }
 0x14a   : > { %v707_v24 = vadd.f32 %v706_v20, %v569_v43  ;;  %v7370_v54 = vld [vmem:[%s9979_s1 + $0x28] sm:$0xff]  ;;  %3346 = vmatpush.bf16.msra.mxu0 %v7378_v53 }
 0x14b   : > { %v1546_v3 = vpack.c.bf16 %v1514_v11, %v1514_v11  ;;  %v1416_v1 = vadd.f32 %v1364_v59, %v990_v61  ;;  %1948 = vmatmul.bf16.gmra.mxu0 %v1852_v16  ;;  %v7620_v59 = vunpack.c.h.bf16 %v8645_v52  ;;  %v2472_v16 = vunpack.c.l.bf16 %v6484_v51  ;;  %3483 = vmatpush.bf16.msra.mxu1 %v7370_v54 }
 0x14c   : > { %2085 = vmatmul.bf16.gmra.mxu1 %v1660_v60 }
 0x14d   : > { %1579 = vst.msk [vmem:[%s8328_s13 + $0x48] sm:$0xf] %vm1560_vm1, %v1546_v3  ;;  %v1451_v5 = vadd.f32 %v8309_v30, %v1416_v1  ;;  %2319 = vmatmul.bf16.gmra.mxu2 %v7335_v0  ;;  %v2560_v32 = vrot.slane %v2472_v16, 1  ;;  %v8665_v3 = vrot.slane %v7619_v55, 1  ;;  %v8669_v1 = vrot.slane %v7620_v59, 1 }
 0x14e   : > { %2744 = vmatmul.bf16.gmra.mxu3 %v8609_v23 }
 0x14f   : > { %v1483_v38 = vmul.f32 0.2, %v1451_v5  ;;  %v2562_v7 = vsel %vm324_vm0, %v2560_v32, %v8665_v3  ;;  %v8679_v28 = vsel %vm324_vm0, %v8665_v3, %v8669_v1 }
 0x150   : > { %v941_v12 = vpop.f32.mrf.mxu2  ;;  %v571_v19 = vpop.f32.mrf.mxu0  ;;  %v2650_v17 = vpack.c.bf16 %v8679_v28, %v2562_v7 }
 0x151   : > { %v1367_v57 = vpop.f32.mrf.mxu3  ;;  %v1515_v13 = vmax.f32 %v1451_v5, %v1483_v38  ;;  %v991_v14 = vadd.f32 %v941_v12, %v707_v24  ;;  %v708_v15 = vpop.f32.mrf.mxu1 }
 0x152   : > { %v709_v22 = vadd.f32 %v708_v15, %v571_v19  ;;  %v7337_v15 = vld [vmem:[%s8045_s24 + $0xdc] sm:$0xff] }
 0x153   : > { %v1547_v27 = vpack.c.bf16 %v1515_v13, %v1515_v13  ;;  %v1417_v56 = vadd.f32 %v1367_v57, %v991_v14 }
 0x155   : > { %1580 = vst.msk [vmem:[%s8328_s13 + $0x4c] sm:$0xf] %vm1560_vm1, %v1547_v27  ;;  %v1452_v26 = vadd.f32 %v8309_v30, %v1417_v56  ;;  %v2559_v30 = vsel %vm324_vm0, %v8619_v25, %v2558_v50  ;;  %v6487_v56 = vld [vmem:[%s8045_s24 + $0xe8] sm:$0xf] }
 0x156   : > { %v2649_v48 = vpack.c.bf16 %v2559_v30, %v8635_v36  ;;  %v2475_v35 = vunpack.c.l.bf16 %v6487_v56 }
 0x157   : > { %v1484_v29 = vmul.f32 0.2, %v1452_v26 }
 0x158   : > { %v943_v8 = vpop.f32.mrf.mxu2  ;;  %v574_v31 = vpop.f32.mrf.mxu0 }
 0x159   : > { %v1369_v37 = vpop.f32.mrf.mxu3  ;;  %v1516_v2 = vmax.f32 %v1452_v26, %v1484_v29  ;;  %v992_v63 = vadd.f32 %v943_v8, %v709_v22  ;;  %v711_v46 = vpop.f32.mrf.mxu1  ;;  %v6488_v26 = vld [vmem:[%s8045_s24 + $0xec] sm:$0x1] }
 0x15a   : > { %v712_v41 = vadd.f32 %v711_v46, %v574_v31  ;;  %v2476_v30 = vunpack.c.l.bf16 %v6488_v26 }
 0x15b   : > { %v1548_v58 = vpack.c.bf16 %v1516_v2, %v1516_v2  ;;  %v1418_v49 = vadd.f32 %v1369_v37, %v992_v63  ;;  %1953 = vmatmul.bf16.gmra.mxu0 %v1853_v39  ;;  %v1771_v2 = vrot.slane %v1700_v44, 1 }
 0x15c   : > { %2090 = vmatmul.bf16.gmra.mxu1 %v1661_v40  ;;  %v2567_v63 = vrot.slane %v2476_v30, 1 }
 0x15d   : > { %1581 = vst.msk [vmem:[%s8328_s13 + $0x50] sm:$0xf] %vm1560_vm1, %v1548_v58  ;;  %v1453_v10 = vadd.f32 %v8652_v9, %v1418_v49  ;;  %2324 = vmatmul.bf16.gmra.mxu2 %v7336_v47  ;;  %v7401_v58 = vld [vmem:[%s9979_s1 + $0xa0] sm:$0xff] }
 0x15e   : > { %2749 = vmatmul.bf16.gmra.mxu3 %v2649_v48  ;;  %v1772_v48 = vsel %vm324_vm0, %v8619_v25, %v1771_v2  ;;  %v7409_v49 = vld [vmem:[%s9979_s1 + $0xe0] sm:$0xff]  ;;  %3718 = vmatpush.bf16.msra.mxu2 %v7401_v58  ;;  %v6245_v58 = vld [vmem:[%s8045_s24 + $0xec] sm:$0x1] }
 0x15f   : > { %v1485_v60 = vmul.f32 0.2, %v1453_v10  ;;  %4143 = vmatpush.bf16.msra.mxu3 %v7409_v49  ;;  %v1855_v16 = vpack.c.bf16 %v1772_v48, %v8635_v36  ;;  %v6225_v48 = vld [vmem:[%s8045_s24 + $0xe8] sm:$0xf] }
 0x160   : > { %v946_v11 = vpop.f32.mrf.mxu2  ;;  %v576_v0 = vpop.f32.mrf.mxu0 }
 0x161   : > { %v1372_v61 = vpop.f32.mrf.mxu3  ;;  %v1517_v43 = vmax.f32 %v1453_v10, %v1485_v60  ;;  %v993_v20 = vadd.f32 %v946_v11, %v712_v41  ;;  %v713_v21 = vpop.f32.mrf.mxu1 }
 0x162   : > { %v714_v6 = vadd.f32 %v713_v21, %v576_v0  ;;  %v6222_v21 = vld [vmem:[%s8045_s24 + $0xdc] sm:$0xf] }
 0x163   : > { %v1549_v62 = vpack.c.bf16 %v1517_v43, %v1517_v43  ;;  %v1419_v5 = vadd.f32 %v1372_v61, %v993_v20  ;;  %v7338_v20 = vld [vmem:[%s8045_s24 + $0xe4] sm:$0xff] }
 0x165   : > { %1582 = vst.msk [vmem:[%s8328_s13 + $0x54] sm:$0xf] %vm1560_vm1, %v1549_v62  ;;  %v1454_v24 = vadd.f32 %v8652_v9, %v1419_v5  ;;  %v8709_v5 = vld [vmem:[%s8045_s24 + $0xf0] sm:$0xff]  }
 0x167   : > { %v1486_v42 = vmul.f32 0.2, %v1454_v24 }
 0x168   : > { %v948_v38 = vpop.f32.mrf.mxu2  ;;  %v579_v14 = vpop.f32.mrf.mxu0 }
 0x169   : > { %v1374_v12 = vpop.f32.mrf.mxu3  ;;  %v1518_v57 = vmax.f32 %v1454_v24, %v1486_v42  ;;  %v994_v13 = vadd.f32 %v948_v38, %v714_v6  ;;  %v716_v19 = vpop.f32.mrf.mxu1  ;;  %v8712_v24 = vld [vmem:[%s8045_s24 + $0xf8] sm:$0xff]   ;;  %v1638_v42 = vunpack.c.l.bf16 %v6222_v21  ;;  %v7377_v6 = vld [vmem:[%s9979_s1 + $0x60] sm:$0xff] }
 0x16a   : > { %v717_v34 = vadd.f32 %v716_v19, %v579_v14  ;;  %v7369_v38 = vld [vmem:[%s9979_s1 + $0x20] sm:$0xff]  ;;  %3347 = vmatpush.bf16.msra.mxu0 %v7377_v6 }
 0x16b   : > { %v1550_v50 = vpack.c.bf16 %v1518_v57, %v1518_v57  ;;  %v1420_v27 = vadd.f32 %v1374_v12, %v994_v13  ;;  %1958 = vmatmul.bf16.gmra.mxu0 %v8609_v23  ;;  %v7623_v12 = vunpack.c.l.bf16 %v8709_v5  ;;  %v7627_v57 = vunpack.c.l.bf16 %v8712_v24  ;;  %3484 = vmatpush.bf16.msra.mxu1 %v7369_v38 }
 0x16c   : > { %2095 = vmatmul.bf16.gmra.mxu1 %v8580_v45  ;;  %v2565_v45 = vrot.slane %v2475_v35, 1  ;;  %v1664_v2 = vpack.c.bf16 %v7619_v55, %v1638_v42  ;;  %v1641_v55 = vunpack.c.l.bf16 %v6225_v48 }
 0x16d   : > { %1583 = vst.msk [vmem:[%s8328_s13 + $0x58] sm:$0xf] %vm1560_vm1, %v1550_v50  ;;  %v1455_v33 = vadd.f32 %v8652_v9, %v1420_v27  ;;  %2329 = vmatmul.bf16.gmra.mxu2 %v7337_v15  ;;  %v1773_v27 = vrot.slane %v1638_v42, 1  ;;  %v2569_v56 = vrot.slane %v7623_v12, 1 }
 0x16e   : > { %2754 = vmatmul.bf16.gmra.mxu3 %v2650_v17  ;;  %v2566_v51 = vsel %vm324_vm0, %v8669_v1, %v2565_v45  ;;  %v2568_v10 = vsel %vm324_vm0, %v2565_v45, %v2567_v63  ;;  %v1778_v21 = vrot.slane %v1641_v55, 1 }
 0x16f   : > { %v1487_v29 = vmul.f32 0.2, %v1455_v33  ;;  %v2651_v0 = vpack.c.bf16 %v2568_v10, %v2566_v51  ;;  %v1775_v30 = vsel %vm324_vm0, %v1773_v27, %v8665_v3  ;;  %v6493_v10 = vld [vmem:[%s8045_s24 + $0x100] sm:$0x1] }
 0x170   : > { %v951_v22 = vpop.f32.mrf.mxu2  ;;  %v581_v40 = vpop.f32.mrf.mxu0  ;;  %v1779_v38 = vsel %vm324_vm0, %v8669_v1, %v1778_v21 }
 0x171   : > { %v1377_v8 = vpop.f32.mrf.mxu3  ;;  %v1519_v37 = vmax.f32 %v1455_v33, %v1487_v29  ;;  %v995_v39 = vadd.f32 %v951_v22, %v717_v34  ;;  %v718_v23 = vpop.f32.mrf.mxu1  ;;  %v2572_v33 = vrot.slane %v7627_v57, 1  ;;  %v7408_v57 = vld [vmem:[%s9979_s1 + $0xd8] sm:$0xff] }
 0x172   : > { %v719_v53 = vadd.f32 %v718_v23, %v581_v40  ;;  %v1856_v23 = vpack.c.bf16 %v8679_v28, %v1775_v30  ;;  %4144 = vmatpush.bf16.msra.mxu3 %v7408_v57 }
 0x173   : > { %v1551_v31 = vpack.c.bf16 %v1519_v37, %v1519_v37  ;;  %v1421_v46 = vadd.f32 %v1377_v8, %v995_v39 }
 0x175   : > { %1584 = vst.msk [vmem:[%s8328_s13 + $0x5c] sm:$0xf] %vm1560_vm1, %v1551_v31  ;;  %v1456_v47 = vadd.f32 %v8652_v9, %v1421_v46  ;;  %v7339_v46 = vld [vmem:[%s8045_s24 + $0xf0] sm:$0xff] }
 0x177   : > { %v1488_v41 = vmul.f32 0.2, %v1456_v47 }
 0x178   : > { %v953_v25 = vpop.f32.mrf.mxu2  ;;  %v584_v61 = vpop.f32.mrf.mxu0 }
 0x179   : > { %v1379_v54 = vpop.f32.mrf.mxu3  ;;  %v1520_v60 = vmax.f32 %v1456_v47, %v1488_v41  ;;  %v996_v11 = vadd.f32 %v953_v25, %v719_v53  ;;  %v721_v43 = vpop.f32.mrf.mxu1  ;;  %v1701_v53 = vunpack.c.l.bf16 %v6245_v58  ;;  %v7628_v25 = vunpack.c.h.bf16 %v8712_v24 }
 0x17a   : > { %v722_v7 = vadd.f32 %v721_v43, %v584_v61 }
 0x17b   : > { %v1552_v32 = vpack.c.bf16 %v1520_v60, %v1520_v60  ;;  %v1422_v62 = vadd.f32 %v1379_v54, %v996_v11  ;;  %1963 = vmatmul.bf16.gmra.mxu0 %v1855_v16  ;;  %v2481_v54 = vunpack.c.l.bf16 %v6493_v10 }
 0x17c   : > { %2100 = vmatmul.bf16.gmra.mxu1 %v8583_v4  ;;  %v7624_v4 = vunpack.c.h.bf16 %v8709_v5 }
 0x17d   : > { %1585 = vst.msk [vmem:[%s8328_s13 + $0x60] sm:$0xf] %vm1560_vm1, %v1552_v32  ;;  %v1457_v36 = vadd.f32 %v8652_v9, %v1422_v62  ;;  %2334 = vmatmul.bf16.gmra.mxu2 %v7338_v20  ;;  %v1780_v32 = vrot.slane %v1701_v53, 1  ;;  %v8748_v62 = vrot.slane %v7628_v25, 1 }
 0x17e   : > { %2759 = vmatmul.bf16.gmra.mxu3 %v2651_v0  ;;  %v2570_v26 = vrot.slane %v7624_v4, 1  ;;  %v7400_v4 = vld [vmem:[%s9979_s1 + $0x98] sm:$0xff] }
 0x17f   : > { %v1489_v13 = vmul.f32 0.2, %v1457_v36  ;;  %v1781_v12 = vsel %vm324_vm0, %v1778_v21, %v1780_v32  ;;  %3719 = vmatpush.bf16.msra.mxu2 %v7400_v4  ;;  %v6246_v32 = vld [vmem:[%s8045_s24 + $0x100] sm:$0x1] }
 0x180   : > { %v956_v14 = vpop.f32.mrf.mxu2  ;;  %v586_v18 = vpop.f32.mrf.mxu0  ;;  %v2571_v29 = vsel %vm324_vm0, %v2569_v56, %v2570_v26  ;;  %v2573_v22 = vsel %vm324_vm0, %v2570_v26, %v2572_v33  ;;  %v1702_v4 = vunpack.c.l.bf16 %v6246_v32 }
 0x181   : > { %v1382_v19 = vpop.f32.mrf.mxu3  ;;  %v1521_v15 = vmax.f32 %v1457_v36, %v1489_v13  ;;  %v997_v17 = vadd.f32 %v956_v14, %v722_v7  ;;  %v723_v50 = vpop.f32.mrf.mxu1  ;;  %v8738_v47 = vpack.c.bf16 %v2573_v22, %v2571_v29  ;;  %v2576_v36 = vrot.slane %v2481_v54, 1  ;;  %v6494_v29 = vld [vmem:[%s8045_s24 + $0x104] sm:$0xf]  ;;  %v8774_v22 = vld [vmem:[%s8045_s24 + $0x108] sm:$0xff]  }
 0x182   : > { %v724_v37 = vadd.f32 %v723_v50, %v586_v18  ;;  %v8764_v13 = vsel %vm324_vm0, %v2572_v33, %v8748_v62  ;;  %v1857_v18 = vpack.c.bf16 %v1781_v12, %v1779_v38  ;;  %v1665_v50 = vpack.c.bf16 %v1641_v55, %v7620_v59  ;;  %v7376_v59 = vld [vmem:[%s9979_s1 + $0x58] sm:$0xff] }
 0x183   : > { %v1553_v34 = vpack.c.bf16 %v1521_v15, %v1521_v15  ;;  %v1423_v44 = vadd.f32 %v1382_v19, %v997_v17  ;;  %v2577_v14 = vsel %vm324_vm0, %v8748_v62, %v2576_v36  ;;  %3348 = vmatpush.bf16.msra.mxu0 %v7376_v59 }
 0x185   : > { %1586 = vst.msk [vmem:[%s8328_s13 + $0x64] sm:$0xf] %vm1560_vm1, %v1553_v34  ;;  %v1458_v35 = vadd.f32 %v8652_v9, %v1423_v44  ;;  %v7340_v34 = vld [vmem:[%s8045_s24 + $0xf8] sm:$0xff]  ;;  %v2653_v44 = vpack.c.bf16 %v2577_v14, %v8764_v13 }
 0x187   : > { %v1490_v8 = vmul.f32 0.2, %v1458_v35 }
 0x188   : > { %v958_v39 = vpop.f32.mrf.mxu2  ;;  %v589_v31 = vpop.f32.mrf.mxu0 }
 0x189   : > { %v1384_v40 = vpop.f32.mrf.mxu3  ;;  %v1522_v45 = vmax.f32 %v1458_v35, %v1490_v8  ;;  %v998_v63 = vadd.f32 %v958_v39, %v724_v37  ;;  %v726_v3 = vpop.f32.mrf.mxu1  ;;  %v7368_v37 = vld [vmem:[%s9979_s1 + $0x18] sm:$0xff]  ;;  %v7631_v39 = vunpack.c.l.bf16 %v8774_v22 }
 0x18a   : > { %v727_v41 = vadd.f32 %v726_v3, %v589_v31  ;;  %3485 = vmatpush.bf16.msra.mxu1 %v7368_v37 }
 0x18b   : > { %v1554_v49 = vpack.c.bf16 %v1522_v45, %v1522_v45  ;;  %v1424_v51 = vadd.f32 %v1384_v40, %v998_v63  ;;  %1968 = vmatmul.bf16.gmra.mxu0 %v1856_v23  ;;  %v7632_v40 = vunpack.c.h.bf16 %v8774_v22  ;;  %v2482_v23 = vunpack.c.l.bf16 %v6494_v29 }
 0x18c   : > { %2105 = vmatmul.bf16.gmra.mxu1 %v1664_v2 }
 0x18d   : > { %1587 = vst.msk [vmem:[%s8328_s13 + $0x68] sm:$0xf] %vm1560_vm1, %v1554_v49  ;;  %v1459_v28 = vadd.f32 %v8652_v9, %v1424_v51  ;;  %2339 = vmatmul.bf16.gmra.mxu2 %v7339_v46  ;;  %v2578_v58 = vrot.slane %v2482_v23, 1  ;;  %v8789_v49 = vrot.slane %v7631_v39, 1  ;;  %v8793_v51 = vrot.slane %v7632_v40, 1 }
 0x18e   : > { %2764 = vmatmul.bf16.gmra.mxu3 %v8738_v47 }
 0x18f   : > { %v1491_v16 = vmul.f32 0.2, %v1459_v28  ;;  %v2580_v55 = vsel %vm324_vm0, %v2578_v58, %v8789_v49  ;;  %v8803_v53 = vsel %vm324_vm0, %v8789_v49, %v8793_v51 }
 0x190   : > { %v961_v60 = vpop.f32.mrf.mxu2  ;;  %v591_v20 = vpop.f32.mrf.mxu0  ;;  %v2654_v21 = vpack.c.bf16 %v8803_v53, %v2580_v55 }
 0x191   : > { %v1387_v11 = vpop.f32.mrf.mxu3  ;;  %v1523_v61 = vmax.f32 %v1459_v28, %v1491_v16  ;;  %v999_v43 = vadd.f32 %v961_v60, %v727_v41  ;;  %v728_v0 = vpop.f32.mrf.mxu1 }
 0x192   : > { %v729_v1 = vadd.f32 %v728_v0, %v591_v20  ;;  %v7341_v0 = vld [vmem:[%s8045_s24 + $0x104] sm:$0xff] }
 0x193   : > { %v1555_v7 = vpack.c.bf16 %v1523_v61, %v1523_v61  ;;  %v1425_v42 = vadd.f32 %v1387_v11, %v999_v43 }
 0x195   : > { %1588 = vst.msk [vmem:[%s8328_s13 + $0x6c] sm:$0xf] %vm1560_vm1, %v1555_v7  ;;  %v1460_v6 = vadd.f32 %v8652_v9, %v1425_v42  ;;  %v6497_v42 = vld [vmem:[%s8045_s24 + $0x110] sm:$0xf] }
 0x196   : > { %v2485_v57 = vunpack.c.l.bf16 %v6497_v42 }
 0x197   : > { %v1492_v19 = vmul.f32 0.2, %v1460_v6 }
 0x198   : > { %v963_v15 = vpop.f32.mrf.mxu2  ;;  %v594_v26 = vpop.f32.mrf.mxu0 }
 0x199   : > { %v1389_v17 = vpop.f32.mrf.mxu3  ;;  %v1524_v27 = vmax.f32 %v1460_v6, %v1492_v19  ;;  %v1000_v56 = vadd.f32 %v963_v15, %v729_v1  ;;  %v731_v33 = vpop.f32.mrf.mxu1  ;;  %v6498_v6 = vld [vmem:[%s8045_s24 + $0x114] sm:$0x1] }
 0x19a   : > { %v732_v52 = vadd.f32 %v731_v33, %v594_v26  ;;  %v2486_v14 = vunpack.c.l.bf16 %v6498_v6 }
 0x19b   : > { %v1556_v35 = vpack.c.bf16 %v1524_v27, %v1524_v27  ;;  %v1426_v30 = vadd.f32 %v1389_v17, %v1000_v56  ;;  %1973 = vmatmul.bf16.gmra.mxu0 %v1857_v18  ;;  %v1789_v27 = vrot.slane %v1702_v4, 1 }
 0x19c   : > { %2110 = vmatmul.bf16.gmra.mxu1 %v1665_v50  ;;  %v2585_v56 = vrot.slane %v2486_v14, 1 }
 0x19d   : > { %1589 = vst.msk [vmem:[%s8328_s13 + $0x70] sm:$0xf] %vm1560_vm1, %v1556_v35  ;;  %v1461_v8 = vadd.f32 %v8652_v9, %v1426_v30  ;;  %2344 = vmatmul.bf16.gmra.mxu2 %v7340_v34  ;;  %v7399_v35 = vld [vmem:[%s9979_s1 + $0x90] sm:$0xff] }
 0x19e   : > { %2769 = vmatmul.bf16.gmra.mxu3 %v2653_v44  ;;  %v1790_v44 = vsel %vm324_vm0, %v8748_v62, %v1789_v27  ;;  %v7407_v30 = vld [vmem:[%s9979_s1 + $0xd0] sm:$0xff]  ;;  %3720 = vmatpush.bf16.msra.mxu2 %v7399_v35 }
 0x19f   : > { %v1493_v2 = vmul.f32 0.2, %v1461_v8  ;;  %4145 = vmatpush.bf16.msra.mxu3 %v7407_v30  ;;  %v1859_v23 = vpack.c.bf16 %v1790_v44, %v8764_v13  ;;  %v6233_v44 = vld [vmem:[%s8045_s24 + $0x110] sm:$0xf]  ;;  %v6247_v35 = vld [vmem:[%s8045_s24 + $0x114] sm:$0x1] }
 0x1a0   : > { %v966_v45 = vpop.f32.mrf.mxu2  ;;  %v596_v46 = vpop.f32.mrf.mxu0 }
 0x1a1   : > { %v1392_v63 = vpop.f32.mrf.mxu3  ;;  %v1525_v31 = vmax.f32 %v1461_v8, %v1493_v2  ;;  %v1001_v3 = vadd.f32 %v966_v45, %v732_v52  ;;  %v733_v48 = vpop.f32.mrf.mxu1 }
 0x1a2   : > { %v734_v54 = vadd.f32 %v733_v48, %v596_v46  ;;  %v6230_v48 = vld [vmem:[%s8045_s24 + $0x104] sm:$0xf] }
 0x1a3   : > { %v1557_v10 = vpack.c.bf16 %v1525_v31, %v1525_v31  ;;  %v1427_v28 = vadd.f32 %v1392_v63, %v1001_v3  ;;  %v7342_v3 = vld [vmem:[%s8045_s24 + $0x10c] sm:$0xff] }
 0x1a5   : > { %1590 = vst.msk [vmem:[%s8328_s13 + $0x74] sm:$0xf] %vm1560_vm1, %v1557_v10  ;;  %v1462_v41 = vadd.f32 %v8652_v9, %v1427_v28  ;;  %v8833_v28 = vld [vmem:[%s8045_s24 + $0x118] sm:$0xff]  }
 0x1a7   : > { %v1494_v25 = vmul.f32 0.2, %v1462_v41 }
 0x1a8   : > { %v968_v16 = vpop.f32.mrf.mxu2  ;;  %v1939_v43 = vpop.f32.mrf.mxu0 }
 0x1a9   : > { %v1394_v60 = vpop.f32.mrf.mxu3  ;;  %v1526_v11 = vmax.f32 %v1462_v41, %v1494_v25  ;;  %v1002_v61 = vadd.f32 %v968_v16, %v734_v54  ;;  %v2076_v20 = vpop.f32.mrf.mxu1  ;;  %v8836_v41 = vld [vmem:[%s8045_s24 + $0x120] sm:$0xff]   ;;  %v1646_v25 = vunpack.c.l.bf16 %v6230_v48  ;;  %v7375_v54 = vld [vmem:[%s9979_s1 + $0x50] sm:$0xff] }
 0x1aa   : > { %v2077_v12 = vadd.f32 %v2076_v20, %v1939_v43  ;;  %v7367_v16 = vld [vmem:[%s9979_s1 + $0x10] sm:$0xff]  ;;  %3349 = vmatpush.bf16.msra.mxu0 %v7375_v54 }
 0x1ab   : > { %v1558_v36 = vpack.c.bf16 %v1526_v11, %v1526_v11  ;;  %v1428_v7 = vadd.f32 %v1394_v60, %v1002_v61  ;;  %1978 = vmatmul.bf16.gmra.mxu0 %v8738_v47  ;;  %v7635_v60 = vunpack.c.l.bf16 %v8833_v28  ;;  %v7639_v11 = vunpack.c.l.bf16 %v8836_v41  ;;  %3486 = vmatpush.bf16.msra.mxu1 %v7367_v16 }
 0x1ac   : > { %2115 = vmatmul.bf16.gmra.mxu1 %v8709_v5  ;;  %v2583_v5 = vrot.slane %v2485_v57, 1  ;;  %v1668_v27 = vpack.c.bf16 %v7631_v39, %v1646_v25  ;;  %v1649_v39 = vunpack.c.l.bf16 %v6233_v44 }
 0x1ad   : > { %1591 = vst.msk [vmem:[%s8328_s13 + $0x78] sm:$0xf] %vm1560_vm1, %v1558_v36  ;;  %v1463_v38 = vadd.f32 %v8652_v9, %v1428_v7  ;;  %2349 = vmatmul.bf16.gmra.mxu2 %v7341_v0  ;;  %v1791_v7 = vrot.slane %v1646_v25, 1  ;;  %v2587_v42 = vrot.slane %v7635_v60, 1 }
 0x1ae   : > { %2774 = vmatmul.bf16.gmra.mxu3 %v2654_v21  ;;  %v2584_v29 = vsel %vm324_vm0, %v8793_v51, %v2583_v5  ;;  %v2586_v8 = vsel %vm324_vm0, %v2583_v5, %v2585_v56  ;;  %v1796_v48 = vrot.slane %v1649_v39, 1 }
 0x1af   : > { %v1495_v19 = vmul.f32 0.2, %v1463_v38  ;;  %v2655_v46 = vpack.c.bf16 %v2586_v8, %v2584_v29  ;;  %v1793_v14 = vsel %vm324_vm0, %v1791_v7, %v8789_v49  ;;  %v6503_v8 = vld [vmem:[%s8045_s24 + $0x128] sm:$0x1] }
 0x1b0   : > { %v2310_v1 = vpop.f32.mrf.mxu2  ;;  %v1941_v50 = vpop.f32.mrf.mxu0  ;;  %v1797_v16 = vsel %vm324_vm0, %v8793_v51, %v1796_v48 }
 0x1b1   : > { %v2735_v15 = vpop.f32.mrf.mxu3  ;;  %v1527_v17 = vmax.f32 %v1463_v38, %v1495_v19  ;;  %v2390_v18 = vadd.f32 %v2310_v1, %v2077_v12  ;;  %v2078_v47 = vpop.f32.mrf.mxu1  ;;  %v2590_v38 = vrot.slane %v7639_v11, 1  ;;  %v7406_v11 = vld [vmem:[%s9979_s1 + $0xc8] sm:$0xff] }
 0x1b2   : > { %v2079_v59 = vadd.f32 %v2078_v47, %v1941_v50  ;;  %v1860_v47 = vpack.c.bf16 %v8803_v53, %v1793_v14  ;;  %4146 = vmatpush.bf16.msra.mxu3 %v7406_v11 }
 0x1b3   : > { %v1559_v26 = vpack.c.bf16 %v1527_v17, %v1527_v17  ;;  %v2815_v33 = vadd.f32 %v2735_v15, %v2390_v18 }
 0x1b5   : > { %1592 = vst.msk [vmem:[%s8328_s13 + $0x7c] sm:$0xf] %vm1560_vm1, %v1559_v26  ;;  %v2847_v34 = vadd.f32 %v8652_v9, %v2815_v33  ;;  %v7343_v33 = vld [vmem:[%s8045_s24 + $0x118] sm:$0xff] }
 0x1b7   : > { %v2879_v52 = vmul.f32 0.2, %v2847_v34 }
 0x1b8   : > { %v2312_v62 = vpop.f32.mrf.mxu2  ;;  %v1944_v63 = vpop.f32.mrf.mxu0 }
 0x1b9   : > { %v2737_v37 = vpop.f32.mrf.mxu3  ;;  %v2911_v2 = vmax.f32 %v2847_v34, %v2879_v52  ;;  %v2391_v45 = vadd.f32 %v2312_v62, %v2079_v59  ;;  %v2081_v31 = vpop.f32.mrf.mxu1  ;;  %v1703_v59 = vunpack.c.l.bf16 %v6247_v35  ;;  %v7640_v62 = vunpack.c.h.bf16 %v8836_v41 }
 0x1ba   : > { %v2082_v55 = vadd.f32 %v2081_v31, %v1944_v63 }
 0x1bb   : > { %v2943_v58 = vpack.c.bf16 %v2911_v2, %v2911_v2  ;;  %v2816_v10 = vadd.f32 %v2737_v37, %v2391_v45  ;;  %1983 = vmatmul.bf16.gmra.mxu0 %v1859_v23  ;;  %v2491_v37 = vunpack.c.l.bf16 %v6503_v8 }
 0x1bc   : > { %2120 = vmatmul.bf16.gmra.mxu1 %v8712_v24  ;;  %v7636_v24 = vunpack.c.h.bf16 %v8833_v28 }
 0x1bd   : > { %2975 = vst.msk [vmem:[%s8328_s13 + $0x80] sm:$0xf] %vm1560_vm1, %v2943_v58  ;;  %v2848_v13 = vadd.f32 %v8652_v9, %v2816_v10  ;;  %2354 = vmatmul.bf16.gmra.mxu2 %v7342_v3  ;;  %v1798_v58 = vrot.slane %v1703_v59, 1  ;;  %v8872_v10 = vrot.slane %v7640_v62, 1 }
 0x1be   : > { %2779 = vmatmul.bf16.gmra.mxu3 %v2655_v46  ;;  %v2588_v6 = vrot.slane %v7636_v24, 1  ;;  %v7398_v24 = vld [vmem:[%s9979_s1 + $0x88] sm:$0xff] }
 0x1bf   : > { %v2880_v61 = vmul.f32 0.2, %v2848_v13  ;;  %v1799_v60 = vsel %vm324_vm0, %v1796_v48, %v1798_v58  ;;  %3721 = vmatpush.bf16.msra.mxu2 %v7398_v24  ;;  %v6248_v58 = vld [vmem:[%s8045_s24 + $0x128] sm:$0x1] }
 0x1c0   : > { %v2315_v43 = vpop.f32.mrf.mxu2  ;;  %v1946_v32 = vpop.f32.mrf.mxu0  ;;  %v2589_v19 = vsel %vm324_vm0, %v2587_v42, %v2588_v6  ;;  %v2591_v1 = vsel %vm324_vm0, %v2588_v6, %v2590_v38  ;;  %v1704_v24 = vunpack.c.l.bf16 %v6248_v58 }
 0x1c1   : > { %v2740_v20 = vpop.f32.mrf.mxu3  ;;  %v2912_v0 = vmax.f32 %v2848_v13, %v2880_v61  ;;  %v2392_v21 = vadd.f32 %v2315_v43, %v2082_v55  ;;  %v2083_v36 = vpop.f32.mrf.mxu1  ;;  %v8862_v34 = vpack.c.bf16 %v2591_v1, %v2589_v19  ;;  %v2594_v13 = vrot.slane %v2491_v37, 1  ;;  %v6504_v19 = vld [vmem:[%s8045_s24 + $0x12c] sm:$0xf]  ;;  %v8898_v1 = vld [vmem:[%s8045_s24 + $0x130] sm:$0xff]  }
 0x1c2   : > { %v2084_v17 = vadd.f32 %v2083_v36, %v1946_v32  ;;  %v8888_v61 = vsel %vm324_vm0, %v2590_v38, %v8872_v10  ;;  %v1861_v32 = vpack.c.bf16 %v1799_v60, %v1797_v16  ;;  %v1669_v36 = vpack.c.bf16 %v1649_v39, %v7632_v40  ;;  %v7374_v40 = vld [vmem:[%s9979_s1 + $0x48] sm:$0xff] }
 0x1c3   : > { %v2944_v12 = vpack.c.bf16 %v2912_v0, %v2912_v0  ;;  %v2817_v4 = vadd.f32 %v2740_v20, %v2392_v21  ;;  %v2595_v43 = vsel %vm324_vm0, %v8872_v10, %v2594_v13  ;;  %3350 = vmatpush.bf16.msra.mxu0 %v7374_v40 }
 0x1c5   : > { %2976 = vst.msk [vmem:[%s8328_s13 + $0x84] sm:$0xf] %vm1560_vm1, %v2944_v12  ;;  %v2849_v57 = vadd.f32 %v8652_v9, %v2817_v4  ;;  %v7344_v12 = vld [vmem:[%s8045_s24 + $0x120] sm:$0xff]  ;;  %v2657_v4 = vpack.c.bf16 %v2595_v43, %v8888_v61 }
 0x1c7   : > { %v2881_v15 = vmul.f32 0.2, %v2849_v57 }
 0x1c8   : > { %v2317_v18 = vpop.f32.mrf.mxu2  ;;  %v1949_v26 = vpop.f32.mrf.mxu0 }
 0x1c9   : > { %v2742_v50 = vpop.f32.mrf.mxu3  ;;  %v2913_v5 = vmax.f32 %v2849_v57, %v2881_v15  ;;  %v2393_v56 = vadd.f32 %v2317_v18, %v2084_v17  ;;  %v2086_v49 = vpop.f32.mrf.mxu1  ;;  %v7366_v17 = vld [vmem:[%s9979_s1 + $0x8] sm:$0xff]  ;;  %v7643_v18 = vunpack.c.l.bf16 %v8898_v1 }
 0x1ca   : > { %v2087_v52 = vadd.f32 %v2086_v49, %v1949_v26  ;;  %3487 = vmatpush.bf16.msra.mxu1 %v7366_v17 }
 0x1cb   : > { %v2945_v30 = vpack.c.bf16 %v2913_v5, %v2913_v5  ;;  %v2818_v29 = vadd.f32 %v2742_v50, %v2393_v56  ;;  %1988 = vmatmul.bf16.gmra.mxu0 %v1860_v47  ;;  %v7644_v50 = vunpack.c.h.bf16 %v8898_v1  ;;  %v2492_v47 = vunpack.c.l.bf16 %v6504_v19 }
 0x1cc   : > { %2125 = vmatmul.bf16.gmra.mxu1 %v1668_v27 }
 0x1cd   : > { %2977 = vst.msk [vmem:[%s8328_s13 + $0x88] sm:$0xf] %vm1560_vm1, %v2945_v30  ;;  %v2850_v53 = vadd.f32 %v8652_v9, %v2818_v29  ;;  %2359 = vmatmul.bf16.gmra.mxu2 %v7343_v33  ;;  %v2596_v35 = vrot.slane %v2492_v47, 1  ;;  %v8913_v30 = vrot.slane %v7643_v18, 1  ;;  %v8917_v29 = vrot.slane %v7644_v50, 1 }
 0x1ce   : > { %2784 = vmatmul.bf16.gmra.mxu3 %v8862_v34 }
 0x1cf   : > { %v2882_v23 = vmul.f32 0.2, %v2850_v53  ;;  %v2598_v39 = vsel %vm324_vm0, %v2596_v35, %v8913_v30  ;;  %v8927_v59 = vsel %vm324_vm0, %v8913_v30, %v8917_v29 }
 0x1d0   : > { %v2320_v2 = vpop.f32.mrf.mxu2  ;;  %v1951_v3 = vpop.f32.mrf.mxu0  ;;  %v2658_v48 = vpack.c.bf16 %v8927_v59, %v2598_v39 }
 0x1d1   : > { %v2745_v45 = vpop.f32.mrf.mxu3  ;;  %v2914_v63 = vmax.f32 %v2850_v53, %v2882_v23  ;;  %v2394_v31 = vadd.f32 %v2320_v2, %v2087_v52  ;;  %v2088_v46 = vpop.f32.mrf.mxu1 }
 0x1d2   : > { %v2089_v51 = vadd.f32 %v2088_v46, %v1951_v3  ;;  %v7345_v46 = vld [vmem:[%s8045_s24 + $0x12c] sm:$0xff] }
 0x1d3   : > { %v2946_v55 = vpack.c.bf16 %v2914_v63, %v2914_v63  ;;  %v2819_v25 = vadd.f32 %v2745_v45, %v2394_v31 }
 0x1d5   : > { %2978 = vst.msk [vmem:[%s8328_s13 + $0x8c] sm:$0xf] %vm1560_vm1, %v2946_v55  ;;  %v2851_v54 = vadd.f32 %v8652_v9, %v2819_v25  ;;  %v6507_v25 = vld [vmem:[%s8045_s24 + $0x138] sm:$0xf] }
 0x1d6   : > { %v2495_v11 = vunpack.c.l.bf16 %v6507_v25 }
 0x1d7   : > { %v2883_v20 = vmul.f32 0.2, %v2851_v54 }
 0x1d8   : > { %v2322_v0 = vpop.f32.mrf.mxu2  ;;  %v1954_v6 = vpop.f32.mrf.mxu0 }
 0x1d9   : > { %v2747_v21 = vpop.f32.mrf.mxu3  ;;  %v2915_v7 = vmax.f32 %v2851_v54, %v2883_v20  ;;  %v2395_v42 = vadd.f32 %v2322_v0, %v2089_v51  ;;  %v2091_v38 = vpop.f32.mrf.mxu1  ;;  %v6508_v54 = vld [vmem:[%s8045_s24 + $0x13c] sm:$0x1] }
 0x1da   : > { %v2092_v22 = vadd.f32 %v2091_v38, %v1954_v6  ;;  %v2496_v43 = vunpack.c.l.bf16 %v6508_v54 }
 0x1db   : > { %v2947_v57 = vpack.c.bf16 %v2915_v7, %v2915_v7  ;;  %v2820_v14 = vadd.f32 %v2747_v21, %v2395_v42  ;;  %1993 = vmatmul.bf16.gmra.mxu0 %v1861_v32  ;;  %v1807_v7 = vrot.slane %v1704_v24, 1 }
 0x1dc   : > { %2130 = vmatmul.bf16.gmra.mxu1 %v1669_v36  ;;  %v2603_v42 = vrot.slane %v2496_v43, 1 }
 0x1dd   : > { %2979 = vst.msk [vmem:[%s8328_s13 + $0x90] sm:$0xf] %vm1560_vm1, %v2947_v57  ;;  %v2852_v15 = vadd.f32 %v8652_v9, %v2820_v14  ;;  %2364 = vmatmul.bf16.gmra.mxu2 %v7344_v12  ;;  %v7397_v57 = vld [vmem:[%s9979_s1 + $0x80] sm:$0xff] }
 0x1de   : > { %2789 = vmatmul.bf16.gmra.mxu3 %v2657_v4  ;;  %v1808_v4 = vsel %vm324_vm0, %v8872_v10, %v1807_v7  ;;  %v7405_v14 = vld [vmem:[%s9979_s1 + $0xc0] sm:$0xff]  ;;  %3722 = vmatpush.bf16.msra.mxu2 %v7397_v57 }
 0x1df   : > { %v2884_v27 = vmul.f32 0.2, %v2852_v15  ;;  %4147 = vmatpush.bf16.msra.mxu3 %v7405_v14  ;;  %v1863_v47 = vpack.c.bf16 %v1808_v4, %v8888_v61  ;;  %v6249_v4 = vld [vmem:[%s8045_s24 + $0x13c] sm:$0x1] }
 0x1e0   : > { %v2325_v5 = vpop.f32.mrf.mxu2  ;;  %v1956_v33 = vpop.f32.mrf.mxu0 }
 0x1e1   : > { %v2750_v56 = vpop.f32.mrf.mxu3  ;;  %v2916_v26 = vmax.f32 %v2852_v15, %v2884_v27  ;;  %v2396_v49 = vadd.f32 %v2325_v5, %v2092_v22  ;;  %v2093_v44 = vpop.f32.mrf.mxu1 }
 0x1e2   : > { %v2094_v37 = vadd.f32 %v2093_v44, %v1956_v33  ;;  %v6238_v44 = vld [vmem:[%s8045_s24 + $0x12c] sm:$0xf] }
 0x1e3   : > { %v2948_v8 = vpack.c.bf16 %v2916_v26, %v2916_v26  ;;  %v2821_v53 = vadd.f32 %v2750_v56, %v2396_v49  ;;  %v7346_v49 = vld [vmem:[%s8045_s24 + $0x134] sm:$0xff] }
 0x1e5   : > { %2980 = vst.msk [vmem:[%s8328_s13 + $0x94] sm:$0xf] %vm1560_vm1, %v2948_v8  ;;  %v2853_v52 = vadd.f32 %v8652_v9, %v2821_v53  ;;  %v8957_v53 = vld [vmem:[%s8045_s24 + $0x140] sm:$0xff]  }
 0x1e7   : > { %v2885_v62 = vmul.f32 0.2, %v2853_v52 }
 0x1e8   : > { %v2327_v23 = vpop.f32.mrf.mxu2  ;;  %v1959_v31 = vpop.f32.mrf.mxu0 }
 0x1e9   : > { %v2752_v2 = vpop.f32.mrf.mxu3  ;;  %v2917_v45 = vmax.f32 %v2853_v52, %v2885_v62  ;;  %v2397_v63 = vadd.f32 %v2327_v23, %v2094_v37  ;;  %v2096_v3 = vpop.f32.mrf.mxu1  ;;  %v8960_v52 = vld [vmem:[%s8045_s24 + $0x148] sm:$0xff]   ;;  %v1654_v62 = vunpack.c.l.bf16 %v6238_v44  ;;  %v7373_v37 = vld [vmem:[%s9979_s1 + $0x40] sm:$0xff] }
 0x1ea   : > { %v2097_v60 = vadd.f32 %v2096_v3, %v1959_v31  ;;  %v7365_v23 = vld [vmem:[%s9979_s1] sm:$0xff]  ;;  %3351 = vmatpush.bf16.msra.mxu0 %v7373_v37 }
 0x1eb   : > { %v2949_v13 = vpack.c.bf16 %v2917_v45, %v2917_v45  ;;  %v2822_v55 = vadd.f32 %v2752_v2, %v2397_v63  ;;  %1998 = vmatmul.bf16.gmra.mxu0 %v8862_v34  ;;  %v7647_v2 = vunpack.c.l.bf16 %v8957_v53  ;;  %v7651_v45 = vunpack.c.l.bf16 %v8960_v52  ;;  %3488 = vmatpush.bf16.msra.mxu1 %v7365_v23 }
 0x1ec   : > { %2135 = vmatmul.bf16.gmra.mxu1 %v8833_v28  ;;  %v2601_v28 = vrot.slane %v2495_v11, 1 }
 0x1ed   : > { %2981 = vst.msk [vmem:[%s8328_s13 + $0x98] sm:$0xf] %vm1560_vm1, %v2949_v13  ;;  %v2854_v16 = vadd.f32 %v8652_v9, %v2822_v55  ;;  %2369 = vmatmul.bf16.gmra.mxu2 %v7345_v46  ;;  %v1809_v55 = vrot.slane %v1654_v62, 1  ;;  %v2605_v25 = vrot.slane %v7647_v2, 1 }
 0x1ee   : > { %2794 = vmatmul.bf16.gmra.mxu3 %v2658_v48  ;;  %v2602_v19 = vsel %vm324_vm0, %v8917_v29, %v2601_v28  ;;  %v2604_v15 = vsel %vm324_vm0, %v2601_v28, %v2603_v42 }
 0x1ef   : > { %v2886_v20 = vmul.f32 0.2, %v2854_v16  ;;  %v2659_v33 = vpack.c.bf16 %v2604_v15, %v2602_v19  ;;  %v1811_v43 = vsel %vm324_vm0, %v1809_v55, %v8913_v30  ;;  %v6513_v19 = vld [vmem:[%s8045_s24 + $0x150] sm:$0x1] }
 0x1f0   : > { %v2330_v51 = vpop.f32.mrf.mxu2  ;;  %v1961_v36 = vpop.f32.mrf.mxu0 }
 0x1f1   : > { %v2755_v0 = vpop.f32.mrf.mxu3  ;;  %v2918_v21 = vmax.f32 %v2854_v16, %v2886_v20  ;;  %v2398_v32 = vadd.f32 %v2330_v51, %v2097_v60  ;;  %v2098_v34 = vpop.f32.mrf.mxu1  ;;  %v2608_v16 = vrot.slane %v7651_v45, 1  ;;  %v7460_v45 = vld [vmem:[%s9979_s1 + $0xf8] sm:$0xff] }
 0x1f2   : > { %v2099_v40 = vadd.f32 %v2098_v34, %v1961_v36  ;;  %v1864_v34 = vpack.c.bf16 %v8927_v59, %v1811_v43  ;;  %5554 = vmatpush.bf16.msrb.mxu3 %v7460_v45 }
 0x1f3   : > { %v2950_v6 = vpack.c.bf16 %v2918_v21, %v2918_v21  ;;  %v2823_v38 = vadd.f32 %v2755_v0, %v2398_v32 }
 0x1f5   : > { %2982 = vst.msk [vmem:[%s8328_s13 + $0x9c] sm:$0xf] %vm1560_vm1, %v2950_v6  ;;  %v2855_v12 = vadd.f32 %v8652_v9, %v2823_v38  ;;  %v7347_v6 = vld [vmem:[%s8045_s24 + $0x140] sm:$0xff] }
 0x1f7   : > { %v2887_v22 = vmul.f32 0.2, %v2855_v12 }
 0x1f8   : > { %v2332_v10 = vpop.f32.mrf.mxu2  ;;  %v1964_v56 = vpop.f32.mrf.mxu0 }
 0x1f9   : > { %v2757_v17 = vpop.f32.mrf.mxu3  ;;  %v2919_v27 = vmax.f32 %v2855_v12, %v2887_v22  ;;  %v2399_v5 = vadd.f32 %v2332_v10, %v2099_v40  ;;  %v2101_v26 = vpop.f32.mrf.mxu1  ;;  %v6241_v12 = vld [vmem:[%s8045_s24 + $0x138] sm:$0xf]  ;;  %v1705_v40 = vunpack.c.l.bf16 %v6249_v4  ;;  %v7652_v10 = vunpack.c.h.bf16 %v8960_v52 }
 0x1fa   : > { %v2102_v39 = vadd.f32 %v2101_v26, %v1964_v56  ;;  %v1657_v22 = vunpack.c.l.bf16 %v6241_v12 }
 0x1fb   : > { %v2951_v35 = vpack.c.bf16 %v2919_v27, %v2919_v27  ;;  %v2824_v8 = vadd.f32 %v2757_v17, %v2399_v5  ;;  %2003 = vmatmul.bf16.gmra.mxu0 %v1863_v47  ;;  %v2501_v17 = vunpack.c.l.bf16 %v6513_v19 }
 0x1fc   : > { %2140 = vmatmul.bf16.gmra.mxu1 %v8836_v41  ;;  %v7648_v41 = vunpack.c.h.bf16 %v8957_v53  ;;  %v1814_v44 = vrot.slane %v1657_v22, 1 }
 0x1fd   : > { %2983 = vst.msk [vmem:[%s8328_s13 + $0xa0] sm:$0xf] %vm1560_vm1, %v2951_v35  ;;  %v2856_v61 = vadd.f32 %v8652_v9, %v2824_v8  ;;  %2374 = vmatmul.bf16.gmra.mxu2 %v7346_v49  ;;  %v1816_v35 = vrot.slane %v1705_v40, 1  ;;  %v9001_v8 = vrot.slane %v7652_v10, 1 }
 0x1fe   : > { %2799 = vmatmul.bf16.gmra.mxu3 %v2659_v33  ;;  %v2606_v54 = vrot.slane %v7648_v41, 1  ;;  %v1815_v23 = vsel %vm324_vm0, %v8917_v29, %v1814_v44  ;;  %v7452_v41 = vld [vmem:[%s9979_s1 + $0xb8] sm:$0xff] }
 0x1ff   : > { %v2888_v63 = vmul.f32 0.2, %v2856_v61  ;;  %v1817_v2 = vsel %vm324_vm0, %v1814_v44, %v1816_v35  ;;  %5129 = vmatpush.bf16.msrb.mxu2 %v7452_v41  ;;  %v6594_v35 = vld [vmem:[%s8045_s24 + $0x150] sm:$0x1] }
 0x200   : > { %v2335_v31 = vpop.f32.mrf.mxu2  ;;  %v1966_v58 = vpop.f32.mrf.mxu0  ;;  %v2607_v20 = vsel %vm324_vm0, %v2605_v25, %v2606_v54  ;;  %v2609_v51 = vsel %vm324_vm0, %v2606_v54, %v2608_v16  ;;  %v3112_v41 = vunpack.c.l.bf16 %v6594_v35 }
 0x201   : > { %v2760_v3 = vpop.f32.mrf.mxu3  ;;  %v2920_v46 = vmax.f32 %v2856_v61, %v2888_v63  ;;  %v2400_v48 = vadd.f32 %v2335_v31, %v2102_v39  ;;  %v2103_v13 = vpop.f32.mrf.mxu1  ;;  %v8986_v38 = vpack.c.bf16 %v2609_v51, %v2607_v20  ;;  %v2612_v61 = vrot.slane %v2501_v17, 1  ;;  %v6826_v20 = vld [vmem:[%s8045_s24 + $0x154] sm:$0xf]  ;;  %v9027_v51 = vld [vmem:[%s8045_s24 + $0x158] sm:$0xff]  }
 0x202   : > { %v2104_v21 = vadd.f32 %v2103_v13, %v1966_v58  ;;  %v9017_v63 = vsel %vm324_vm0, %v2608_v16, %v9001_v8  ;;  %v1865_v58 = vpack.c.bf16 %v1817_v2, %v1815_v23  ;;  %v1673_v13 = vpack.c.bf16 %v1657_v22, %v7644_v50  ;;  %v7428_v50 = vld [vmem:[%s9979_s1 + $0x78] sm:$0xff] }
 0x203   : > { %v2952_v60 = vpack.c.bf16 %v2920_v46, %v2920_v46  ;;  %v2825_v24 = vadd.f32 %v2760_v3, %v2400_v48  ;;  %v2613_v31 = vsel %vm324_vm0, %v9001_v8, %v2612_v61  ;;  %4758 = vmatpush.bf16.msrb.mxu0 %v7428_v50 }
 0x205   : > { %2984 = vst.msk [vmem:[%s8328_s13 + $0xa4] sm:$0xf] %vm1560_vm1, %v2952_v60  ;;  %v2857_v11 = vadd.f32 %v8652_v9, %v2825_v24  ;;  %v1672_v9 = vpack.c.bf16 %v7643_v18, %v1654_v62  ;;  %v8996_v18 = vld [vmem:[%s9980_s2] ss:$0 sm:$0xff]  ;;  %v7348_v60 = vld [vmem:[%s8045_s24 + $0x148] sm:$0xff]  ;;  %v2661_v24 = vpack.c.bf16 %v2613_v31, %v9017_v63 }
 0x207   : > { %v2889_v0 = vmul.f32 0.2, %v2857_v11 }
 0x208   : > { %v2337_v32 = vpop.f32.mrf.mxu2  ;;  %v1969_v42 = vpop.f32.mrf.mxu0 }
 0x209   : > { %v2762_v36 = vpop.f32.mrf.mxu3  ;;  %v2921_v7 = vmax.f32 %v2857_v11, %v2889_v0  ;;  %v2401_v28 = vadd.f32 %v2337_v32, %v2104_v21  ;;  %v2106_v30 = vpop.f32.mrf.mxu1  ;;  %v7420_v21 = vld [vmem:[%s9979_s1 + $0x38] sm:$0xff]  ;;  %v7703_v32 = vunpack.c.l.bf16 %v9027_v51 }
 0x20a   : > { %v2107_v15 = vadd.f32 %v2106_v30, %v1969_v42  ;;  %4895 = vmatpush.bf16.msrb.mxu1 %v7420_v21 }
 0x20b   : > { %v2953_v57 = vpack.c.bf16 %v2921_v7, %v2921_v7  ;;  %v2826_v14 = vadd.f32 %v2762_v36, %v2401_v28  ;;  %2008 = vmatmul.bf16.gmra.mxu0 %v1864_v34  ;;  %v7704_v36 = vunpack.c.h.bf16 %v9027_v51  ;;  %v3876_v34 = vunpack.c.l.bf16 %v6826_v20 }
 0x20c   : > { %2145 = vmatmul.bf16.gmra.mxu1 %v1672_v9 }
 0x20d   : > { %2985 = vst.msk [vmem:[%s8328_s13 + $0xa8] sm:$0xf] %vm1560_vm1, %v2953_v57  ;;  %v2858_v59 = vadd.f32 %v8996_v18, %v2826_v14  ;;  %2379 = vmatmul.bf16.gmra.mxu2 %v7347_v6  ;;  %v3956_v4 = vrot.slane %v3876_v34, 1  ;;  %v9042_v57 = vrot.slane %v7703_v32, 1  ;;  %v9046_v14 = vrot.slane %v7704_v36, 1 }
 0x20e   : > { %2804 = vmatmul.bf16.gmra.mxu3 %v8986_v38 }
 0x20f   : > { %v2890_v47 = vmul.f32 0.2, %v2858_v59  ;;  %v3958_v22 = vsel %vm324_vm0, %v3956_v4, %v9042_v57  ;;  %v9056_v40 = vsel %vm324_vm0, %v9042_v57, %v9046_v14 }
 0x210   : > { %v2340_v27 = vpop.f32.mrf.mxu2  ;;  %v1971_v49 = vpop.f32.mrf.mxu0  ;;  %v4060_v44 = vpack.c.bf16 %v9056_v40, %v3958_v22 }
 0x211   : > { %v2765_v5 = vpop.f32.mrf.mxu3  ;;  %v2922_v56 = vmax.f32 %v2858_v59, %v2890_v47  ;;  %v2402_v26 = vadd.f32 %v2340_v27, %v2107_v15  ;;  %v2108_v33 = vpop.f32.mrf.mxu1 }
 0x212   : > { %v2109_v29 = vadd.f32 %v2108_v33, %v1971_v49  ;;  %v7381_v33 = vld [vmem:[%s8045_s24 + $0x154] sm:$0xff] }
 0x213   : > { %v2954_v39 = vpack.c.bf16 %v2922_v56, %v2922_v56  ;;  %v2827_v62 = vadd.f32 %v2765_v5, %v2402_v26 }
 0x215   : > { %2986 = vst.msk [vmem:[%s8328_s13 + $0xac] sm:$0xf] %vm1560_vm1, %v2954_v39  ;;  %v2859_v37 = vadd.f32 %v8996_v18, %v2827_v62  ;;  %v6829_v62 = vld [vmem:[%s8045_s24 + $0x160] sm:$0xf] }
 0x216   : > { %v3879_v45 = vunpack.c.l.bf16 %v6829_v62 }
 0x217   : > { %v2891_v3 = vmul.f32 0.2, %v2859_v37 }
 0x218   : > { %v2342_v46 = vpop.f32.mrf.mxu2  ;;  %v1974_v54 = vpop.f32.mrf.mxu0 }
 0x219   : > { %v2767_v48 = vpop.f32.mrf.mxu3  ;;  %v2923_v55 = vmax.f32 %v2859_v37, %v2891_v3  ;;  %v2403_v25 = vadd.f32 %v2342_v46, %v2109_v29  ;;  %v2111_v16 = vpop.f32.mrf.mxu1  ;;  %v6830_v37 = vld [vmem:[%s8045_s24 + $0x164] sm:$0x1] }
 0x21a   : > { %v2112_v1 = vadd.f32 %v2111_v16, %v1974_v54  ;;  %v3880_v31 = vunpack.c.l.bf16 %v6830_v37 }
 0x21b   : > { %v2955_v11 = vpack.c.bf16 %v2923_v55, %v2923_v55  ;;  %v2828_v43 = vadd.f32 %v2767_v48, %v2403_v25  ;;  %2013 = vmatmul.bf16.gmra.mxu0 %v1865_v58  ;;  %v3167_v55 = vrot.slane %v3112_v41, 1 }
 0x21c   : > { %2150 = vmatmul.bf16.gmra.mxu1 %v1673_v13  ;;  %v3963_v25 = vrot.slane %v3880_v31, 1 }
 0x21d   : > { %2987 = vst.msk [vmem:[%s8328_s13 + $0xb0] sm:$0xf] %vm1560_vm1, %v2955_v11  ;;  %v2860_v0 = vadd.f32 %v8996_v18, %v2828_v43  ;;  %2384 = vmatmul.bf16.gmra.mxu2 %v7348_v60  ;;  %v7451_v11 = vld [vmem:[%s9979_s1 + $0xb0] sm:$0xff] }
 0x21e   : > { %2809 = vmatmul.bf16.gmra.mxu3 %v2661_v24  ;;  %v3168_v24 = vsel %vm324_vm0, %v9001_v8, %v3167_v55  ;;  %v7459_v43 = vld [vmem:[%s9979_s1 + $0xf0] sm:$0xff]  ;;  %5130 = vmatpush.bf16.msrb.mxu2 %v7451_v11  ;;  %v6595_v11 = vld [vmem:[%s8045_s24 + $0x164] sm:$0x1] }
 0x21f   : > { %v2892_v9 = vmul.f32 0.2, %v2860_v0  ;;  %5555 = vmatpush.bf16.msrb.mxu3 %v7459_v43  ;;  %v3265_v34 = vpack.c.bf16 %v3168_v24, %v9017_v63  ;;  %v6569_v24 = vld [vmem:[%s8045_s24 + $0x160] sm:$0xf] }
 0x220   : > { %v2345_v7 = vpop.f32.mrf.mxu2  ;;  %v1976_v6 = vpop.f32.mrf.mxu0 }
 0x221   : > { %v2770_v28 = vpop.f32.mrf.mxu3  ;;  %v2924_v42 = vmax.f32 %v2860_v0, %v2892_v9  ;;  %v2404_v30 = vadd.f32 %v2345_v7, %v2112_v1  ;;  %v2113_v12 = vpop.f32.mrf.mxu1 }
 0x222   : > { %v2114_v17 = vadd.f32 %v2113_v12, %v1976_v6  ;;  %v6566_v12 = vld [vmem:[%s8045_s24 + $0x154] sm:$0xf] }
 0x223   : > { %v2956_v19 = vpack.c.bf16 %v2924_v42, %v2924_v42  ;;  %v2829_v59 = vadd.f32 %v2770_v28, %v2404_v30  ;;  %v7382_v30 = vld [vmem:[%s8045_s24 + $0x15c] sm:$0xff] }
 0x225   : > { %2988 = vst.msk [vmem:[%s8328_s13 + $0xb4] sm:$0xf] %vm1560_vm1, %v2956_v19  ;;  %v2861_v15 = vadd.f32 %v8996_v18, %v2829_v59  ;;  %v9086_v59 = vld [vmem:[%s8045_s24 + $0x168] sm:$0xff]  }
 0x227   : > { %v2893_v10 = vmul.f32 0.2, %v2861_v15 }
 0x228   : > { %v2347_v47 = vpop.f32.mrf.mxu2  ;;  %v1979_v26 = vpop.f32.mrf.mxu0 }
 0x229   : > { %v2772_v27 = vpop.f32.mrf.mxu3  ;;  %v2925_v5 = vmax.f32 %v2861_v15, %v2893_v10  ;;  %v2405_v56 = vadd.f32 %v2347_v47, %v2114_v17  ;;  %v2116_v49 = vpop.f32.mrf.mxu1  ;;  %v9089_v15 = vld [vmem:[%s8045_s24 + $0x170] sm:$0xff]   ;;  %v3044_v10 = vunpack.c.l.bf16 %v6566_v12 }
 0x22a   : > { %v2117_v2 = vadd.f32 %v2116_v49, %v1979_v26  ;;  %v7427_v17 = vld [vmem:[%s9979_s1 + $0x70] sm:$0xff] }
 0x22b   : > { %v2957_v61 = vpack.c.bf16 %v2925_v5, %v2925_v5  ;;  %v2830_v39 = vadd.f32 %v2772_v27, %v2405_v56  ;;  %3352 = vmatmul.bf16.vlgmr.msra.gmra.mxu0 %v8986_v38  ;;  %v7419_v47 = vld [vmem:[%s9979_s1 + $0x30] sm:$0xff]  ;;  %v7707_v27 = vunpack.c.l.bf16 %v9086_v59  ;;  %v7711_v5 = vunpack.c.l.bf16 %v9089_v15 }
 0x22c   : > { %3489 = vmatmul.bf16.vlgmr.msra.gmra.mxu1 %v8957_v53  ;;  %v3961_v53 = vrot.slane %v3879_v45, 1  ;;  %4759 = vmatpush.bf16.msrb.mxu0 %v7427_v17  ;;  %v3074_v55 = vpack.c.bf16 %v7703_v32, %v3044_v10  ;;  %v3047_v32 = vunpack.c.l.bf16 %v6569_v24 }
 0x22d   : > { %2989 = vst.msk [vmem:[%s8328_s13 + $0xb8] sm:$0xf] %vm1560_vm1, %v2957_v61  ;;  %v2862_v23 = vadd.f32 %v8996_v18, %v2830_v39  ;;  %3723 = vmatmul.bf16.vlgmr.msra.gmra.mxu2 %v7381_v33  ;;  %4896 = vmatpush.bf16.msrb.mxu1 %v7419_v47  ;;  %v3169_v39 = vrot.slane %v3044_v10, 1  ;;  %v3965_v62 = vrot.slane %v7707_v27, 1 }
 0x22e   : > { %4148 = vmatmul.bf16.vlgmr.msra.gmra.mxu3 %v4060_v44  ;;  %v3962_v20 = vsel %vm324_vm0, %v9046_v14, %v3961_v53  ;;  %v3964_v0 = vsel %vm324_vm0, %v3961_v53, %v3963_v25  ;;  %v3174_v12 = vrot.slane %v3047_v32, 1 }
 0x22f   : > { %v2894_v3 = vmul.f32 0.2, %v2862_v23  ;;  %v4061_v6 = vpack.c.bf16 %v3964_v0, %v3962_v20  ;;  %v3171_v31 = vsel %vm324_vm0, %v3169_v39, %v9042_v57  ;;  %v6835_v0 = vld [vmem:[%s8045_s24 + $0x178] sm:$0x1] }
 0x230   : > { %v2350_v29 = vpop.f32.mrf.mxu2  ;;  %v1981_v13 = vpop.f32.mrf.mxu0  ;;  %v3175_v47 = vsel %vm324_vm0, %v9046_v14, %v3174_v12 }
 0x231   : > { %v2775_v46 = vpop.f32.mrf.mxu3  ;;  %v2926_v48 = vmax.f32 %v2862_v23, %v2894_v3  ;;  %v2406_v58 = vadd.f32 %v2350_v29, %v2117_v2  ;;  %v2118_v38 = vpop.f32.mrf.mxu1  ;;  %v3968_v23 = vrot.slane %v7711_v5, 1  ;;  %v7458_v5 = vld [vmem:[%s9979_s1 + $0xe8] sm:$0xff] }
 0x232   : > { %v2119_v50 = vadd.f32 %v2118_v38, %v1981_v13  ;;  %v3266_v38 = vpack.c.bf16 %v9056_v40, %v3171_v31  ;;  %5556 = vmatpush.bf16.msrb.mxu3 %v7458_v5 }
 0x233   : > { %v2958_v54 = vpack.c.bf16 %v2926_v48, %v2926_v48  ;;  %v2831_v16 = vadd.f32 %v2775_v46, %v2406_v58 }
 0x235   : > { %2990 = vst.msk [vmem:[%s8328_s13 + $0xbc] sm:$0xf] %vm1560_vm1, %v2958_v54  ;;  %v2863_v60 = vadd.f32 %v8996_v18, %v2831_v16  ;;  %v7383_v16 = vld [vmem:[%s8045_s24 + $0x168] sm:$0xff] }
 0x237   : > { %v2895_v1 = vmul.f32 0.2, %v2863_v60 }
 0x238   : > { %v2352_v8 = vpop.f32.mrf.mxu2  ;;  %v1984_v28 = vpop.f32.mrf.mxu0 }
 0x239   : > { %v2777_v21 = vpop.f32.mrf.mxu3  ;;  %v2927_v9 = vmax.f32 %v2863_v60, %v2895_v1  ;;  %v2407_v7 = vadd.f32 %v2352_v8, %v2119_v50  ;;  %v2121_v42 = vpop.f32.mrf.mxu1  ;;  %v3113_v50 = vunpack.c.l.bf16 %v6595_v11  ;;  %v7712_v8 = vunpack.c.h.bf16 %v9089_v15 }
 0x23a   : > { %v2122_v22 = vadd.f32 %v2121_v42, %v1984_v28 }
 0x23b   : > { %v2959_v4 = vpack.c.bf16 %v2927_v9, %v2927_v9  ;;  %v2832_v19 = vadd.f32 %v2777_v21, %v2407_v7  ;;  %3357 = vmatmul.bf16.gmra.mxu0 %v3265_v34  ;;  %v3885_v21 = vunpack.c.l.bf16 %v6835_v0 }
 0x23c   : > { %3494 = vmatmul.bf16.gmra.mxu1 %v8960_v52  ;;  %v7708_v52 = vunpack.c.h.bf16 %v9086_v59 }
 0x23d   : > { %2991 = vst.msk [vmem:[%s8328_s13 + $0xc0] sm:$0xf] %vm1560_vm1, %v2959_v4  ;;  %v2864_v63 = vadd.f32 %v8996_v18, %v2832_v19  ;;  %3728 = vmatmul.bf16.gmra.mxu2 %v7382_v30  ;;  %v3176_v4 = vrot.slane %v3113_v50, 1  ;;  %v9125_v19 = vrot.slane %v7712_v8, 1 }
 0x23e   : > { %4153 = vmatmul.bf16.gmra.mxu3 %v4061_v6  ;;  %v3966_v37 = vrot.slane %v7708_v52, 1  ;;  %v7450_v52 = vld [vmem:[%s9979_s1 + $0xa8] sm:$0xff] }
 0x23f   : > { %v2896_v56 = vmul.f32 0.2, %v2864_v63  ;;  %v3177_v27 = vsel %vm324_vm0, %v3174_v12, %v3176_v4  ;;  %5131 = vmatpush.bf16.msrb.mxu2 %v7450_v52  ;;  %v6596_v4 = vld [vmem:[%s8045_s24 + $0x178] sm:$0x1] }
 0x240   : > { %v2355_v26 = vpop.f32.mrf.mxu2  ;;  %v1986_v35 = vpop.f32.mrf.mxu0  ;;  %v3967_v3 = vsel %vm324_vm0, %v3965_v62, %v3966_v37  ;;  %v3969_v29 = vsel %vm324_vm0, %v3966_v37, %v3968_v23  ;;  %v3114_v52 = vunpack.c.l.bf16 %v6596_v4 }
 0x241   : > { %v2780_v49 = vpop.f32.mrf.mxu3  ;;  %v2928_v33 = vmax.f32 %v2864_v63, %v2896_v56  ;;  %v2408_v44 = vadd.f32 %v2355_v26, %v2122_v22  ;;  %v2123_v61 = vpop.f32.mrf.mxu1  ;;  %v9115_v60 = vpack.c.bf16 %v3969_v29, %v3967_v3  ;;  %v3972_v63 = vrot.slane %v3885_v21, 1  ;;  %v6836_v3 = vld [vmem:[%s8045_s24 + $0x17c] sm:$0xf]  ;;  %v9151_v29 = vld [vmem:[%s8045_s24 + $0x180] sm:$0xff]  }
 0x242   : > { %v2124_v48 = vadd.f32 %v2123_v61, %v1986_v35  ;;  %v9141_v56 = vsel %vm324_vm0, %v3968_v23, %v9125_v19  ;;  %v3267_v35 = vpack.c.bf16 %v3177_v27, %v3175_v47  ;;  %v3075_v61 = vpack.c.bf16 %v3047_v32, %v7704_v36  ;;  %v7426_v36 = vld [vmem:[%s9979_s1 + $0x68] sm:$0xff] }
 0x243   : > { %v2960_v2 = vpack.c.bf16 %v2928_v33, %v2928_v33  ;;  %v2833_v41 = vadd.f32 %v2780_v49, %v2408_v44  ;;  %v3973_v26 = vsel %vm324_vm0, %v9125_v19, %v3972_v63  ;;  %4760 = vmatpush.bf16.msrb.mxu0 %v7426_v36 }
 0x245   : > { %2992 = vst.msk [vmem:[%s8328_s13 + $0xc4] sm:$0xf] %vm1560_vm1, %v2960_v2  ;;  %v2865_v45 = vadd.f32 %v8996_v18, %v2833_v41  ;;  %v7384_v2 = vld [vmem:[%s8045_s24 + $0x170] sm:$0xff]  ;;  %v4063_v41 = vpack.c.bf16 %v3973_v26, %v9141_v56 }
 0x247   : > { %v2897_v46 = vmul.f32 0.2, %v2865_v45 }
 0x248   : > { %v2357_v58 = vpop.f32.mrf.mxu2  ;;  %v1989_v54 = vpop.f32.mrf.mxu0 }
 0x249   : > { %v2782_v13 = vpop.f32.mrf.mxu3  ;;  %v2929_v53 = vmax.f32 %v2865_v45, %v2897_v46  ;;  %v2409_v25 = vadd.f32 %v2357_v58, %v2124_v48  ;;  %v2126_v57 = vpop.f32.mrf.mxu1  ;;  %v7418_v48 = vld [vmem:[%s9979_s1 + $0x28] sm:$0xff]  ;;  %v7715_v58 = vunpack.c.l.bf16 %v9151_v29 }
 0x24a   : > { %v2127_v1 = vadd.f32 %v2126_v57, %v1989_v54  ;;  %4897 = vmatpush.bf16.msrb.mxu1 %v7418_v48 }
 0x24b   : > { %v2961_v43 = vpack.c.bf16 %v2929_v53, %v2929_v53  ;;  %v2834_v20 = vadd.f32 %v2782_v13, %v2409_v25  ;;  %3362 = vmatmul.bf16.gmra.mxu0 %v3266_v38  ;;  %v7716_v13 = vunpack.c.h.bf16 %v9151_v29  ;;  %v3886_v38 = vunpack.c.l.bf16 %v6836_v3 }
 0x24c   : > { %3499 = vmatmul.bf16.gmra.mxu1 %v3074_v55 }
 0x24d   : > { %2993 = vst.msk [vmem:[%s8328_s13 + $0xc8] sm:$0xf] %vm1560_vm1, %v2961_v43  ;;  %v2866_v40 = vadd.f32 %v8996_v18, %v2834_v20  ;;  %3733 = vmatmul.bf16.gmra.mxu2 %v7383_v16  ;;  %v3974_v11 = vrot.slane %v3886_v38, 1  ;;  %v9166_v43 = vrot.slane %v7715_v58, 1  ;;  %v9170_v20 = vrot.slane %v7716_v13, 1 }
 0x24e   : > { %4158 = vmatmul.bf16.gmra.mxu3 %v9115_v60 }
 0x24f   : > { %v2898_v34 = vmul.f32 0.2, %v2866_v40  ;;  %v3976_v32 = vsel %vm324_vm0, %v3974_v11, %v9166_v43  ;;  %v9180_v50 = vsel %vm324_vm0, %v9166_v43, %v9170_v20 }
 0x250   : > { %v2360_v9 = vpop.f32.mrf.mxu2  ;;  %v1991_v30 = vpop.f32.mrf.mxu0  ;;  %v4064_v12 = vpack.c.bf16 %v9180_v50, %v3976_v32 }
 0x251   : > { %v2785_v7 = vpop.f32.mrf.mxu3  ;;  %v2930_v28 = vmax.f32 %v2866_v40, %v2898_v34  ;;  %v2410_v42 = vadd.f32 %v2360_v9, %v2127_v1  ;;  %v2128_v6 = vpop.f32.mrf.mxu1 }
 0x252   : > { %v2129_v14 = vadd.f32 %v2128_v6, %v1991_v30  ;;  %v7385_v6 = vld [vmem:[%s8045_s24 + $0x17c] sm:$0xff] }
 0x253   : > { %v2962_v22 = vpack.c.bf16 %v2930_v28, %v2930_v28  ;;  %v2835_v10 = vadd.f32 %v2785_v7, %v2410_v42 }
 0x255   : > { %2994 = vst.msk [vmem:[%s8328_s13 + $0xcc] sm:$0xf] %vm1560_vm1, %v2962_v22  ;;  %v2867_v17 = vadd.f32 %v8996_v18, %v2835_v10  ;;  %v6839_v10 = vld [vmem:[%s8045_s24 + $0x188] sm:$0xf] }
 0x256   : > { %v3889_v5 = vunpack.c.l.bf16 %v6839_v10 }
 0x257   : > { %v2899_v49 = vmul.f32 0.2, %v2867_v17 }
 0x258   : > { %v2362_v33 = vpop.f32.mrf.mxu2  ;;  %v1994_v37 = vpop.f32.mrf.mxu0 }
 0x259   : > { %v2787_v44 = vpop.f32.mrf.mxu3  ;;  %v2931_v39 = vmax.f32 %v2867_v17, %v2899_v49  ;;  %v2411_v62 = vadd.f32 %v2362_v33, %v2129_v14  ;;  %v2131_v23 = vpop.f32.mrf.mxu1  ;;  %v6840_v17 = vld [vmem:[%s8045_s24 + $0x18c] sm:$0x1] }
 0x25a   : > { %v2132_v51 = vadd.f32 %v2131_v23, %v1994_v37  ;;  %v3890_v26 = vunpack.c.l.bf16 %v6840_v17 }
 0x25b   : > { %v2963_v45 = vpack.c.bf16 %v2931_v39, %v2931_v39  ;;  %v2836_v31 = vadd.f32 %v2787_v44, %v2411_v62  ;;  %3367 = vmatmul.bf16.gmra.mxu0 %v3267_v35  ;;  %v3185_v39 = vrot.slane %v3114_v52, 1 }
 0x25c   : > { %3504 = vmatmul.bf16.gmra.mxu1 %v3075_v61  ;;  %v3981_v62 = vrot.slane %v3890_v26, 1 }
 0x25d   : > { %2995 = vst.msk [vmem:[%s8328_s13 + $0xd0] sm:$0xf] %vm1560_vm1, %v2963_v45  ;;  %v2868_v46 = vadd.f32 %v8996_v18, %v2836_v31  ;;  %3738 = vmatmul.bf16.gmra.mxu2 %v7384_v2  ;;  %v7449_v45 = vld [vmem:[%s9979_s1 + $0xa0] sm:$0xff] }
 0x25e   : > { %4163 = vmatmul.bf16.gmra.mxu3 %v4063_v41  ;;  %v3186_v41 = vsel %vm324_vm0, %v9125_v19, %v3185_v39  ;;  %v7457_v31 = vld [vmem:[%s9979_s1 + $0xe0] sm:$0xff]  ;;  %5132 = vmatpush.bf16.msrb.mxu2 %v7449_v45  ;;  %v6597_v45 = vld [vmem:[%s8045_s24 + $0x18c] sm:$0x1] }
 0x25f   : > { %v2900_v55 = vmul.f32 0.2, %v2868_v46  ;;  %5557 = vmatpush.bf16.msrb.mxu3 %v7457_v31  ;;  %v3269_v38 = vpack.c.bf16 %v3186_v41, %v9141_v56  ;;  %v6577_v41 = vld [vmem:[%s8045_s24 + $0x188] sm:$0xf] }
 0x260   : > { %v2365_v53 = vpop.f32.mrf.mxu2  ;;  %v1996_v16 = vpop.f32.mrf.mxu0 }
 0x261   : > { %v2790_v25 = vpop.f32.mrf.mxu3  ;;  %v2932_v54 = vmax.f32 %v2868_v46, %v2900_v55  ;;  %v2412_v57 = vadd.f32 %v2365_v53, %v2132_v51  ;;  %v2133_v24 = vpop.f32.mrf.mxu1 }
 0x262   : > { %v2134_v21 = vadd.f32 %v2133_v24, %v1996_v16  ;;  %v6574_v24 = vld [vmem:[%s8045_s24 + $0x17c] sm:$0xf] }
 0x263   : > { %v2964_v0 = vpack.c.bf16 %v2932_v54, %v2932_v54  ;;  %v2837_v40 = vadd.f32 %v2790_v25, %v2412_v57  ;;  %v7386_v57 = vld [vmem:[%s8045_s24 + $0x184] sm:$0xff] }
 0x265   : > { %2996 = vst.msk [vmem:[%s8328_s13 + $0xd4] sm:$0xf] %vm1560_vm1, %v2964_v0  ;;  %v2869_v1 = vadd.f32 %v8996_v18, %v2837_v40  ;;  %v9210_v40 = vld [vmem:[%s8045_s24 + $0x190] sm:$0xff]  }
 0x267   : > { %v2901_v8 = vmul.f32 0.2, %v2869_v1 }
 0x268   : > { %v2367_v34 = vpop.f32.mrf.mxu2  ;;  %v1999_v42 = vpop.f32.mrf.mxu0 }
 0x269   : > { %v2792_v9 = vpop.f32.mrf.mxu3  ;;  %v2933_v7 = vmax.f32 %v2869_v1, %v2901_v8  ;;  %v2413_v28 = vadd.f32 %v2367_v34, %v2134_v21  ;;  %v2136_v30 = vpop.f32.mrf.mxu1  ;;  %v9213_v1 = vld [vmem:[%s8045_s24 + $0x198] sm:$0xff]   ;;  %v3052_v8 = vunpack.c.l.bf16 %v6574_v24  ;;  %v7425_v21 = vld [vmem:[%s9979_s1 + $0x60] sm:$0xff] }
 0x26a   : > { %v2137_v27 = vadd.f32 %v2136_v30, %v1999_v42  ;;  %v7417_v34 = vld [vmem:[%s9979_s1 + $0x20] sm:$0xff]  ;;  %4761 = vmatpush.bf16.msrb.mxu0 %v7425_v21 }
 0x26b   : > { %v2965_v63 = vpack.c.bf16 %v2933_v7, %v2933_v7  ;;  %v2838_v22 = vadd.f32 %v2792_v9, %v2413_v28  ;;  %3372 = vmatmul.bf16.gmra.mxu0 %v9115_v60  ;;  %v7719_v9 = vunpack.c.l.bf16 %v9210_v40  ;;  %v7723_v7 = vunpack.c.l.bf16 %v9213_v1  ;;  %4898 = vmatpush.bf16.msrb.mxu1 %v7417_v34 }
 0x26c   : > { %3509 = vmatmul.bf16.gmra.mxu1 %v9086_v59  ;;  %v3979_v59 = vrot.slane %v3889_v5, 1  ;;  %v3078_v39 = vpack.c.bf16 %v7715_v58, %v3052_v8  ;;  %v3055_v58 = vunpack.c.l.bf16 %v6577_v41 }
 0x26d   : > { %2997 = vst.msk [vmem:[%s8328_s13 + $0xd8] sm:$0xf] %vm1560_vm1, %v2965_v63  ;;  %v2870_v47 = vadd.f32 %v8996_v18, %v2838_v22  ;;  %3743 = vmatmul.bf16.gmra.mxu2 %v7385_v6  ;;  %v3187_v22 = vrot.slane %v3052_v8, 1  ;;  %v3983_v10 = vrot.slane %v7719_v9, 1 }
 0x26e   : > { %4168 = vmatmul.bf16.gmra.mxu3 %v4064_v12  ;;  %v3980_v3 = vsel %vm324_vm0, %v9170_v20, %v3979_v59  ;;  %v3982_v46 = vsel %vm324_vm0, %v3979_v59, %v3981_v62  ;;  %v3192_v24 = vrot.slane %v3055_v58, 1 }
 0x26f   : > { %v2902_v49 = vmul.f32 0.2, %v2870_v47  ;;  %v4065_v16 = vpack.c.bf16 %v3982_v46, %v3980_v3  ;;  %v3189_v26 = vsel %vm324_vm0, %v3187_v22, %v9166_v43  ;;  %v6845_v46 = vld [vmem:[%s8045_s24 + $0x1a0] sm:$0x1] }
 0x270   : > { %v2370_v14 = vpop.f32.mrf.mxu2  ;;  %v2001_v61 = vpop.f32.mrf.mxu0  ;;  %v3193_v34 = vsel %vm324_vm0, %v9170_v20, %v3192_v24 }
 0x271   : > { %v2795_v33 = vpop.f32.mrf.mxu3  ;;  %v2934_v44 = vmax.f32 %v2870_v47, %v2902_v49  ;;  %v2414_v35 = vadd.f32 %v2370_v14, %v2137_v27  ;;  %v2138_v60 = vpop.f32.mrf.mxu1  ;;  %v3986_v47 = vrot.slane %v7723_v7, 1  ;;  %v7456_v7 = vld [vmem:[%s9979_s1 + $0xd8] sm:$0xff] }
 0x272   : > { %v2139_v36 = vadd.f32 %v2138_v60, %v2001_v61  ;;  %v3270_v60 = vpack.c.bf16 %v9180_v50, %v3189_v26  ;;  %5558 = vmatpush.bf16.msrb.mxu3 %v7456_v7 }
 0x273   : > { %v2966_v37 = vpack.c.bf16 %v2934_v44, %v2934_v44  ;;  %v2839_v23 = vadd.f32 %v2795_v33, %v2414_v35 }
 0x275   : > { %2998 = vst.msk [vmem:[%s8328_s13 + $0xdc] sm:$0xf] %vm1560_vm1, %v2966_v37  ;;  %v2871_v2 = vadd.f32 %v8996_v18, %v2839_v23  ;;  %v7387_v23 = vld [vmem:[%s8045_s24 + $0x190] sm:$0xff] }
 0x277   : > { %v2903_v51 = vmul.f32 0.2, %v2871_v2 }
 0x278   : > { %v2372_v19 = vpop.f32.mrf.mxu2  ;;  %v2004_v25 = vpop.f32.mrf.mxu0 }
 0x279   : > { %v2797_v48 = vpop.f32.mrf.mxu3  ;;  %v2935_v55 = vmax.f32 %v2871_v2, %v2903_v51  ;;  %v2415_v53 = vadd.f32 %v2372_v19, %v2139_v36  ;;  %v2141_v54 = vpop.f32.mrf.mxu1  ;;  %v3115_v36 = vunpack.c.l.bf16 %v6597_v45  ;;  %v7724_v19 = vunpack.c.h.bf16 %v9213_v1 }
 0x27a   : > { %v2142_v32 = vadd.f32 %v2141_v54, %v2004_v25 }
 0x27b   : > { %v2967_v11 = vpack.c.bf16 %v2935_v55, %v2935_v55  ;;  %v2840_v0 = vadd.f32 %v2797_v48, %v2415_v53  ;;  %3377 = vmatmul.bf16.gmra.mxu0 %v3269_v38  ;;  %v3895_v48 = vunpack.c.l.bf16 %v6845_v46 }
 0x27c   : > { %3514 = vmatmul.bf16.gmra.mxu1 %v9089_v15  ;;  %v7720_v15 = vunpack.c.h.bf16 %v9210_v40 }
 0x27d   : > { %2999 = vst.msk [vmem:[%s8328_s13 + $0xe0] sm:$0xf] %vm1560_vm1, %v2967_v11  ;;  %v2872_v56 = vadd.f32 %v8996_v18, %v2840_v0  ;;  %3748 = vmatmul.bf16.gmra.mxu2 %v7386_v57  ;;  %v3194_v11 = vrot.slane %v3115_v36, 1  ;;  %v9249_v0 = vrot.slane %v7724_v19, 1 }
 0x27e   : > { %4173 = vmatmul.bf16.gmra.mxu3 %v4065_v16  ;;  %v3984_v17 = vrot.slane %v7720_v15, 1  ;;  %v7448_v15 = vld [vmem:[%s9979_s1 + $0x98] sm:$0xff] }
 0x27f   : > { %v2904_v28 = vmul.f32 0.2, %v2872_v56  ;;  %v3195_v9 = vsel %vm324_vm0, %v3192_v24, %v3194_v11  ;;  %5133 = vmatpush.bf16.msrb.mxu2 %v7448_v15  ;;  %v6598_v11 = vld [vmem:[%s8045_s24 + $0x1a0] sm:$0x1] }
 0x280   : > { %v2375_v42 = vpop.f32.mrf.mxu2  ;;  %v2006_v4 = vpop.f32.mrf.mxu0  ;;  %v3985_v49 = vsel %vm324_vm0, %v3983_v10, %v3984_v17  ;;  %v3987_v14 = vsel %vm324_vm0, %v3984_v17, %v3986_v47  ;;  %v3116_v15 = vunpack.c.l.bf16 %v6598_v11 }
 0x281   : > { %v2800_v30 = vpop.f32.mrf.mxu3  ;;  %v2936_v6 = vmax.f32 %v2872_v56, %v2904_v28  ;;  %v2416_v12 = vadd.f32 %v2375_v42, %v2142_v32  ;;  %v2143_v63 = vpop.f32.mrf.mxu1  ;;  %v9239_v2 = vpack.c.bf16 %v3987_v14, %v3985_v49  ;;  %v3990_v56 = vrot.slane %v3895_v48, 1  ;;  %v6846_v49 = vld [vmem:[%s8045_s24 + $0x1a4] sm:$0xf]  ;;  %v9275_v14 = vld [vmem:[%s8045_s24 + $0x1a8] sm:$0xff]  }
 0x282   : > { %v2144_v44 = vadd.f32 %v2143_v63, %v2006_v4  ;;  %v9265_v28 = vsel %vm324_vm0, %v3986_v47, %v9249_v0  ;;  %v3271_v4 = vpack.c.bf16 %v3195_v9, %v3193_v34  ;;  %v3079_v63 = vpack.c.bf16 %v3055_v58, %v7716_v13  ;;  %v7424_v13 = vld [vmem:[%s9979_s1 + $0x58] sm:$0xff] }
 0x283   : > { %v2968_v27 = vpack.c.bf16 %v2936_v6, %v2936_v6  ;;  %v2841_v52 = vadd.f32 %v2800_v30, %v2416_v12  ;;  %v3991_v42 = vsel %vm324_vm0, %v9249_v0, %v3990_v56  ;;  %4762 = vmatpush.bf16.msrb.mxu0 %v7424_v13 }
 0x285   : > { %3000 = vst.msk [vmem:[%s8328_s13 + $0xe4] sm:$0xf] %vm1560_vm1, %v2968_v27  ;;  %v2873_v5 = vadd.f32 %v8996_v18, %v2841_v52  ;;  %v7388_v27 = vld [vmem:[%s8045_s24 + $0x198] sm:$0xff]  ;;  %v4067_v52 = vpack.c.bf16 %v3991_v42, %v9265_v28 }
 0x287   : > { %v2905_v33 = vmul.f32 0.2, %v2873_v5 }
 0x288   : > { %v2377_v35 = vpop.f32.mrf.mxu2  ;;  %v2009_v37 = vpop.f32.mrf.mxu0 }
 0x289   : > { %v2802_v61 = vpop.f32.mrf.mxu3  ;;  %v2937_v59 = vmax.f32 %v2873_v5, %v2905_v33  ;;  %v2417_v62 = vadd.f32 %v2377_v35, %v2144_v44  ;;  %v2146_v43 = vpop.f32.mrf.mxu1  ;;  %v7416_v44 = vld [vmem:[%s9979_s1 + $0x18] sm:$0xff]  ;;  %v7727_v35 = vunpack.c.l.bf16 %v9275_v14 }
 0x28a   : > { %v2147_v51 = vadd.f32 %v2146_v43, %v2009_v37  ;;  %4899 = vmatpush.bf16.msrb.mxu1 %v7416_v44 }
 0x28b   : > { %v2969_v31 = vpack.c.bf16 %v2937_v59, %v2937_v59  ;;  %v2842_v3 = vadd.f32 %v2802_v61, %v2417_v62  ;;  %3382 = vmatmul.bf16.gmra.mxu0 %v3270_v60  ;;  %v7728_v61 = vunpack.c.h.bf16 %v9275_v14  ;;  %v3896_v60 = vunpack.c.l.bf16 %v6846_v49 }
 0x28c   : > { %3519 = vmatmul.bf16.gmra.mxu1 %v3078_v39 }
 0x28d   : > { %3001 = vst.msk [vmem:[%s8328_s13 + $0xe8] sm:$0xf] %vm1560_vm1, %v2969_v31  ;;  %v2874_v50 = vadd.f32 %v8996_v18, %v2842_v3  ;;  %3753 = vmatmul.bf16.gmra.mxu2 %v7387_v23  ;;  %v3992_v45 = vrot.slane %v3896_v60, 1  ;;  %v9290_v31 = vrot.slane %v7727_v35, 1  ;;  %v9294_v3 = vrot.slane %v7728_v61, 1 }
 0x28e   : > { %4178 = vmatmul.bf16.gmra.mxu3 %v9239_v2 }
 0x28f   : > { %v2906_v38 = vmul.f32 0.2, %v2874_v50  ;;  %v3994_v58 = vsel %vm324_vm0, %v3992_v45, %v9290_v31  ;;  %v9304_v36 = vsel %vm324_vm0, %v9290_v31, %v9294_v3 }
 0x290   : > { %v2380_v55 = vpop.f32.mrf.mxu2  ;;  %v2011_v57 = vpop.f32.mrf.mxu0  ;;  %v4068_v24 = vpack.c.bf16 %v9304_v36, %v3994_v58 }
 0x291   : > { %v2805_v53 = vpop.f32.mrf.mxu3  ;;  %v2938_v25 = vmax.f32 %v2874_v50, %v2906_v38  ;;  %v2418_v54 = vadd.f32 %v2380_v55, %v2147_v51  ;;  %v2148_v16 = vpop.f32.mrf.mxu1 }
 0x292   : > { %v2149_v20 = vadd.f32 %v2148_v16, %v2011_v57  ;;  %v7389_v16 = vld [vmem:[%s8045_s24 + $0x1a4] sm:$0xff] }
 0x293   : > { %v2970_v32 = vpack.c.bf16 %v2938_v25, %v2938_v25  ;;  %v2843_v8 = vadd.f32 %v2805_v53, %v2418_v54 }
 0x295   : > { %3002 = vst.msk [vmem:[%s8328_s13 + $0xec] sm:$0xf] %vm1560_vm1, %v2970_v32  ;;  %v2875_v21 = vadd.f32 %v8996_v18, %v2843_v8  ;;  %v6849_v8 = vld [vmem:[%s8045_s24 + $0x1b0] sm:$0xf] }
 0x296   : > { %v3899_v7 = vunpack.c.l.bf16 %v6849_v8 }
 0x297   : > { %v2907_v30 = vmul.f32 0.2, %v2875_v21 }
 0x298   : > { %v2382_v6 = vpop.f32.mrf.mxu2  ;;  %v2014_v17 = vpop.f32.mrf.mxu0 }
 0x299   : > { %v2807_v12 = vpop.f32.mrf.mxu3  ;;  %v2939_v22 = vmax.f32 %v2875_v21, %v2907_v30  ;;  %v2419_v10 = vadd.f32 %v2382_v6, %v2149_v20  ;;  %v2151_v47 = vpop.f32.mrf.mxu1  ;;  %v6850_v21 = vld [vmem:[%s8045_s24 + $0x1b4] sm:$0x1] }
 0x29a   : > { %v2152_v29 = vadd.f32 %v2151_v47, %v2014_v17  ;;  %v3900_v42 = vunpack.c.l.bf16 %v6850_v21 }
 0x29b   : > { %v2971_v5 = vpack.c.bf16 %v2939_v22, %v2939_v22  ;;  %v2844_v26 = vadd.f32 %v2807_v12, %v2419_v10  ;;  %3387 = vmatmul.bf16.gmra.mxu0 %v3271_v4  ;;  %v3203_v22 = vrot.slane %v3116_v15, 1 }
 0x29c   : > { %3524 = vmatmul.bf16.gmra.mxu1 %v3079_v63  ;;  %v3999_v10 = vrot.slane %v3900_v42, 1 }
 0x29d   : > { %3003 = vst.msk [vmem:[%s8328_s13 + $0xf0] sm:$0xf] %vm1560_vm1, %v2971_v5  ;;  %v2876_v33 = vadd.f32 %v8996_v18, %v2844_v26  ;;  %3758 = vmatmul.bf16.gmra.mxu2 %v7388_v27  ;;  %v7447_v5 = vld [vmem:[%s9979_s1 + $0x90] sm:$0xff] }
 0x29e   : > { %4183 = vmatmul.bf16.gmra.mxu3 %v4067_v52  ;;  %v3204_v52 = vsel %vm324_vm0, %v9249_v0, %v3203_v22  ;;  %v7455_v26 = vld [vmem:[%s9979_s1 + $0xd0] sm:$0xff]  ;;  %5134 = vmatpush.bf16.msrb.mxu2 %v7447_v5 }
 0x29f   : > { %v2908_v39 = vmul.f32 0.2, %v2876_v33  ;;  %5559 = vmatpush.bf16.msrb.mxu3 %v7455_v26  ;;  %v3273_v44 = vpack.c.bf16 %v3204_v52, %v9265_v28  ;;  %v9345_v28 = vld [vmem:[%s9980_s2] ss:$0 sm:$0xff]  ;;  %v6585_v52 = vld [vmem:[%s8045_s24 + $0x1b0] sm:$0xf] }
 0x2a0   : > { %v2385_v59 = vpop.f32.mrf.mxu2  ;;  %v2016_v23 = vpop.f32.mrf.mxu0  ;;  %v6599_v5 = vld [vmem:[%s8045_s24 + $0x1b4] sm:$0x1] }
 0x2a1   : > { %v2810_v62 = vpop.f32.mrf.mxu3  ;;  %v2940_v37 = vmax.f32 %v2876_v33, %v2908_v39  ;;  %v2420_v43 = vadd.f32 %v2385_v59, %v2152_v29  ;;  %v2153_v41 = vpop.f32.mrf.mxu1 }
 0x2a2   : > { %v2154_v48 = vadd.f32 %v2153_v41, %v2016_v23  ;;  %v6582_v23 = vld [vmem:[%s8045_s24 + $0x1a4] sm:$0xf] }
 0x2a3   : > { %v2972_v46 = vpack.c.bf16 %v2940_v37, %v2940_v37  ;;  %v2845_v50 = vadd.f32 %v2810_v62, %v2420_v43  ;;  %v7390_v37 = vld [vmem:[%s8045_s24 + $0x1ac] sm:$0xff] }
 0x2a5   : > { %3004 = vst.msk [vmem:[%s8328_s13 + $0xf4] sm:$0xf] %vm1560_vm1, %v2972_v46  ;;  %v2877_v51 = vadd.f32 %v8996_v18, %v2845_v50  ;;  %v9334_v46 = vld [vmem:[%s8045_s24 + $0x1b8] sm:$0xff]   ;;  %v9337_v50 = vld [vmem:[%s8045_s24 + $0x1c0] sm:$0xff]  }
 0x2a7   : > { %v2909_v19 = vmul.f32 0.2, %v2877_v51 }
 0x2a8   : > { %v2387_v38 = vpop.f32.mrf.mxu2  ;;  %v3353_v54 = vpop.f32.mrf.mxu0 }
 0x2a9   : > { %v2812_v55 = vpop.f32.mrf.mxu3  ;;  %v2941_v53 = vmax.f32 %v2877_v51, %v2909_v19  ;;  %v2421_v25 = vadd.f32 %v2387_v38, %v2154_v48  ;;  %v3490_v57 = vpop.f32.mrf.mxu1  ;;  %v3060_v19 = vunpack.c.l.bf16 %v6582_v23  ;;  %v7423_v48 = vld [vmem:[%s9979_s1 + $0x50] sm:$0xff]  ;;  %v7731_v38 = vunpack.c.l.bf16 %v9334_v46 }
 0x2aa   : > { %v3491_v9 = vadd.f32 %v3490_v57, %v3353_v54  ;;  %4763 = vmatpush.bf16.msrb.mxu0 %v7423_v48 }
 0x2ab   : > { %v2973_v56 = vpack.c.bf16 %v2941_v53, %v2941_v53  ;;  %v2846_v32 = vadd.f32 %v2812_v55, %v2421_v25  ;;  %3392 = vmatmul.bf16.gmra.mxu0 %v9239_v2  ;;  %v7732_v55 = vunpack.c.h.bf16 %v9334_v46  ;;  %v7735_v53 = vunpack.c.l.bf16 %v9337_v50 }
 0x2ac   : > { %3529 = vmatmul.bf16.gmra.mxu1 %v9210_v40  ;;  %v3997_v40 = vrot.slane %v3899_v7, 1  ;;  %v4001_v8 = vrot.slane %v7731_v38, 1  ;;  %v3082_v22 = vpack.c.bf16 %v7727_v35, %v3060_v19  ;;  %v3063_v35 = vunpack.c.l.bf16 %v6585_v52 }
 0x2ad   : > { %3005 = vst.msk [vmem:[%s8328_s13 + $0xf8] sm:$0xf] %vm1560_vm1, %v2973_v56  ;;  %v2878_v34 = vadd.f32 %v8996_v18, %v2846_v32  ;;  %3763 = vmatmul.bf16.gmra.mxu2 %v7389_v16  ;;  %v3205_v32 = vrot.slane %v3060_v19, 1  ;;  %v4002_v21 = vrot.slane %v7732_v55, 1  ;;  %v7446_v55 = vld [vmem:[%s9979_s1 + $0x88] sm:$0xff] }
 0x2ae   : > { %4188 = vmatmul.bf16.gmra.mxu3 %v4068_v24  ;;  %v3998_v49 = vsel %vm324_vm0, %v9294_v3, %v3997_v40  ;;  %v4000_v33 = vsel %vm324_vm0, %v3997_v40, %v3999_v10  ;;  %v3210_v23 = vrot.slane %v3063_v35, 1  ;;  %5135 = vmatpush.bf16.msrb.mxu2 %v7446_v55 }
 0x2af   : > { %v2910_v30 = vmul.f32 0.2, %v2878_v34  ;;  %v4069_v43 = vpack.c.bf16 %v4000_v33, %v3998_v49  ;;  %v3207_v42 = vsel %vm324_vm0, %v3205_v32, %v9290_v31  ;;  %v6855_v33 = vld [vmem:[%s8045_s24 + $0x1c8] sm:$0x1] }
 0x2b0   : > { %v3724_v20 = vpop.f32.mrf.mxu2  ;;  %v3355_v63 = vpop.f32.mrf.mxu0 }
 0x2b1   : > { %v4149_v6 = vpop.f32.mrf.mxu3  ;;  %v2942_v12 = vmax.f32 %v2878_v34, %v2910_v30  ;;  %v3804_v4 = vadd.f32 %v3724_v20, %v3491_v9  ;;  %v3492_v2 = vpop.f32.mrf.mxu1  ;;  %v4004_v34 = vrot.slane %v7735_v53, 1  ;;  %v4003_v30 = vsel %vm324_vm0, %v4001_v8, %v4002_v21  ;;  %v7454_v53 = vld [vmem:[%s9979_s1 + $0xc8] sm:$0xff] }
 0x2b2   : > { %5560 = vmatpush.bf16.msrb.mxu3 %v7454_v53 }
 0x2b3   : > { %v2974_v17 = vpack.c.bf16 %v2942_v12, %v2942_v12  ;;  %v4229_v47 = vadd.f32 %v4149_v6, %v3804_v4  ;;  %v4005_v20 = vsel %vm324_vm0, %v4002_v21, %v4004_v34 }
 0x2b5   : > { %3006 = vst.msk [vmem:[%s8328_s13 + $0xfc] sm:$0xf] %vm1560_vm1, %v2974_v17  ;;  %v4261_v27 = vadd.f32 %v8996_v18, %v4229_v47  ;;  %v3493_v18 = vadd.f32 %v3492_v2, %v3355_v63  ;;  %v3274_v2 = vpack.c.bf16 %v9304_v36, %v3207_v42  ;;  %v7391_v47 = vld [vmem:[%s8045_s24 + $0x1b8] sm:$0xff] }
 0x2b7   : > { %v4293_v29 = vmul.f32 0.2, %v4261_v27 }
 0x2b8   : > { %v3726_v0 = vpop.f32.mrf.mxu2  ;;  %v3358_v59 = vpop.f32.mrf.mxu0 }
 0x2b9   : > { %v4151_v13 = vpop.f32.mrf.mxu3  ;;  %v4325_v60 = vmax.f32 %v4261_v27, %v4293_v29  ;;  %v3805_v39 = vadd.f32 %v3726_v0, %v3493_v18  ;;  %v3495_v62 = vpop.f32.mrf.mxu1  ;;  %v9368_v27 = vpack.c.bf16 %v4005_v20, %v4003_v30  ;;  %v3117_v18 = vunpack.c.l.bf16 %v6599_v5  ;;  %v6856_v30 = vld [vmem:[%s8045_s24 + $0x1cc] sm:$0xf]  ;;  %v9404_v20 = vld [vmem:[%s8045_s24 + $0x1d0] sm:$0xff]  }
 0x2ba   : > { %v3496_v58 = vadd.f32 %v3495_v62, %v3358_v59  ;;  %v7736_v0 = vunpack.c.h.bf16 %v9337_v50 }
 0x2bb   : > { %v4357_v41 = vpack.c.bf16 %v4325_v60, %v4325_v60  ;;  %v4230_v45 = vadd.f32 %v4151_v13, %v3805_v39  ;;  %3397 = vmatmul.bf16.gmra.mxu0 %v3273_v44  ;;  %v3905_v13 = vunpack.c.l.bf16 %v6855_v33 }
 0x2bc   : > { %3534 = vmatmul.bf16.gmra.mxu1 %v9213_v1  ;;  %v7415_v1 = vld [vmem:[%s9979_s1 + $0x10] sm:$0xff] }
 0x2bd   : > { %4389 = vst.msk [vmem:[%s8328_s13 + $0x100] sm:$0xf] %vm1560_vm1, %v4357_v41  ;;  %v4262_v51 = vadd.f32 %v9345_v28, %v4230_v45  ;;  %3768 = vmatmul.bf16.gmra.mxu2 %v7390_v37  ;;  %4900 = vmatpush.bf16.msrb.mxu1 %v7415_v1  ;;  %v3212_v41 = vrot.slane %v3117_v18, 1  ;;  %v9378_v45 = vrot.slane %v7736_v0, 1  ;;  %v3211_v1 = vsel %vm324_vm0, %v9294_v3, %v3210_v23 }
 0x2be   : > { %4193 = vmatmul.bf16.gmra.mxu3 %v4069_v43 }
 0x2bf   : > { %v4294_v25 = vmul.f32 0.2, %v4262_v51  ;;  %v3213_v38 = vsel %vm324_vm0, %v3210_v23, %v3212_v41  ;;  %v6600_v41 = vld [vmem:[%s8045_s24 + $0x1c8] sm:$0x1] }
 0x2c0   : > { %v3729_v54 = vpop.f32.mrf.mxu2  ;;  %v3360_v11 = vpop.f32.mrf.mxu0  ;;  %v3118_v55 = vunpack.c.l.bf16 %v6600_v41 }
 0x2c1   : > { %v4154_v57 = vpop.f32.mrf.mxu3  ;;  %v4326_v16 = vmax.f32 %v4262_v51, %v4294_v25  ;;  %v3806_v24 = vadd.f32 %v3729_v54, %v3496_v58  ;;  %v3497_v56 = vpop.f32.mrf.mxu1  ;;  %v4008_v51 = vrot.slane %v3905_v13, 1  ;;  %v9394_v25 = vsel %vm324_vm0, %v4004_v34, %v9378_v45 }
 0x2c2   : > { %v3498_v12 = vadd.f32 %v3497_v56, %v3360_v11  ;;  %v3275_v11 = vpack.c.bf16 %v3213_v38, %v3211_v1  ;;  %v3083_v56 = vpack.c.bf16 %v3063_v35, %v7728_v61  ;;  %v7422_v61 = vld [vmem:[%s9979_s1 + $0x48] sm:$0xff] }
 0x2c3   : > { %v4358_v9 = vpack.c.bf16 %v4326_v16, %v4326_v16  ;;  %v4231_v15 = vadd.f32 %v4154_v57, %v3806_v24  ;;  %v4009_v54 = vsel %vm324_vm0, %v9378_v45, %v4008_v51  ;;  %4764 = vmatpush.bf16.msrb.mxu0 %v7422_v61 }
 0x2c5   : > { %4390 = vst.msk [vmem:[%s8328_s13 + $0x104] sm:$0xf] %vm1560_vm1, %v4358_v9  ;;  %v4263_v7 = vadd.f32 %v9345_v28, %v4231_v15  ;;  %v7392_v9 = vld [vmem:[%s8045_s24 + $0x1c0] sm:$0xff]  ;;  %v4071_v15 = vpack.c.bf16 %v4009_v54, %v9394_v25 }
 0x2c7   : > { %v4295_v6 = vmul.f32 0.2, %v4263_v7 }
 0x2c8   : > { %v3731_v4 = vpop.f32.mrf.mxu2  ;;  %v3363_v17 = vpop.f32.mrf.mxu0 }
 0x2c9   : > { %v4156_v63 = vpop.f32.mrf.mxu3  ;;  %v4327_v40 = vmax.f32 %v4263_v7, %v4295_v6  ;;  %v3807_v10 = vadd.f32 %v3731_v4, %v3498_v12  ;;  %v3500_v31 = vpop.f32.mrf.mxu1  ;;  %v7414_v12 = vld [vmem:[%s9979_s1 + $0x8] sm:$0xff]  ;;  %v7739_v4 = vunpack.c.l.bf16 %v9404_v20 }
 0x2ca   : > { %v3501_v29 = vadd.f32 %v3500_v31, %v3363_v17  ;;  %4901 = vmatpush.bf16.msrb.mxu1 %v7414_v12 }
 0x2cb   : > { %v4359_v26 = vpack.c.bf16 %v4327_v40, %v4327_v40  ;;  %v4232_v49 = vadd.f32 %v4156_v63, %v3807_v10  ;;  %3402 = vmatmul.bf16.gmra.mxu0 %v3274_v2  ;;  %v7740_v63 = vunpack.c.h.bf16 %v9404_v20  ;;  %v3906_v2 = vunpack.c.l.bf16 %v6856_v30 }
 0x2cc   : > { %3539 = vmatmul.bf16.gmra.mxu1 %v3082_v22 }
 0x2cd   : > { %4391 = vst.msk [vmem:[%s8328_s13 + $0x108] sm:$0xf] %vm1560_vm1, %v4359_v26  ;;  %v4264_v36 = vadd.f32 %v9345_v28, %v4232_v49  ;;  %3773 = vmatmul.bf16.gmra.mxu2 %v7391_v47  ;;  %v4010_v5 = vrot.slane %v3906_v2, 1  ;;  %v9419_v26 = vrot.slane %v7739_v4, 1  ;;  %v9423_v49 = vrot.slane %v7740_v63, 1 }
 0x2ce   : > { %4198 = vmatmul.bf16.gmra.mxu3 %v9368_v27 }
 0x2cf   : > { %v4296_v44 = vmul.f32 0.2, %v4264_v36  ;;  %v4012_v35 = vsel %vm324_vm0, %v4010_v5, %v9419_v26  ;;  %v9433_v18 = vsel %vm324_vm0, %v9419_v26, %v9423_v49 }
 0x2d0   : > { %v3734_v60 = vpop.f32.mrf.mxu2  ;;  %v3365_v37 = vpop.f32.mrf.mxu0  ;;  %v4072_v23 = vpack.c.bf16 %v9433_v18, %v4012_v35 }
 0x2d1   : > { %v4159_v39 = vpop.f32.mrf.mxu3  ;;  %v4328_v59 = vmax.f32 %v4264_v36, %v4296_v44  ;;  %v3808_v62 = vadd.f32 %v3734_v60, %v3501_v29  ;;  %v3502_v43 = vpop.f32.mrf.mxu1 }
 0x2d2   : > { %v3503_v3 = vadd.f32 %v3502_v43, %v3365_v37  ;;  %v7393_v43 = vld [vmem:[%s8045_s24 + $0x1cc] sm:$0xff] }
 0x2d3   : > { %v4360_v58 = vpack.c.bf16 %v4328_v59, %v4328_v59  ;;  %v4233_v19 = vadd.f32 %v4159_v39, %v3808_v62 }
 0x2d5   : > { %4392 = vst.msk [vmem:[%s8328_s13 + $0x10c] sm:$0xf] %vm1560_vm1, %v4360_v58  ;;  %v4265_v48 = vadd.f32 %v9345_v28, %v4233_v19  ;;  %v6859_v19 = vld [vmem:[%s8045_s24 + $0x1d8] sm:$0xf] }
 0x2d6   : > { %v3909_v53 = vunpack.c.l.bf16 %v6859_v19 }
 0x2d7   : > { %v4297_v57 = vmul.f32 0.2, %v4265_v48 }
 0x2d8   : > { %v3736_v16 = vpop.f32.mrf.mxu2  ;;  %v3368_v21 = vpop.f32.mrf.mxu0 }
 0x2d9   : > { %v4161_v24 = vpop.f32.mrf.mxu3  ;;  %v4329_v32 = vmax.f32 %v4265_v48, %v4297_v57  ;;  %v3809_v8 = vadd.f32 %v3736_v16, %v3503_v3  ;;  %v3505_v34 = vpop.f32.mrf.mxu1  ;;  %v6860_v48 = vld [vmem:[%s8045_s24 + $0x1dc] sm:$0x1] }
 0x2da   : > { %v3506_v14 = vadd.f32 %v3505_v34, %v3368_v21  ;;  %v3910_v54 = vunpack.c.l.bf16 %v6860_v48 }
 0x2db   : > { %v4361_v7 = vpack.c.bf16 %v4329_v32, %v4329_v32  ;;  %v4234_v42 = vadd.f32 %v4161_v24, %v3809_v8  ;;  %3407 = vmatmul.bf16.gmra.mxu0 %v3275_v11  ;;  %v3221_v32 = vrot.slane %v3118_v55, 1 }
 0x2dc   : > { %3544 = vmatmul.bf16.gmra.mxu1 %v3083_v56  ;;  %v4017_v8 = vrot.slane %v3910_v54, 1 }
 0x2dd   : > { %4393 = vst.msk [vmem:[%s8328_s13 + $0x110] sm:$0xf] %vm1560_vm1, %v4361_v7  ;;  %v4266_v6 = vadd.f32 %v9345_v28, %v4234_v42  ;;  %3778 = vmatmul.bf16.gmra.mxu2 %v7392_v9  ;;  %v7445_v7 = vld [vmem:[%s9979_s1 + $0x80] sm:$0xff] }
 0x2de   : > { %4203 = vmatmul.bf16.gmra.mxu3 %v4071_v15  ;;  %v3222_v15 = vsel %vm324_vm0, %v9378_v45, %v3221_v32  ;;  %v7453_v42 = vld [vmem:[%s9979_s1 + $0xc0] sm:$0xff]  ;;  %5136 = vmatpush.bf16.msrb.mxu2 %v7445_v7  ;;  %v6601_v7 = vld [vmem:[%s8045_s24 + $0x1dc] sm:$0x1] }
 0x2df   : > { %v4298_v22 = vmul.f32 0.2, %v4266_v6  ;;  %5561 = vmatpush.bf16.msrb.mxu3 %v7453_v42  ;;  %v3277_v2 = vpack.c.bf16 %v3222_v15, %v9394_v25  ;;  %v6593_v15 = vld [vmem:[%s8045_s24 + $0x1d8] sm:$0xf] }
 0x2e0   : > { %v3739_v40 = vpop.f32.mrf.mxu2  ;;  %v3370_v47 = vpop.f32.mrf.mxu0 }
 0x2e1   : > { %v4164_v10 = vpop.f32.mrf.mxu3  ;;  %v4330_v17 = vmax.f32 %v4266_v6, %v4298_v22  ;;  %v3810_v31 = vadd.f32 %v3739_v40, %v3506_v14  ;;  %v3507_v52 = vpop.f32.mrf.mxu1 }
 0x2e2   : > { %v3508_v13 = vadd.f32 %v3507_v52, %v3370_v47  ;;  %v6590_v52 = vld [vmem:[%s8045_s24 + $0x1cc] sm:$0xf] }
 0x2e3   : > { %v4362_v33 = vpack.c.bf16 %v4330_v17, %v4330_v17  ;;  %v4235_v36 = vadd.f32 %v4164_v10, %v3810_v31  ;;  %v7394_v31 = vld [vmem:[%s8045_s24 + $0x1d4] sm:$0xff] }
 0x2e5   : > { %4394 = vst.msk [vmem:[%s8328_s13 + $0x114] sm:$0xf] %vm1560_vm1, %v4362_v33  ;;  %v4267_v29 = vadd.f32 %v9345_v28, %v4235_v36  ;;  %v9463_v36 = vld [vmem:[%s8045_s24 + $0x1e0] sm:$0xff]  }
 0x2e7   : > { %v4299_v0 = vmul.f32 0.2, %v4267_v29 }
 0x2e8   : > { %v3741_v44 = vpop.f32.mrf.mxu2  ;;  %v3373_v62 = vpop.f32.mrf.mxu0 }
 0x2e9   : > { %v4166_v60 = vpop.f32.mrf.mxu3  ;;  %v4331_v39 = vmax.f32 %v4267_v29, %v4299_v0  ;;  %v3811_v59 = vadd.f32 %v3741_v44, %v3508_v13  ;;  %v3510_v37 = vpop.f32.mrf.mxu1  ;;  %v9466_v29 = vld [vmem:[%s8045_s24 + $0x1e8] sm:$0xff]   ;;  %v3068_v0 = vunpack.c.l.bf16 %v6590_v52  ;;  %v7421_v13 = vld [vmem:[%s9979_s1 + $0x40] sm:$0xff] }
 0x2ea   : > { %v3511_v38 = vadd.f32 %v3510_v37, %v3373_v62  ;;  %v7413_v44 = vld [vmem:[%s9979_s1] sm:$0xff]  ;;  %4765 = vmatpush.bf16.msrb.mxu0 %v7421_v13 }
 0x2eb   : > { %v4363_v51 = vpack.c.bf16 %v4331_v39, %v4331_v39  ;;  %v4236_v58 = vadd.f32 %v4166_v60, %v3811_v59  ;;  %3412 = vmatmul.bf16.gmra.mxu0 %v9368_v27  ;;  %v7743_v60 = vunpack.c.l.bf16 %v9463_v36  ;;  %v7747_v39 = vunpack.c.l.bf16 %v9466_v29  ;;  %4902 = vmatpush.bf16.msrb.mxu1 %v7413_v44 }
 0x2ec   : > { %3549 = vmatmul.bf16.gmra.mxu1 %v9334_v46  ;;  %v4015_v46 = vrot.slane %v3909_v53, 1  ;;  %v3086_v32 = vpack.c.bf16 %v7739_v4, %v3068_v0  ;;  %v3071_v4 = vunpack.c.l.bf16 %v6593_v15 }
 0x2ed   : > { %4395 = vst.msk [vmem:[%s8328_s13 + $0x118] sm:$0xf] %vm1560_vm1, %v4363_v51  ;;  %v4268_v1 = vadd.f32 %v9345_v28, %v4236_v58  ;;  %3783 = vmatmul.bf16.gmra.mxu2 %v7393_v43  ;;  %v3223_v58 = vrot.slane %v3068_v0, 1  ;;  %v4019_v19 = vrot.slane %v7743_v60, 1 }
 0x2ee   : > { %4208 = vmatmul.bf16.gmra.mxu3 %v4072_v23  ;;  %v4016_v30 = vsel %vm324_vm0, %v9423_v49, %v4015_v46  ;;  %v4018_v6 = vsel %vm324_vm0, %v4015_v46, %v4017_v8  ;;  %v3228_v52 = vrot.slane %v3071_v4, 1 }
 0x2ef   : > { %v4300_v57 = vmul.f32 0.2, %v4268_v1  ;;  %v4073_v47 = vpack.c.bf16 %v4018_v6, %v4016_v30  ;;  %v3225_v54 = vsel %vm324_vm0, %v3223_v58, %v9419_v26  ;;  %v6865_v6 = vld [vmem:[%s8045_s24 + $0x1f0] sm:$0x1] }
 0x2f0   : > { %v3744_v3 = vpop.f32.mrf.mxu2  ;;  %v3375_v56 = vpop.f32.mrf.mxu0  ;;  %v3229_v44 = vsel %vm324_vm0, %v9423_v49, %v3228_v52  ;;  %v3087_v49 = vpack.c.bf16 %v3071_v4, %v7740_v63 }
 0x2f1   : > { %v4169_v16 = vpop.f32.mrf.mxu3  ;;  %v4332_v24 = vmax.f32 %v4268_v1, %v4300_v57  ;;  %v3812_v11 = vadd.f32 %v3744_v3, %v3511_v38  ;;  %v3512_v27 = vpop.f32.mrf.mxu1  ;;  %v4022_v1 = vrot.slane %v7747_v39, 1 }
 0x2f2   : > { %v3513_v61 = vadd.f32 %v3512_v27, %v3375_v56  ;;  %v3278_v27 = vpack.c.bf16 %v9433_v18, %v3225_v54  ;;  %v9522_v54 = vld [vmem:[%s8045_s24 + $0x1f8] sm:$0xff]  }
 0x2f3   : > { %v4364_v21 = vpack.c.bf16 %v4332_v24, %v4332_v24  ;;  %v4237_v34 = vadd.f32 %v4169_v16, %v3812_v11  ;;  %v7799_v63 = vunpack.c.l.bf16 %v9522_v54 }
 0x2f5   : > { %4396 = vst.msk [vmem:[%s8328_s13 + $0x11c] sm:$0xf] %vm1560_vm1, %v4364_v21  ;;  %v4269_v9 = vadd.f32 %v9345_v28, %v4237_v34  ;;  %v7395_v34 = vld [vmem:[%s8045_s24 + $0x1e0] sm:$0xff] }
 0x2f7   : > { %v4301_v14 = vmul.f32 0.2, %v4269_v9 }
 0x2f8   : > { %v3746_v45 = vpop.f32.mrf.mxu2  ;;  %v3378_v10 = vpop.f32.mrf.mxu0 }
 0x2f9   : > { %v4171_v12 = vpop.f32.mrf.mxu3  ;;  %v4333_v22 = vmax.f32 %v4269_v9, %v4301_v14  ;;  %v3813_v40 = vadd.f32 %v3746_v45, %v3513_v61  ;;  %v3515_v17 = vpop.f32.mrf.mxu1  ;;  %v3119_v61 = vunpack.c.l.bf16 %v6601_v7  ;;  %v7748_v45 = vunpack.c.h.bf16 %v9466_v29 }
 0x2fa   : > { %v3516_v35 = vadd.f32 %v3515_v17, %v3378_v10 }
 0x2fb   : > { %v4365_v5 = vpack.c.bf16 %v4333_v22, %v4333_v22  ;;  %v4238_v33 = vadd.f32 %v4171_v12, %v3813_v40  ;;  %3417 = vmatmul.bf16.gmra.mxu0 %v3277_v2  ;;  %v3915_v12 = vunpack.c.l.bf16 %v6865_v6 }
 0x2fc   : > { %3554 = vmatmul.bf16.gmra.mxu1 %v9337_v50  ;;  %v7744_v50 = vunpack.c.h.bf16 %v9463_v36 }
 0x2fd   : > { %4397 = vst.msk [vmem:[%s8328_s13 + $0x120] sm:$0xf] %vm1560_vm1, %v4365_v5  ;;  %v4270_v25 = vadd.f32 %v9345_v28, %v4238_v33  ;;  %3788 = vmatmul.bf16.gmra.mxu2 %v7394_v31  ;;  %v3230_v5 = vrot.slane %v3119_v61, 1  ;;  %v9502_v33 = vrot.slane %v7748_v45, 1 }
 0x2fe   : > { %4213 = vmatmul.bf16.gmra.mxu3 %v4073_v47  ;;  %v4020_v48 = vrot.slane %v7744_v50, 1 }
 0x2ff   : > { %v4302_v59 = vmul.f32 0.2, %v4270_v25  ;;  %v3231_v60 = vsel %vm324_vm0, %v3228_v52, %v3230_v5  ;;  %v9512_v50 = vsel %vm324_vm0, %v4022_v1, %v9502_v33  ;;  %v7181_v52 = vld [vmem:[%s8045_s24 + $0x200] sm:$0xf]  ;;  %v7182_v5 = vld [vmem:[%s8045_s24 + $0x204] sm:$0x1] }
 0x300   : > { %v3749_v62 = vpop.f32.mrf.mxu2  ;;  %v3380_v41 = vpop.f32.mrf.mxu0  ;;  %v4021_v57 = vsel %vm324_vm0, %v4019_v19, %v4020_v48  ;;  %v4023_v3 = vsel %vm324_vm0, %v4020_v48, %v4022_v1  ;;  %v7396_v48 = vld [vmem:[%s8045_s24 + $0x1e8] sm:$0xff] }
 0x301   : > { %v4174_v37 = vpop.f32.mrf.mxu3  ;;  %v4334_v43 = vmax.f32 %v4270_v25, %v4302_v59  ;;  %v3814_v23 = vadd.f32 %v3749_v62, %v3516_v35  ;;  %v3517_v51 = vpop.f32.mrf.mxu1  ;;  %v9492_v9 = vpack.c.bf16 %v4023_v3, %v4021_v57  ;;  %v4026_v25 = vrot.slane %v3915_v12, 1 }
 0x302   : > { %v3518_v24 = vadd.f32 %v3517_v51, %v3380_v41  ;;  %v7800_v3 = vunpack.c.h.bf16 %v9522_v54 }
 0x303   : > { %v4366_v38 = vpack.c.bf16 %v4334_v43, %v4334_v43  ;;  %v4239_v55 = vadd.f32 %v4174_v37, %v3814_v23  ;;  %v4027_v39 = vsel %vm324_vm0, %v9502_v33, %v4026_v25  ;;  %v3279_v23 = vpack.c.bf16 %v3231_v60, %v3229_v44 }
 0x304   : > { %v4075_v1 = vpack.c.bf16 %v4027_v39, %v9512_v50  ;;  %v5294_v44 = vunpack.c.l.bf16 %v7182_v5 }
 0x305   : > { %4398 = vst.msk [vmem:[%s8328_s13 + $0x124] sm:$0xf] %vm1560_vm1, %v4366_v38  ;;  %v4271_v53 = vadd.f32 %v9345_v28, %v4239_v55 }
 0x307   : > { %v4303_v16 = vmul.f32 0.2, %v4271_v53 }
 0x308   : > { %v3751_v11 = vpop.f32.mrf.mxu2  ;;  %v3383_v21 = vpop.f32.mrf.mxu0 }
 0x309   : > { %v4176_v56 = vpop.f32.mrf.mxu3  ;;  %v4335_v46 = vmax.f32 %v4271_v53, %v4303_v16  ;;  %v3815_v8 = vadd.f32 %v3751_v11, %v3518_v24  ;;  %v3520_v26 = vpop.f32.mrf.mxu1  ;;  %v7178_v53 = vld [vmem:[%s8045_s24 + $0x1f4] sm:$0xf] }
 0x30a   : > { %v3521_v14 = vadd.f32 %v3520_v26, %v3383_v21  ;;  %v5290_v16 = vunpack.c.l.bf16 %v7178_v53  ;;  %v9531_v26 = vrot.slane %v7799_v63, 1 }
 0x30b   : > { %v4367_v42 = vpack.c.bf16 %v4335_v46, %v4335_v46  ;;  %v4240_v30 = vadd.f32 %v4176_v56, %v3815_v8  ;;  %3422 = vmatmul.bf16.gmra.mxu0 %v3278_v27 }
 0x30c   : > { %3559 = vmatmul.bf16.gmra.mxu1 %v3086_v32  ;;  %v5370_v21 = vrot.slane %v5290_v16, 1 }
 0x30d   : > { %4399 = vst.msk [vmem:[%s8328_s13 + $0x128] sm:$0xf] %vm1560_vm1, %v4367_v42  ;;  %v4272_v18 = vadd.f32 %v9345_v28, %v4240_v30  ;;  %3793 = vmatmul.bf16.gmra.mxu2 %v7395_v34  ;;  %v9535_v34 = vrot.slane %v7800_v3, 1 }
 0x30e   : > { %4218 = vmatmul.bf16.gmra.mxu3 %v9492_v9  ;;  %v5372_v30 = vsel %vm324_vm0, %v5370_v21, %v9531_v26  ;;  %v9569_v21 = vld [vmem:[%s8045_s24 + $0x208] sm:$0xff]  }
 0x30f   : > { %v4304_v2 = vmul.f32 0.2, %v4272_v18  ;;  %v9545_v6 = vsel %vm324_vm0, %v9531_v26, %v9535_v34 }
 0x310   : > { %v3754_v22 = vpop.f32.mrf.mxu2  ;;  %v3385_v31 = vpop.f32.mrf.mxu0 }
 0x311   : > { %v4179_v40 = vpop.f32.mrf.mxu3  ;;  %v4336_v10 = vmax.f32 %v4272_v18, %v4304_v2  ;;  %v3816_v17 = vadd.f32 %v3754_v22, %v3521_v14  ;;  %v3522_v47 = vpop.f32.mrf.mxu1 }
 0x312   : > { %v3523_v62 = vadd.f32 %v3522_v47, %v3385_v31 }
 0x313   : > { %v4368_v35 = vpack.c.bf16 %v4336_v10, %v4336_v10  ;;  %v4241_v0 = vadd.f32 %v4179_v40, %v3816_v17  ;;  %v7429_v40 = vld [vmem:[%s8045_s24 + $0x1f4] sm:$0xff]  ;;  %v5474_v10 = vpack.c.bf16 %v9545_v6, %v5372_v30  ;;  %v6946_v17 = vld [vmem:[%s8045_s24 + $0x1f0] sm:$0x1]  ;;  %v7803_v30 = vunpack.c.l.bf16 %v9569_v21 }
 0x315   : > { %4400 = vst.msk [vmem:[%s8328_s13 + $0x12c] sm:$0xf] %vm1560_vm1, %v4368_v35  ;;  %v4273_v13 = vadd.f32 %v9345_v28, %v4241_v0  ;;  %v4526_v0 = vunpack.c.l.bf16 %v6946_v17 }
 0x317   : > { %v4305_v59 = vmul.f32 0.2, %v4273_v13 }
 0x318   : > { %v3756_v37 = vpop.f32.mrf.mxu2  ;;  %v3388_v58 = vpop.f32.mrf.mxu0 }
 0x319   : > { %v4181_v43 = vpop.f32.mrf.mxu3  ;;  %v4337_v41 = vmax.f32 %v4273_v13, %v4305_v59  ;;  %v3817_v51 = vadd.f32 %v3756_v37, %v3523_v62  ;;  %v3525_v19 = vpop.f32.mrf.mxu1  ;;  %v5293_v13 = vunpack.c.l.bf16 %v7181_v52 }
 0x31a   : > { %v3526_v20 = vadd.f32 %v3525_v19, %v3388_v58 }
 0x31b   : > { %v4369_v38 = vpack.c.bf16 %v4337_v41, %v4337_v41  ;;  %v4242_v55 = vadd.f32 %v4181_v43, %v3817_v51  ;;  %3427 = vmatmul.bf16.gmra.mxu0 %v3279_v23  ;;  %v4581_v23 = vrot.slane %v4526_v0, 1 }
 0x31c   : > { %3564 = vmatmul.bf16.gmra.mxu1 %v3087_v49  ;;  %v5377_v49 = vrot.slane %v5294_v44, 1 }
 0x31d   : > { %4401 = vst.msk [vmem:[%s8328_s13 + $0x130] sm:$0xf] %vm1560_vm1, %v4369_v38  ;;  %v4274_v57 = vadd.f32 %v9345_v28, %v4242_v55  ;;  %3798 = vmatmul.bf16.gmra.mxu2 %v7396_v48  ;;  %v4582_v19 = vsel %vm324_vm0, %v9502_v33, %v4581_v23  ;;  %v7431_v23 = vld [vmem:[%s8045_s24 + $0x208] sm:$0xff] }
 0x31e   : > { %4223 = vmatmul.bf16.gmra.mxu3 %v4075_v1 }
 0x31f   : > { %v4306_v24 = vmul.f32 0.2, %v4274_v57 }
 0x320   : > { %v3759_v11 = vpop.f32.mrf.mxu2  ;;  %v3390_v46 = vpop.f32.mrf.mxu0 }
 0x321   : > { %v4184_v56 = vpop.f32.mrf.mxu3  ;;  %v4338_v27 = vmax.f32 %v4274_v57, %v4306_v24  ;;  %v3818_v32 = vadd.f32 %v3759_v11, %v3526_v20  ;;  %v3527_v8 = vpop.f32.mrf.mxu1  ;;  %v4679_v20 = vpack.c.bf16 %v4582_v19, %v9512_v50  ;;  %v7187_v19 = vld [vmem:[%s8045_s24 + $0x218] sm:$0x1] }
 0x322   : > { %v3528_v14 = vadd.f32 %v3527_v8, %v3390_v46 }
 0x323   : > { %v4370_v15 = vpack.c.bf16 %v4338_v27, %v4338_v27  ;;  %v4243_v7 = vadd.f32 %v4184_v56, %v3818_v32  ;;  %v7430_v27 = vld [vmem:[%s8045_s24 + $0x1fc] sm:$0xff]  ;;  %v6918_v32 = vld [vmem:[%s8045_s24 + $0x1f4] sm:$0xf] }
 0x325   : > { %4402 = vst.msk [vmem:[%s8328_s13 + $0x134] sm:$0xf] %vm1560_vm1, %v4370_v15  ;;  %v4275_v42 = vadd.f32 %v9345_v28, %v4243_v7  ;;  %v9572_v15 = vld [vmem:[%s8045_s24 + $0x210] sm:$0xff]  }
 0x327   : > { %v4307_v18 = vmul.f32 0.2, %v4275_v42 }
 0x328   : > { %v3761_v4 = vpop.f32.mrf.mxu2  ;;  %v3393_v2 = vpop.f32.mrf.mxu0 }
 0x329   : > { %v4186_v61 = vpop.f32.mrf.mxu3  ;;  %v4339_v45 = vmax.f32 %v4275_v42, %v4307_v18  ;;  %v3819_v12 = vadd.f32 %v3761_v4, %v3528_v14  ;;  %v3530_v22 = vpop.f32.mrf.mxu1  ;;  %v4458_v42 = vunpack.c.l.bf16 %v6918_v32  ;;  %v7804_v18 = vunpack.c.h.bf16 %v9569_v21 }
 0x32a   : > { %v3531_v35 = vadd.f32 %v3530_v22, %v3393_v2  ;;  %v7807_v14 = vunpack.c.l.bf16 %v9572_v15 }
 0x32b   : > { %v4371_v31 = vpack.c.bf16 %v4339_v45, %v4339_v45  ;;  %v4244_v47 = vadd.f32 %v4186_v61, %v3819_v12  ;;  %4766 = vmatmul.bf16.vlgmr.msrb.gmra.mxu0 %v9492_v9  ;;  %v5380_v17 = vrot.slane %v7804_v18, 1 }
 0x32c   : > { %4903 = vmatmul.bf16.vlgmr.msrb.gmra.mxu1 %v9463_v36  ;;  %v5375_v36 = vrot.slane %v5293_v13, 1 }
 0x32d   : > { %4403 = vst.msk [vmem:[%s8328_s13 + $0x138] sm:$0xf] %vm1560_vm1, %v4371_v31  ;;  %v4276_v25 = vadd.f32 %v9345_v28, %v4244_v47  ;;  %5137 = vmatmul.bf16.vlgmr.msrb.gmra.mxu2 %v7429_v40  ;;  %v4583_v40 = vrot.slane %v4458_v42, 1  ;;  %v5382_v31 = vrot.slane %v7807_v14, 1 }
 0x32e   : > { %5562 = vmatmul.bf16.vlgmr.msrb.gmra.mxu3 %v5474_v10  ;;  %v5376_v48 = vsel %vm324_vm0, %v9535_v34, %v5375_v36  ;;  %v5378_v1 = vsel %vm324_vm0, %v5375_v36, %v5377_v49  ;;  %v5379_v10 = vrot.slane %v7803_v30, 1  ;;  %v6921_v49 = vld [vmem:[%s8045_s24 + $0x200] sm:$0xf] }
 0x32f   : > { %v4308_v60 = vmul.f32 0.2, %v4276_v25  ;;  %v5475_v33 = vpack.c.bf16 %v5378_v1, %v5376_v48  ;;  %v5383_v0 = vsel %vm324_vm0, %v5380_v17, %v5382_v31 }
 0x330   : > { %v3764_v39 = vpop.f32.mrf.mxu2  ;;  %v3395_v43 = vpop.f32.mrf.mxu0 }
 0x331   : > { %v4189_v59 = vpop.f32.mrf.mxu3  ;;  %v4340_v62 = vmax.f32 %v4276_v25, %v4308_v60  ;;  %v3820_v37 = vadd.f32 %v3764_v39, %v3531_v35  ;;  %v3532_v9 = vpop.f32.mrf.mxu1  ;;  %v4585_v25 = vsel %vm324_vm0, %v4583_v40, %v9531_v26  ;;  %v5381_v35 = vsel %vm324_vm0, %v5379_v10, %v5380_v17  ;;  %v7432_v17 = vld [vmem:[%s8045_s24 + $0x210] sm:$0xff] }
 0x332   : > { %v3533_v55 = vadd.f32 %v3532_v9, %v3395_v43  ;;  %v9592_v36 = vpack.c.bf16 %v5383_v0, %v5381_v35 }
 0x333   : > { %v4372_v41 = vpack.c.bf16 %v4340_v62, %v4340_v62  ;;  %v4245_v51 = vadd.f32 %v4189_v59, %v3820_v37  ;;  %v4680_v59 = vpack.c.bf16 %v9545_v6, %v4585_v25  ;;  %v4488_v62 = vpack.c.bf16 %v7799_v63, %v4458_v42  ;;  %v9622_v25 = vld [vmem:[%s8045_s24 + $0x220] sm:$0xff]  }
 0x334   : > { %v4461_v63 = vunpack.c.l.bf16 %v6921_v49  ;;  %v7812_v0 = vunpack.c.h.bf16 %v9622_v25 }
 0x335   : > { %4404 = vst.msk [vmem:[%s8328_s13 + $0x13c] sm:$0xf] %vm1560_vm1, %v4372_v41  ;;  %v4277_v58 = vadd.f32 %v9345_v28, %v4245_v51  ;;  %v6947_v41 = vld [vmem:[%s8045_s24 + $0x204] sm:$0x1] }
 0x336   : > { %v4527_v1 = vunpack.c.l.bf16 %v6947_v41 }
 0x337   : > { %v4309_v38 = vmul.f32 0.2, %v4277_v58 }
 0x338   : > { %v3766_v53 = vpop.f32.mrf.mxu2  ;;  %v3398_v11 = vpop.f32.mrf.mxu0 }
 0x339   : > { %v4191_v57 = vpop.f32.mrf.mxu3  ;;  %v4341_v16 = vmax.f32 %v4277_v58, %v4309_v38  ;;  %v3821_v24 = vadd.f32 %v3766_v53, %v3533_v55  ;;  %v3535_v56 = vpop.f32.mrf.mxu1  ;;  %v7808_v38 = vunpack.c.h.bf16 %v9572_v15  ;;  %v5299_v55 = vunpack.c.l.bf16 %v7187_v19 }
 0x33a   : > { %v3536_v7 = vadd.f32 %v3535_v56, %v3398_v11 }
 0x33b   : > { %v4373_v46 = vpack.c.bf16 %v4341_v16, %v4341_v16  ;;  %v4246_v8 = vadd.f32 %v4191_v57, %v3821_v24  ;;  %4771 = vmatmul.bf16.gmra.mxu0 %v4679_v20  ;;  %v9602_v32 = vrot.slane %v7808_v38, 1 }
 0x33c   : > { %4908 = vmatmul.bf16.gmra.mxu1 %v9466_v29 }
 0x33d   : > { %4405 = vst.msk [vmem:[%s8328_s13 + $0x140] sm:$0xf] %vm1560_vm1, %v4373_v46  ;;  %v4278_v50 = vadd.f32 %v9345_v28, %v4246_v8  ;;  %5142 = vmatmul.bf16.gmra.mxu2 %v7430_v27  ;;  %v4588_v27 = vrot.slane %v4461_v63, 1  ;;  %v5386_v46 = vrot.slane %v5299_v55, 1  ;;  %v9612_v18 = vsel %vm324_vm0, %v5382_v31, %v9602_v32 }
 0x33e   : > { %5567 = vmatmul.bf16.gmra.mxu3 %v5475_v33  ;;  %v4590_v33 = vrot.slane %v4527_v1, 1 }
 0x33f   : > { %v4310_v4 = vmul.f32 0.2, %v4278_v50  ;;  %v4589_v42 = vsel %vm324_vm0, %v9535_v34, %v4588_v27  ;;  %v5387_v14 = vsel %vm324_vm0, %v9602_v32, %v5386_v46  ;;  %v4489_v34 = vpack.c.bf16 %v4461_v63, %v7800_v3 }
 0x340   : > { %v3769_v61 = vpop.f32.mrf.mxu2  ;;  %v3400_v2 = vpop.f32.mrf.mxu0  ;;  %v4591_v30 = vsel %vm324_vm0, %v4588_v27, %v4590_v33  ;;  %v5477_v31 = vpack.c.bf16 %v5387_v14, %v9612_v18  ;;  %v7811_v3 = vunpack.c.l.bf16 %v9622_v25  ;;  %v7191_v27 = vld [vmem:[%s8045_s24 + $0x228] sm:$0xf]  ;;  %v7192_v33 = vld [vmem:[%s8045_s24 + $0x22c] sm:$0x1] }
 0x341   : > { %v4194_v45 = vpop.f32.mrf.mxu3  ;;  %v4342_v12 = vmax.f32 %v4278_v50, %v4310_v4  ;;  %v3822_v29 = vadd.f32 %v3769_v61, %v3536_v7  ;;  %v3537_v22 = vpop.f32.mrf.mxu1 }
 0x342   : > { %v3538_v44 = vadd.f32 %v3537_v22, %v3400_v2 }
 0x343   : > { %v4374_v47 = vpack.c.bf16 %v4342_v12, %v4342_v12  ;;  %v4247_v52 = vadd.f32 %v4194_v45, %v3822_v29  ;;  %v4681_v29 = vpack.c.bf16 %v4591_v30, %v4589_v42  ;;  %v5304_v42 = vunpack.c.l.bf16 %v7192_v33 }
 0x345   : > { %4406 = vst.msk [vmem:[%s8328_s13 + $0x144] sm:$0xf] %vm1560_vm1, %v4374_v47  ;;  %v4279_v5 = vadd.f32 %v9345_v28, %v4247_v52 }
 0x347   : > { %v4311_v13 = vmul.f32 0.2, %v4279_v5 }
 0x348   : > { %v3771_v60 = vpop.f32.mrf.mxu2  ;;  %v3403_v9 = vpop.f32.mrf.mxu0 }
 0x349   : > { %v4196_v39 = vpop.f32.mrf.mxu3  ;;  %v4343_v37 = vmax.f32 %v4279_v5, %v4311_v13  ;;  %v3823_v43 = vadd.f32 %v3771_v60, %v3538_v44  ;;  %v3540_v26 = vpop.f32.mrf.mxu1  ;;  %v7188_v5 = vld [vmem:[%s8045_s24 + $0x21c] sm:$0xf] }
 0x34a   : > { %v3541_v48 = vadd.f32 %v3540_v26, %v3403_v9  ;;  %v5300_v13 = vunpack.c.l.bf16 %v7188_v5  ;;  %v9631_v26 = vrot.slane %v7811_v3, 1 }
 0x34b   : > { %v4375_v51 = vpack.c.bf16 %v4343_v37, %v4343_v37  ;;  %v4248_v58 = vadd.f32 %v4196_v39, %v3823_v43  ;;  %4776 = vmatmul.bf16.gmra.mxu0 %v4680_v59 }
 0x34c   : > { %4913 = vmatmul.bf16.gmra.mxu1 %v4488_v62  ;;  %v5388_v9 = vrot.slane %v5300_v13, 1 }
 0x34d   : > { %4407 = vst.msk [vmem:[%s8328_s13 + $0x148] sm:$0xf] %vm1560_vm1, %v4375_v51  ;;  %v4280_v6 = vadd.f32 %v9345_v28, %v4248_v58  ;;  %5147 = vmatmul.bf16.gmra.mxu2 %v7431_v23  ;;  %v9635_v23 = vrot.slane %v7812_v0, 1 }
 0x34e   : > { %5572 = vmatmul.bf16.gmra.mxu3 %v9592_v36  ;;  %v5390_v58 = vsel %vm324_vm0, %v5388_v9, %v9631_v26  ;;  %v9674_v9 = vld [vmem:[%s8045_s24 + $0x230] sm:$0xff]  }
 0x34f   : > { %v4312_v53 = vmul.f32 0.2, %v4280_v6  ;;  %v9645_v19 = vsel %vm324_vm0, %v9631_v26, %v9635_v23 }
 0x350   : > { %v3774_v57 = vpop.f32.mrf.mxu2  ;;  %v3405_v11 = vpop.f32.mrf.mxu0 }
 0x351   : > { %v4199_v20 = vpop.f32.mrf.mxu3  ;;  %v4344_v16 = vmax.f32 %v4280_v6, %v4312_v53  ;;  %v3824_v24 = vadd.f32 %v3774_v57, %v3541_v48  ;;  %v3542_v56 = vpop.f32.mrf.mxu1 }
 0x352   : > { %v3543_v61 = vadd.f32 %v3542_v56, %v3405_v11 }
 0x353   : > { %v4376_v8 = vpack.c.bf16 %v4344_v16, %v4344_v16  ;;  %v4249_v50 = vadd.f32 %v4199_v20, %v3824_v24  ;;  %v7433_v20 = vld [vmem:[%s8045_s24 + $0x21c] sm:$0xff]  ;;  %v5478_v16 = vpack.c.bf16 %v9645_v19, %v5390_v58  ;;  %v6948_v24 = vld [vmem:[%s8045_s24 + $0x218] sm:$0x1]  ;;  %v7815_v58 = vunpack.c.l.bf16 %v9674_v9 }
 0x355   : > { %4408 = vst.msk [vmem:[%s8328_s13 + $0x14c] sm:$0xf] %vm1560_vm1, %v4376_v8  ;;  %v4281_v7 = vadd.f32 %v9345_v28, %v4249_v50  ;;  %v4528_v50 = vunpack.c.l.bf16 %v6948_v24 }
 0x357   : > { %v4313_v4 = vmul.f32 0.2, %v4281_v7 }
 0x358   : > { %v3776_v45 = vpop.f32.mrf.mxu2  ;;  %v3408_v40 = vpop.f32.mrf.mxu0 }
 0x359   : > { %v4201_v12 = vpop.f32.mrf.mxu3  ;;  %v4345_v2 = vmax.f32 %v4281_v7, %v4313_v4  ;;  %v3825_v22 = vadd.f32 %v3776_v45, %v3543_v61  ;;  %v3545_v10 = vpop.f32.mrf.mxu1  ;;  %v5303_v7 = vunpack.c.l.bf16 %v7191_v27 }
 0x35a   : > { %v3546_v54 = vadd.f32 %v3545_v10, %v3408_v40 }
 0x35b   : > { %v4377_v47 = vpack.c.bf16 %v4345_v2, %v4345_v2  ;;  %v4250_v52 = vadd.f32 %v4201_v12, %v3825_v22  ;;  %4781 = vmatmul.bf16.gmra.mxu0 %v4681_v29  ;;  %v4599_v29 = vrot.slane %v4528_v50, 1 }
 0x35c   : > { %4918 = vmatmul.bf16.gmra.mxu1 %v4489_v34  ;;  %v5395_v34 = vrot.slane %v5304_v42, 1 }
 0x35d   : > { %4409 = vst.msk [vmem:[%s8328_s13 + $0x150] sm:$0xf] %vm1560_vm1, %v4377_v47  ;;  %v4282_v35 = vadd.f32 %v9345_v28, %v4250_v52  ;;  %5152 = vmatmul.bf16.gmra.mxu2 %v7432_v17  ;;  %v4600_v10 = vsel %vm324_vm0, %v9602_v32, %v4599_v29  ;;  %v7435_v29 = vld [vmem:[%s8045_s24 + $0x230] sm:$0xff] }
 0x35e   : > { %5577 = vmatmul.bf16.gmra.mxu3 %v5477_v31 }
 0x35f   : > { %v4314_v44 = vmul.f32 0.2, %v4282_v35 }
 0x360   : > { %v3779_v60 = vpop.f32.mrf.mxu2  ;;  %v3410_v37 = vpop.f32.mrf.mxu0 }
 0x361   : > { %v4204_v39 = vpop.f32.mrf.mxu3  ;;  %v4346_v59 = vmax.f32 %v4282_v35, %v4314_v44  ;;  %v3826_v62 = vadd.f32 %v3779_v60, %v3546_v54  ;;  %v3547_v43 = vpop.f32.mrf.mxu1  ;;  %v4683_v54 = vpack.c.bf16 %v4600_v10, %v9612_v18  ;;  %v7197_v10 = vld [vmem:[%s8045_s24 + $0x240] sm:$0x1] }
 0x362   : > { %v3548_v48 = vadd.f32 %v3547_v43, %v3410_v37 }
 0x363   : > { %v4378_v49 = vpack.c.bf16 %v4346_v59, %v4346_v59  ;;  %v4251_v41 = vadd.f32 %v4204_v39, %v3826_v62  ;;  %v7434_v59 = vld [vmem:[%s8045_s24 + $0x224] sm:$0xff]  ;;  %v6926_v62 = vld [vmem:[%s8045_s24 + $0x21c] sm:$0xf] }
 0x365   : > { %4410 = vst.msk [vmem:[%s8328_s13 + $0x154] sm:$0xf] %vm1560_vm1, %v4378_v49  ;;  %v4283_v51 = vadd.f32 %v9345_v28, %v4251_v41  ;;  %v9677_v49 = vld [vmem:[%s8045_s24 + $0x238] sm:$0xff]  }
 0x367   : > { %v4315_v6 = vmul.f32 0.2, %v4283_v51 }
 0x368   : > { %v3781_v63 = vpop.f32.mrf.mxu2  ;;  %v3413_v53 = vpop.f32.mrf.mxu0 }
 0x369   : > { %v4206_v1 = vpop.f32.mrf.mxu3  ;;  %v4347_v38 = vmax.f32 %v4283_v51, %v4315_v6  ;;  %v3827_v55 = vadd.f32 %v3781_v63, %v3548_v48  ;;  %v3550_v57 = vpop.f32.mrf.mxu1  ;;  %v4466_v51 = vunpack.c.l.bf16 %v6926_v62  ;;  %v7816_v6 = vunpack.c.h.bf16 %v9674_v9 }
 0x36a   : > { %v3551_v8 = vadd.f32 %v3550_v57, %v3413_v53  ;;  %v7819_v48 = vunpack.c.l.bf16 %v9677_v49 }
 0x36b   : > { %v4379_v11 = vpack.c.bf16 %v4347_v38, %v4347_v38  ;;  %v4252_v56 = vadd.f32 %v4206_v1, %v3827_v55  ;;  %4786 = vmatmul.bf16.gmra.mxu0 %v9592_v36  ;;  %v5398_v24 = vrot.slane %v7816_v6, 1 }
 0x36c   : > { %4923 = vmatmul.bf16.gmra.mxu1 %v9569_v21  ;;  %v5393_v21 = vrot.slane %v5303_v7, 1 }
 0x36d   : > { %4411 = vst.msk [vmem:[%s8328_s13 + $0x158] sm:$0xf] %vm1560_vm1, %v4379_v11  ;;  %v4284_v46 = vadd.f32 %v9345_v28, %v4252_v56  ;;  %5157 = vmatmul.bf16.gmra.mxu2 %v7433_v20  ;;  %v9662_v28 = vld [vmem:[%s9980_s2] ss:$0 sm:$0xff]  ;;  %v4601_v20 = vrot.slane %v4466_v51, 1  ;;  %v5400_v11 = vrot.slane %v7819_v48, 1 }
 0x36e   : > { %5582 = vmatmul.bf16.gmra.mxu3 %v5478_v16  ;;  %v5394_v17 = vsel %vm324_vm0, %v9635_v23, %v5393_v21  ;;  %v5396_v31 = vsel %vm324_vm0, %v5393_v21, %v5395_v34  ;;  %v5397_v16 = vrot.slane %v7815_v58, 1  ;;  %v6929_v34 = vld [vmem:[%s8045_s24 + $0x228] sm:$0xf] }
 0x36f   : > { %v4316_v30 = vmul.f32 0.2, %v4284_v46  ;;  %v5479_v32 = vpack.c.bf16 %v5396_v31, %v5394_v17  ;;  %v5401_v50 = vsel %vm324_vm0, %v5398_v24, %v5400_v11 }
 0x370   : > { %v3784_v14 = vpop.f32.mrf.mxu2  ;;  %v3415_v12 = vpop.f32.mrf.mxu0 }
 0x371   : > { %v4209_v4 = vpop.f32.mrf.mxu3  ;;  %v4348_v61 = vmax.f32 %v4284_v46, %v4316_v30  ;;  %v3828_v45 = vadd.f32 %v3784_v14, %v3551_v8  ;;  %v3552_v36 = vpop.f32.mrf.mxu1  ;;  %v4603_v46 = vsel %vm324_vm0, %v4601_v20, %v9631_v26  ;;  %v5399_v8 = vsel %vm324_vm0, %v5397_v16, %v5398_v24  ;;  %v7436_v24 = vld [vmem:[%s8045_s24 + $0x238] sm:$0xff] }
 0x372   : > { %v3553_v52 = vadd.f32 %v3552_v36, %v3415_v12  ;;  %v9697_v21 = vpack.c.bf16 %v5401_v50, %v5399_v8 }
 0x373   : > { %v4380_v2 = vpack.c.bf16 %v4348_v61, %v4348_v61  ;;  %v4253_v22 = vadd.f32 %v4209_v4, %v3828_v45  ;;  %v4684_v4 = vpack.c.bf16 %v9645_v19, %v4603_v46  ;;  %v4492_v61 = vpack.c.bf16 %v7811_v3, %v4466_v51  ;;  %v9727_v46 = vld [vmem:[%s8045_s24 + $0x248] sm:$0xff]  }
 0x374   : > { %v4469_v3 = vunpack.c.l.bf16 %v6929_v34  ;;  %v7824_v50 = vunpack.c.h.bf16 %v9727_v46 }
 0x375   : > { %4412 = vst.msk [vmem:[%s8328_s13 + $0x15c] sm:$0xf] %vm1560_vm1, %v4380_v2  ;;  %v4285_v40 = vadd.f32 %v9662_v28, %v4253_v22  ;;  %v6949_v2 = vld [vmem:[%s8045_s24 + $0x22c] sm:$0x1] }
 0x376   : > { %v4529_v31 = vunpack.c.l.bf16 %v6949_v2 }
 0x377   : > { %v4317_v47 = vmul.f32 0.2, %v4285_v40 }
 0x378   : > { %v3786_v5 = vpop.f32.mrf.mxu2  ;;  %v3418_v60 = vpop.f32.mrf.mxu0 }
 0x379   : > { %v4211_v35 = vpop.f32.mrf.mxu3  ;;  %v4349_v13 = vmax.f32 %v4285_v40, %v4317_v47  ;;  %v3829_v44 = vadd.f32 %v3786_v5, %v3553_v52  ;;  %v3555_v39 = vpop.f32.mrf.mxu1  ;;  %v7820_v47 = vunpack.c.h.bf16 %v9677_v49  ;;  %v5309_v52 = vunpack.c.l.bf16 %v7197_v10 }
 0x37a   : > { %v3556_v41 = vadd.f32 %v3555_v39, %v3418_v60 }
 0x37b   : > { %v4381_v37 = vpack.c.bf16 %v4349_v13, %v4349_v13  ;;  %v4254_v43 = vadd.f32 %v4211_v35, %v3829_v44  ;;  %4791 = vmatmul.bf16.gmra.mxu0 %v4683_v54  ;;  %v9707_v62 = vrot.slane %v7820_v47, 1 }
 0x37c   : > { %4928 = vmatmul.bf16.gmra.mxu1 %v9572_v15 }
 0x37d   : > { %4413 = vst.msk [vmem:[%s8328_s13 + $0x160] sm:$0xf] %vm1560_vm1, %v4381_v37  ;;  %v4286_v18 = vadd.f32 %v9662_v28, %v4254_v43  ;;  %5162 = vmatmul.bf16.gmra.mxu2 %v7434_v59  ;;  %v4606_v59 = vrot.slane %v4469_v3, 1  ;;  %v5404_v37 = vrot.slane %v5309_v52, 1  ;;  %v9717_v6 = vsel %vm324_vm0, %v5400_v11, %v9707_v62 }
 0x37e   : > { %5587 = vmatmul.bf16.gmra.mxu3 %v5479_v32  ;;  %v4608_v32 = vrot.slane %v4529_v31, 1 }
 0x37f   : > { %v4318_v63 = vmul.f32 0.2, %v4286_v18  ;;  %v4607_v51 = vsel %vm324_vm0, %v9635_v23, %v4606_v59  ;;  %v5405_v48 = vsel %vm324_vm0, %v9707_v62, %v5404_v37  ;;  %v4493_v23 = vpack.c.bf16 %v4469_v3, %v7812_v0 }
 0x380   : > { %v3789_v1 = vpop.f32.mrf.mxu2  ;;  %v3420_v53 = vpop.f32.mrf.mxu0  ;;  %v4609_v58 = vsel %vm324_vm0, %v4606_v59, %v4608_v32  ;;  %v5481_v11 = vpack.c.bf16 %v5405_v48, %v9717_v6  ;;  %v7823_v0 = vunpack.c.l.bf16 %v9727_v46  ;;  %v7201_v59 = vld [vmem:[%s8045_s24 + $0x250] sm:$0xf]  ;;  %v7202_v32 = vld [vmem:[%s8045_s24 + $0x254] sm:$0x1] }
 0x381   : > { %v4214_v38 = vpop.f32.mrf.mxu3  ;;  %v4350_v55 = vmax.f32 %v4286_v18, %v4318_v63  ;;  %v3830_v15 = vadd.f32 %v3789_v1, %v3556_v41  ;;  %v3557_v57 = vpop.f32.mrf.mxu1 }
 0x382   : > { %v3558_v42 = vadd.f32 %v3557_v57, %v3420_v53 }
 0x383   : > { %v4382_v56 = vpack.c.bf16 %v4350_v55, %v4350_v55  ;;  %v4255_v27 = vadd.f32 %v4214_v38, %v3830_v15  ;;  %v4685_v15 = vpack.c.bf16 %v4609_v58, %v4607_v51  ;;  %v5314_v51 = vunpack.c.l.bf16 %v7202_v32 }
 0x385   : > { %4414 = vst.msk [vmem:[%s8328_s13 + $0x164] sm:$0xf] %vm1560_vm1, %v4382_v56  ;;  %v4287_v33 = vadd.f32 %v9662_v28, %v4255_v27 }
 0x387   : > { %v4319_v7 = vmul.f32 0.2, %v4287_v33 }
 0x388   : > { %v3791_v30 = vpop.f32.mrf.mxu2  ;;  %v3423_v36 = vpop.f32.mrf.mxu0 }
 0x389   : > { %v4216_v14 = vpop.f32.mrf.mxu3  ;;  %v4351_v45 = vmax.f32 %v4287_v33, %v4319_v7  ;;  %v3831_v12 = vadd.f32 %v3791_v30, %v3558_v42  ;;  %v3560_v26 = vpop.f32.mrf.mxu1  ;;  %v7198_v33 = vld [vmem:[%s8045_s24 + $0x244] sm:$0xf] }
 0x38a   : > { %v3561_v17 = vadd.f32 %v3560_v26, %v3423_v36  ;;  %v5310_v7 = vunpack.c.l.bf16 %v7198_v33  ;;  %v9736_v26 = vrot.slane %v7823_v0, 1 }
 0x38b   : > { %v4383_v22 = vpack.c.bf16 %v4351_v45, %v4351_v45  ;;  %v4256_v40 = vadd.f32 %v4216_v14, %v3831_v12  ;;  %4796 = vmatmul.bf16.gmra.mxu0 %v4684_v4 }
 0x38c   : > { %4933 = vmatmul.bf16.gmra.mxu1 %v4492_v61  ;;  %v5406_v36 = vrot.slane %v5310_v7, 1 }
 0x38d   : > { %4415 = vst.msk [vmem:[%s8328_s13 + $0x168] sm:$0xf] %vm1560_vm1, %v4383_v22  ;;  %v4288_v19 = vadd.f32 %v9662_v28, %v4256_v40  ;;  %5167 = vmatmul.bf16.gmra.mxu2 %v7435_v29  ;;  %v9740_v29 = vrot.slane %v7824_v50, 1 }
 0x38e   : > { %5592 = vmatmul.bf16.gmra.mxu3 %v9697_v21  ;;  %v5408_v40 = vsel %vm324_vm0, %v5406_v36, %v9736_v26  ;;  %v9774_v36 = vld [vmem:[%s8045_s24 + $0x258] sm:$0xff]  }
 0x38f   : > { %v4320_v5 = vmul.f32 0.2, %v4288_v19  ;;  %v9750_v10 = vsel %vm324_vm0, %v9736_v26, %v9740_v29 }
 0x390   : > { %v3794_v35 = vpop.f32.mrf.mxu2  ;;  %v3425_v60 = vpop.f32.mrf.mxu0 }
 0x391   : > { %v4219_v54 = vpop.f32.mrf.mxu3  ;;  %v4352_v13 = vmax.f32 %v4288_v19, %v4320_v5  ;;  %v3832_v44 = vadd.f32 %v3794_v35, %v3561_v17  ;;  %v3562_v39 = vpop.f32.mrf.mxu1 }
 0x392   : > { %v3563_v1 = vadd.f32 %v3562_v39, %v3425_v60 }
 0x393   : > { %v4384_v43 = vpack.c.bf16 %v4352_v13, %v4352_v13  ;;  %v4257_v18 = vadd.f32 %v4219_v54, %v3832_v44  ;;  %v7437_v54 = vld [vmem:[%s8045_s24 + $0x244] sm:$0xff]  ;;  %v5482_v13 = vpack.c.bf16 %v9750_v10, %v5408_v40  ;;  %v6950_v44 = vld [vmem:[%s8045_s24 + $0x240] sm:$0x1]  ;;  %v7827_v40 = vunpack.c.l.bf16 %v9774_v36 }
 0x395   : > { %4416 = vst.msk [vmem:[%s8328_s13 + $0x16c] sm:$0xf] %vm1560_vm1, %v4384_v43  ;;  %v4289_v41 = vadd.f32 %v9662_v28, %v4257_v18  ;;  %v4530_v18 = vunpack.c.l.bf16 %v6950_v44 }
 0x397   : > { %v4321_v63 = vmul.f32 0.2, %v4289_v41 }
 0x398   : > { %v3796_v38 = vpop.f32.mrf.mxu2  ;;  %v3428_v20 = vpop.f32.mrf.mxu0 }
 0x399   : > { %v4221_v55 = vpop.f32.mrf.mxu3  ;;  %v4353_v53 = vmax.f32 %v4289_v41, %v4321_v63  ;;  %v3833_v57 = vadd.f32 %v3796_v38, %v3563_v1  ;;  %v3565_v16 = vpop.f32.mrf.mxu1  ;;  %v5313_v41 = vunpack.c.l.bf16 %v7201_v59 }
 0x39a   : > { %v3566_v25 = vadd.f32 %v3565_v16, %v3428_v20 }
 0x39b   : > { %v4385_v56 = vpack.c.bf16 %v4353_v53, %v4353_v53  ;;  %v4258_v27 = vadd.f32 %v4221_v55, %v3833_v57  ;;  %4801 = vmatmul.bf16.gmra.mxu0 %v4685_v15  ;;  %v4617_v15 = vrot.slane %v4530_v18, 1 }
 0x39c   : > { %4938 = vmatmul.bf16.gmra.mxu1 %v4493_v23  ;;  %v5413_v23 = vrot.slane %v5314_v51, 1 }
 0x39d   : > { %4417 = vst.msk [vmem:[%s8328_s13 + $0x170] sm:$0xf] %vm1560_vm1, %v4385_v56  ;;  %v4290_v8 = vadd.f32 %v9662_v28, %v4258_v27  ;;  %5172 = vmatmul.bf16.gmra.mxu2 %v7436_v24  ;;  %v4618_v16 = vsel %vm324_vm0, %v9707_v62, %v4617_v15  ;;  %v7439_v15 = vld [vmem:[%s8045_s24 + $0x258] sm:$0xff] }
 0x39e   : > { %5597 = vmatmul.bf16.gmra.mxu3 %v5481_v11 }
 0x39f   : > { %v4322_v42 = vmul.f32 0.2, %v4290_v8 }
 0x3a0   : > { %v3799_v30 = vpop.f32.mrf.mxu2  ;;  %v3430_v45 = vpop.f32.mrf.mxu0 }
 0x3a1   : > { %v4224_v14 = vpop.f32.mrf.mxu3  ;;  %v4354_v4 = vmax.f32 %v4290_v8, %v4322_v42  ;;  %v3834_v61 = vadd.f32 %v3799_v30, %v3566_v25  ;;  %v3567_v12 = vpop.f32.mrf.mxu1  ;;  %v4687_v25 = vpack.c.bf16 %v4618_v16, %v9717_v6  ;;  %v7207_v16 = vld [vmem:[%s8045_s24 + $0x268] sm:$0x1] }
 0x3a2   : > { %v3568_v17 = vadd.f32 %v3567_v12, %v3430_v45 }
 0x3a3   : > { %v4386_v34 = vpack.c.bf16 %v4354_v4, %v4354_v4  ;;  %v4259_v2 = vadd.f32 %v4224_v14, %v3834_v61  ;;  %v7438_v4 = vld [vmem:[%s8045_s24 + $0x24c] sm:$0xff]  ;;  %v6934_v61 = vld [vmem:[%s8045_s24 + $0x244] sm:$0xf] }
 0x3a5   : > { %4418 = vst.msk [vmem:[%s8328_s13 + $0x174] sm:$0xf] %vm1560_vm1, %v4386_v34  ;;  %v4291_v22 = vadd.f32 %v9662_v28, %v4259_v2  ;;  %v9777_v34 = vld [vmem:[%s8045_s24 + $0x260] sm:$0xff]  }
 0x3a7   : > { %v4323_v19 = vmul.f32 0.2, %v4291_v22 }
 0x3a8   : > { %v3801_v3 = vpop.f32.mrf.mxu2  ;;  %v4767_v5 = vpop.f32.mrf.mxu0 }
 0x3a9   : > { %v4226_v31 = vpop.f32.mrf.mxu3  ;;  %v4355_v47 = vmax.f32 %v4291_v22, %v4323_v19  ;;  %v3835_v52 = vadd.f32 %v3801_v3, %v3568_v17  ;;  %v4904_v35 = vpop.f32.mrf.mxu1  ;;  %v4474_v22 = vunpack.c.l.bf16 %v6934_v61  ;;  %v7828_v19 = vunpack.c.h.bf16 %v9774_v36 }
 0x3aa   : > { %v4905_v43 = vadd.f32 %v4904_v35, %v4767_v5  ;;  %v7831_v17 = vunpack.c.l.bf16 %v9777_v34 }
 0x3ab   : > { %v4387_v60 = vpack.c.bf16 %v4355_v47, %v4355_v47  ;;  %v4260_v39 = vadd.f32 %v4226_v31, %v3835_v52  ;;  %4806 = vmatmul.bf16.gmra.mxu0 %v9697_v21  ;;  %v5416_v44 = vrot.slane %v7828_v19, 1 }
 0x3ac   : > { %4943 = vmatmul.bf16.gmra.mxu1 %v9674_v9  ;;  %v5411_v9 = vrot.slane %v5313_v41, 1 }
 0x3ad   : > { %4419 = vst.msk [vmem:[%s8328_s13 + $0x178] sm:$0xf] %vm1560_vm1, %v4387_v60  ;;  %v4292_v37 = vadd.f32 %v9662_v28, %v4260_v39  ;;  %5177 = vmatmul.bf16.gmra.mxu2 %v7437_v54  ;;  %v4619_v54 = vrot.slane %v4474_v22, 1  ;;  %v5418_v60 = vrot.slane %v7831_v17, 1 }
 0x3ae   : > { %5602 = vmatmul.bf16.gmra.mxu3 %v5482_v13  ;;  %v5412_v24 = vsel %vm324_vm0, %v9740_v29, %v5411_v9  ;;  %v5414_v11 = vsel %vm324_vm0, %v5411_v9, %v5413_v23  ;;  %v5415_v13 = vrot.slane %v7827_v40, 1  ;;  %v6937_v23 = vld [vmem:[%s8045_s24 + $0x250] sm:$0xf] }
 0x3af   : > { %v4324_v58 = vmul.f32 0.2, %v4292_v37  ;;  %v5483_v62 = vpack.c.bf16 %v5414_v11, %v5412_v24  ;;  %v5419_v18 = vsel %vm324_vm0, %v5416_v44, %v5418_v60 }
 0x3b0   : > { %v5138_v48 = vpop.f32.mrf.mxu2  ;;  %v4769_v55 = vpop.f32.mrf.mxu0 }
 0x3b1   : > { %v5563_v63 = vpop.f32.mrf.mxu3  ;;  %v4356_v1 = vmax.f32 %v4292_v37, %v4324_v58  ;;  %v5218_v38 = vadd.f32 %v5138_v48, %v4905_v43  ;;  %v4906_v21 = vpop.f32.mrf.mxu1  ;;  %v4621_v37 = vsel %vm324_vm0, %v4619_v54, %v9736_v26  ;;  %v5417_v43 = vsel %vm324_vm0, %v5415_v13, %v5416_v44  ;;  %v7440_v44 = vld [vmem:[%s8045_s24 + $0x260] sm:$0xff] }
 0x3b2   : > { %v4907_v27 = vadd.f32 %v4906_v21, %v4769_v55  ;;  %v9797_v9 = vpack.c.bf16 %v5419_v18, %v5417_v43 }
 0x3b3   : > { %v4388_v53 = vpack.c.bf16 %v4356_v1, %v4356_v1  ;;  %v5643_v57 = vadd.f32 %v5563_v63, %v5218_v38  ;;  %v4688_v63 = vpack.c.bf16 %v9750_v10, %v4621_v37  ;;  %v4496_v1 = vpack.c.bf16 %v7823_v0, %v4474_v22  ;;  %v9827_v37 = vld [vmem:[%s8045_s24 + $0x270] sm:$0xff]  }
 0x3b4   : > { %v4477_v0 = vunpack.c.l.bf16 %v6937_v23  ;;  %v7836_v18 = vunpack.c.h.bf16 %v9827_v37 }
 0x3b5   : > { %4420 = vst.msk [vmem:[%s8328_s13 + $0x17c] sm:$0xf] %vm1560_vm1, %v4388_v53  ;;  %v5675_v20 = vadd.f32 %v9662_v28, %v5643_v57  ;;  %v6951_v53 = vld [vmem:[%s8045_s24 + $0x254] sm:$0x1] }
 0x3b6   : > { %v4531_v11 = vunpack.c.l.bf16 %v6951_v53 }
 0x3b7   : > { %v5707_v56 = vmul.f32 0.2, %v5675_v20 }
 0x3b8   : > { %v5140_v33 = vpop.f32.mrf.mxu2  ;;  %v4772_v30 = vpop.f32.mrf.mxu0 }
 0x3b9   : > { %v5565_v8 = vpop.f32.mrf.mxu3  ;;  %v5739_v7 = vmax.f32 %v5675_v20, %v5707_v56  ;;  %v5219_v42 = vadd.f32 %v5140_v33, %v4907_v27  ;;  %v4909_v14 = vpop.f32.mrf.mxu1  ;;  %v7832_v56 = vunpack.c.h.bf16 %v9777_v34  ;;  %v5319_v27 = vunpack.c.l.bf16 %v7207_v16 }
 0x3ba   : > { %v4910_v2 = vadd.f32 %v4909_v14, %v4772_v30 }
 0x3bb   : > { %v5771_v45 = vpack.c.bf16 %v5739_v7, %v5739_v7  ;;  %v5644_v12 = vadd.f32 %v5565_v8, %v5219_v42  ;;  %4811 = vmatmul.bf16.gmra.mxu0 %v4687_v25  ;;  %v9807_v61 = vrot.slane %v7832_v56, 1 }
 0x3bc   : > { %4948 = vmatmul.bf16.gmra.mxu1 %v9677_v49 }
 0x3bd   : > { %5803 = vst.msk [vmem:[%s8328_s13 + $0x180] sm:$0xf] %vm1560_vm1, %v5771_v45  ;;  %v5676_v6 = vadd.f32 %v9662_v28, %v5644_v12  ;;  %5182 = vmatmul.bf16.gmra.mxu2 %v7438_v4  ;;  %v4624_v4 = vrot.slane %v4477_v0, 1  ;;  %v5422_v45 = vrot.slane %v5319_v27, 1  ;;  %v9817_v19 = vsel %vm324_vm0, %v5418_v60, %v9807_v61 }
 0x3be   : > { %5607 = vmatmul.bf16.gmra.mxu3 %v5483_v62  ;;  %v4626_v62 = vrot.slane %v4531_v11, 1 }
 0x3bf   : > { %v5708_v3 = vmul.f32 0.2, %v5676_v6  ;;  %v4625_v22 = vsel %vm324_vm0, %v9740_v29, %v4624_v4  ;;  %v5423_v17 = vsel %vm324_vm0, %v9807_v61, %v5422_v45  ;;  %v4497_v29 = vpack.c.bf16 %v4477_v0, %v7824_v50 }
 0x3c0   : > { %v5143_v31 = vpop.f32.mrf.mxu2  ;;  %v4774_v5 = vpop.f32.mrf.mxu0  ;;  %v4627_v40 = vsel %vm324_vm0, %v4624_v4, %v4626_v62  ;;  %v5485_v60 = vpack.c.bf16 %v5423_v17, %v9817_v19  ;;  %v7835_v50 = vunpack.c.l.bf16 %v9827_v37  ;;  %v7211_v4 = vld [vmem:[%s8045_s24 + $0x278] sm:$0xf]  ;;  %v7212_v62 = vld [vmem:[%s8045_s24 + $0x27c] sm:$0x1] }
 0x3c1   : > { %v5568_v47 = vpop.f32.mrf.mxu3  ;;  %v5740_v52 = vmax.f32 %v5676_v6, %v5708_v3  ;;  %v5220_v49 = vadd.f32 %v5143_v31, %v4910_v2  ;;  %v4911_v35 = vpop.f32.mrf.mxu1 }
 0x3c2   : > { %v4912_v51 = vadd.f32 %v4911_v35, %v4774_v5 }
 0x3c3   : > { %v5772_v39 = vpack.c.bf16 %v5740_v52, %v5740_v52  ;;  %v5645_v59 = vadd.f32 %v5568_v47, %v5220_v49  ;;  %v4689_v49 = vpack.c.bf16 %v4627_v40, %v4625_v22  ;;  %v5324_v22 = vunpack.c.l.bf16 %v7212_v62 }
 0x3c5   : > { %5804 = vst.msk [vmem:[%s8328_s13 + $0x184] sm:$0xf] %vm1560_vm1, %v5772_v39  ;;  %v5677_v32 = vadd.f32 %v9662_v28, %v5645_v59 }
 0x3c7   : > { %v5709_v41 = vmul.f32 0.2, %v5677_v32 }
 0x3c8   : > { %v5145_v58 = vpop.f32.mrf.mxu2  ;;  %v4777_v21 = vpop.f32.mrf.mxu0 }
 0x3c9   : > { %v5570_v48 = vpop.f32.mrf.mxu3  ;;  %v5741_v38 = vmax.f32 %v5677_v32, %v5709_v41  ;;  %v5221_v55 = vadd.f32 %v5145_v58, %v4912_v51  ;;  %v4914_v26 = vpop.f32.mrf.mxu1  ;;  %v7208_v32 = vld [vmem:[%s8045_s24 + $0x26c] sm:$0xf] }
 0x3ca   : > { %v4915_v24 = vadd.f32 %v4914_v26, %v4777_v21  ;;  %v5320_v41 = vunpack.c.l.bf16 %v7208_v32  ;;  %v9836_v26 = vrot.slane %v7835_v50, 1 }
 0x3cb   : > { %v5773_v57 = vpack.c.bf16 %v5741_v38, %v5741_v38  ;;  %v5646_v20 = vadd.f32 %v5570_v48, %v5221_v55  ;;  %4816 = vmatmul.bf16.gmra.mxu0 %v4688_v63 }
 0x3cc   : > { %4953 = vmatmul.bf16.gmra.mxu1 %v4496_v1  ;;  %v5424_v21 = vrot.slane %v5320_v41, 1 }
 0x3cd   : > { %5805 = vst.msk [vmem:[%s8328_s13 + $0x188] sm:$0xf] %vm1560_vm1, %v5773_v57  ;;  %v5678_v10 = vadd.f32 %v9662_v28, %v5646_v20  ;;  %5187 = vmatmul.bf16.gmra.mxu2 %v7439_v15  ;;  %v9840_v15 = vrot.slane %v7836_v18, 1 }
 0x3ce   : > { %5612 = vmatmul.bf16.gmra.mxu3 %v9797_v9  ;;  %v5426_v20 = vsel %vm324_vm0, %v5424_v21, %v9836_v26  ;;  %v7938_v21 = vld [vmem:[%s8045_s24 + $0x280] sm:$0xff]  }
 0x3cf   : > { %v5710_v33 = vmul.f32 0.2, %v5678_v10  ;;  %v9850_v16 = vsel %vm324_vm0, %v9836_v26, %v9840_v15 }
 0x3d0   : > { %v5148_v8 = vpop.f32.mrf.mxu2  ;;  %v4779_v30 = vpop.f32.mrf.mxu0 }
 0x3d1   : > { %v5573_v25 = vpop.f32.mrf.mxu3  ;;  %v5742_v7 = vmax.f32 %v5678_v10, %v5710_v33  ;;  %v5222_v42 = vadd.f32 %v5148_v8, %v4915_v24  ;;  %v4916_v14 = vpop.f32.mrf.mxu1 }
 0x3d2   : > { %v4917_v31 = vadd.f32 %v4916_v14, %v4779_v30 }
 0x3d3   : > { %v5774_v12 = vpack.c.bf16 %v5742_v7, %v5742_v7  ;;  %v5647_v6 = vadd.f32 %v5573_v25, %v5222_v42  ;;  %v7441_v25 = vld [vmem:[%s8045_s24 + $0x26c] sm:$0xff]  ;;  %v5486_v7 = vpack.c.bf16 %v9850_v16, %v5426_v20  ;;  %v6952_v42 = vld [vmem:[%s8045_s24 + $0x268] sm:$0x1]  ;;  %v7839_v20 = vunpack.c.l.bf16 %v7938_v21 }
 0x3d5   : > { %5806 = vst.msk [vmem:[%s8328_s13 + $0x18c] sm:$0xf] %vm1560_vm1, %v5774_v12  ;;  %v5679_v2 = vadd.f32 %v9662_v28, %v5647_v6  ;;  %v4532_v6 = vunpack.c.l.bf16 %v6952_v42 }
 0x3d7   : > { %v5711_v3 = vmul.f32 0.2, %v5679_v2 }
 0x3d8   : > { %v5150_v47 = vpop.f32.mrf.mxu2  ;;  %v4782_v54 = vpop.f32.mrf.mxu0 }
 0x3d9   : > { %v5575_v52 = vpop.f32.mrf.mxu3  ;;  %v5743_v5 = vmax.f32 %v5679_v2, %v5711_v3  ;;  %v5223_v35 = vadd.f32 %v5150_v47, %v4917_v31  ;;  %v4919_v13 = vpop.f32.mrf.mxu1  ;;  %v5323_v2 = vunpack.c.l.bf16 %v7211_v4 }
 0x3da   : > { %v4920_v46 = vadd.f32 %v4919_v13, %v4782_v54 }
 0x3db   : > { %v5775_v39 = vpack.c.bf16 %v5743_v5, %v5743_v5  ;;  %v5648_v59 = vadd.f32 %v5575_v52, %v5223_v35  ;;  %4821 = vmatmul.bf16.gmra.mxu0 %v4689_v49  ;;  %v4635_v49 = vrot.slane %v4532_v6, 1 }
 0x3dc   : > { %4958 = vmatmul.bf16.gmra.mxu1 %v4497_v29  ;;  %v5431_v29 = vrot.slane %v5324_v22, 1 }
 0x3dd   : > { %5807 = vst.msk [vmem:[%s8328_s13 + $0x190] sm:$0xf] %vm1560_vm1, %v5775_v39  ;;  %v5680_v43 = vadd.f32 %v9662_v28, %v5648_v59  ;;  %5192 = vmatmul.bf16.gmra.mxu2 %v7440_v44  ;;  %v4636_v13 = vsel %vm324_vm0, %v9807_v61, %v4635_v49  ;;  %v7443_v49 = vld [vmem:[%s8045_s24 + $0x280] sm:$0xff] }
 0x3de   : > { %5617 = vmatmul.bf16.gmra.mxu3 %v5485_v60 }
 0x3df   : > { %v5712_v51 = vmul.f32 0.2, %v5680_v43 }
 0x3e0   : > { %v5153_v58 = vpop.f32.mrf.mxu2  ;;  %v4784_v38 = vpop.f32.mrf.mxu0 }
 0x3e1   : > { %v5578_v48 = vpop.f32.mrf.mxu3  ;;  %v5744_v63 = vmax.f32 %v5680_v43, %v5712_v51  ;;  %v5224_v1 = vadd.f32 %v5153_v58, %v4920_v46  ;;  %v4921_v55 = vpop.f32.mrf.mxu1  ;;  %v4691_v46 = vpack.c.bf16 %v4636_v13, %v9817_v19  ;;  %v7217_v13 = vld [vmem:[%s8045_s24 + $0x290] sm:$0x1] }
 0x3e2   : > { %v4922_v24 = vadd.f32 %v4921_v55, %v4784_v38 }
 0x3e3   : > { %v5776_v23 = vpack.c.bf16 %v5744_v63, %v5744_v63  ;;  %v5649_v53 = vadd.f32 %v5578_v48, %v5224_v1  ;;  %v7442_v63 = vld [vmem:[%s8045_s24 + $0x274] sm:$0xff]  ;;  %v6942_v1 = vld [vmem:[%s8045_s24 + $0x26c] sm:$0xf] }
 0x3e5   : > { %5808 = vst.msk [vmem:[%s8328_s13 + $0x194] sm:$0xf] %vm1560_vm1, %v5776_v23  ;;  %v5681_v57 = vadd.f32 %v9662_v28, %v5649_v53  ;;  %v9875_v23 = vld [vmem:[%s8045_s24 + $0x288] sm:$0xff]  }
 0x3e7   : > { %v5713_v10 = vmul.f32 0.2, %v5681_v57 }
 0x3e8   : > { %v5155_v0 = vpop.f32.mrf.mxu2  ;;  %v4787_v33 = vpop.f32.mrf.mxu0 }
 0x3e9   : > { %v5580_v11 = vpop.f32.mrf.mxu3  ;;  %v5745_v56 = vmax.f32 %v5681_v57, %v5713_v10  ;;  %v5225_v27 = vadd.f32 %v5155_v0, %v4922_v24  ;;  %v4924_v8 = vpop.f32.mrf.mxu1  ;;  %v4482_v57 = vunpack.c.l.bf16 %v6942_v1  ;;  %v7840_v10 = vunpack.c.h.bf16 %v7938_v21 }
 0x3ea   : > { %v4925_v12 = vadd.f32 %v4924_v8, %v4787_v33  ;;  %v7843_v24 = vunpack.c.l.bf16 %v9875_v23 }
 0x3eb   : > { %v5777_v30 = vpack.c.bf16 %v5745_v56, %v5745_v56  ;;  %v5650_v14 = vadd.f32 %v5580_v11, %v5225_v27  ;;  %4826 = vmatmul.bf16.gmra.mxu0 %v9797_v9  ;;  %v5434_v42 = vrot.slane %v7840_v10, 1 }
 0x3ec   : > { %4963 = vmatmul.bf16.gmra.mxu1 %v9774_v36  ;;  %v5429_v36 = vrot.slane %v5323_v2, 1 }
 0x3ed   : > { %5809 = vst.msk [vmem:[%s8328_s13 + $0x198] sm:$0xf] %vm1560_vm1, %v5777_v30  ;;  %v5682_v45 = vadd.f32 %v9662_v28, %v5650_v14  ;;  %5197 = vmatmul.bf16.gmra.mxu2 %v7441_v25  ;;  %v4637_v25 = vrot.slane %v4482_v57, 1  ;;  %v5436_v30 = vrot.slane %v7843_v24, 1 }
 0x3ee   : > { %5622 = vmatmul.bf16.gmra.mxu3 %v5486_v7  ;;  %v5430_v44 = vsel %vm324_vm0, %v9840_v15, %v5429_v36  ;;  %v5432_v60 = vsel %vm324_vm0, %v5429_v36, %v5431_v29  ;;  %v5433_v7 = vrot.slane %v7839_v20, 1  ;;  %v6945_v29 = vld [vmem:[%s8045_s24 + $0x278] sm:$0xf] }
 0x3ef   : > { %v5714_v40 = vmul.f32 0.2, %v5682_v45  ;;  %v5487_v61 = vpack.c.bf16 %v5432_v60, %v5430_v44  ;;  %v5437_v6 = vsel %vm324_vm0, %v5434_v42, %v5436_v30 }
 0x3f0   : > { %v5158_v17 = vpop.f32.mrf.mxu2  ;;  %v4789_v52 = vpop.f32.mrf.mxu0 }
 0x3f1   : > { %v5583_v3 = vpop.f32.mrf.mxu3  ;;  %v5746_v31 = vmax.f32 %v5682_v45, %v5714_v40  ;;  %v5226_v47 = vadd.f32 %v5158_v17, %v4925_v12  ;;  %v4926_v9 = vpop.f32.mrf.mxu1  ;;  %v4639_v45 = vsel %vm324_vm0, %v4637_v25, %v9836_v26  ;;  %v5435_v12 = vsel %vm324_vm0, %v5433_v7, %v5434_v42 }
 0x3f2   : > { %v4927_v59 = vadd.f32 %v4926_v9, %v4789_v52  ;;  %v5488_v36 = vpack.c.bf16 %v5437_v6, %v5435_v12 }
 0x3f3   : > { %v5778_v5 = vpack.c.bf16 %v5746_v31, %v5746_v31  ;;  %v5651_v35 = vadd.f32 %v5583_v3, %v5226_v47  ;;  %v4692_v3 = vpack.c.bf16 %v9850_v16, %v4639_v45  ;;  %v4500_v31 = vpack.c.bf16 %v7835_v50, %v4482_v57 }
 0x3f4   : > { %v4485_v50 = vunpack.c.l.bf16 %v6945_v29 }
 0x3f5   : > { %5810 = vst.msk [vmem:[%s8328_s13 + $0x19c] sm:$0xf] %vm1560_vm1, %v5778_v5  ;;  %v5683_v54 = vadd.f32 %v9662_v28, %v5651_v35  ;;  %v6953_v5 = vld [vmem:[%s8045_s24 + $0x27c] sm:$0x1] }
 0x3f6   : > { %v4533_v60 = vunpack.c.l.bf16 %v6953_v5 }
 0x3f7   : > { %v5715_v39 = vmul.f32 0.2, %v5683_v54 }
 0x3f8   : > { %v5160_v32 = vpop.f32.mrf.mxu2  ;;  %v4792_v58 = vpop.f32.mrf.mxu0 }
 0x3f9   : > { %v5585_v43 = vpop.f32.mrf.mxu3  ;;  %v5747_v41 = vmax.f32 %v5683_v54, %v5715_v39  ;;  %v5227_v51 = vadd.f32 %v5160_v32, %v4927_v59  ;;  %v4929_v48 = vpop.f32.mrf.mxu1  ;;  %v7844_v39 = vunpack.c.h.bf16 %v9875_v23  ;;  %v5329_v59 = vunpack.c.l.bf16 %v7217_v13 }
 0x3fa   : > { %v4930_v19 = vadd.f32 %v4929_v48, %v4792_v58 }
 0x3fb   : > { %v5779_v38 = vpack.c.bf16 %v5747_v41, %v5747_v41  ;;  %v5652_v55 = vadd.f32 %v5585_v43, %v5227_v51  ;;  %4831 = vmatmul.bf16.gmra.mxu0 %v4691_v46  ;;  %v5438_v1 = vrot.slane %v7844_v39, 1 }
 0x3fc   : > { %4968 = vmatmul.bf16.gmra.mxu1 %v9777_v34 }
 0x3fd   : > { %5811 = vst.msk [vmem:[%s8328_s13 + $0x1a0] sm:$0xf] %vm1560_vm1, %v5779_v38  ;;  %v5684_v53 = vadd.f32 %v9662_v28, %v5652_v55  ;;  %5202 = vmatmul.bf16.gmra.mxu2 %v7442_v63  ;;  %v4642_v63 = vrot.slane %v4485_v50, 1  ;;  %v5440_v38 = vrot.slane %v5329_v59, 1  ;;  %v5439_v57 = vsel %vm324_vm0, %v5436_v30, %v5438_v1 }
 0x3fe   : > { %5627 = vmatmul.bf16.gmra.mxu3 %v5487_v61  ;;  %v4644_v61 = vrot.slane %v4533_v60, 1 }
 0x3ff   : > { %v5716_v0 = vmul.f32 0.2, %v5684_v53  ;;  %v4643_v23 = vsel %vm324_vm0, %v9840_v15, %v4642_v63  ;;  %v5441_v20 = vsel %vm324_vm0, %v5438_v1, %v5440_v38  ;;  %v7444_v15 = vld [vmem:[%s8045_s24 + $0x288] sm:$0xff] }
 0x400   : > { %v5163_v11 = vpop.f32.mrf.mxu2  ;;  %v4794_v8 = vpop.f32.mrf.mxu0  ;;  %v5489_v7 = vpack.c.bf16 %v5441_v20, %v5439_v57 }
 0x401   : > { %v5588_v56 = vpop.f32.mrf.mxu3  ;;  %v5748_v27 = vmax.f32 %v5684_v53, %v5716_v0  ;;  %v5228_v33 = vadd.f32 %v5163_v11, %v4930_v19  ;;  %v4931_v34 = vpop.f32.mrf.mxu1  ;;  %v4645_v19 = vsel %vm324_vm0, %v4642_v63, %v4644_v61 }
 0x402   : > { %v4932_v22 = vadd.f32 %v4931_v34, %v4794_v8 }
 0x403   : > { %v5780_v14 = vpack.c.bf16 %v5748_v27, %v5748_v27  ;;  %v5653_v4 = vadd.f32 %v5588_v56, %v5228_v33  ;;  %v4693_v56 = vpack.c.bf16 %v4645_v19, %v4643_v23  ;;  %v4501_v27 = vpack.c.bf16 %v4485_v50, %v7836_v18 }
 0x405   : > { %5812 = vst.msk [vmem:[%s8328_s13 + $0x1a4] sm:$0xf] %vm1560_vm1, %v5780_v14  ;;  %v5685_v62 = vadd.f32 %v9662_v28, %v5653_v4 }
 0x407   : > { %v5717_v2 = vmul.f32 0.2, %v5685_v62 }
 0x408   : > { %v5165_v40 = vpop.f32.mrf.mxu2  ;;  %v4797_v9 = vpop.f32.mrf.mxu0 }
 0x409   : > { %v5590_v17 = vpop.f32.mrf.mxu3  ;;  %v5749_v47 = vmax.f32 %v5685_v62, %v5717_v2  ;;  %v5229_v52 = vadd.f32 %v5165_v40, %v4932_v22  ;;  %v4934_v26 = vpop.f32.mrf.mxu1 }
 0x40a   : > { %v4935_v44 = vadd.f32 %v4934_v26, %v4797_v9 }
 0x40b   : > { %v5781_v35 = vpack.c.bf16 %v5749_v47, %v5749_v47  ;;  %v5654_v54 = vadd.f32 %v5590_v17, %v5229_v52  ;;  %4836 = vmatmul.bf16.gmra.mxu0 %v4692_v3 }
 0x40c   : > { %4973 = vmatmul.bf16.gmra.mxu1 %v4500_v31 }
 0x40d   : > { %5813 = vst.msk [vmem:[%s8328_s13 + $0x1a8] sm:$0xf] %vm1560_vm1, %v5781_v35  ;;  %v5686_v16 = vadd.f32 %v9662_v28, %v5654_v54  ;;  %5207 = vmatmul.bf16.gmra.mxu2 %v7443_v49 }
 0x40e   : > { %5632 = vmatmul.bf16.gmra.mxu3 %v5488_v36 }
 0x40f   : > { %v5718_v32 = vmul.f32 0.2, %v5686_v16 }
 0x410   : > { %v5168_v43 = vpop.f32.mrf.mxu2  ;;  %v4799_v58 = vpop.f32.mrf.mxu0 }
 0x411   : > { %v5593_v46 = vpop.f32.mrf.mxu3  ;;  %v5750_v41 = vmax.f32 %v5686_v16, %v5718_v32  ;;  %v5230_v51 = vadd.f32 %v5168_v43, %v4935_v44  ;;  %v4936_v48 = vpop.f32.mrf.mxu1 }
 0x412   : > { %v4937_v24 = vadd.f32 %v4936_v48, %v4799_v58 }
 0x413   : > { %v5782_v55 = vpack.c.bf16 %v5750_v41, %v5750_v41  ;;  %v5655_v21 = vadd.f32 %v5593_v46, %v5230_v51 }
 0x415   : > { %5814 = vst.msk [vmem:[%s8328_s13 + $0x1ac] sm:$0xf] %vm1560_vm1, %v5782_v55  ;;  %v5687_v53 = vadd.f32 %v9662_v28, %v5655_v21 }
 0x417   : > { %v5719_v10 = vmul.f32 0.2, %v5687_v53 }
 0x418   : > { %v5170_v0 = vpop.f32.mrf.mxu2  ;;  %v4802_v34 = vpop.f32.mrf.mxu0 }
 0x419   : > { %v5595_v11 = vpop.f32.mrf.mxu3  ;;  %v5751_v33 = vmax.f32 %v5687_v53, %v5719_v10  ;;  %v5231_v8 = vadd.f32 %v5170_v0, %v4937_v24  ;;  %v4939_v25 = vpop.f32.mrf.mxu1  ;;  %v9928_v53 = vld [vmem:[%s9980_s2] ss:$0 sm:$0xff] }
 0x41a   : > { %v4940_v4 = vadd.f32 %v4939_v25, %v4802_v34 }
 0x41b   : > { %v5783_v42 = vpack.c.bf16 %v5751_v33, %v5751_v33  ;;  %v5656_v14 = vadd.f32 %v5595_v11, %v5231_v8  ;;  %4841 = vmatmul.bf16.gmra.mxu0 %v4693_v56 }
 0x41c   : > { %4978 = vmatmul.bf16.gmra.mxu1 %v4501_v27 }
 0x41d   : > { %5815 = vst.msk [vmem:[%s8328_s13 + $0x1b0] sm:$0xf] %vm1560_vm1, %v5783_v42  ;;  %v5688_v30 = vadd.f32 %v9662_v28, %v5656_v14  ;;  %5212 = vmatmul.bf16.gmra.mxu2 %v7444_v15 }
 0x41e   : > { %5637 = vmatmul.bf16.gmra.mxu3 %v5489_v7 }
 0x41f   : > { %v5720_v37 = vmul.f32 0.2, %v5688_v30 }
 0x420   : > { %v5173_v18 = vpop.f32.mrf.mxu2  ;;  %v4804_v6 = vpop.f32.mrf.mxu0 }
 0x421   : > { %v5598_v62 = vpop.f32.mrf.mxu3  ;;  %v5752_v45 = vmax.f32 %v5688_v30, %v5720_v37  ;;  %v5232_v12 = vadd.f32 %v5173_v18, %v4940_v4  ;;  %v4941_v2 = vpop.f32.mrf.mxu1 }
 0x422   : > { %v4942_v31 = vadd.f32 %v4941_v2, %v4804_v6 }
 0x423   : > { %v5784_v22 = vpack.c.bf16 %v5752_v45, %v5752_v45  ;;  %v5657_v40 = vadd.f32 %v5598_v62, %v5232_v12 }
 0x425   : > { %5816 = vst.msk [vmem:[%s8328_s13 + $0x1b4] sm:$0xf] %vm1560_vm1, %v5784_v22  ;;  %v5689_v17 = vadd.f32 %v9662_v28, %v5657_v40 }
 0x427   : > { %v5721_v3 = vmul.f32 0.2, %v5689_v17 }
 0x428   : > { %v5175_v47 = vpop.f32.mrf.mxu2  ;;  %v4807_v49 = vpop.f32.mrf.mxu0 }
 0x429   : > { %v5600_v52 = vpop.f32.mrf.mxu3  ;;  %v5753_v9 = vmax.f32 %v5689_v17, %v5721_v3  ;;  %v5233_v26 = vadd.f32 %v5175_v47, %v4942_v31  ;;  %v4944_v36 = vpop.f32.mrf.mxu1 }
 0x42a   : > { %v4945_v54 = vadd.f32 %v4944_v36, %v4807_v49 }
 0x42b   : > { %v5785_v29 = vpack.c.bf16 %v5753_v9, %v5753_v9  ;;  %v5658_v5 = vadd.f32 %v5600_v52, %v5233_v26 }
 0x42d   : > { %5817 = vst.msk [vmem:[%s8328_s13 + $0x1b8] sm:$0xf] %vm1560_vm1, %v5785_v29  ;;  %v5690_v35 = vadd.f32 %v9662_v28, %v5658_v5 }
 0x42f   : > { %v5722_v13 = vmul.f32 0.2, %v5690_v35 }
 0x430   : > { %v5178_v16 = vpop.f32.mrf.mxu2  ;;  %v4809_v39 = vpop.f32.mrf.mxu0 }
 0x431   : > { %v5603_v44 = vpop.f32.mrf.mxu3  ;;  %v5754_v50 = vmax.f32 %v5690_v35, %v5722_v13  ;;  %v5234_v60 = vadd.f32 %v5178_v16, %v4945_v54  ;;  %v4946_v59 = vpop.f32.mrf.mxu1 }
 0x432   : > { %v4947_v51 = vadd.f32 %v4946_v59, %v4809_v39 }
 0x433   : > { %v5786_v32 = vpack.c.bf16 %v5754_v50, %v5754_v50  ;;  %v5659_v43 = vadd.f32 %v5603_v44, %v5234_v60 }
 0x435   : > { %5818 = vst.msk [vmem:[%s8328_s13 + $0x1bc] sm:$0xf] %vm1560_vm1, %v5786_v32  ;;  %v5691_v46 = vadd.f32 %v9662_v28, %v5659_v43 }
 0x437   : > { %v5723_v41 = vmul.f32 0.2, %v5691_v46 }
 0x438   : > { %v5180_v58 = vpop.f32.mrf.mxu2  ;;  %v4812_v1 = vpop.f32.mrf.mxu0 }
 0x439   : > { %v5605_v48 = vpop.f32.mrf.mxu3  ;;  %v5755_v63 = vmax.f32 %v5691_v46, %v5723_v41  ;;  %v5235_v61 = vadd.f32 %v5180_v58, %v4947_v51  ;;  %v4949_v38 = vpop.f32.mrf.mxu1 }
 0x43a   : > { %v4950_v23 = vadd.f32 %v4949_v38, %v4812_v1 }
 0x43b   : > { %v5787_v55 = vpack.c.bf16 %v5755_v63, %v5755_v63  ;;  %v5660_v21 = vadd.f32 %v5605_v48, %v5235_v61 }
 0x43d   : > { %5819 = vst.msk [vmem:[%s8328_s13 + $0x1c0] sm:$0xf] %vm1560_vm1, %v5787_v55  ;;  %v5692_v28 = vadd.f32 %v9928_v53, %v5660_v21 }
 0x43f   : > { %v5724_v19 = vmul.f32 0.2, %v5692_v28 }
 0x440   : > { %v5183_v57 = vpop.f32.mrf.mxu2  ;;  %v4814_v0 = vpop.f32.mrf.mxu0 }
 0x441   : > { %v5608_v20 = vpop.f32.mrf.mxu3  ;;  %v5756_v10 = vmax.f32 %v5692_v28, %v5724_v19  ;;  %v5236_v24 = vadd.f32 %v5183_v57, %v4950_v23  ;;  %v4951_v11 = vpop.f32.mrf.mxu1 }
 0x442   : > { %v4952_v34 = vadd.f32 %v4951_v11, %v4814_v0 }
 0x443   : > { %v5788_v56 = vpack.c.bf16 %v5756_v10, %v5756_v10  ;;  %v5661_v27 = vadd.f32 %v5608_v20, %v5236_v24 }
 0x445   : > { %5820 = vst.msk [vmem:[%s8328_s13 + $0x1c4] sm:$0xf] %vm1560_vm1, %v5788_v56  ;;  %v5693_v33 = vadd.f32 %v9928_v53, %v5661_v27 }
 0x447   : > { %v5725_v8 = vmul.f32 0.2, %v5693_v33 }
 0x448   : > { %v5185_v25 = vpop.f32.mrf.mxu2  ;;  %v4817_v14 = vpop.f32.mrf.mxu0 }
 0x449   : > { %v5610_v15 = vpop.f32.mrf.mxu3  ;;  %v5757_v7 = vmax.f32 %v5693_v33, %v5725_v8  ;;  %v5237_v42 = vadd.f32 %v5185_v25, %v4952_v34  ;;  %v4954_v30 = vpop.f32.mrf.mxu1 }
 0x44a   : > { %v4955_v62 = vadd.f32 %v4954_v30, %v4817_v14 }
 0x44b   : > { %v5789_v4 = vpack.c.bf16 %v5757_v7, %v5757_v7  ;;  %v5662_v37 = vadd.f32 %v5610_v15, %v5237_v42 }
 0x44d   : > { %5821 = vst.msk [vmem:[%s8328_s13 + $0x1c8] sm:$0xf] %vm1560_vm1, %v5789_v4  ;;  %v5694_v18 = vadd.f32 %v9928_v53, %v5662_v37 }
 0x44f   : > { %v5726_v45 = vmul.f32 0.2, %v5694_v18 }
 0x450   : > { %v5188_v12 = vpop.f32.mrf.mxu2  ;;  %v4819_v40 = vpop.f32.mrf.mxu0 }
 0x451   : > { %v5613_v6 = vpop.f32.mrf.mxu3  ;;  %v5758_v2 = vmax.f32 %v5694_v18, %v5726_v45  ;;  %v5238_v22 = vadd.f32 %v5188_v12, %v4955_v62  ;;  %v4956_v17 = vpop.f32.mrf.mxu1 }
 0x452   : > { %v4957_v9 = vadd.f32 %v4956_v17, %v4819_v40 }
 0x453   : > { %v5790_v3 = vpack.c.bf16 %v5758_v2, %v5758_v2  ;;  %v5663_v31 = vadd.f32 %v5613_v6, %v5238_v22 }
 0x455   : > { %5822 = vst.msk [vmem:[%s8328_s13 + $0x1cc] sm:$0xf] %vm1560_vm1, %v5790_v3  ;;  %v5695_v47 = vadd.f32 %v9928_v53, %v5663_v31 }
 0x457   : > { %v5727_v52 = vmul.f32 0.2, %v5695_v47 }
 0x458   : > { %v5190_v26 = vpop.f32.mrf.mxu2  ;;  %v4822_v5 = vpop.f32.mrf.mxu0 }
 0x459   : > { %v5615_v49 = vpop.f32.mrf.mxu3  ;;  %v5759_v36 = vmax.f32 %v5695_v47, %v5727_v52  ;;  %v5239_v29 = vadd.f32 %v5190_v26, %v4957_v9  ;;  %v4959_v35 = vpop.f32.mrf.mxu1 }
 0x45a   : > { %v4960_v44 = vadd.f32 %v4959_v35, %v4822_v5 }
 0x45b   : > { %v5791_v54 = vpack.c.bf16 %v5759_v36, %v5759_v36  ;;  %v5664_v13 = vadd.f32 %v5615_v49, %v5239_v29 }
 0x45d   : > { %5823 = vst.msk [vmem:[%s8328_s13 + $0x1d0] sm:$0xf] %vm1560_vm1, %v5791_v54  ;;  %v5696_v16 = vadd.f32 %v9928_v53, %v5664_v13 }
 0x45f   : > { %v5728_v50 = vmul.f32 0.2, %v5696_v16 }
 0x460   : > { %v5193_v60 = vpop.f32.mrf.mxu2  ;;  %v4824_v43 = vpop.f32.mrf.mxu0 }
 0x461   : > { %v5618_v39 = vpop.f32.mrf.mxu3  ;;  %v5760_v59 = vmax.f32 %v5696_v16, %v5728_v50  ;;  %v5240_v32 = vadd.f32 %v5193_v60, %v4960_v44  ;;  %v4961_v46 = vpop.f32.mrf.mxu1 }
 0x462   : > { %v4962_v63 = vadd.f32 %v4961_v46, %v4824_v43 }
 0x463   : > { %v5792_v41 = vpack.c.bf16 %v5760_v59, %v5760_v59  ;;  %v5665_v51 = vadd.f32 %v5618_v39, %v5240_v32 }
 0x465   : > { %5824 = vst.msk [vmem:[%s8328_s13 + $0x1d4] sm:$0xf] %vm1560_vm1, %v5792_v41  ;;  %v5697_v58 = vadd.f32 %v9928_v53, %v5665_v51 }
 0x467   : > { %v5729_v48 = vmul.f32 0.2, %v5697_v58 }
 0x468   : > { %v5195_v61 = vpop.f32.mrf.mxu2  ;;  %v4827_v21 = vpop.f32.mrf.mxu0 }
 0x469   : > { %v5620_v1 = vpop.f32.mrf.mxu3  ;;  %v5761_v38 = vmax.f32 %v5697_v58, %v5729_v48  ;;  %v5241_v55 = vadd.f32 %v5195_v61, %v4962_v63  ;;  %v4964_v28 = vpop.f32.mrf.mxu1 }
 0x46a   : > { %v4965_v20 = vadd.f32 %v4964_v28, %v4827_v21 }
 0x46b   : > { %v5793_v23 = vpack.c.bf16 %v5761_v38, %v5761_v38  ;;  %v5666_v19 = vadd.f32 %v5620_v1, %v5241_v55 }
 0x46d   : > { %5825 = vst.msk [vmem:[%s8328_s13 + $0x1d8] sm:$0xf] %vm1560_vm1, %v5793_v23  ;;  %v5698_v57 = vadd.f32 %v9928_v53, %v5666_v19 }
 0x46f   : > { %v5730_v10 = vmul.f32 0.2, %v5698_v57 }
 0x470   : > { %v5198_v24 = vpop.f32.mrf.mxu2  ;;  %v4829_v27 = vpop.f32.mrf.mxu0 }
 0x471   : > { %v5623_v0 = vpop.f32.mrf.mxu3  ;;  %v5762_v11 = vmax.f32 %v5698_v57, %v5730_v10  ;;  %v5242_v56 = vadd.f32 %v5198_v24, %v4965_v20  ;;  %v4966_v33 = vpop.f32.mrf.mxu1 }
 0x472   : > { %v4967_v7 = vadd.f32 %v4966_v33, %v4829_v27 }
 0x473   : > { %v5794_v8 = vpack.c.bf16 %v5762_v11, %v5762_v11  ;;  %v5667_v34 = vadd.f32 %v5623_v0, %v5242_v56 }
 0x475   : > { %5826 = vst.msk [vmem:[%s8328_s13 + $0x1dc] sm:$0xf] %vm1560_vm1, %v5794_v8  ;;  %v5699_v25 = vadd.f32 %v9928_v53, %v5667_v34 }
 0x477   : > { %v5731_v15 = vmul.f32 0.2, %v5699_v25 }
 0x478   : > { %v5200_v42 = vpop.f32.mrf.mxu2  ;;  %v4832_v37 = vpop.f32.mrf.mxu0 }
 0x479   : > { %v5625_v14 = vpop.f32.mrf.mxu3  ;;  %v5763_v30 = vmax.f32 %v5699_v25, %v5731_v15  ;;  %v5243_v4 = vadd.f32 %v5200_v42, %v4967_v7  ;;  %v4969_v18 = vpop.f32.mrf.mxu1 }
 0x47a   : > { %v4970_v6 = vadd.f32 %v4969_v18, %v4832_v37 }
 0x47b   : > { %v5795_v62 = vpack.c.bf16 %v5763_v30, %v5763_v30  ;;  %v5668_v45 = vadd.f32 %v5625_v14, %v5243_v4 }
 0x47d   : > { %5827 = vst.msk [vmem:[%s8328_s13 + $0x1e0] sm:$0xf] %vm1560_vm1, %v5795_v62  ;;  %v5700_v12 = vadd.f32 %v9928_v53, %v5668_v45 }
 0x47f   : > { %v5732_v2 = vmul.f32 0.2, %v5700_v12 }
 0x480   : > { %v5203_v22 = vpop.f32.mrf.mxu2  ;;  %v4834_v31 = vpop.f32.mrf.mxu0 }
 0x481   : > { %v5628_v40 = vpop.f32.mrf.mxu3  ;;  %v5764_v17 = vmax.f32 %v5700_v12, %v5732_v2  ;;  %v5244_v3 = vadd.f32 %v5203_v22, %v4970_v6  ;;  %v4971_v47 = vpop.f32.mrf.mxu1 }
 0x482   : > { %v4972_v36 = vadd.f32 %v4971_v47, %v4834_v31 }
 0x483   : > { %v5796_v52 = vpack.c.bf16 %v5764_v17, %v5764_v17  ;;  %v5669_v9 = vadd.f32 %v5628_v40, %v5244_v3 }
 0x485   : > { %5828 = vst.msk [vmem:[%s8328_s13 + $0x1e4] sm:$0xf] %vm1560_vm1, %v5796_v52  ;;  %v5701_v26 = vadd.f32 %v9928_v53, %v5669_v9 }
 0x487   : > { %v5733_v49 = vmul.f32 0.2, %v5701_v26 }
 0x488   : > { %v5205_v29 = vpop.f32.mrf.mxu2  ;;  %v4837_v13 = vpop.f32.mrf.mxu0 }
 0x489   : > { %v5630_v5 = vpop.f32.mrf.mxu3  ;;  %v5765_v35 = vmax.f32 %v5701_v26, %v5733_v49  ;;  %v5245_v54 = vadd.f32 %v5205_v29, %v4972_v36  ;;  %v4974_v16 = vpop.f32.mrf.mxu1 }
 0x48a   : > { %v4975_v39 = vadd.f32 %v4974_v16, %v4837_v13 }
 0x48b   : > { %v5797_v44 = vpack.c.bf16 %v5765_v35, %v5765_v35  ;;  %v5670_v50 = vadd.f32 %v5630_v5, %v5245_v54 }
 0x48d   : > { %5829 = vst.msk [vmem:[%s8328_s13 + $0x1e8] sm:$0xf] %vm1560_vm1, %v5797_v44  ;;  %v5702_v60 = vadd.f32 %v9928_v53, %v5670_v50 }
 0x48f   : > { %v5734_v59 = vmul.f32 0.2, %v5702_v60 }
 0x490   : > { %v5208_v32 = vpop.f32.mrf.mxu2  ;;  %v4839_v51 = vpop.f32.mrf.mxu0 }
 0x491   : > { %v5633_v43 = vpop.f32.mrf.mxu3  ;;  %v5766_v46 = vmax.f32 %v5702_v60, %v5734_v59  ;;  %v5246_v41 = vadd.f32 %v5208_v32, %v4975_v39  ;;  %v4976_v58 = vpop.f32.mrf.mxu1 }
 0x492   : > { %v4977_v38 = vadd.f32 %v4976_v58, %v4839_v51 }
 0x493   : > { %v5798_v48 = vpack.c.bf16 %v5766_v46, %v5766_v46  ;;  %v5671_v63 = vadd.f32 %v5633_v43, %v5246_v41 }
 0x495   : > { %5830 = vst.msk [vmem:[%s8328_s13 + $0x1ec] sm:$0xf] %vm1560_vm1, %v5798_v48  ;;  %v5703_v61 = vadd.f32 %v9928_v53, %v5671_v63 }
 0x497   : > { %v5735_v1 = vmul.f32 0.2, %v5703_v61 }
 0x498   : > { %v5210_v55 = vpop.f32.mrf.mxu2  ;;  %v4842_v19 = vpop.f32.mrf.mxu0 }
 0x499   : > { %v5635_v21 = vpop.f32.mrf.mxu3  ;;  %v5767_v28 = vmax.f32 %v5703_v61, %v5735_v1  ;;  %v5247_v23 = vadd.f32 %v5210_v55, %v4977_v38  ;;  %v4979_v57 = vpop.f32.mrf.mxu1 }
 0x49a   : > { %v4980_v0 = vadd.f32 %v4979_v57, %v4842_v19 }
 0x49b   : > { %v5799_v20 = vpack.c.bf16 %v5767_v28, %v5767_v28  ;;  %v5672_v10 = vadd.f32 %v5635_v21, %v5247_v23 }
 0x49d   : > { %5831 = vst.msk [vmem:[%s8328_s13 + $0x1f0] sm:$0xf] %vm1560_vm1, %v5799_v20  ;;  %v5704_v24 = vadd.f32 %v9928_v53, %v5672_v10 }
 0x49f   : > { %v5736_v11 = vmul.f32 0.2, %v5704_v24 }
 0x4a0   : > { %v5213_v56 = vpop.f32.mrf.mxu2  ;;  %v4844_v15 = vpop.f32.mrf.mxu0 }
 0x4a1   : > { %v5638_v27 = vpop.f32.mrf.mxu3  ;;  %v5768_v33 = vmax.f32 %v5704_v24, %v5736_v11  ;;  %v5248_v8 = vadd.f32 %v5213_v56, %v4980_v0  ;;  %v4981_v7 = vpop.f32.mrf.mxu1 }
 0x4a2   : > { %v4982_v30 = vadd.f32 %v4981_v7, %v4844_v15 }
 0x4a3   : > { %v5800_v34 = vpack.c.bf16 %v5768_v33, %v5768_v33  ;;  %v5673_v25 = vadd.f32 %v5638_v27, %v5248_v8 }
 0x4a5   : > { %5832 = vst.msk [vmem:[%s8328_s13 + $0x1f4] sm:$0xf] %vm1560_vm1, %v5800_v34  ;;  %v5705_v42 = vadd.f32 %v9928_v53, %v5673_v25 }
 0x4a7   : > { %v5737_v14 = vmul.f32 0.2, %v5705_v42 }
 0x4a8   : > { %v5215_v4 = vpop.f32.mrf.mxu2 }
 0x4a9   : > { %v5769_v37 = vmax.f32 %v5705_v42, %v5737_v14  ;;  %v5249_v18 = vadd.f32 %v5215_v4, %v4982_v30  ;;  %v5640_v62 = vpop.f32.mrf.mxu3 }
 0x4ab   : > { %v5801_v45 = vpack.c.bf16 %v5769_v37, %v5769_v37  ;;  %v5674_v12 = vadd.f32 %v5640_v62, %v5249_v18 }
 0x4ad   : > { %5833 = vst.msk [vmem:[%s8328_s13 + $0x1f8] sm:$0xf] %vm1560_vm1, %v5801_v45  ;;  %v5706_v6 = vadd.f32 %v9928_v53, %v5674_v12 }
 0x4af   : > { %v5738_v2 = vmul.f32 0.2, %v5706_v6 }
 0x4b1   : > { %v5770_v22 = vmax.f32 %v5706_v6, %v5738_v2 }
 0x4b3   : > { %v5802_v40 = vpack.c.bf16 %v5770_v22, %v5770_v22 }
 0x4b5   : > { %5834 = vst.msk [vmem:[%s8328_s13 + $0x1fc] sm:$0xf] %vm1560_vm1, %v5802_v40 }
 0x4b6 PF: > { %s13_s12 = sadd.s32 1, %s7961_s12  }
 0x4b7   : > { %p10_p4 = scmp.ge.s32.totalorder %s13_s12, 4  }
 0x4b9   :  { %12 = sbr.rel (!%p10_p4) target bundleno = 1 (0x1), region = 72 }

// kernel: discriminator_forward.6
= control target key start
LH: loop header
LB: loop body
LE: loop exit
PB: predicated region body
PF: predicated region fallthrough
CT: control target
= control target key end

     0   :  { %s2387_s15 = smov 0   ;;  %s2822_s0 = inlined_call_operand.vmem [shape: bf16[2,17,17,128], index: 0, kind: input, shape index: {}]   ;;  %s2823_s1 = inlined_call_operand.vmem [shape: bf16[4,128,16], index: 1, kind: input, shape index: {}]   ;;  %s2824_s2 = inlined_call_operand.vmem [shape: bf16[2,256,16], index: 2, kind: output, shape index: {0}]   ;;  %s2825_s3 = inlined_call_operand.vmem [shape: f32[2,8,16], index: 3, kind: output, shape index: {1}]   ;;  %s2826_s4 = inlined_call_operand.vmem [shape: f32[2,8,16], index: 4, kind: output, shape index: {2}]  }
   0x1 LB: > { %s1885_s16 = sadd.s32 4294967295, %s2360_s15   ;;  %p1889_p0 = scmp.ge.s32.totalorder %s2360_s15, 1  ;;  %s2360_s15 = sphi %s2387_s15, %s15_s15  }
   0x2   : > { %p167_p1 = scmp.lt.s32.totalorder %s2360_s15, 3 }
   0x4   : > { %p168_p2 = pnand %p1889_p0, %p167_p1 }
   0x5   : > { %p201_p3 = scmp.lt.s32.totalorder (!%p168_p2), %s1885_s16, 1 }
   0x6   : > { %171 = sbr.rel (%p168_p2) target bundleno = 435 (0x1b3), region = 28 }
   0xb   : > { %v2233_v0 = vld [vmem:[%s2823_s1 + $0x78] sm:$0xff]  ;;  %v2232_v4 = vld [vmem:[%s2823_s1 + $0x70] sm:$0xff]  ;;  %s2828_s16 = smov (!%p201_p3, %s1885_s16), 1  ;;  %v2231_v8 = vld [vmem:[%s2823_s1 + $0x68] sm:$0xff]  ;;  %vm395_vm0 = vcmask 1046528   ;;  %vm1572_vm1 = vcmask 125952  }
   0xc   : > { %v2225_v1 = vld [vmem:[%s2823_s1 + $0x38] sm:$0xff]  ;;  %589 = vmatpush.bf16.msra.mxu0 %v2233_v0  ;;  %v2224_v5 = vld [vmem:[%s2823_s1 + $0x30] sm:$0xff]  ;;  %v2223_v9 = vld [vmem:[%s2823_s1 + $0x28] sm:$0xff]  ;;  %s2345_s17 = smul.u32 204, %s2828_s16  ;;  %s2217_s12 = sshll.u32 %s2828_s16, 7  ;;  %vm1605_vm2 = vcmask 130048  }
   0xd   : > { %v2257_v2 = vld [vmem:[%s2823_s1 + $0xb8] sm:$0xff]  ;;  %726 = vmatpush.bf16.msra.mxu1 %v2225_v1  ;;  %v2256_v6 = vld [vmem:[%s2823_s1 + $0xb0] sm:$0xff]  ;;  %v2255_v10 = vld [vmem:[%s2823_s1 + $0xa8] sm:$0xff] }
   0xe   : > { %v2265_v3 = vld [vmem:[%s2823_s1 + $0xf8] sm:$0xff]  ;;  %961 = vmatpush.bf16.msra.mxu2 %v2257_v2  ;;  %v2264_v7 = vld [vmem:[%s2823_s1 + $0xf0] sm:$0xff]  ;;  %v2263_v11 = vld [vmem:[%s2823_s1 + $0xe8] sm:$0xff]  ;;  %s2449_s28 = scalar_lea.vmem %s2822_s0, %s2345_s17  ;;  %s2584_s17 = scalar_lea.vmem %s2824_s2, %s2217_s12 }
   0xf   : > { %1419 = vmatpush.bf16.msra.mxu3 %v2265_v3  ;;  %v2230_v12 = vld [vmem:[%s2823_s1 + $0x60] sm:$0xff]  ;;  %v2229_v16 = vld [vmem:[%s2823_s1 + $0x58] sm:$0xff]  ;;  %v315_v21 = vld [vmem:[%s2449_s28 + $0x8] sm:$0x1] }
  0x10   : > { %590 = vmatpush.bf16.msra.mxu0 %v2232_v4  ;;  %v2222_v13 = vld [vmem:[%s2823_s1 + $0x20] sm:$0xff]  ;;  %v2221_v17 = vld [vmem:[%s2823_s1 + $0x18] sm:$0xff]  ;;  %v2119_v22 = vld [vmem:[%s2449_s28 + $0xc] sm:$0xff]   ;;  %v331_v28 = vunpack.c.l.bf16 %v315_v21 }
  0x11   : > { %727 = vmatpush.bf16.msra.mxu1 %v2224_v5  ;;  %v2254_v14 = vld [vmem:[%s2823_s1 + $0xa0] sm:$0xff]  ;;  %v2253_v18 = vld [vmem:[%s2823_s1 + $0x98] sm:$0xff]  ;;  %v2121_v23 = vld [vmem:[%s2449_s28 + $0x14] sm:$0x1]  ;;  %v1130_v31 = vunpack.c.l.bf16 %v2119_v22  ;;  %v1131_v32 = vunpack.c.h.bf16 %v2119_v22 }
  0x12   : > { %962 = vmatpush.bf16.msra.mxu2 %v2256_v6  ;;  %v2262_v15 = vld [vmem:[%s2823_s1 + $0xe0] sm:$0xff]  ;;  %v2261_v19 = vld [vmem:[%s2823_s1 + $0xd8] sm:$0xff]  ;;  %v2228_v24 = vld [vmem:[%s2823_s1 + $0x50] sm:$0xff]  ;;  %v1132_v33 = vunpack.c.l.bf16 %v2121_v23  ;;  %v399_v38 = vrot.slane %v331_v28, 1 }
  0x13   : > { %1420 = vmatpush.bf16.msra.mxu3 %v2264_v7  ;;  %v2267_v20 = vld [vmem:[%s2449_s28] sm:$0xff]   ;;  %v2220_v25 = vld [vmem:[%s2823_s1 + $0x10] sm:$0xff]  ;;  %v2227_v34 = vld [vmem:[%s2823_s1 + $0x48] sm:$0xff]  ;;  %v1226_v41 = vrot.slane %v1130_v31, 1  ;;  %v1227_v42 = vrot.slane %v1131_v32, 1 }
  0x14   : > { %591 = vmatpush.bf16.msra.mxu0 %v2231_v8  ;;  %v2268_v26 = vunpack.c.l.bf16 %v2267_v20  ;;  %v2269_v27 = vunpack.c.h.bf16 %v2267_v20  ;;  %v2252_v29 = vld [vmem:[%s2823_s1 + $0x90] sm:$0xff]  ;;  %v2219_v35 = vld [vmem:[%s2823_s1 + $0x8] sm:$0xff]  ;;  %v1229_v43 = vrot.slane %v1132_v33, 1  ;;  %v2226_v44 = vld [vmem:[%s2823_s1 + $0x40] sm:$0xff] }
  0x15   : > { %728 = vmatpush.bf16.msra.mxu1 %v2223_v9  ;;  %v2260_v30 = vld [vmem:[%s2823_s1 + $0xd0] sm:$0xff]  ;;  %v2251_v39 = vld [vmem:[%s2823_s1 + $0x88] sm:$0xff]  ;;  %v2218_v45 = vld [vmem:[%s2823_s1] sm:$0xff]  ;;  %v1228_v50 = vsel %vm395_vm0, %v1226_v41, %v1227_v42 }
  0x16   : > { %963 = vmatpush.bf16.msra.mxu2 %v2255_v10  ;;  %v396_v36 = vrot.slane %v2268_v26, 1  ;;  %v397_v37 = vrot.slane %v2269_v27, 1  ;;  %v2259_v40 = vld [vmem:[%s2823_s1 + $0xc8] sm:$0xff]  ;;  %v2250_v48 = vld [vmem:[%s2823_s1 + $0x80] sm:$0xff]  ;;  %v1230_v51 = vsel %vm395_vm0, %v1227_v42, %v1229_v43  ;;  %v316_v56 = vld [vmem:[%s2449_s28 + $0x14] sm:$0x1] }
  0x17   : > { %1421 = vmatpush.bf16.msra.mxu3 %v2263_v11  ;;  %v2258_v49 = vld [vmem:[%s2823_s1 + $0xc0] sm:$0xff]  ;;  %v2234_v53 = vld [vmem:[%s2449_s28 + $0xc] sm:$0xff]  ;;  %v1338_v54 = vpack.c.bf16 %v1230_v51, %v1228_v50  ;;  %v2337_v57 = vld [vmem:[%s2449_s28 + $0x18] sm:$0xff]   ;;  %v332_v61 = vunpack.c.l.bf16 %v316_v56 }
  0x18   : > { %592 = vmatpush.bf16.msra.mxu0 %v2230_v12  ;;  %v398_v46 = vsel %vm395_vm0, %v396_v36, %v397_v37  ;;  %v400_v47 = vsel %vm395_vm0, %v397_v37, %v399_v38  ;;  %v221_v55 = vld [vmem:[%s2449_s28 + $0xc] sm:$0xff]   ;;  %v2124_v58 = vld [vmem:[%s2449_s28 + $0x20] sm:$0x1]  ;;  %v2300_v62 = vunpack.c.l.bf16 %v2337_v57  ;;  %v2301_v63 = vunpack.c.h.bf16 %v2337_v57  ;;  %v2235_v12 = vld [vmem:[%s2449_s28 + $0x18] sm:$0xff] }
  0x19   : > { %729 = vmatpush.bf16.msra.mxu1 %v2222_v13  ;;  %v508_v52 = vpack.c.bf16 %v400_v47, %v398_v46  ;;  %v253_v59 = vunpack.c.l.bf16 %v221_v55  ;;  %v254_v60 = vunpack.c.h.bf16 %v221_v55  ;;  %v1135_v0 = vunpack.c.l.bf16 %v2124_v58  ;;  %v225_v31 = vld [vmem:[%s2449_s28 + $0x24] sm:$0xff]   ;;  %v318_v32 = vld [vmem:[%s2449_s28 + $0x2c] sm:$0x1]  ;;  %v2338_v33 = vld [vmem:[%s2449_s28 + $0x30] sm:$0xff]  }
  0x1a   : > { %964 = vmatpush.bf16.msra.mxu2 %v2254_v14  ;;  %v404_v3 = vrot.slane %v332_v61, 1  ;;  %v1231_v4 = vrot.slane %v2300_v62, 1  ;;  %v1232_v5 = vrot.slane %v2301_v63, 1  ;;  %v317_v14 = vld [vmem:[%s2449_s28 + $0x20] sm:$0x1]  ;;  %v258_v36 = vunpack.c.h.bf16 %v225_v31 }
  0x1b   : > { %1422 = vmatpush.bf16.msra.mxu3 %v2262_v15  ;;  %v401_v1 = vrot.slane %v253_v59, 1  ;;  %v402_v2 = vrot.slane %v254_v60, 1  ;;  %v1234_v6 = vrot.slane %v1135_v0, 1  ;;  %v2125_v15 = vld [vmem:[%s2449_s28 + $0x24] sm:$0xff]   ;;  %v334_v37 = vunpack.c.l.bf16 %v318_v32  ;;  %v2139_v32 = vld [vmem:[%s2449_s28 + $0x5c] sm:$0x1] }
  0x1c   : > { %593 = vmatpush.bf16.msra.mxu0 %v2229_v16  ;;  %v1233_v9 = vsel %vm395_vm0, %v1231_v4, %v1232_v5  ;;  %v2127_v16 = vld [vmem:[%s2449_s28 + $0x2c] sm:$0x1]  ;;  %v2304_v38 = vunpack.c.l.bf16 %v2338_v33  ;;  %v412_v42 = vrot.slane %v258_v36, 1  ;;  %v2133_v56 = vld [vmem:[%s2449_s28 + $0x44] sm:$0x1]  ;;  %v1150_v36 = vunpack.c.l.bf16 %v2139_v32 }
  0x1d   : > { %730 = vmatpush.bf16.msra.mxu1 %v2221_v17  ;;  %v403_v7 = vsel %vm395_vm0, %v401_v1, %v402_v2  ;;  %v405_v8 = vsel %vm395_vm0, %v402_v2, %v404_v3  ;;  %v1235_v10 = vsel %vm395_vm0, %v1232_v5, %v1234_v6  ;;  %v333_v17 = vunpack.c.l.bf16 %v317_v14 }
  0x1e   : > { %965 = vmatpush.bf16.msra.mxu2 %v2253_v18  ;;  %v509_v11 = vpack.c.bf16 %v405_v8, %v403_v7  ;;  %v1339_v13 = vpack.c.bf16 %v1235_v10, %v1233_v9  ;;  %v1136_v18 = vunpack.c.l.bf16 %v2125_v15  ;;  %v414_v43 = vrot.slane %v334_v37, 1  ;;  %v229_v7 = vld [vmem:[%s2449_s28 + $0x3c] sm:$0xff]   ;;  %v320_v8 = vld [vmem:[%s2449_s28 + $0x44] sm:$0x1]  ;;  %v2136_v10 = vld [vmem:[%s2449_s28 + $0x50] sm:$0x1] }
  0x1f   : > { %1423 = vmatpush.bf16.msra.mxu3 %v2261_v19  ;;  %v1137_v19 = vunpack.c.h.bf16 %v2125_v15  ;;  %v409_v21 = vrot.slane %v333_v17, 1  ;;  %v1144_v60 = vunpack.c.l.bf16 %v2133_v56 }
  0x20   : > { %594 = vmatpush.bf16.msra.mxu0 %v2228_v24  ;;  %v1236_v22 = vrot.slane %v1136_v18, 1 }
  0x21   : > { %731 = vmatpush.bf16.msra.mxu1 %v2220_v25  ;;  %v1237_v23 = vrot.slane %v1137_v19, 1  ;;  %v410_v25 = vsel %vm395_vm0, %v1232_v5, %v409_v21  ;;  %v1249_v0 = vrot.slane %v1144_v60, 1  ;;  %v2238_v5 = vld [vmem:[%s2449_s28 + $0x3c] sm:$0xff] }
  0x22   : > { %966 = vmatpush.bf16.msra.mxu2 %v2252_v29  ;;  %v510_v28 = vpack.c.bf16 %v410_v25, %v1233_v9  ;;  %v2236_v29 = vld [vmem:[%s2449_s28 + $0x24] sm:$0xff] }
  0x23   : > { %1424 = vmatpush.bf16.msra.mxu3 %v2260_v30  ;;  %v1238_v26 = vsel %vm395_vm0, %v1236_v22, %v1237_v23  ;;  %v2339_v9 = vld [vmem:[%s2449_s28 + $0x48] sm:$0xff]  }
  0x24   : > { %595 = vmatpush.bf16.msra.mxu0 %v2227_v34  ;;  %v2130_v34 = vld [vmem:[%s2449_s28 + $0x38] sm:$0x1]  ;;  %v2308_v14 = vunpack.c.l.bf16 %v2339_v9  ;;  %v2309_v15 = vunpack.c.h.bf16 %v2339_v9 }
  0x25   : > { %732 = vmatpush.bf16.msra.mxu1 %v2219_v35  ;;  %v257_v35 = vunpack.c.l.bf16 %v225_v31 }
  0x26   : > { %967 = vmatpush.bf16.msra.mxu2 %v2251_v39  ;;  %v2305_v39 = vunpack.c.h.bf16 %v2338_v33  ;;  %v1252_v21 = vrot.slane %v2309_v15, 1 }
  0x27   : > { %1425 = vmatpush.bf16.msra.mxu3 %v2259_v40  ;;  %v1141_v40 = vunpack.c.l.bf16 %v2130_v34  ;;  %v411_v41 = vrot.slane %v257_v35, 1 }
  0x28   : > { %596 = vmatpush.bf16.msra.mxu0 %v2226_v44  ;;  %v1241_v44 = vrot.slane %v2304_v38, 1 }
  0x29   : > { %733 = vmatpush.bf16.msra.mxu1 %v2218_v45  ;;  %v1242_v45 = vrot.slane %v2305_v39, 1  ;;  %v1244_v46 = vrot.slane %v1141_v40, 1  ;;  %v413_v47 = vsel %vm395_vm0, %v411_v41, %v412_v42  ;;  %v1259_v40 = vrot.slane %v1150_v36, 1 }
  0x2a   : > { %968 = vmatpush.bf16.msra.mxu2 %v2250_v48  ;;  %v415_v48 = vsel %vm395_vm0, %v412_v42, %v414_v43 }
  0x2b   : > { %1426 = vmatpush.bf16.msra.mxu3 %v2258_v49  ;;  %597 = vmatmul.bf16.vlgmr.msra.gmra.mxu0 %v508_v52  ;;  %v1243_v49 = vsel %vm395_vm0, %v1241_v44, %v1242_v45  ;;  %v1245_v50 = vsel %vm395_vm0, %v1242_v45, %v1244_v46  ;;  %v511_v51 = vpack.c.bf16 %v415_v48, %v413_v47  ;;  %v2237_v52 = vld [vmem:[%s2449_s28 + $0x30] sm:$0xff]  ;;  %v322_v48 = vld [vmem:[%s2449_s28 + $0x5c] sm:$0x1] }
  0x2c   : > { %734 = vmatmul.bf16.vlgmr.msra.gmra.mxu1 %v2267_v20  ;;  %v1138_v20 = vunpack.c.l.bf16 %v2127_v16  ;;  %v1147_v16 = vunpack.c.l.bf16 %v2136_v10  ;;  %v233_v47 = vld [vmem:[%s2449_s28 + $0x54] sm:$0xff]  }
  0x2d   : > { %969 = vmatmul.bf16.vlgmr.msra.gmra.mxu2 %v2234_v53  ;;  %v1341_v53 = vpack.c.bf16 %v1245_v50, %v1243_v49  ;;  %v2142_v50 = vld [vmem:[%s2449_s28 + $0x68] sm:$0x1] }
  0x2e   : > { %1427 = vmatmul.bf16.vlgmr.msra.gmra.mxu3 %v1338_v54  ;;  %v1239_v24 = vrot.slane %v1138_v20, 1  ;;  %v319_v54 = vld [vmem:[%s2449_s28 + $0x38] sm:$0x1]  ;;  %v1251_v20 = vrot.slane %v2308_v14, 1  ;;  %v1254_v22 = vrot.slane %v1147_v16, 1  ;;  %v1153_v56 = vunpack.c.l.bf16 %v2142_v50 }
  0x30   : > { %v1240_v27 = vsel %vm395_vm0, %v1237_v23, %v1239_v24  ;;  %v1253_v25 = vsel %vm395_vm0, %v1251_v20, %v1252_v21 }
  0x31   : > { %v1340_v30 = vpack.c.bf16 %v1240_v27, %v1238_v26  ;;  %v1255_v26 = vsel %vm395_vm0, %v1252_v21, %v1254_v22 }
  0x3b   : > { %602 = vmatmul.bf16.gmra.mxu0 %v509_v11  ;;  %v261_v11 = vunpack.c.l.bf16 %v229_v7 }
  0x3c   : > { %739 = vmatmul.bf16.gmra.mxu1 %v221_v55  ;;  %v2131_v55 = vld [vmem:[%s2449_s28 + $0x3c] sm:$0xff]  }
  0x3d   : > { %974 = vmatmul.bf16.gmra.mxu2 %v2235_v12  ;;  %v1142_v58 = vunpack.c.l.bf16 %v2131_v55  ;;  %v1143_v59 = vunpack.c.h.bf16 %v2131_v55  ;;  %v262_v12 = vunpack.c.h.bf16 %v229_v7  ;;  %v421_v17 = vrot.slane %v261_v11, 1 }
  0x3e   : > { %1432 = vmatmul.bf16.gmra.mxu3 %v1339_v13  ;;  %v336_v13 = vunpack.c.l.bf16 %v320_v8  ;;  %v2145_v8 = vld [vmem:[%s2449_s28 + $0x74] sm:$0x1] }
  0x3f   : > { %v1246_v62 = vrot.slane %v1142_v58, 1  ;;  %v1247_v63 = vrot.slane %v1143_v59, 1  ;;  %v422_v18 = vrot.slane %v262_v12, 1  ;;  %v1156_v12 = vunpack.c.l.bf16 %v2145_v8 }
  0x40   : > { %v424_v19 = vrot.slane %v336_v13, 1 }
  0x41   : > { %v1248_v2 = vsel %vm395_vm0, %v1246_v62, %v1247_v63  ;;  %v1250_v3 = vsel %vm395_vm0, %v1247_v63, %v1249_v0  ;;  %v423_v23 = vsel %vm395_vm0, %v421_v17, %v422_v18  ;;  %v1264_v62 = vrot.slane %v1153_v56, 1 }
  0x42   : > { %v1342_v6 = vpack.c.bf16 %v1250_v3, %v1248_v2  ;;  %v425_v24 = vsel %vm395_vm0, %v422_v18, %v424_v19  ;;  %v1269_v16 = vrot.slane %v1156_v12, 1 }
  0x43   : > { %v513_v27 = vpack.c.bf16 %v425_v24, %v423_v23  ;;  %v2242_v23 = vld [vmem:[%s2449_s28 + $0x6c] sm:$0xff] }
  0x4b   : > { %607 = vmatmul.bf16.gmra.mxu0 %v510_v28  ;;  %v2239_v28 = vld [vmem:[%s2449_s28 + $0x48] sm:$0xff] }
  0x4c   : > { %744 = vmatmul.bf16.gmra.mxu1 %v2337_v57  ;;  %v335_v57 = vunpack.c.l.bf16 %v319_v54 }
  0x4d   : > { %979 = vmatmul.bf16.gmra.mxu2 %v2236_v29  ;;  %v1343_v29 = vpack.c.bf16 %v1255_v26, %v1253_v25  ;;  %v324_v26 = vld [vmem:[%s2449_s28 + $0x74] sm:$0x1] }
  0x4e   : > { %1437 = vmatmul.bf16.gmra.mxu3 %v1340_v30  ;;  %v419_v61 = vrot.slane %v335_v57, 1  ;;  %v321_v30 = vld [vmem:[%s2449_s28 + $0x50] sm:$0x1]  ;;  %v340_v32 = vunpack.c.l.bf16 %v324_v26 }
  0x50   : > { %v420_v1 = vsel %vm395_vm0, %v1242_v45, %v419_v61  ;;  %v2240_v45 = vld [vmem:[%s2449_s28 + $0x54] sm:$0xff] }
  0x51   : > { %v512_v4 = vpack.c.bf16 %v420_v1, %v1243_v49  ;;  %v2340_v49 = vld [vmem:[%s2449_s28 + $0x60] sm:$0xff]  }
  0x52   : > { %v2312_v54 = vunpack.c.l.bf16 %v2340_v49  ;;  %v2313_v55 = vunpack.c.h.bf16 %v2340_v49 }
  0x54   : > { %v1261_v60 = vrot.slane %v2312_v54, 1  ;;  %v1262_v61 = vrot.slane %v2313_v55, 1 }
  0x56   : > { %v1263_v1 = vsel %vm395_vm0, %v1261_v60, %v1262_v61  ;;  %v1265_v2 = vsel %vm395_vm0, %v1262_v61, %v1264_v62  ;;  %v2243_v60 = vld [vmem:[%s2449_s28 + $0x78] sm:$0xff]  ;;  %v325_v62 = vld [vmem:[%s2449_s28 + $0x80] sm:$0x1] }
  0x5b   : > { %612 = vmatmul.bf16.gmra.mxu0 %v511_v51  ;;  %v265_v51 = vunpack.c.l.bf16 %v233_v47 }
  0x5c   : > { %749 = vmatmul.bf16.gmra.mxu1 %v225_v31  ;;  %v2137_v31 = vld [vmem:[%s2449_s28 + $0x54] sm:$0xff]  }
  0x5d   : > { %984 = vmatmul.bf16.gmra.mxu2 %v2237_v52  ;;  %v1148_v34 = vunpack.c.l.bf16 %v2137_v31  ;;  %v1149_v35 = vunpack.c.h.bf16 %v2137_v31  ;;  %v266_v52 = vunpack.c.h.bf16 %v233_v47  ;;  %v431_v57 = vrot.slane %v265_v51, 1 }
  0x5e   : > { %1442 = vmatmul.bf16.gmra.mxu3 %v1341_v53  ;;  %v338_v53 = vunpack.c.l.bf16 %v322_v48 }
  0x5f   : > { %v1256_v38 = vrot.slane %v1148_v34, 1  ;;  %v1257_v39 = vrot.slane %v1149_v35, 1  ;;  %v432_v58 = vrot.slane %v266_v52, 1 }
  0x60   : > { %v434_v59 = vrot.slane %v338_v53, 1 }
  0x61   : > { %v1258_v42 = vsel %vm395_vm0, %v1256_v38, %v1257_v39  ;;  %v1260_v43 = vsel %vm395_vm0, %v1257_v39, %v1259_v40  ;;  %v433_v63 = vsel %vm395_vm0, %v431_v57, %v432_v58 }
  0x62   : > { %v1344_v46 = vpack.c.bf16 %v1260_v43, %v1258_v42  ;;  %v435_v0 = vsel %vm395_vm0, %v432_v58, %v434_v59  ;;  %v444_v43 = vrot.slane %v340_v32, 1 }
  0x63   : > { %v515_v3 = vpack.c.bf16 %v435_v0, %v433_v63 }
  0x6b   : > { %617 = vmatmul.bf16.gmra.mxu0 %v512_v4  ;;  %v2241_v4 = vld [vmem:[%s2449_s28 + $0x60] sm:$0xff] }
  0x6c   : > { %754 = vmatmul.bf16.gmra.mxu1 %v2338_v33  ;;  %v337_v33 = vunpack.c.l.bf16 %v321_v30 }
  0x6d   : > { %989 = vmatmul.bf16.gmra.mxu2 %v2238_v5  ;;  %v1345_v5 = vpack.c.bf16 %v1265_v2, %v1263_v1  ;;  %v2151_v2 = vld [vmem:[%s2449_s28 + $0x8c] sm:$0x1] }
  0x6e   : > { %1447 = vmatmul.bf16.gmra.mxu3 %v1342_v6  ;;  %v429_v37 = vrot.slane %v337_v33, 1  ;;  %v323_v6 = vld [vmem:[%s2449_s28 + $0x68] sm:$0x1]  ;;  %v1162_v12 = vunpack.c.l.bf16 %v2151_v2 }
  0x70   : > { %v430_v41 = vsel %vm395_vm0, %v1252_v21, %v429_v37 }
  0x71   : > { %v514_v44 = vpack.c.bf16 %v430_v41, %v1253_v25  ;;  %v237_v25 = vld [vmem:[%s2449_s28 + $0x6c] sm:$0xff]  }
  0x72   : > { %v269_v30 = vunpack.c.l.bf16 %v237_v25  ;;  %v270_v31 = vunpack.c.h.bf16 %v237_v25 }
  0x74   : > { %v441_v41 = vrot.slane %v269_v30, 1  ;;  %v442_v42 = vrot.slane %v270_v31, 1 }
  0x76   : > { %v445_v50 = vsel %vm395_vm0, %v442_v42, %v444_v43  ;;  %v2244_v43 = vld [vmem:[%s2449_s28 + $0x84] sm:$0xff] }
  0x7b   : > { %622 = vmatmul.bf16.gmra.mxu0 %v513_v27  ;;  %v2575_v27 = vld [vmem:[%s2449_s28 + $0x78] sm:$0xff]  }
  0x7c   : > { %759 = vmatmul.bf16.gmra.mxu1 %v229_v7  ;;  %v2143_v7 = vld [vmem:[%s2449_s28 + $0x6c] sm:$0xff]   ;;  %v2316_v33 = vunpack.c.l.bf16 %v2575_v27  ;;  %v2317_v34 = vunpack.c.h.bf16 %v2575_v27 }
  0x7d   : > { %994 = vmatmul.bf16.gmra.mxu2 %v2239_v28  ;;  %v1154_v10 = vunpack.c.l.bf16 %v2143_v7  ;;  %v1155_v11 = vunpack.c.h.bf16 %v2143_v7  ;;  %v2148_v28 = vld [vmem:[%s2449_s28 + $0x80] sm:$0x1] }
  0x7e   : > { %1452 = vmatmul.bf16.gmra.mxu3 %v1343_v29  ;;  %v1159_v35 = vunpack.c.l.bf16 %v2148_v28 }
  0x7f   : > { %v1266_v14 = vrot.slane %v1154_v10, 1  ;;  %v1267_v15 = vrot.slane %v1155_v11, 1 }
  0x81   : > { %v1268_v18 = vsel %vm395_vm0, %v1266_v14, %v1267_v15  ;;  %v1270_v19 = vsel %vm395_vm0, %v1267_v15, %v1269_v16 }
  0x82   : > { %v1346_v24 = vpack.c.bf16 %v1270_v19, %v1268_v18 }
  0x8b   : > { %627 = vmatmul.bf16.gmra.mxu0 %v514_v44  ;;  %v1271_v44 = vrot.slane %v2316_v33, 1 }
  0x8c   : > { %764 = vmatmul.bf16.gmra.mxu1 %v2339_v9  ;;  %v339_v9 = vunpack.c.l.bf16 %v323_v6 }
  0x8d   : > { %999 = vmatmul.bf16.gmra.mxu2 %v2240_v45  ;;  %v1272_v45 = vrot.slane %v2317_v34, 1 }
  0x8e   : > { %1457 = vmatmul.bf16.gmra.mxu3 %v1344_v46  ;;  %v439_v13 = vrot.slane %v339_v9, 1  ;;  %v1274_v46 = vrot.slane %v1159_v35, 1 }
  0x8f   : > { %v2589_v51 = vsel %vm395_vm0, %v1271_v44, %v1272_v45 }
  0x90   : > { %v440_v17 = vsel %vm395_vm0, %v1262_v61, %v439_v13  ;;  %v1275_v52 = vsel %vm395_vm0, %v1272_v45, %v1274_v46  ;;  %v326_v46 = vld [vmem:[%s2449_s28 + $0x8c] sm:$0x1] }
  0x91   : > { %v516_v20 = vpack.c.bf16 %v440_v17, %v1263_v1  ;;  %v1347_v61 = vpack.c.bf16 %v1275_v52, %v2589_v51  ;;  %v2149_v1 = vld [vmem:[%s2449_s28 + $0x84] sm:$0xff]  }
  0x92   : > { %v1160_v10 = vunpack.c.l.bf16 %v2149_v1  ;;  %v1161_v11 = vunpack.c.h.bf16 %v2149_v1 }
  0x9b   : > { %632 = vmatmul.bf16.gmra.mxu0 %v515_v3 }
  0x9c   : > { %769 = vmatmul.bf16.gmra.mxu1 %v233_v47 }
  0x9d   : > { %1004 = vmatmul.bf16.gmra.mxu2 %v2241_v4  ;;  %v341_v4 = vunpack.c.l.bf16 %v325_v62 }
  0x9e   : > { %1462 = vmatmul.bf16.gmra.mxu3 %v1345_v5 }
  0xa8   : > { %v598_v21 = vpop.f32.mrf.mxu0 }
  0xa9   : > { %v735_v22 = vpop.f32.mrf.mxu1 }
  0xaa   : > { %v736_v29 = vadd.f32 %v735_v22, %v598_v21  ;;  %v449_v21 = vrot.slane %v341_v4, 1  ;;  %v1276_v22 = vrot.slane %v1160_v10, 1 }
  0xab   : > { %637 = vmatmul.bf16.gmra.mxu0 %v516_v20 }
  0xac   : > { %774 = vmatmul.bf16.gmra.mxu1 %v2340_v49  ;;  %v443_v49 = vsel %vm395_vm0, %v441_v41, %v442_v42  ;;  %v450_v30 = vsel %vm395_vm0, %v1272_v45, %v449_v21  ;;  %v241_v45 = vld [vmem:[%s2449_s28 + $0x84] sm:$0xff]  }
  0xad   : > { %1009 = vmatmul.bf16.gmra.mxu2 %v2242_v23  ;;  %v517_v56 = vpack.c.bf16 %v445_v50, %v443_v49  ;;  %v1277_v23 = vrot.slane %v1161_v11, 1  ;;  %v2154_v49 = vld [vmem:[%s2449_s28 + $0x98] sm:$0x1]  ;;  %v273_v50 = vunpack.c.l.bf16 %v241_v45  ;;  %v274_v52 = vunpack.c.h.bf16 %v241_v45 }
  0xae   : > { %1467 = vmatmul.bf16.gmra.mxu3 %v1346_v24  ;;  %v1279_v24 = vrot.slane %v1162_v12, 1 }
  0xaf   : > { %v1278_v32 = vsel %vm395_vm0, %v1276_v22, %v1277_v23  ;;  %v452_v1 = vrot.slane %v274_v52, 1 }
  0xb0   : > { %v970_v36 = vpop.f32.mrf.mxu2  ;;  %v600_v39 = vpop.f32.mrf.mxu0  ;;  %v1280_v33 = vsel %vm395_vm0, %v1277_v23, %v1279_v24 }
  0xb1   : > { %v1428_v37 = vpop.f32.mrf.mxu3  ;;  %v1050_v38 = vadd.f32 %v970_v36, %v736_v29  ;;  %v737_v40 = vpop.f32.mrf.mxu1  ;;  %v1348_v44 = vpack.c.bf16 %v1280_v33, %v1278_v32  ;;  %v2155_v32 = vld [vmem:[%s2449_s28 + $0x9c] sm:$0xff]   ;;  %v2157_v33 = vld [vmem:[%s2449_s28 + $0xa4] sm:$0x1] }
  0xb2   : > { %v738_v53 = vadd.f32 %v737_v40, %v600_v39  ;;  %v518_v39 = vpack.c.bf16 %v450_v30, %v2589_v51  ;;  %v327_v30 = vld [vmem:[%s2449_s28 + $0x98] sm:$0x1] }
  0xb3   : > { %v1508_v47 = vadd.f32 %v1428_v37, %v1050_v38 }
  0xb5   : > { %v1540_v48 = vpack.c.bf16 %v1508_v47, %v1508_v47  ;;  %v1670_v63 = vmul.f32 %v1508_v47, %v1508_v47  ;;  %v1606_v3 = vsel %vm1605_vm2, %v1508_v47, 0.0 }
  0xb7   : > { %1573 = vst.msk [vmem:[%s2584_s17] sm:$0xf] %vm1572_vm1, %v1540_v48  ;;  %v1702_v13 = vsel %vm1605_vm2, %v1670_v63, 0.0  ;;  %v2617_v48 = vld [vmem:[%s2449_s28 + $0x90] sm:$0xff]  }
  0xb8   : > { %v972_v54 = vpop.f32.mrf.mxu2  ;;  %v603_v58 = vpop.f32.mrf.mxu0 }
  0xb9   : > { %v1430_v55 = vpop.f32.mrf.mxu3  ;;  %v1051_v57 = vadd.f32 %v972_v54, %v738_v53  ;;  %v740_v59 = vpop.f32.mrf.mxu1  ;;  %v342_v53 = vunpack.c.l.bf16 %v326_v46 }
  0xba   : > { %v741_v8 = vadd.f32 %v740_v59, %v603_v58  ;;  %v2320_v58 = vunpack.c.l.bf16 %v2617_v48  ;;  %v2321_v59 = vunpack.c.h.bf16 %v2617_v48 }
  0xbb   : > { %v1509_v0 = vadd.f32 %v1430_v55, %v1051_v57  ;;  %642 = vmatmul.bf16.gmra.mxu0 %v517_v56 }
  0xbc   : > { %779 = vmatmul.bf16.gmra.mxu1 %v237_v25 }
  0xbd   : > { %v1541_v5 = vpack.c.bf16 %v1509_v0, %v1509_v0  ;;  %v1607_v6 = vsel %vm1605_vm2, %v1509_v0, 0.0  ;;  %v1671_v7 = vmul.f32 %v1509_v0, %v1509_v0  ;;  %1014 = vmatmul.bf16.gmra.mxu2 %v2243_v60  ;;  %v1165_v60 = vunpack.c.l.bf16 %v2154_v49 }
  0xbe   : > { %1472 = vmatmul.bf16.gmra.mxu3 %v1347_v61  ;;  %v1608_v9 = vadd.f32 %v1607_v6, %v1606_v3  ;;  %v451_v0 = vrot.slane %v273_v50, 1  ;;  %v1281_v6 = vrot.slane %v2320_v58, 1 }
  0xbf   : > { %1574 = vst.msk [vmem:[%s2584_s17 + $0x4] sm:$0xf] %vm1572_vm1, %v1541_v5  ;;  %v1703_v14 = vsel %vm1605_vm2, %v1671_v7, 0.0  ;;  %v454_v5 = vrot.slane %v342_v53, 1  ;;  %v1282_v7 = vrot.slane %v2321_v59, 1 }
  0xc0   : > { %v1704_v15 = vadd.f32 %v1703_v14, %v1702_v13  ;;  %v975_v16 = vpop.f32.mrf.mxu2  ;;  %v605_v19 = vpop.f32.mrf.mxu0  ;;  %v453_v10 = vsel %vm395_vm0, %v451_v0, %v452_v1 }
  0xc1   : > { %v1433_v17 = vpop.f32.mrf.mxu3  ;;  %v1052_v18 = vadd.f32 %v975_v16, %v741_v8  ;;  %v742_v20 = vpop.f32.mrf.mxu1  ;;  %v1284_v8 = vrot.slane %v1165_v60, 1  ;;  %v455_v14 = vsel %vm395_vm0, %v452_v1, %v454_v5  ;;  %v2631_v16 = vsel %vm395_vm0, %v1281_v6, %v1282_v7 }
  0xc2   : > { %v743_v35 = vadd.f32 %v742_v20, %v605_v19  ;;  %v519_v23 = vpack.c.bf16 %v455_v14, %v453_v10  ;;  %v328_v10 = vld [vmem:[%s2449_s28 + $0xa4] sm:$0x1] }
  0xc3   : > { %v1510_v25 = vadd.f32 %v1433_v17, %v1052_v18  ;;  %v1285_v17 = vsel %vm395_vm0, %v1282_v7, %v1284_v8 }
  0xc5   : > { %v1542_v26 = vpack.c.bf16 %v1510_v25, %v1510_v25  ;;  %v1609_v28 = vsel %vm1605_vm2, %v1510_v25, 0.0  ;;  %v1672_v29 = vmul.f32 %v1510_v25, %v1510_v25 }
  0xc6   : > { %v1610_v31 = vadd.f32 %v1609_v28, %v1608_v9  ;;  %v2245_v28 = vld [vmem:[%s2449_s28 + $0x90] sm:$0xff] }
  0xc7   : > { %1575 = vst.msk [vmem:[%s2584_s17 + $0x8] sm:$0xf] %vm1572_vm1, %v1542_v26  ;;  %v1705_v34 = vsel %vm1605_vm2, %v1672_v29, 0.0  ;;  %v1349_v29 = vpack.c.bf16 %v1285_v17, %v2631_v16  ;;  %v344_v17 = vunpack.c.l.bf16 %v328_v10 }
  0xc8   : > { %v1706_v36 = vadd.f32 %v1705_v34, %v1704_v15  ;;  %v977_v37 = vpop.f32.mrf.mxu2  ;;  %v608_v41 = vpop.f32.mrf.mxu0  ;;  %v343_v34 = vunpack.c.l.bf16 %v327_v30 }
  0xc9   : > { %v1435_v38 = vpop.f32.mrf.mxu3  ;;  %v1053_v40 = vadd.f32 %v977_v37, %v743_v35  ;;  %v745_v42 = vpop.f32.mrf.mxu1 }
  0xca   : > { %v746_v56 = vadd.f32 %v745_v42, %v608_v41  ;;  %v1167_v41 = vunpack.c.h.bf16 %v2155_v32  ;;  %v1168_v42 = vunpack.c.l.bf16 %v2157_v33  ;;  %v459_v52 = vrot.slane %v343_v34, 1 }
  0xcb   : > { %v1511_v47 = vadd.f32 %v1435_v38, %v1053_v40  ;;  %647 = vmatmul.bf16.gmra.mxu0 %v518_v39  ;;  %v1166_v40 = vunpack.c.l.bf16 %v2155_v32  ;;  %v464_v34 = vrot.slane %v344_v17, 1 }
  0xcc   : > { %784 = vmatmul.bf16.gmra.mxu1 %v2575_v27  ;;  %v460_v59 = vsel %vm395_vm0, %v1282_v7, %v459_v52  ;;  %v2246_v7 = vld [vmem:[%s2449_s28 + $0x9c] sm:$0xff] }
  0xcd   : > { %v1543_v54 = vpack.c.bf16 %v1511_v47, %v1511_v47  ;;  %v1611_v51 = vsel %vm1605_vm2, %v1511_v47, 0.0  ;;  %v1673_v55 = vmul.f32 %v1511_v47, %v1511_v47  ;;  %1019 = vmatmul.bf16.gmra.mxu2 %v2244_v43  ;;  %v1286_v53 = vrot.slane %v1166_v40, 1 }
  0xce   : > { %1477 = vmatmul.bf16.gmra.mxu3 %v1348_v44  ;;  %v1612_v57 = vadd.f32 %v1611_v51, %v1610_v31  ;;  %v1289_v51 = vrot.slane %v1168_v42, 1 }
  0xcf   : > { %1576 = vst.msk [vmem:[%s2584_s17 + $0xc] sm:$0xf] %vm1572_vm1, %v1543_v54  ;;  %v1707_v27 = vsel %vm1605_vm2, %v1673_v55, 0.0  ;;  %v1287_v54 = vrot.slane %v1167_v41, 1 }
  0xd0   : > { %v1708_v61 = vadd.f32 %v1707_v27, %v1706_v36  ;;  %v980_v62 = vpop.f32.mrf.mxu2  ;;  %v610_v3 = vpop.f32.mrf.mxu0 }
  0xd1   : > { %v1438_v63 = vpop.f32.mrf.mxu3  ;;  %v1054_v2 = vadd.f32 %v980_v62, %v746_v56  ;;  %v747_v4 = vpop.f32.mrf.mxu1  ;;  %v1288_v27 = vsel %vm395_vm0, %v1286_v53, %v1287_v54 }
  0xd2   : > { %v748_v19 = vadd.f32 %v747_v4, %v610_v3  ;;  %v520_v3 = vpack.c.bf16 %v460_v59, %v2631_v16  ;;  %v329_v59 = vld [vmem:[%s2449_s28 + $0xb0] sm:$0x1] }
  0xd3   : > { %v1512_v9 = vadd.f32 %v1438_v63, %v1054_v2 }
  0xd5   : > { %v1544_v11 = vpack.c.bf16 %v1512_v9, %v1512_v9  ;;  %v1613_v12 = vsel %vm1605_vm2, %v1512_v9, 0.0  ;;  %v1674_v13 = vmul.f32 %v1512_v9, %v1512_v9  ;;  %v245_v9 = vld [vmem:[%s2449_s28 + $0x9c] sm:$0xff]  }
  0xd6   : > { %v1614_v15 = vadd.f32 %v1613_v12, %v1612_v57  ;;  %v2658_v12 = vld [vmem:[%s2449_s28 + $0xa8] sm:$0xff]   ;;  %v277_v14 = vunpack.c.l.bf16 %v245_v9 }
  0xd7   : > { %1577 = vst.msk [vmem:[%s2584_s17 + $0x10] sm:$0xf] %vm1572_vm1, %v1544_v11  ;;  %v1709_v18 = vsel %vm1605_vm2, %v1674_v13, 0.0  ;;  %v2160_v13 = vld [vmem:[%s2449_s28 + $0xb0] sm:$0x1] }
  0xd8   : > { %v1710_v20 = vadd.f32 %v1709_v18, %v1708_v61  ;;  %v982_v21 = vpop.f32.mrf.mxu2  ;;  %v613_v25 = vpop.f32.mrf.mxu0  ;;  %v1290_v61 = vsel %vm395_vm0, %v1287_v54, %v1289_v51 }
  0xd9   : > { %v1440_v22 = vpop.f32.mrf.mxu3  ;;  %v1055_v24 = vadd.f32 %v982_v21, %v748_v19  ;;  %v750_v26 = vpop.f32.mrf.mxu1  ;;  %v1350_v8 = vpack.c.bf16 %v1290_v61, %v1288_v27  ;;  %v2161_v27 = vld [vmem:[%s2449_s28 + $0xb4] sm:$0xff]   ;;  %v2163_v61 = vld [vmem:[%s2449_s28 + $0xbc] sm:$0x1] }
  0xda   : > { %v751_v38 = vadd.f32 %v750_v26, %v613_v25 }
  0xdb   : > { %v1513_v31 = vadd.f32 %v1440_v22, %v1055_v24  ;;  %652 = vmatmul.bf16.gmra.mxu0 %v519_v23  ;;  %v2324_v22 = vunpack.c.l.bf16 %v2658_v12  ;;  %v2325_v23 = vunpack.c.h.bf16 %v2658_v12  ;;  %v1171_v24 = vunpack.c.l.bf16 %v2160_v13 }
  0xdc   : > { %789 = vmatmul.bf16.gmra.mxu1 %v241_v45 }
  0xdd   : > { %v1545_v35 = vpack.c.bf16 %v1513_v31, %v1513_v31  ;;  %v1615_v36 = vsel %vm1605_vm2, %v1513_v31, 0.0  ;;  %v1675_v37 = vmul.f32 %v1513_v31, %v1513_v31  ;;  %1024 = vmatmul.bf16.gmra.mxu2 %v2245_v28 }
  0xde   : > { %1482 = vmatmul.bf16.gmra.mxu3 %v1349_v29  ;;  %v1616_v39 = vadd.f32 %v1615_v36, %v1614_v15  ;;  %v278_v15 = vunpack.c.h.bf16 %v245_v9  ;;  %v461_v29 = vrot.slane %v277_v14, 1  ;;  %v1292_v36 = vrot.slane %v2325_v23, 1 }
  0xdf   : > { %1578 = vst.msk [vmem:[%s2584_s17 + $0x14] sm:$0xf] %vm1572_vm1, %v1545_v35  ;;  %v1711_v43 = vsel %vm1605_vm2, %v1675_v37, 0.0  ;;  %v1291_v35 = vrot.slane %v2324_v22, 1  ;;  %v1294_v37 = vrot.slane %v1171_v24, 1 }
  0xe0   : > { %v1712_v44 = vadd.f32 %v1711_v43, %v1710_v20  ;;  %v985_v46 = vpop.f32.mrf.mxu2  ;;  %v615_v49 = vpop.f32.mrf.mxu0  ;;  %v462_v30 = vrot.slane %v278_v15, 1 }
  0xe1   : > { %v1443_v47 = vpop.f32.mrf.mxu3  ;;  %v1056_v45 = vadd.f32 %v985_v46, %v751_v38  ;;  %v752_v50 = vpop.f32.mrf.mxu1  ;;  %v2672_v46 = vsel %vm395_vm0, %v1291_v35, %v1292_v36 }
  0xe2   : > { %v753_v63 = vadd.f32 %v752_v50, %v615_v49  ;;  %v465_v43 = vsel %vm395_vm0, %v462_v30, %v464_v34 }
  0xe3   : > { %v1514_v55 = vadd.f32 %v1443_v47, %v1056_v45  ;;  %v1295_v47 = vsel %vm395_vm0, %v1292_v36, %v1294_v37 }
  0xe5   : > { %v1546_v56 = vpack.c.bf16 %v1514_v55, %v1514_v55  ;;  %v1617_v57 = vsel %vm1605_vm2, %v1514_v55, 0.0  ;;  %v1676_v58 = vmul.f32 %v1514_v55, %v1514_v55 }
  0xe6   : > { %v1618_v60 = vadd.f32 %v1617_v57, %v1616_v39  ;;  %v463_v39 = vsel %vm395_vm0, %v461_v29, %v462_v30  ;;  %v2247_v57 = vld [vmem:[%s2449_s28 + $0xa8] sm:$0xff] }
  0xe7   : > { %1579 = vst.msk [vmem:[%s2584_s17 + $0x18] sm:$0xf] %vm1572_vm1, %v1546_v56  ;;  %v1713_v62 = vsel %vm1605_vm2, %v1676_v58, 0.0  ;;  %v521_v54 = vpack.c.bf16 %v465_v43, %v463_v39  ;;  %v1351_v58 = vpack.c.bf16 %v1295_v47, %v2672_v46  ;;  %v330_v39 = vld [vmem:[%s2449_s28 + $0xbc] sm:$0x1] }
  0xe8   : > { %v1714_v0 = vadd.f32 %v1713_v62, %v1712_v44  ;;  %v987_v1 = vpop.f32.mrf.mxu2  ;;  %v618_v5 = vpop.f32.mrf.mxu0  ;;  %v345_v62 = vunpack.c.l.bf16 %v329_v59  ;;  %v346_v47 = vunpack.c.l.bf16 %v330_v39 }
  0xe9   : > { %v1445_v2 = vpop.f32.mrf.mxu3  ;;  %v1057_v4 = vadd.f32 %v987_v1, %v753_v63  ;;  %v755_v6 = vpop.f32.mrf.mxu1 }
  0xea   : > { %v756_v20 = vadd.f32 %v755_v6, %v618_v5  ;;  %v1173_v5 = vunpack.c.h.bf16 %v2161_v27  ;;  %v1174_v6 = vunpack.c.l.bf16 %v2163_v61  ;;  %v469_v15 = vrot.slane %v345_v62, 1 }
  0xeb   : > { %v1515_v11 = vadd.f32 %v1445_v2, %v1057_v4  ;;  %657 = vmatmul.bf16.gmra.mxu0 %v520_v3  ;;  %v1172_v4 = vunpack.c.l.bf16 %v2161_v27  ;;  %v474_v62 = vrot.slane %v346_v47, 1 }
  0xec   : > { %794 = vmatmul.bf16.gmra.mxu1 %v2617_v48  ;;  %v470_v23 = vsel %vm395_vm0, %v1292_v36, %v469_v15  ;;  %v2248_v36 = vld [vmem:[%s2449_s28 + $0xb4] sm:$0xff] }
  0xed   : > { %v1547_v18 = vpack.c.bf16 %v1515_v11, %v1515_v11  ;;  %v1619_v16 = vsel %vm1605_vm2, %v1515_v11, 0.0  ;;  %v1677_v19 = vmul.f32 %v1515_v11, %v1515_v11  ;;  %1029 = vmatmul.bf16.gmra.mxu2 %v2246_v7  ;;  %v1296_v17 = vrot.slane %v1172_v4, 1 }
  0xee   : > { %1487 = vmatmul.bf16.gmra.mxu3 %v1350_v8  ;;  %v1620_v21 = vadd.f32 %v1619_v16, %v1618_v60  ;;  %v1299_v16 = vrot.slane %v1174_v6, 1 }
  0xef   : > { %1580 = vst.msk [vmem:[%s2584_s17 + $0x1c] sm:$0xf] %vm1572_vm1, %v1547_v18  ;;  %v1715_v48 = vsel %vm1605_vm2, %v1677_v19, 0.0  ;;  %v1297_v18 = vrot.slane %v1173_v5, 1 }
  0xf0   : > { %v1716_v25 = vadd.f32 %v1715_v48, %v1714_v0  ;;  %v990_v26 = vpop.f32.mrf.mxu2  ;;  %v620_v32 = vpop.f32.mrf.mxu0 }
  0xf1   : > { %v1448_v28 = vpop.f32.mrf.mxu3  ;;  %v1058_v31 = vadd.f32 %v990_v26, %v756_v20  ;;  %v757_v33 = vpop.f32.mrf.mxu1  ;;  %v1298_v48 = vsel %vm395_vm0, %v1296_v17, %v1297_v18 }
  0xf2   : > { %v758_v49 = vadd.f32 %v757_v33, %v620_v32  ;;  %v522_v32 = vpack.c.bf16 %v470_v23, %v2672_v46 }
  0xf3   : > { %v1516_v38 = vadd.f32 %v1448_v28, %v1058_v31 }
  0xf5   : > { %v1548_v40 = vpack.c.bf16 %v1516_v38, %v1516_v38  ;;  %v1621_v41 = vsel %vm1605_vm2, %v1516_v38, 0.0  ;;  %v1678_v42 = vmul.f32 %v1516_v38, %v1516_v38  ;;  %v249_v38 = vld [vmem:[%s2449_s28 + $0xb4] sm:$0xff]  }
  0xf6   : > { %v1622_v44 = vadd.f32 %v1621_v41, %v1620_v21  ;;  %v2344_v41 = vld [vmem:[%s2449_s28 + $0xc0] sm:$0xff]   ;;  %v281_v43 = vunpack.c.l.bf16 %v249_v38 }
  0xf7   : > { %1581 = vst.msk [vmem:[%s2584_s17 + $0x20] sm:$0xf] %vm1572_vm1, %v1548_v40  ;;  %v1717_v45 = vsel %vm1605_vm2, %v1678_v42, 0.0  ;;  %v2166_v42 = vld [vmem:[%s2449_s28 + $0xc8] sm:$0x1] }
  0xf8   : > { %v1718_v50 = vadd.f32 %v1717_v45, %v1716_v25  ;;  %v992_v52 = vpop.f32.mrf.mxu2  ;;  %v623_v55 = vpop.f32.mrf.mxu0  ;;  %v1300_v25 = vsel %vm395_vm0, %v1297_v18, %v1299_v16 }
  0xf9   : > { %v1450_v53 = vpop.f32.mrf.mxu3  ;;  %v1059_v51 = vadd.f32 %v992_v52, %v758_v49  ;;  %v760_v56 = vpop.f32.mrf.mxu1  ;;  %v1352_v37 = vpack.c.bf16 %v1300_v25, %v1298_v48 }
  0xfa   : > { %v761_v2 = vadd.f32 %v760_v56, %v623_v55 }
  0xfb   : > { %v1517_v60 = vadd.f32 %v1450_v53, %v1059_v51  ;;  %662 = vmatmul.bf16.gmra.mxu0 %v521_v54  ;;  %v2328_v53 = vunpack.c.l.bf16 %v2344_v41  ;;  %v2329_v54 = vunpack.c.h.bf16 %v2344_v41  ;;  %v1177_v51 = vunpack.c.l.bf16 %v2166_v42 }
  0xfc   : > { %799 = vmatmul.bf16.gmra.mxu1 %v245_v9 }
  0xfd   : > { %v1549_v63 = vpack.c.bf16 %v1517_v60, %v1517_v60  ;;  %v1623_v0 = vsel %vm1605_vm2, %v1517_v60, 0.0  ;;  %v1679_v1 = vmul.f32 %v1517_v60, %v1517_v60  ;;  %1034 = vmatmul.bf16.gmra.mxu2 %v2247_v57 }
  0xfe   : > { %1492 = vmatmul.bf16.gmra.mxu3 %v1351_v58  ;;  %v1624_v3 = vadd.f32 %v1623_v0, %v1622_v44  ;;  %v282_v44 = vunpack.c.h.bf16 %v249_v38  ;;  %v471_v58 = vrot.slane %v281_v43, 1  ;;  %v1302_v0 = vrot.slane %v2329_v54, 1 }
  0xff   : > { %1582 = vst.msk [vmem:[%s2584_s17 + $0x24] sm:$0xf] %vm1572_vm1, %v1549_v63  ;;  %v1719_v7 = vsel %vm1605_vm2, %v1679_v1, 0.0  ;;  %v1301_v63 = vrot.slane %v2328_v53, 1  ;;  %v1304_v1 = vrot.slane %v1177_v51, 1 }
 0x100   : > { %v1720_v8 = vadd.f32 %v1719_v7, %v1718_v50  ;;  %v995_v10 = vpop.f32.mrf.mxu2  ;;  %v625_v13 = vpop.f32.mrf.mxu0  ;;  %v472_v59 = vrot.slane %v282_v44, 1 }
 0x101   : > { %v1453_v11 = vpop.f32.mrf.mxu3  ;;  %v1060_v9 = vadd.f32 %v995_v10, %v761_v2  ;;  %v762_v14 = vpop.f32.mrf.mxu1  ;;  %v1303_v10 = vsel %vm395_vm0, %v1301_v63, %v1302_v0 }
 0x102   : > { %v763_v28 = vadd.f32 %v762_v14, %v625_v13  ;;  %v475_v7 = vsel %vm395_vm0, %v472_v59, %v474_v62 }
 0x103   : > { %v1518_v19 = vadd.f32 %v1453_v11, %v1060_v9  ;;  %v1305_v11 = vsel %vm395_vm0, %v1302_v0, %v1304_v1 }
 0x105   : > { %v1550_v20 = vpack.c.bf16 %v1518_v19, %v1518_v19  ;;  %v1625_v21 = vsel %vm1605_vm2, %v1518_v19, 0.0  ;;  %v1680_v22 = vmul.f32 %v1518_v19, %v1518_v19 }
 0x106   : > { %v1626_v24 = vadd.f32 %v1625_v21, %v1624_v3  ;;  %v473_v3 = vsel %vm395_vm0, %v471_v58, %v472_v59  ;;  %v2249_v21 = vld [vmem:[%s2449_s28 + $0xc0] sm:$0xff]  ;;  %s1893_s28 = sshll.u32 %s2828_s16, 3 }
 0x107   : > { %1583 = vst.msk [vmem:[%s2584_s17 + $0x28] sm:$0xf] %vm1572_vm1, %v1550_v20  ;;  %v1721_v26 = vsel %vm1605_vm2, %v1680_v22, 0.0  ;;  %v523_v18 = vpack.c.bf16 %v475_v7, %v473_v3  ;;  %v1353_v22 = vpack.c.bf16 %v1305_v11, %v1303_v10  ;;  %s214_s20 = scalar_lea.vmem %s2825_s3, %s1893_s28  ;;  %s218_s16 = scalar_lea.vmem %s2826_s4, %s1893_s28 }
 0x108   : > { %v1722_v29 = vadd.f32 %v1721_v26, %v1720_v8  ;;  %v997_v30 = vpop.f32.mrf.mxu2  ;;  %v628_v34 = vpop.f32.mrf.mxu0 }
 0x109   : > { %v1455_v31 = vpop.f32.mrf.mxu3  ;;  %v1061_v33 = vadd.f32 %v997_v30, %v763_v28  ;;  %v765_v35 = vpop.f32.mrf.mxu1 }
 0x10a   : > { %v766_v50 = vadd.f32 %v765_v35, %v628_v34 }
 0x10b   : > { %v1519_v40 = vadd.f32 %v1455_v31, %v1061_v33  ;;  %667 = vmatmul.bf16.gmra.mxu0 %v522_v32 }
 0x10c   : > { %804 = vmatmul.bf16.gmra.mxu1 %v2658_v12 }
 0x10d   : > { %v1551_v45 = vpack.c.bf16 %v1519_v40, %v1519_v40  ;;  %v1627_v46 = vsel %vm1605_vm2, %v1519_v40, 0.0  ;;  %v1681_v49 = vmul.f32 %v1519_v40, %v1519_v40  ;;  %1039 = vmatmul.bf16.gmra.mxu2 %v2248_v36 }
 0x10e   : > { %1497 = vmatmul.bf16.gmra.mxu3 %v1352_v37  ;;  %v1628_v52 = vadd.f32 %v1627_v46, %v1626_v24 }
 0x10f   : > { %1584 = vst.msk [vmem:[%s2584_s17 + $0x2c] sm:$0xf] %vm1572_vm1, %v1551_v45  ;;  %v1723_v55 = vsel %vm1605_vm2, %v1681_v49, 0.0 }
 0x110   : > { %v1724_v56 = vadd.f32 %v1723_v55, %v1722_v29  ;;  %v1000_v12 = vpop.f32.mrf.mxu2  ;;  %v630_v27 = vpop.f32.mrf.mxu0 }
 0x111   : > { %v1458_v57 = vpop.f32.mrf.mxu3  ;;  %v1062_v60 = vadd.f32 %v1000_v12, %v766_v50  ;;  %v767_v61 = vpop.f32.mrf.mxu1 }
 0x112   : > { %v768_v13 = vadd.f32 %v767_v61, %v630_v27 }
 0x113   : > { %v1520_v2 = vadd.f32 %v1458_v57, %v1062_v60 }
 0x115   : > { %v1552_v4 = vpack.c.bf16 %v1520_v2, %v1520_v2  ;;  %v1629_v5 = vsel %vm1605_vm2, %v1520_v2, 0.0  ;;  %v1682_v6 = vmul.f32 %v1520_v2, %v1520_v2 }
 0x116   : > { %v1630_v8 = vadd.f32 %v1629_v5, %v1628_v52 }
 0x117   : > { %1585 = vst.msk [vmem:[%s2584_s17 + $0x30] sm:$0xf] %vm1572_vm1, %v1552_v4  ;;  %v1725_v9 = vsel %vm1605_vm2, %v1682_v6, 0.0 }
 0x118   : > { %v1726_v14 = vadd.f32 %v1725_v9, %v1724_v56  ;;  %v1002_v15 = vpop.f32.mrf.mxu2  ;;  %v633_v19 = vpop.f32.mrf.mxu0 }
 0x119   : > { %v1460_v17 = vpop.f32.mrf.mxu3  ;;  %v1063_v16 = vadd.f32 %v1002_v15, %v768_v13  ;;  %v770_v20 = vpop.f32.mrf.mxu1 }
 0x11a   : > { %v771_v26 = vadd.f32 %v770_v20, %v633_v19 }
 0x11b   : > { %v1521_v23 = vadd.f32 %v1460_v17, %v1063_v16  ;;  %672 = vmatmul.bf16.gmra.mxu0 %v523_v18 }
 0x11c   : > { %809 = vmatmul.bf16.gmra.mxu1 %v249_v38 }
 0x11d   : > { %v1553_v24 = vpack.c.bf16 %v1521_v23, %v1521_v23  ;;  %v1631_v48 = vsel %vm1605_vm2, %v1521_v23, 0.0  ;;  %v1683_v25 = vmul.f32 %v1521_v23, %v1521_v23  ;;  %1044 = vmatmul.bf16.gmra.mxu2 %v2249_v21 }
 0x11e   : > { %1502 = vmatmul.bf16.gmra.mxu3 %v1353_v22  ;;  %v1632_v28 = vadd.f32 %v1631_v48, %v1630_v8 }
 0x11f   : > { %1586 = vst.msk [vmem:[%s2584_s17 + $0x34] sm:$0xf] %vm1572_vm1, %v1553_v24  ;;  %v1727_v29 = vsel %vm1605_vm2, %v1683_v25, 0.0 }
 0x120   : > { %v1728_v30 = vadd.f32 %v1727_v29, %v1726_v14  ;;  %v1005_v31 = vpop.f32.mrf.mxu2  ;;  %v635_v34 = vpop.f32.mrf.mxu0 }
 0x121   : > { %v1463_v32 = vpop.f32.mrf.mxu3  ;;  %v1064_v33 = vadd.f32 %v1005_v31, %v771_v26  ;;  %v772_v35 = vpop.f32.mrf.mxu1 }
 0x122   : > { %v773_v42 = vadd.f32 %v772_v35, %v635_v34 }
 0x123   : > { %v1522_v36 = vadd.f32 %v1463_v32, %v1064_v33 }
 0x125   : > { %v1554_v37 = vpack.c.bf16 %v1522_v36, %v1522_v36  ;;  %v1633_v38 = vsel %vm1605_vm2, %v1522_v36, 0.0  ;;  %v1684_v39 = vmul.f32 %v1522_v36, %v1522_v36 }
 0x126   : > { %v1634_v40 = vadd.f32 %v1633_v38, %v1632_v28 }
 0x127   : > { %1587 = vst.msk [vmem:[%s2584_s17 + $0x38] sm:$0xf] %vm1572_vm1, %v1554_v37  ;;  %v1729_v41 = vsel %vm1605_vm2, %v1684_v39, 0.0 }
 0x128   : > { %v1730_v43 = vadd.f32 %v1729_v41, %v1728_v30  ;;  %v1007_v44 = vpop.f32.mrf.mxu2  ;;  %v638_v46 = vpop.f32.mrf.mxu0 }
 0x129   : > { %v1465_v47 = vpop.f32.mrf.mxu3  ;;  %v1065_v45 = vadd.f32 %v1007_v44, %v773_v42  ;;  %v775_v49 = vpop.f32.mrf.mxu1 }
 0x12a   : > { %v776_v51 = vadd.f32 %v775_v49, %v638_v46 }
 0x12b   : > { %v1523_v50 = vadd.f32 %v1465_v47, %v1065_v45 }
 0x12d   : > { %v1555_v52 = vpack.c.bf16 %v1523_v50, %v1523_v50  ;;  %v1635_v53 = vsel %vm1605_vm2, %v1523_v50, 0.0  ;;  %v1685_v54 = vmul.f32 %v1523_v50, %v1523_v50 }
 0x12e   : > { %v1636_v55 = vadd.f32 %v1635_v53, %v1634_v40 }
 0x12f   : > { %1588 = vst.msk [vmem:[%s2584_s17 + $0x3c] sm:$0xf] %vm1572_vm1, %v1555_v52  ;;  %v1731_v56 = vsel %vm1605_vm2, %v1685_v54, 0.0 }
 0x130   : > { %v1732_v12 = vadd.f32 %v1731_v56, %v1730_v43  ;;  %v1010_v57 = vpop.f32.mrf.mxu2  ;;  %v640_v60 = vpop.f32.mrf.mxu0 }
 0x131   : > { %v1468_v58 = vpop.f32.mrf.mxu3  ;;  %v1066_v59 = vadd.f32 %v1010_v57, %v776_v51  ;;  %v777_v27 = vpop.f32.mrf.mxu1 }
 0x132   : > { %v778_v3 = vadd.f32 %v777_v27, %v640_v60 }
 0x133   : > { %v1524_v61 = vadd.f32 %v1468_v58, %v1066_v59 }
 0x135   : > { %v1556_v62 = vpack.c.bf16 %v1524_v61, %v1524_v61  ;;  %v1637_v63 = vsel %vm1605_vm2, %v1524_v61, 0.0  ;;  %v1686_v0 = vmul.f32 %v1524_v61, %v1524_v61 }
 0x136   : > { %v1638_v1 = vadd.f32 %v1637_v63, %v1636_v55 }
 0x137   : > { %1589 = vst.msk [vmem:[%s2584_s17 + $0x40] sm:$0xf] %vm1572_vm1, %v1556_v62  ;;  %v1733_v2 = vsel %vm1605_vm2, %v1686_v0, 0.0 }
 0x138   : > { %v1734_v4 = vadd.f32 %v1733_v2, %v1732_v12  ;;  %v1012_v5 = vpop.f32.mrf.mxu2  ;;  %v643_v8 = vpop.f32.mrf.mxu0 }
 0x139   : > { %v1470_v6 = vpop.f32.mrf.mxu3  ;;  %v1067_v7 = vadd.f32 %v1012_v5, %v778_v3  ;;  %v780_v10 = vpop.f32.mrf.mxu1 }
 0x13a   : > { %v781_v15 = vadd.f32 %v780_v10, %v643_v8 }
 0x13b   : > { %v1525_v11 = vadd.f32 %v1470_v6, %v1067_v7 }
 0x13d   : > { %v1557_v9 = vpack.c.bf16 %v1525_v11, %v1525_v11  ;;  %v1639_v13 = vsel %vm1605_vm2, %v1525_v11, 0.0  ;;  %v1687_v14 = vmul.f32 %v1525_v11, %v1525_v11 }
 0x13e   : > { %v1640_v17 = vadd.f32 %v1639_v13, %v1638_v1 }
 0x13f   : > { %1590 = vst.msk [vmem:[%s2584_s17 + $0x44] sm:$0xf] %vm1572_vm1, %v1557_v9  ;;  %v1735_v18 = vsel %vm1605_vm2, %v1687_v14, 0.0 }
 0x140   : > { %v1736_v16 = vadd.f32 %v1735_v18, %v1734_v4  ;;  %v1015_v19 = vpop.f32.mrf.mxu2  ;;  %v645_v22 = vpop.f32.mrf.mxu0 }
 0x141   : > { %v1473_v20 = vpop.f32.mrf.mxu3  ;;  %v1068_v21 = vadd.f32 %v1015_v19, %v781_v15  ;;  %v782_v23 = vpop.f32.mrf.mxu1 }
 0x142   : > { %v783_v30 = vadd.f32 %v782_v23, %v645_v22 }
 0x143   : > { %v1526_v24 = vadd.f32 %v1473_v20, %v1068_v21 }
 0x145   : > { %v1558_v48 = vpack.c.bf16 %v1526_v24, %v1526_v24  ;;  %v1641_v25 = vsel %vm1605_vm2, %v1526_v24, 0.0  ;;  %v1688_v26 = vmul.f32 %v1526_v24, %v1526_v24 }
 0x146   : > { %v1642_v28 = vadd.f32 %v1641_v25, %v1640_v17 }
 0x147   : > { %1591 = vst.msk [vmem:[%s2584_s17 + $0x48] sm:$0xf] %vm1572_vm1, %v1558_v48  ;;  %v1737_v29 = vsel %vm1605_vm2, %v1688_v26, 0.0 }
 0x148   : > { %v1738_v31 = vadd.f32 %v1737_v29, %v1736_v16  ;;  %v1017_v32 = vpop.f32.mrf.mxu2  ;;  %v648_v35 = vpop.f32.mrf.mxu0 }
 0x149   : > { %v1475_v33 = vpop.f32.mrf.mxu3  ;;  %v1069_v34 = vadd.f32 %v1017_v32, %v783_v30  ;;  %v785_v36 = vpop.f32.mrf.mxu1 }
 0x14a   : > { %v786_v41 = vadd.f32 %v785_v36, %v648_v35 }
 0x14b   : > { %v1527_v37 = vadd.f32 %v1475_v33, %v1069_v34 }
 0x14d   : > { %v1559_v38 = vpack.c.bf16 %v1527_v37, %v1527_v37  ;;  %v1643_v39 = vsel %vm1605_vm2, %v1527_v37, 0.0  ;;  %v1689_v40 = vmul.f32 %v1527_v37, %v1527_v37 }
 0x14e   : > { %v1644_v42 = vadd.f32 %v1643_v39, %v1642_v28 }
 0x14f   : > { %1592 = vst.msk [vmem:[%s2584_s17 + $0x4c] sm:$0xf] %vm1572_vm1, %v1559_v38  ;;  %v1739_v43 = vsel %vm1605_vm2, %v1689_v40, 0.0 }
 0x150   : > { %v1740_v44 = vadd.f32 %v1739_v43, %v1738_v31  ;;  %v1020_v47 = vpop.f32.mrf.mxu2  ;;  %v650_v49 = vpop.f32.mrf.mxu0 }
 0x151   : > { %v1478_v45 = vpop.f32.mrf.mxu3  ;;  %v1070_v46 = vadd.f32 %v1020_v47, %v786_v41  ;;  %v787_v50 = vpop.f32.mrf.mxu1 }
 0x152   : > { %v788_v12 = vadd.f32 %v787_v50, %v650_v49 }
 0x153   : > { %v1528_v52 = vadd.f32 %v1478_v45, %v1070_v46 }
 0x155   : > { %v1560_v53 = vpack.c.bf16 %v1528_v52, %v1528_v52  ;;  %v1645_v54 = vsel %vm1605_vm2, %v1528_v52, 0.0  ;;  %v1690_v51 = vmul.f32 %v1528_v52, %v1528_v52 }
 0x156   : > { %v2743_v55 = vadd.f32 %v1645_v54, %v1644_v42 }
 0x157   : > { %1593 = vst.msk [vmem:[%s2584_s17 + $0x50] sm:$0xf] %vm1572_vm1, %v1560_v53  ;;  %v1741_v56 = vsel %vm1605_vm2, %v1690_v51, 0.0 }
 0x158   : > { %v2748_v57 = vadd.f32 %v1741_v56, %v1740_v44  ;;  %v1022_v58 = vpop.f32.mrf.mxu2  ;;  %v653_v27 = vpop.f32.mrf.mxu0 }
 0x159   : > { %v1480_v59 = vpop.f32.mrf.mxu3  ;;  %v1071_v60 = vadd.f32 %v1022_v58, %v788_v12  ;;  %v790_v61 = vpop.f32.mrf.mxu1 }
 0x15a   : > { %v791_v0 = vadd.f32 %v790_v61, %v653_v27 }
 0x15b   : > { %v2750_v62 = vadd.f32 %v1480_v59, %v1071_v60 }
 0x15d   : > { %v1561_v63 = vpack.c.bf16 %v2750_v62, %v2750_v62  ;;  %v1691_v58 = vmul.f32 %v2750_v62, %v2750_v62  ;;  %v1647_v60 = vsel %vm1605_vm2, %v2750_v62, 0.0 }
 0x15f   : > { %1594 = vst.msk [vmem:[%s2584_s17 + $0x54] sm:$0xf] %vm1572_vm1, %v1561_v63 }
 0x160   : > { %v1025_v1 = vpop.f32.mrf.mxu2  ;;  %v655_v4 = vpop.f32.mrf.mxu0 }
 0x161   : > { %v1483_v2 = vpop.f32.mrf.mxu3  ;;  %v1072_v3 = vadd.f32 %v1025_v1, %v791_v0  ;;  %v792_v5 = vpop.f32.mrf.mxu1 }
 0x162   : > { %v793_v8 = vadd.f32 %v792_v5, %v655_v4  ;;  %v1648_v5 = vadd.f32 %v1647_v60, %v2743_v55 }
 0x163   : > { %v2756_v6 = vadd.f32 %v1483_v2, %v1072_v3  ;;  %v1743_v2 = vsel %vm1605_vm2, %v1691_v58, 0.0 }
 0x165   : > { %v1562_v7 = vpack.c.bf16 %v2756_v6, %v2756_v6  ;;  %v1692_v27 = vmul.f32 %v2756_v6, %v2756_v6  ;;  %v1649_v3 = vsel %vm1605_vm2, %v2756_v6, 0.0 }
 0x167   : > { %1595 = vst.msk [vmem:[%s2584_s17 + $0x58] sm:$0xf] %vm1572_vm1, %v1562_v7  ;;  %v1745_v62 = vsel %vm1605_vm2, %v1692_v27, 0.0 }
 0x168   : > { %v1027_v10 = vpop.f32.mrf.mxu2  ;;  %v658_v13 = vpop.f32.mrf.mxu0 }
 0x169   : > { %v1485_v11 = vpop.f32.mrf.mxu3  ;;  %v1073_v9 = vadd.f32 %v1027_v10, %v793_v8  ;;  %v795_v14 = vpop.f32.mrf.mxu1 }
 0x16a   : > { %v796_v18 = vadd.f32 %v795_v14, %v658_v13  ;;  %v1744_v13 = vadd.f32 %v1743_v2, %v2748_v57  ;;  %v1650_v14 = vadd.f32 %v1649_v3, %v1648_v5 }
 0x16b   : > { %v1531_v15 = vadd.f32 %v1485_v11, %v1073_v9 }
 0x16c   : > { %v1746_v55 = vadd.f32 %v1745_v62, %v1744_v13 }
 0x16d   : > { %v1563_v17 = vpack.c.bf16 %v1531_v15, %v1531_v15  ;;  %v1693_v63 = vmul.f32 %v1531_v15, %v1531_v15  ;;  %v1651_v10 = vsel %vm1605_vm2, %v1531_v15, 0.0 }
 0x16f   : > { %1596 = vst.msk [vmem:[%s2584_s17 + $0x5c] sm:$0xf] %vm1572_vm1, %v1563_v17  ;;  %v1747_v17 = vsel %vm1605_vm2, %v1693_v63, 0.0 }
 0x170   : > { %v1030_v16 = vpop.f32.mrf.mxu2  ;;  %v660_v21 = vpop.f32.mrf.mxu0  ;;  %v1748_v15 = vadd.f32 %v1747_v17, %v1746_v55 }
 0x171   : > { %v1488_v19 = vpop.f32.mrf.mxu3  ;;  %v1074_v20 = vadd.f32 %v1030_v16, %v796_v18  ;;  %v797_v22 = vpop.f32.mrf.mxu1 }
 0x172   : > { %v798_v48 = vadd.f32 %v797_v22, %v660_v21 }
 0x173   : > { %v1532_v23 = vadd.f32 %v1488_v19, %v1074_v20  ;;  %v1652_v20 = vadd.f32 %v1651_v10, %v1650_v14 }
 0x175   : > { %v1564_v24 = vpack.c.bf16 %v1532_v23, %v1532_v23  ;;  %v1694_v11 = vmul.f32 %v1532_v23, %v1532_v23  ;;  %v1653_v18 = vsel %vm1605_vm2, %v1532_v23, 0.0 }
 0x177   : > { %1597 = vst.msk [vmem:[%s2584_s17 + $0x60] sm:$0xf] %vm1572_vm1, %v1564_v24  ;;  %v1749_v21 = vsel %vm1605_vm2, %v1694_v11, 0.0 }
 0x178   : > { %v1032_v25 = vpop.f32.mrf.mxu2  ;;  %v663_v29 = vpop.f32.mrf.mxu0 }
 0x179   : > { %v1490_v26 = vpop.f32.mrf.mxu3  ;;  %v1075_v28 = vadd.f32 %v1032_v25, %v798_v48  ;;  %v800_v30 = vpop.f32.mrf.mxu1  ;;  %v1654_v48 = vadd.f32 %v1653_v18, %v1652_v20 }
 0x17a   : > { %v801_v33 = vadd.f32 %v800_v30, %v663_v29  ;;  %v1750_v30 = vadd.f32 %v1749_v21, %v1748_v15 }
 0x17b   : > { %v1533_v31 = vadd.f32 %v1490_v26, %v1075_v28 }
 0x17d   : > { %v1565_v32 = vpack.c.bf16 %v1533_v31, %v1533_v31  ;;  %v1695_v6 = vmul.f32 %v1533_v31, %v1533_v31  ;;  %v1655_v22 = vsel %vm1605_vm2, %v1533_v31, 0.0 }
 0x17f   : > { %1598 = vst.msk [vmem:[%s2584_s17 + $0x64] sm:$0xf] %vm1572_vm1, %v1565_v32  ;;  %v1751_v26 = vsel %vm1605_vm2, %v1695_v6, 0.0  ;;  %v1656_v32 = vadd.f32 %v1655_v22, %v1654_v48 }
 0x180   : > { %v1035_v34 = vpop.f32.mrf.mxu2  ;;  %v665_v37 = vpop.f32.mrf.mxu0 }
 0x181   : > { %v1493_v35 = vpop.f32.mrf.mxu3  ;;  %v1076_v36 = vadd.f32 %v1035_v34, %v801_v33  ;;  %v802_v38 = vpop.f32.mrf.mxu1 }
 0x182   : > { %v803_v41 = vadd.f32 %v802_v38, %v665_v37 }
 0x183   : > { %v1534_v39 = vadd.f32 %v1493_v35, %v1076_v36  ;;  %v1752_v36 = vadd.f32 %v1751_v26, %v1750_v30 }
 0x185   : > { %v1566_v40 = vpack.c.bf16 %v1534_v39, %v1534_v39  ;;  %v1696_v24 = vmul.f32 %v1534_v39, %v1534_v39  ;;  %v1657_v23 = vsel %vm1605_vm2, %v1534_v39, 0.0 }
 0x186   : > { %v1658_v37 = vadd.f32 %v1657_v23, %v1656_v32 }
 0x187   : > { %1599 = vst.msk [vmem:[%s2584_s17 + $0x68] sm:$0xf] %vm1572_vm1, %v1566_v40  ;;  %v1753_v33 = vsel %vm1605_vm2, %v1696_v24, 0.0 }
 0x188   : > { %v1037_v42 = vpop.f32.mrf.mxu2  ;;  %v668_v47 = vpop.f32.mrf.mxu0 }
 0x189   : > { %v1495_v43 = vpop.f32.mrf.mxu3  ;;  %v1077_v44 = vadd.f32 %v1037_v42, %v803_v41  ;;  %v805_v45 = vpop.f32.mrf.mxu1 }
 0x18a   : > { %v806_v50 = vadd.f32 %v805_v45, %v668_v47 }
 0x18b   : > { %v1535_v46 = vadd.f32 %v1495_v43, %v1077_v44  ;;  %v1754_v44 = vadd.f32 %v1753_v33, %v1752_v36 }
 0x18d   : > { %v1567_v49 = vpack.c.bf16 %v1535_v46, %v1535_v46  ;;  %v1697_v28 = vmul.f32 %v1535_v46, %v1535_v46  ;;  %v1659_v31 = vsel %vm1605_vm2, %v1535_v46, 0.0 }
 0x18e   : > { %v1660_v47 = vadd.f32 %v1659_v31, %v1658_v37 }
 0x18f   : > { %1600 = vst.msk [vmem:[%s2584_s17 + $0x6c] sm:$0xf] %vm1572_vm1, %v1567_v49  ;;  %v1755_v41 = vsel %vm1605_vm2, %v1697_v28, 0.0 }
 0x190   : > { %v1040_v52 = vpop.f32.mrf.mxu2  ;;  %v670_v51 = vpop.f32.mrf.mxu0 }
 0x191   : > { %v1498_v53 = vpop.f32.mrf.mxu3  ;;  %v1078_v54 = vadd.f32 %v1040_v52, %v806_v50  ;;  %v807_v56 = vpop.f32.mrf.mxu1  ;;  %v1756_v52 = vadd.f32 %v1755_v41, %v1754_v44 }
 0x192   : > { %v808_v61 = vadd.f32 %v807_v56, %v670_v51 }
 0x193   : > { %v1536_v12 = vadd.f32 %v1498_v53, %v1078_v54 }
 0x195   : > { %v1568_v59 = vpack.c.bf16 %v1536_v12, %v1536_v12  ;;  %v1698_v34 = vmul.f32 %v1536_v12, %v1536_v12  ;;  %v1661_v42 = vsel %vm1605_vm2, %v1536_v12, 0.0 }
 0x196   : > { %v1662_v53 = vadd.f32 %v1661_v42, %v1660_v47 }
 0x197   : > { %1601 = vst.msk [vmem:[%s2584_s17 + $0x70] sm:$0xf] %vm1572_vm1, %v1568_v59  ;;  %v1757_v45 = vsel %vm1605_vm2, %v1698_v34, 0.0 }
 0x198   : > { %v1042_v0 = vpop.f32.mrf.mxu2  ;;  %v673_v7 = vpop.f32.mrf.mxu0  ;;  %v1758_v58 = vadd.f32 %v1757_v45, %v1756_v52 }
 0x199   : > { %v1500_v1 = vpop.f32.mrf.mxu3  ;;  %v1079_v4 = vadd.f32 %v1042_v0, %v808_v61  ;;  %v810_v8 = vpop.f32.mrf.mxu1 }
 0x19a   : > { %v811_v19 = vadd.f32 %v810_v8, %v673_v7 }
 0x19b   : > { %v1537_v9 = vadd.f32 %v1500_v1, %v1079_v4 }
 0x19d   : > { %v1569_v16 = vpack.c.bf16 %v1537_v9, %v1537_v9  ;;  %v1699_v39 = vmul.f32 %v1537_v9, %v1537_v9  ;;  %v1663_v49 = vsel %vm1605_vm2, %v1537_v9, 0.0 }
 0x19e   : > { %v1664_v59 = vadd.f32 %v1663_v49, %v1662_v53 }
 0x19f   : > { %1602 = vst.msk [vmem:[%s2584_s17 + $0x74] sm:$0xf] %vm1572_vm1, %v1569_v16  ;;  %v1759_v51 = vsel %vm1605_vm2, %v1699_v39, 0.0 }
 0x1a0   : > { %v1045_v57 = vpop.f32.mrf.mxu2  ;;  %v675_v38 = vpop.f32.mrf.mxu0  ;;  %v1760_v63 = vadd.f32 %v1759_v51, %v1758_v58 }
 0x1a1   : > { %v1503_v25 = vpop.f32.mrf.mxu3  ;;  %v1080_v29 = vadd.f32 %v1045_v57, %v811_v19  ;;  %v812_v40 = vpop.f32.mrf.mxu1 }
 0x1a2   : > { %v813_v50 = vadd.f32 %v812_v40, %v675_v38 }
 0x1a3   : > { %v1538_v35 = vadd.f32 %v1503_v25, %v1080_v29 }
 0x1a5   : > { %v1570_v43 = vpack.c.bf16 %v1538_v35, %v1538_v35  ;;  %v1700_v46 = vmul.f32 %v1538_v35, %v1538_v35  ;;  %v1665_v56 = vsel %vm1605_vm2, %v1538_v35, 0.0 }
 0x1a6   : > { %v1666_v0 = vadd.f32 %v1665_v56, %v1664_v59 }
 0x1a7   : > { %1603 = vst.msk [vmem:[%s2584_s17 + $0x78] sm:$0xf] %vm1572_vm1, %v1570_v43  ;;  %v1761_v27 = vsel %vm1605_vm2, %v1700_v46, 0.0 }
 0x1a8   : > { %v1047_v54 = vpop.f32.mrf.mxu2  ;;  %v1762_v4 = vadd.f32 %v1761_v27, %v1760_v63 }
 0x1a9   : > { %v1081_v12 = vadd.f32 %v1047_v54, %v813_v50  ;;  %v1505_v60 = vpop.f32.mrf.mxu3 }
 0x1ab   : > { %v1539_v61 = vadd.f32 %v1505_v60, %v1081_v12 }
 0x1ad   : > { %v1571_v1 = vpack.c.bf16 %v1539_v61, %v1539_v61  ;;  %v1667_v2 = vsel %vm1605_vm2, %v1539_v61, 0.0  ;;  %v1701_v3 = vmul.f32 %v1539_v61, %v1539_v61 }
 0x1ae   : > { %v1668_v5 = vadd.f32 %v1667_v2, %v1666_v0 }
 0x1af   : > { %1604 = vst.msk [vmem:[%s2584_s17 + $0x7c] sm:$0xf] %vm1572_vm1, %v1571_v1  ;;  %v1763_v7 = vsel %vm1605_vm2, %v1701_v3, 0.0 }
 0x1b0   : > { %v1764_v8 = vadd.f32 %v1763_v7, %v1762_v4  ;;  %1766 = vst.msk [vmem:[%s214_s20] sm:$0xff] %vm1605_vm2, %v1668_v5 }
 0x1b2   : > { %1767 = vst.msk [vmem:[%s218_s16] sm:$0xff] %vm1605_vm2, %v1764_v8 }
 0x1b3 PF: > { %s15_s15 = sadd.s32 1, %s2360_s15  }
 0x1b4   : > { %p12_p4 = scmp.ge.s32.totalorder %s15_s15, 4  }
 0x1b6   :  { %14 = sbr.rel (!%p12_p4) target bundleno = 1 (0x1), region = 86 }

// kernel: discriminator_forward.7
= control target key start
LH: loop header
LB: loop body
LE: loop exit
PB: predicated region body
PF: predicated region fallthrough
CT: control target
= control target key end

     0   :  { %s1288_s15 = smov 0   ;;  %s1506_s0 = inlined_call_operand.vmem [shape: bf16[2,9,9,128], index: 0, kind: input, shape index: {}]   ;;  %s1507_s1 = inlined_call_operand.vmem [shape: bf16[4,128,32], index: 1, kind: input, shape index: {}]   ;;  %s1508_s2 = inlined_call_operand.vmem [shape: bf16[2,64,32], index: 2, kind: output, shape index: {0}]   ;;  %s1509_s3 = inlined_call_operand.vmem [shape: f32[2,8,32], index: 3, kind: output, shape index: {1}]   ;;  %s1510_s4 = inlined_call_operand.vmem [shape: f32[2,8,32], index: 4, kind: output, shape index: {2}]  }
   0x1 LB: > { %s981_s16 = sadd.s32 4294967295, %s1261_s15   ;;  %p985_p0 = scmp.ge.s32.totalorder %s1261_s15, 1  ;;  %s1261_s15 = sphi %s1288_s15, %s15_s15  }
   0x2   : > { %p167_p1 = scmp.lt.s32.totalorder %s1261_s15, 3 }
   0x4   : > { %p168_p2 = pnand %p985_p0, %p167_p1 }
   0x5   : > { %p201_p3 = scmp.lt.s32.totalorder (!%p168_p2), %s981_s16, 1 }
   0x6   : > { %171 = sbr.rel (%p168_p2) target bundleno = 243 (0xf3), region = 28 }
   0xb   : > { %v1225_v0 = vld [vmem:[%s1507_s1 + $0x78] sm:$0xff]  ;;  %v1224_v4 = vld [vmem:[%s1507_s1 + $0x70] sm:$0xff]  ;;  %s1512_s16 = smov (!%p201_p3, %s981_s16), 1  ;;  %v1223_v8 = vld [vmem:[%s1507_s1 + $0x68] sm:$0xff]  ;;  %vm287_vm0 = vcmask 1046528   ;;  %vm812_vm1 = vcmask 257024  }
   0xc   : > { %v1217_v1 = vld [vmem:[%s1507_s1 + $0x38] sm:$0xff]  ;;  %389 = vmatpush.bf16.msra.mxu0 %v1225_v0  ;;  %v1216_v5 = vld [vmem:[%s1507_s1 + $0x30] sm:$0xff]  ;;  %v1215_v9 = vld [vmem:[%s1507_s1 + $0x28] sm:$0xff]  ;;  %s1246_s17 = smul.u32 72, %s1512_s16  ;;  %vm821_vm2 = vcmask 261120  }
   0xd   : > { %v1237_v2 = vld [vmem:[%s1507_s1 + $0xb8] sm:$0xff]  ;;  %466 = vmatpush.bf16.msra.mxu1 %v1217_v1  ;;  %v1236_v6 = vld [vmem:[%s1507_s1 + $0xb0] sm:$0xff]  ;;  %v1235_v10 = vld [vmem:[%s1507_s1 + $0xa8] sm:$0xff] }
   0xe   : > { %v1245_v3 = vld [vmem:[%s1507_s1 + $0xf8] sm:$0xff]  ;;  %581 = vmatpush.bf16.msra.mxu2 %v1237_v2  ;;  %v1244_v7 = vld [vmem:[%s1507_s1 + $0xf0] sm:$0xff]  ;;  %v1243_v11 = vld [vmem:[%s1507_s1 + $0xe8] sm:$0xff]  ;;  %s1350_s28 = scalar_lea.vmem %s1506_s0, %s1246_s17  ;;  %s989_s17 = sshll.u32 %s1512_s16, 3 }
   0xf   : > { %767 = vmatpush.bf16.msra.mxu3 %v1245_v3  ;;  %v1222_v12 = vld [vmem:[%s1507_s1 + $0x60] sm:$0xff]  ;;  %v1221_v16 = vld [vmem:[%s1507_s1 + $0x58] sm:$0xff]  ;;  %v220_v21 = vld [vmem:[%s1350_s28 + $0x8] sm:$0xf]  ;;  %s214_s20 = scalar_lea.vmem %s1509_s3, %s989_s17 }
  0x10   : > { %390 = vmatpush.bf16.msra.mxu0 %v1224_v4  ;;  %v1214_v13 = vld [vmem:[%s1507_s1 + $0x20] sm:$0xff]  ;;  %v1213_v17 = vld [vmem:[%s1507_s1 + $0x18] sm:$0xff]  ;;  %v256_v23 = vld [vmem:[%s1350_s28 + $0xc] sm:$0x1]  ;;  %v228_v31 = vunpack.c.l.bf16 %v220_v21 }
  0x11   : > { %467 = vmatpush.bf16.msra.mxu1 %v1216_v5  ;;  %v1234_v14 = vld [vmem:[%s1507_s1 + $0xa0] sm:$0xff]  ;;  %v1233_v18 = vld [vmem:[%s1507_s1 + $0x98] sm:$0xff]  ;;  %v1143_v24 = vld [vmem:[%s1350_s28 + $0x8] sm:$0xf]  ;;  %v264_v33 = vunpack.c.l.bf16 %v256_v23 }
  0x12   : > { %582 = vmatpush.bf16.msra.mxu2 %v1236_v6  ;;  %v1242_v15 = vld [vmem:[%s1507_s1 + $0xe0] sm:$0xff]  ;;  %v1241_v19 = vld [vmem:[%s1507_s1 + $0xd8] sm:$0xff]  ;;  %v1144_v25 = vld [vmem:[%s1350_s28 + $0xc] sm:$0x1]  ;;  %v634_v36 = vunpack.c.l.bf16 %v1143_v24  ;;  %v291_v44 = vrot.slane %v228_v31, 1 }
  0x13   : > { %768 = vmatpush.bf16.msra.mxu3 %v1244_v7  ;;  %v219_v20 = vld [vmem:[%s1350_s28] sm:$0xf]  ;;  %v255_v22 = vld [vmem:[%s1350_s28 + $0x4] sm:$0x1]  ;;  %v1145_v26 = vld [vmem:[%s1350_s28 + $0x10] sm:$0xf]  ;;  %v635_v37 = vunpack.c.l.bf16 %v1144_v25 }
  0x14   : > { %391 = vmatpush.bf16.msra.mxu0 %v1223_v8  ;;  %v1146_v27 = vld [vmem:[%s1350_s28 + $0x14] sm:$0x1]  ;;  %v227_v30 = vunpack.c.l.bf16 %v219_v20  ;;  %v263_v32 = vunpack.c.l.bf16 %v255_v22  ;;  %v636_v38 = vunpack.c.l.bf16 %v1145_v26  ;;  %v1219_v40 = vld [vmem:[%s1507_s1 + $0x48] sm:$0xff]  ;;  %v292_v45 = vrot.slane %v264_v33, 1  ;;  %v1218_v52 = vld [vmem:[%s1507_s1 + $0x40] sm:$0xff] }
  0x15   : > { %468 = vmatpush.bf16.msra.mxu1 %v1215_v9  ;;  %v1220_v28 = vld [vmem:[%s1507_s1 + $0x50] sm:$0xff]  ;;  %v637_v39 = vunpack.c.l.bf16 %v1146_v27  ;;  %v1211_v41 = vld [vmem:[%s1507_s1 + $0x8] sm:$0xff]  ;;  %v666_v48 = vrot.slane %v634_v36, 1  ;;  %v667_v49 = vrot.slane %v635_v37, 1  ;;  %v1210_v53 = vld [vmem:[%s1507_s1] sm:$0xff] }
  0x16   : > { %583 = vmatpush.bf16.msra.mxu2 %v1235_v10  ;;  %v1212_v29 = vld [vmem:[%s1507_s1 + $0x10] sm:$0xff]  ;;  %v288_v42 = vrot.slane %v227_v30, 1  ;;  %v289_v43 = vrot.slane %v263_v32, 1  ;;  %v1231_v46 = vld [vmem:[%s1507_s1 + $0x88] sm:$0xff]  ;;  %v669_v50 = vrot.slane %v636_v38, 1  ;;  %v1230_v54 = vld [vmem:[%s1507_s1 + $0x80] sm:$0xff]  ;;  %v293_v56 = vsel %vm287_vm0, %v291_v44, %v292_v45 }
  0x17   : > { %769 = vmatpush.bf16.msra.mxu3 %v1243_v11  ;;  %v1232_v34 = vld [vmem:[%s1507_s1 + $0x90] sm:$0xff]  ;;  %v1239_v47 = vld [vmem:[%s1507_s1 + $0xc8] sm:$0xff]  ;;  %v670_v51 = vrot.slane %v637_v39, 1  ;;  %v1238_v57 = vld [vmem:[%s1507_s1 + $0xc0] sm:$0xff]  ;;  %v668_v60 = vsel %vm287_vm0, %v666_v48, %v667_v49  ;;  %v235_v63 = vpack.c.bf16 %v228_v31, %v227_v30 }
  0x18   : > { %392 = vmatpush.bf16.msra.mxu0 %v1222_v12  ;;  %v1240_v35 = vld [vmem:[%s1507_s1 + $0xd0] sm:$0xff]  ;;  %v290_v55 = vsel %vm287_vm0, %v288_v42, %v289_v43  ;;  %v1081_v58 = vld [vmem:[%s1350_s28 + $0x8] sm:$0xf]  ;;  %v222_v3 = vld [vmem:[%s1350_s28 + $0x18] sm:$0xf] }
  0x19   : > { %469 = vmatpush.bf16.msra.mxu1 %v1214_v13  ;;  %v1226_v59 = vld [vmem:[%s1350_s28 + $0xc] sm:$0xf0]  ;;  %v671_v61 = vsel %vm287_vm0, %v669_v50, %v670_v51  ;;  %v320_v62 = vpack.c.bf16 %v293_v56, %v290_v55  ;;  %v257_v4 = vld [vmem:[%s1350_s28 + $0x14] sm:$0x1]  ;;  %v258_v5 = vld [vmem:[%s1350_s28 + $0x1c] sm:$0x1]  ;;  %v230_v11 = vunpack.c.l.bf16 %v222_v3 }
  0x1a   : > { %584 = vmatpush.bf16.msra.mxu2 %v1234_v14  ;;  %v1082_v0 = vor.u32 %v1226_v59, %v1081_v58  ;;  %v698_v1 = vpack.c.bf16 %v671_v61, %v668_v60  ;;  %v221_v2 = vld [vmem:[%s1350_s28 + $0x10] sm:$0xf]  ;;  %v1147_v6 = vld [vmem:[%s1350_s28 + $0x18] sm:$0xf]  ;;  %v1148_v7 = vld [vmem:[%s1350_s28 + $0x1c] sm:$0x1]  ;;  %v265_v12 = vunpack.c.l.bf16 %v257_v4  ;;  %v266_v13 = vunpack.c.l.bf16 %v258_v5 }
  0x1b   : > { %770 = vmatpush.bf16.msra.mxu3 %v1242_v15  ;;  %v1149_v8 = vld [vmem:[%s1350_s28 + $0x20] sm:$0xf]  ;;  %v1150_v9 = vld [vmem:[%s1350_s28 + $0x24] sm:$0x1]  ;;  %v229_v10 = vunpack.c.l.bf16 %v221_v2  ;;  %v638_v14 = vunpack.c.l.bf16 %v1147_v6  ;;  %v639_v15 = vunpack.c.l.bf16 %v1148_v7  ;;  %v297_v20 = vrot.slane %v230_v11, 1 }
  0x1c   : > { %393 = vmatpush.bf16.msra.mxu0 %v1221_v16  ;;  %v640_v16 = vunpack.c.l.bf16 %v1149_v8  ;;  %v298_v21 = vrot.slane %v266_v13, 1  ;;  %v223_v36 = vld [vmem:[%s1350_s28 + $0x20] sm:$0xf]  ;;  %v224_v37 = vld [vmem:[%s1350_s28 + $0x28] sm:$0xf] }
  0x1d   : > { %470 = vmatpush.bf16.msra.mxu1 %v1213_v17  ;;  %v641_v17 = vunpack.c.l.bf16 %v1150_v9  ;;  %v672_v22 = vrot.slane %v638_v14, 1  ;;  %v673_v23 = vrot.slane %v639_v15, 1  ;;  %v236_v33 = vpack.c.bf16 %v230_v11, %v229_v10  ;;  %v259_v38 = vld [vmem:[%s1350_s28 + $0x24] sm:$0x1]  ;;  %v260_v39 = vld [vmem:[%s1350_s28 + $0x2c] sm:$0x1] }
  0x1e   : > { %585 = vmatpush.bf16.msra.mxu2 %v1233_v18  ;;  %v294_v18 = vrot.slane %v229_v10, 1  ;;  %v675_v24 = vrot.slane %v640_v16, 1  ;;  %v299_v27 = vsel %vm287_vm0, %v297_v20, %v298_v21  ;;  %v1153_v42 = vld [vmem:[%s1350_s28 + $0x30] sm:$0xf]  ;;  %v1154_v43 = vld [vmem:[%s1350_s28 + $0x34] sm:$0x1]  ;;  %v231_v44 = vunpack.c.l.bf16 %v223_v36 }
  0x1f   : > { %771 = vmatpush.bf16.msra.mxu3 %v1241_v19  ;;  %v295_v19 = vrot.slane %v265_v12, 1  ;;  %v676_v25 = vrot.slane %v641_v17, 1  ;;  %v674_v30 = vsel %vm287_vm0, %v672_v22, %v673_v23  ;;  %v232_v45 = vunpack.c.l.bf16 %v224_v37  ;;  %v225_v6 = vld [vmem:[%s1350_s28 + $0x30] sm:$0xf]  ;;  %v226_v7 = vld [vmem:[%s1350_s28 + $0x38] sm:$0xf] }
  0x20   : > { %394 = vmatpush.bf16.msra.mxu0 %v1220_v28  ;;  %v1085_v28 = vld [vmem:[%s1350_s28 + $0x18] sm:$0xf]  ;;  %v644_v50 = vunpack.c.l.bf16 %v1153_v42  ;;  %v645_v51 = vunpack.c.l.bf16 %v1154_v43  ;;  %v261_v8 = vld [vmem:[%s1350_s28 + $0x34] sm:$0x1]  ;;  %v262_v9 = vld [vmem:[%s1350_s28 + $0x3c] sm:$0x1]  ;;  %v233_v14 = vunpack.c.l.bf16 %v225_v6  ;;  %v234_v15 = vunpack.c.l.bf16 %v226_v7 }
  0x21   : > { %471 = vmatpush.bf16.msra.mxu1 %v1212_v29  ;;  %v296_v26 = vsel %vm287_vm0, %v294_v18, %v295_v19  ;;  %v1227_v29 = vld [vmem:[%s1350_s28 + $0x1c] sm:$0xf0]  ;;  %v677_v31 = vsel %vm287_vm0, %v675_v24, %v676_v25  ;;  %v237_v3 = vpack.c.bf16 %v232_v45, %v231_v44  ;;  %v1155_v10 = vld [vmem:[%s1350_s28 + $0x38] sm:$0xf]  ;;  %v1156_v11 = vld [vmem:[%s1350_s28 + $0x3c] sm:$0x1]  ;;  %v269_v16 = vunpack.c.l.bf16 %v261_v8 }
  0x22   : > { %586 = vmatpush.bf16.msra.mxu2 %v1232_v34  ;;  %v321_v32 = vpack.c.bf16 %v299_v27, %v296_v26  ;;  %v1086_v34 = vor.u32 %v1227_v29, %v1085_v28  ;;  %v681_v58 = vrot.slane %v644_v50, 1  ;;  %v682_v59 = vrot.slane %v645_v51, 1  ;;  %v1157_v12 = vld [vmem:[%s1350_s28 + $0x40] sm:$0xf]  ;;  %v1158_v13 = vld [vmem:[%s1350_s28 + $0x44] sm:$0x1] }
  0x23   : > { %772 = vmatpush.bf16.msra.mxu3 %v1240_v35  ;;  %v699_v35 = vpack.c.bf16 %v677_v31, %v674_v30  ;;  %v270_v17 = vunpack.c.l.bf16 %v262_v9  ;;  %v646_v18 = vunpack.c.l.bf16 %v1155_v10  ;;  %v647_v19 = vunpack.c.l.bf16 %v1156_v11 }
  0x24   : > { %395 = vmatpush.bf16.msra.mxu0 %v1219_v40  ;;  %v1151_v40 = vld [vmem:[%s1350_s28 + $0x28] sm:$0xf]  ;;  %v648_v20 = vunpack.c.l.bf16 %v1157_v12  ;;  %v649_v21 = vunpack.c.l.bf16 %v1158_v13  ;;  %v306_v22 = vrot.slane %v233_v14, 1  ;;  %v307_v23 = vrot.slane %v269_v16, 1 }
  0x25   : > { %472 = vmatpush.bf16.msra.mxu1 %v1211_v41  ;;  %v1152_v41 = vld [vmem:[%s1350_s28 + $0x2c] sm:$0x1]  ;;  %v642_v48 = vunpack.c.l.bf16 %v1151_v40  ;;  %v309_v24 = vrot.slane %v234_v15, 1  ;;  %v310_v25 = vrot.slane %v270_v17, 1  ;;  %v684_v26 = vrot.slane %v646_v18, 1 }
  0x26   : > { %587 = vmatpush.bf16.msra.mxu2 %v1231_v46  ;;  %v267_v46 = vunpack.c.l.bf16 %v259_v38  ;;  %v643_v49 = vunpack.c.l.bf16 %v1152_v41  ;;  %v685_v27 = vrot.slane %v647_v19, 1  ;;  %v687_v28 = vrot.slane %v648_v20, 1 }
  0x27   : > { %773 = vmatpush.bf16.msra.mxu3 %v1239_v47  ;;  %v268_v47 = vunpack.c.l.bf16 %v260_v39  ;;  %v678_v56 = vrot.slane %v642_v48, 1  ;;  %v688_v29 = vrot.slane %v649_v21, 1  ;;  %v308_v30 = vsel %vm287_vm0, %v306_v22, %v307_v23 }
  0x28   : > { %396 = vmatpush.bf16.msra.mxu0 %v1218_v52  ;;  %v300_v52 = vrot.slane %v231_v44, 1  ;;  %v311_v31 = vsel %vm287_vm0, %v309_v24, %v310_v25  ;;  %v238_v37 = vpack.c.bf16 %v234_v15, %v233_v14 }
  0x29   : > { %473 = vmatpush.bf16.msra.mxu1 %v1210_v53  ;;  %v301_v53 = vrot.slane %v267_v46, 1  ;;  %v304_v55 = vrot.slane %v268_v47, 1  ;;  %v323_v36 = vpack.c.bf16 %v311_v31, %v308_v30 }
  0x2a   : > { %588 = vmatpush.bf16.msra.mxu2 %v1230_v54  ;;  %v303_v54 = vrot.slane %v232_v45, 1 }
  0x2b   : > { %774 = vmatpush.bf16.msra.mxu3 %v1238_v57  ;;  %397 = vmatmul.bf16.vlgmr.msra.gmra.mxu0 %v320_v62  ;;  %v679_v57 = vrot.slane %v643_v49, 1  ;;  %v302_v60 = vsel %vm287_vm0, %v300_v52, %v301_v53  ;;  %v1089_v62 = vld [vmem:[%s1350_s28 + $0x28] sm:$0xf] }
  0x2c   : > { %474 = vmatmul.bf16.vlgmr.msra.gmra.mxu1 %v235_v63  ;;  %v305_v61 = vsel %vm287_vm0, %v303_v54, %v304_v55  ;;  %v1228_v63 = vld [vmem:[%s1350_s28 + $0x2c] sm:$0xf0] }
  0x2d   : > { %589 = vmatmul.bf16.vlgmr.msra.gmra.mxu2 %v1082_v0  ;;  %v680_v0 = vsel %vm287_vm0, %v678_v56, %v679_v57  ;;  %v322_v2 = vpack.c.bf16 %v305_v61, %v302_v60  ;;  %v1090_v4 = vor.u32 %v1228_v63, %v1089_v62 }
  0x2e   : > { %775 = vmatmul.bf16.vlgmr.msra.gmra.mxu3 %v698_v1  ;;  %v683_v1 = vsel %vm287_vm0, %v681_v58, %v682_v59 }
  0x2f   : > { %v700_v5 = vpack.c.bf16 %v683_v1, %v680_v0 }
  0x3b   : > { %402 = vmatmul.bf16.gmra.mxu0 %v321_v32  ;;  %v1093_v32 = vld [vmem:[%s1350_s28 + $0x38] sm:$0xf] }
  0x3c   : > { %479 = vmatmul.bf16.gmra.mxu1 %v236_v33  ;;  %v1229_v33 = vld [vmem:[%s1350_s28 + $0x3c] sm:$0xf0]  ;;  %s1209_s28 = sshll.u32 %s1512_s16, 5  ;;  %s218_s16 = scalar_lea.vmem %s1510_s4, %s989_s17 }
  0x3d   : > { %594 = vmatmul.bf16.gmra.mxu2 %v1086_v34  ;;  %v686_v34 = vsel %vm287_vm0, %v684_v26, %v685_v27  ;;  %v1094_v38 = vor.u32 %v1229_v33, %v1093_v32  ;;  %s1460_s14 = scalar_lea.vmem %s1508_s2, %s1209_s28 }
  0x3e   : > { %780 = vmatmul.bf16.gmra.mxu3 %v699_v35  ;;  %v689_v35 = vsel %vm287_vm0, %v687_v28, %v688_v29 }
  0x3f   : > { %v701_v39 = vpack.c.bf16 %v689_v35, %v686_v34 }
  0x4b   : > { %407 = vmatmul.bf16.gmra.mxu0 %v322_v2 }
  0x4c   : > { %484 = vmatmul.bf16.gmra.mxu1 %v237_v3 }
  0x4d   : > { %599 = vmatmul.bf16.gmra.mxu2 %v1090_v4 }
  0x4e   : > { %785 = vmatmul.bf16.gmra.mxu3 %v700_v5 }
  0x5b   : > { %412 = vmatmul.bf16.gmra.mxu0 %v323_v36 }
  0x5c   : > { %489 = vmatmul.bf16.gmra.mxu1 %v238_v37 }
  0x5d   : > { %604 = vmatmul.bf16.gmra.mxu2 %v1094_v38 }
  0x5e   : > { %790 = vmatmul.bf16.gmra.mxu3 %v701_v39 }
  0xa8   : > { %v398_v40 = vpop.f32.mrf.mxu0 }
  0xa9   : > { %v475_v41 = vpop.f32.mrf.mxu1 }
  0xaa   : > { %v476_v42 = vadd.f32 %v475_v41, %v398_v40 }
  0xb0   : > { %v590_v43 = vpop.f32.mrf.mxu2  ;;  %v400_v46 = vpop.f32.mrf.mxu0 }
  0xb1   : > { %v776_v44 = vpop.f32.mrf.mxu3  ;;  %v610_v45 = vadd.f32 %v590_v43, %v476_v42  ;;  %v477_v47 = vpop.f32.mrf.mxu1 }
  0xb2   : > { %v478_v50 = vadd.f32 %v477_v47, %v400_v46 }
  0xb3   : > { %v796_v48 = vadd.f32 %v776_v44, %v610_v45 }
  0xb5   : > { %v804_v49 = vpack.c.bf16 %v796_v48, %v796_v48  ;;  %v838_v28 = vmul.f32 %v796_v48, %v796_v48  ;;  %v822_v31 = vsel %vm821_vm2, %v796_v48, 0.0 }
  0xb7   : > { %813 = vst.msk [vmem:[%s1460_s14] sm:$0xf] %vm812_vm1, %v804_v49  ;;  %v846_v38 = vsel %vm821_vm2, %v838_v28, 0.0 }
  0xb8   : > { %v592_v51 = vpop.f32.mrf.mxu2  ;;  %v403_v54 = vpop.f32.mrf.mxu0 }
  0xb9   : > { %v778_v52 = vpop.f32.mrf.mxu3  ;;  %v611_v53 = vadd.f32 %v592_v51, %v478_v50  ;;  %v480_v55 = vpop.f32.mrf.mxu1 }
  0xba   : > { %v481_v58 = vadd.f32 %v480_v55, %v403_v54 }
  0xbb   : > { %v797_v56 = vadd.f32 %v778_v52, %v611_v53 }
  0xbd   : > { %v805_v57 = vpack.c.bf16 %v797_v56, %v797_v56  ;;  %v839_v25 = vmul.f32 %v797_v56, %v797_v56  ;;  %v823_v29 = vsel %vm821_vm2, %v797_v56, 0.0 }
  0xbe   : > { %v824_v39 = vadd.f32 %v823_v29, %v822_v31 }
  0xbf   : > { %814 = vst.msk [vmem:[%s1460_s14 + $0x4] sm:$0xf] %vm812_vm1, %v805_v57  ;;  %v847_v34 = vsel %vm821_vm2, %v839_v25, 0.0 }
  0xc0   : > { %v595_v59 = vpop.f32.mrf.mxu2  ;;  %v405_v62 = vpop.f32.mrf.mxu0  ;;  %v848_v44 = vadd.f32 %v847_v34, %v846_v38 }
  0xc1   : > { %v781_v60 = vpop.f32.mrf.mxu3  ;;  %v612_v61 = vadd.f32 %v595_v59, %v481_v58  ;;  %v482_v63 = vpop.f32.mrf.mxu1 }
  0xc2   : > { %v483_v2 = vadd.f32 %v482_v63, %v405_v62 }
  0xc3   : > { %v798_v0 = vadd.f32 %v781_v60, %v612_v61 }
  0xc5   : > { %v806_v1 = vpack.c.bf16 %v798_v0, %v798_v0  ;;  %v840_v30 = vmul.f32 %v798_v0, %v798_v0  ;;  %v825_v35 = vsel %vm821_vm2, %v798_v0, 0.0 }
  0xc6   : > { %v826_v45 = vadd.f32 %v825_v35, %v824_v39 }
  0xc7   : > { %815 = vst.msk [vmem:[%s1460_s14 + $0x8] sm:$0xf] %vm812_vm1, %v806_v1  ;;  %v849_v40 = vsel %vm821_vm2, %v840_v30, 0.0 }
  0xc8   : > { %v597_v3 = vpop.f32.mrf.mxu2  ;;  %v408_v6 = vpop.f32.mrf.mxu0  ;;  %v850_v52 = vadd.f32 %v849_v40, %v848_v44 }
  0xc9   : > { %v783_v4 = vpop.f32.mrf.mxu3  ;;  %v613_v5 = vadd.f32 %v597_v3, %v483_v2  ;;  %v485_v7 = vpop.f32.mrf.mxu1 }
  0xca   : > { %v486_v10 = vadd.f32 %v485_v7, %v408_v6 }
  0xcb   : > { %v799_v8 = vadd.f32 %v783_v4, %v613_v5 }
  0xcd   : > { %v807_v9 = vpack.c.bf16 %v799_v8, %v799_v8  ;;  %v841_v36 = vmul.f32 %v799_v8, %v799_v8  ;;  %v827_v41 = vsel %vm821_vm2, %v799_v8, 0.0 }
  0xce   : > { %v828_v53 = vadd.f32 %v827_v41, %v826_v45 }
  0xcf   : > { %816 = vst.msk [vmem:[%s1460_s14 + $0xc] sm:$0xf] %vm812_vm1, %v807_v9  ;;  %v851_v48 = vsel %vm821_vm2, %v841_v36, 0.0 }
  0xd0   : > { %v600_v11 = vpop.f32.mrf.mxu2  ;;  %v410_v14 = vpop.f32.mrf.mxu0  ;;  %v852_v58 = vadd.f32 %v851_v48, %v850_v52 }
  0xd1   : > { %v786_v12 = vpop.f32.mrf.mxu3  ;;  %v614_v13 = vadd.f32 %v600_v11, %v486_v10  ;;  %v487_v15 = vpop.f32.mrf.mxu1 }
  0xd2   : > { %v488_v18 = vadd.f32 %v487_v15, %v410_v14 }
  0xd3   : > { %v800_v16 = vadd.f32 %v786_v12, %v614_v13 }
  0xd5   : > { %v808_v17 = vpack.c.bf16 %v800_v16, %v800_v16  ;;  %v842_v42 = vmul.f32 %v800_v16, %v800_v16  ;;  %v829_v49 = vsel %vm821_vm2, %v800_v16, 0.0 }
  0xd6   : > { %v830_v59 = vadd.f32 %v829_v49, %v828_v53 }
  0xd7   : > { %817 = vst.msk [vmem:[%s1460_s14 + $0x10] sm:$0xf] %vm812_vm1, %v808_v17  ;;  %v853_v54 = vsel %vm821_vm2, %v842_v42, 0.0 }
  0xd8   : > { %v602_v19 = vpop.f32.mrf.mxu2  ;;  %v413_v22 = vpop.f32.mrf.mxu0  ;;  %v854_v0 = vadd.f32 %v853_v54, %v852_v58 }
  0xd9   : > { %v788_v20 = vpop.f32.mrf.mxu3  ;;  %v615_v21 = vadd.f32 %v602_v19, %v488_v18  ;;  %v490_v23 = vpop.f32.mrf.mxu1 }
  0xda   : > { %v491_v27 = vadd.f32 %v490_v23, %v413_v22 }
  0xdb   : > { %v801_v24 = vadd.f32 %v788_v20, %v615_v21 }
  0xdd   : > { %v809_v26 = vpack.c.bf16 %v801_v24, %v801_v24  ;;  %v843_v50 = vmul.f32 %v801_v24, %v801_v24  ;;  %v831_v55 = vsel %vm821_vm2, %v801_v24, 0.0 }
  0xde   : > { %v832_v1 = vadd.f32 %v831_v55, %v830_v59 }
  0xdf   : > { %818 = vst.msk [vmem:[%s1460_s14 + $0x14] sm:$0xf] %vm812_vm1, %v809_v26  ;;  %v855_v61 = vsel %vm821_vm2, %v843_v50, 0.0 }
  0xe0   : > { %v605_v32 = vpop.f32.mrf.mxu2  ;;  %v415_v46 = vpop.f32.mrf.mxu0  ;;  %v856_v5 = vadd.f32 %v855_v61, %v854_v0 }
  0xe1   : > { %v791_v33 = vpop.f32.mrf.mxu3  ;;  %v616_v37 = vadd.f32 %v605_v32, %v491_v27  ;;  %v492_v47 = vpop.f32.mrf.mxu1 }
  0xe2   : > { %v493_v57 = vadd.f32 %v492_v47, %v415_v46 }
  0xe3   : > { %v802_v43 = vadd.f32 %v791_v33, %v616_v37 }
  0xe5   : > { %v810_v51 = vpack.c.bf16 %v802_v43, %v802_v43  ;;  %v844_v56 = vmul.f32 %v802_v43, %v802_v43  ;;  %v833_v62 = vsel %vm821_vm2, %v802_v43, 0.0 }
  0xe6   : > { %v834_v6 = vadd.f32 %v833_v62, %v832_v1 }
  0xe7   : > { %819 = vst.msk [vmem:[%s1460_s14 + $0x18] sm:$0xf] %vm812_vm1, %v810_v51  ;;  %v857_v3 = vsel %vm821_vm2, %v844_v56, 0.0 }
  0xe8   : > { %v607_v60 = vpop.f32.mrf.mxu2  ;;  %v858_v10 = vadd.f32 %v857_v3, %v856_v5 }
  0xe9   : > { %v617_v63 = vadd.f32 %v607_v60, %v493_v57  ;;  %v793_v2 = vpop.f32.mrf.mxu3 }
  0xeb   : > { %v803_v4 = vadd.f32 %v793_v2, %v617_v63 }
  0xed   : > { %v811_v7 = vpack.c.bf16 %v803_v4, %v803_v4  ;;  %v835_v8 = vsel %vm821_vm2, %v803_v4, 0.0  ;;  %v845_v9 = vmul.f32 %v803_v4, %v803_v4 }
  0xee   : > { %v836_v11 = vadd.f32 %v835_v8, %v834_v6 }
  0xef   : > { %820 = vst.msk [vmem:[%s1460_s14 + $0x1c] sm:$0xf] %vm812_vm1, %v811_v7  ;;  %v859_v12 = vsel %vm821_vm2, %v845_v9, 0.0 }
  0xf0   : > { %v860_v13 = vadd.f32 %v859_v12, %v858_v10  ;;  %862 = vst.msk [vmem:[%s214_s20] sm:$0xff] %vm821_vm2, %v836_v11 }
  0xf2   : > { %863 = vst.msk [vmem:[%s218_s16] sm:$0xff] %vm821_vm2, %v860_v13 }
  0xf3 PF: > { %s15_s15 = sadd.s32 1, %s1261_s15  }
  0xf4   : > { %p12_p4 = scmp.ge.s32.totalorder %s15_s15, 4  }
  0xf6   :  { %14 = sbr.rel (!%p12_p4) target bundleno = 1 (0x1), region = 86 }

// kernel: discriminator_forward.8
= control target key start
LH: loop header
LB: loop body
LE: loop exit
PB: predicated region body
PF: predicated region fallthrough
CT: control target
= control target key end

     0   :  { %s2678_s15 = smov 0   ;;  %s3130_s0 = inlined_call_operand.vmem [shape: bf16[2,5,5,128], index: 0, kind: input, shape index: {}]   ;;  %s3131_s1 = inlined_call_operand.vmem [shape: bf16[4,128,64], index: 1, kind: input, shape index: {}]   ;;  %s3132_s2 = inlined_call_operand.vmem [shape: bf16[2,16,64], index: 2, kind: output, shape index: {0}]   ;;  %s3133_s3 = inlined_call_operand.vmem [shape: f32[2,8,64], index: 3, kind: output, shape index: {1}]   ;;  %s3134_s4 = inlined_call_operand.vmem [shape: f32[2,8,64], index: 4, kind: output, shape index: {2}]  }
   0x1 LB: > { %s1777_s16 = sadd.s32 4294967295, %s2651_s15   ;;  %p1781_p0 = scmp.ge.s32.totalorder %s2651_s15, 1  ;;  %s2651_s15 = sphi %s2678_s15, %s15_s15  }
   0x2   : > { %p167_p1 = scmp.lt.s32.totalorder %s2651_s15, 3 }
   0x4   : > { %p168_p2 = pnand %p1781_p0, %p167_p1 }
   0x5   : > { %p201_p3 = scmp.lt.s32.totalorder (!%p168_p2), %s1777_s16, 1 }
   0x6   : > { %171 = sbr.rel (%p168_p2) target bundleno = 297 (0x129), region = 28 }
   0xb   : > { %v2523_v0 = vld [vmem:[%s3131_s1 + $0x78] sm:$0xff]  ;;  %v2522_v4 = vld [vmem:[%s3131_s1 + $0x70] sm:$0xff]  ;;  %v2521_v8 = vld [vmem:[%s3131_s1 + $0x68] sm:$0xff]  ;;  %s3136_s16 = smov (!%p201_p3, %s1777_s16), 1  ;;  %vm560_vm0 = vcmask 517120   ;;  %vm921_vm1 = vcmask 519170  }
   0xc   : > { %v2515_v1 = vld [vmem:[%s3131_s1 + $0x38] sm:$0xff]  ;;  %313 = vmatpush.bf16.msra.mxu0 %v2523_v0  ;;  %v2514_v5 = vld [vmem:[%s3131_s1 + $0x30] sm:$0xff]  ;;  %v2513_v9 = vld [vmem:[%s3131_s1 + $0x28] sm:$0xff]  ;;  %s2636_s21 = smul.u32 20, %s3136_s16  ;;  %s3095_s22 = sshll.u32 %s3136_s16, 3  ;;  %vm562_vm2 = vcmask 519168  }
   0xd   : > { %v2531_v2 = vld [vmem:[%s3131_s1 + $0xb8] sm:$0xff]  ;;  %374 = vmatpush.bf16.msra.mxu1 %v2515_v1  ;;  %v2530_v6 = vld [vmem:[%s3131_s1 + $0xb0] sm:$0xff]  ;;  %v2529_v10 = vld [vmem:[%s3131_s1 + $0xa8] sm:$0xff]  ;;  %s214_s26 = scalar_lea.vmem %s3133_s3, %s3095_s22  ;;  %vm1656_vm3 = vcmask 523264   ;;  %s218_s29 = scalar_lea.vmem %s3134_s4, %s3095_s22 }
   0xe   : > { %v2539_v3 = vld [vmem:[%s3131_s1 + $0xf8] sm:$0xff]  ;;  %454 = vmatpush.bf16.msra.mxu2 %v2531_v2  ;;  %v2538_v7 = vld [vmem:[%s3131_s1 + $0xf0] sm:$0xff]  ;;  %v2537_v11 = vld [vmem:[%s3131_s1 + $0xe8] sm:$0xff]  ;;  %s2746_s6 = scalar_lea.vmem %s3130_s0, %s2636_s21 }
   0xf   : > { %545 = vmatpush.bf16.msra.mxu3 %v2539_v3  ;;  %v2520_v12 = vld [vmem:[%s3131_s1 + $0x60] sm:$0xff]  ;;  %v2519_v16 = vld [vmem:[%s3131_s1 + $0x58] sm:$0xff]  ;;  %v2518_v21 = vld [vmem:[%s3131_s1 + $0x50] sm:$0xff] }
  0x10   : > { %314 = vmatpush.bf16.msra.mxu0 %v2522_v4  ;;  %v2512_v13 = vld [vmem:[%s3131_s1 + $0x20] sm:$0xff]  ;;  %v2511_v17 = vld [vmem:[%s3131_s1 + $0x18] sm:$0xff]  ;;  %v2510_v22 = vld [vmem:[%s3131_s1 + $0x10] sm:$0xff] }
  0x11   : > { %375 = vmatpush.bf16.msra.mxu1 %v2514_v5  ;;  %v2528_v14 = vld [vmem:[%s3131_s1 + $0xa0] sm:$0xff]  ;;  %v2527_v18 = vld [vmem:[%s3131_s1 + $0x98] sm:$0xff]  ;;  %v2526_v25 = vld [vmem:[%s3131_s1 + $0x90] sm:$0xff] }
  0x12   : > { %455 = vmatpush.bf16.msra.mxu2 %v2530_v6  ;;  %v2536_v15 = vld [vmem:[%s3131_s1 + $0xe0] sm:$0xff]  ;;  %v2535_v19 = vld [vmem:[%s3131_s1 + $0xd8] sm:$0xff]  ;;  %v2534_v26 = vld [vmem:[%s3131_s1 + $0xd0] sm:$0xff] }
  0x13   : > { %546 = vmatpush.bf16.msra.mxu3 %v2538_v7  ;;  %v1916_v20 = vld [vmem:[%s2746_s6 + $0x4] sm:$0x7]  ;;  %v236_v24 = vld [vmem:[%s2746_s6] sm:$0x7]  ;;  %v2517_v30 = vld [vmem:[%s3131_s1 + $0x48] sm:$0xff] }
  0x14   : > { %315 = vmatpush.bf16.msra.mxu0 %v2521_v8  ;;  %v487_v23 = vunpack.c.l.b16 %v1916_v20  ;;  %v255_v27 = vunpack.c.l.b16 %v236_v24  ;;  %v2509_v31 = vld [vmem:[%s3131_s1 + $0x8] sm:$0xff]  ;;  %v2516_v36 = vld [vmem:[%s3131_s1 + $0x40] sm:$0xff]  ;;  %v2555_v44 = vld [vmem:[%s3131_s1 + $0x78] sm:$0xff] }
  0x15   : > { %376 = vmatpush.bf16.msra.mxu1 %v2513_v9  ;;  %v2525_v33 = vld [vmem:[%s3131_s1 + $0x88] sm:$0xff]  ;;  %v2508_v37 = vld [vmem:[%s3131_s1] sm:$0xff]  ;;  %v2547_v45 = vld [vmem:[%s3131_s1 + $0x38] sm:$0xff] }
  0x16   : > { %456 = vmatpush.bf16.msra.mxu2 %v2529_v10  ;;  %v488_v28 = vpack.c.b16 %v487_v23, %v487_v23  ;;  %v256_v29 = vpack.c.b16 %v255_v27, %v255_v27  ;;  %v2533_v34 = vld [vmem:[%s3131_s1 + $0xc8] sm:$0xff]  ;;  %v2524_v40 = vld [vmem:[%s3131_s1 + $0x80] sm:$0xff]  ;;  %v2563_v46 = vld [vmem:[%s3131_s1 + $0xb8] sm:$0xff] }
  0x17   : > { %547 = vmatpush.bf16.msra.mxu3 %v2537_v11  ;;  %v2532_v41 = vld [vmem:[%s3131_s1 + $0xc0] sm:$0xff]  ;;  %v2571_v47 = vld [vmem:[%s3131_s1 + $0xf8] sm:$0xff]  ;;  %v2554_v51 = vld [vmem:[%s3131_s1 + $0x70] sm:$0xff] }
  0x18   : > { %316 = vmatpush.bf16.msra.mxu0 %v2520_v12  ;;  %v492_v32 = vshll.u32 %v488_v28, 16  ;;  %v260_v35 = vshll.u32 %v256_v29, 16  ;;  %v490_v38 = vshrl.u32 %v488_v28, 16  ;;  %v258_v42 = vshrl.u32 %v256_v29, 16  ;;  %v1867_v49 = vld [vmem:[%s2746_s6 + $0x4] sm:$0x3] }
  0x19   : > { %377 = vmatpush.bf16.msra.mxu1 %v2512_v13  ;;  %v2546_v52 = vld [vmem:[%s3131_s1 + $0x30] sm:$0xff]  ;;  %v219_v53 = vld [vmem:[%s2746_s6] sm:$0x3]  ;;  %v2553_v56 = vld [vmem:[%s3131_s1 + $0x68] sm:$0xff] }
  0x1a   : > { %457 = vmatpush.bf16.msra.mxu2 %v2528_v14  ;;  %v494_v39 = vrot.slane %v492_v32, 1  ;;  %v262_v43 = vrot.slane %v260_v35, 1  ;;  %v2562_v54 = vld [vmem:[%s3131_s1 + $0xb0] sm:$0xff]  ;;  %v2545_v57 = vld [vmem:[%s3131_s1 + $0x28] sm:$0xff]  ;;  %v2552_v60 = vld [vmem:[%s3131_s1 + $0x60] sm:$0xff] }
  0x1b   : > { %548 = vmatpush.bf16.msra.mxu3 %v2536_v15  ;;  %v2570_v55 = vld [vmem:[%s3131_s1 + $0xf0] sm:$0xff]  ;;  %v2561_v58 = vld [vmem:[%s3131_s1 + $0xa8] sm:$0xff]  ;;  %v2544_v61 = vld [vmem:[%s3131_s1 + $0x20] sm:$0xff] }
  0x1c   : > { %317 = vmatpush.bf16.msra.mxu0 %v2519_v16  ;;  %v495_v48 = vor.u32 %v494_v39, %v490_v38  ;;  %v263_v50 = vor.u32 %v262_v43, %v258_v42  ;;  %v2569_v59 = vld [vmem:[%s3131_s1 + $0xe8] sm:$0xff]  ;;  %v2560_v62 = vld [vmem:[%s3131_s1 + $0xa0] sm:$0xff]  ;;  %v2551_v2 = vld [vmem:[%s3131_s1 + $0x58] sm:$0xff] }
  0x1d   : > { %378 = vmatpush.bf16.msra.mxu1 %v2511_v17  ;;  %v2568_v63 = vld [vmem:[%s3131_s1 + $0xe0] sm:$0xff]  ;;  %v2096_v0 = vld [vmem:[%s2746_s6 + $0x8] sm:$0x7]  ;;  %v2543_v3 = vld [vmem:[%s3131_s1 + $0x18] sm:$0xff] }
  0x1e   : > { %458 = vmatpush.bf16.msra.mxu2 %v2527_v18  ;;  %v1966_v1 = vld [vmem:[%s2746_s6 + $0x4] sm:$0x7]  ;;  %v845_v4 = vunpack.c.l.b16 %v2096_v0  ;;  %v2559_v5 = vld [vmem:[%s3131_s1 + $0x98] sm:$0xff]  ;;  %v2550_v8 = vld [vmem:[%s3131_s1 + $0x50] sm:$0xff] }
  0x1f   : > { %549 = vmatpush.bf16.msra.mxu3 %v2535_v19  ;;  %v2567_v6 = vld [vmem:[%s3131_s1 + $0xd8] sm:$0xff]  ;;  %v615_v7 = vunpack.c.l.b16 %v1966_v1  ;;  %v2542_v9 = vld [vmem:[%s3131_s1 + $0x10] sm:$0xff]  ;;  %v2549_v14 = vld [vmem:[%s3131_s1 + $0x48] sm:$0xff] }
  0x20   : > { %318 = vmatpush.bf16.msra.mxu0 %v2518_v21  ;;  %v846_v10 = vpack.c.b16 %v845_v4, %v845_v4  ;;  %v2558_v11 = vld [vmem:[%s3131_s1 + $0x90] sm:$0xff]  ;;  %v2541_v15 = vld [vmem:[%s3131_s1 + $0x8] sm:$0xff]  ;;  %v2548_v20 = vld [vmem:[%s3131_s1 + $0x40] sm:$0xff] }
  0x21   : > { %379 = vmatpush.bf16.msra.mxu1 %v2510_v22  ;;  %v2566_v12 = vld [vmem:[%s3131_s1 + $0xd0] sm:$0xff]  ;;  %v616_v13 = vpack.c.b16 %v615_v7, %v615_v7  ;;  %v2557_v17 = vld [vmem:[%s3131_s1 + $0x88] sm:$0xff]  ;;  %v2540_v21 = vld [vmem:[%s3131_s1] sm:$0xff] }
  0x22   : > { %459 = vmatpush.bf16.msra.mxu2 %v2526_v25  ;;  %v850_v16 = vshll.u32 %v846_v10, 16  ;;  %v2565_v18 = vld [vmem:[%s3131_s1 + $0xc8] sm:$0xff]  ;;  %v848_v22 = vshrl.u32 %v846_v10, 16  ;;  %v2556_v24 = vld [vmem:[%s3131_s1 + $0x80] sm:$0xff]  ;;  %v2587_v28 = vld [vmem:[%s3131_s1 + $0x78] sm:$0xff] }
  0x23   : > { %550 = vmatpush.bf16.msra.mxu3 %v2534_v26  ;;  %v620_v19 = vshll.u32 %v616_v13, 16  ;;  %v2564_v25 = vld [vmem:[%s3131_s1 + $0xc0] sm:$0xff]  ;;  %v618_v26 = vshrl.u32 %v616_v13, 16  ;;  %v2579_v29 = vld [vmem:[%s3131_s1 + $0x38] sm:$0xff]  ;;  %v2586_v35 = vld [vmem:[%s3131_s1 + $0x70] sm:$0xff] }
  0x24   : > { %319 = vmatpush.bf16.msra.mxu0 %v2517_v30  ;;  %v852_v23 = vrot.slane %v850_v16, 1  ;;  %v2595_v30 = vld [vmem:[%s3131_s1 + $0xb8] sm:$0xff]  ;;  %v2594_v38 = vld [vmem:[%s3131_s1 + $0xb0] sm:$0xff]  ;;  %v2593_v42 = vld [vmem:[%s3131_s1 + $0xa8] sm:$0xff] }
  0x25   : > { %380 = vmatpush.bf16.msra.mxu1 %v2509_v31  ;;  %v622_v27 = vrot.slane %v620_v19, 1  ;;  %v2603_v31 = vld [vmem:[%s3131_s1 + $0xf8] sm:$0xff]  ;;  %v2602_v39 = vld [vmem:[%s3131_s1 + $0xf0] sm:$0xff]  ;;  %v2601_v43 = vld [vmem:[%s3131_s1 + $0xe8] sm:$0xff] }
  0x26   : > { %460 = vmatpush.bf16.msra.mxu2 %v2525_v33  ;;  %v853_v32 = vor.u32 %v852_v23, %v848_v22  ;;  %v2047_v33 = vld [vmem:[%s2746_s6 + $0x8] sm:$0x3]  ;;  %v2580_v4 = vld [vmem:[%s3131_s1 + $0x40] sm:$0xff]  ;;  %v2611_v13 = vld [vmem:[%s3131_s1 + $0x38] sm:$0xff] }
  0x27   : > { %551 = vmatpush.bf16.msra.mxu3 %v2533_v34  ;;  %v623_v34 = vor.u32 %v622_v27, %v618_v26  ;;  %v2589_v1 = vld [vmem:[%s3131_s1 + $0x88] sm:$0xff]  ;;  %v2618_v19 = vld [vmem:[%s3131_s1 + $0x70] sm:$0xff] }
  0x28   : > { %320 = vmatpush.bf16.msra.mxu0 %v2516_v36  ;;  %v2578_v36 = vld [vmem:[%s3131_s1 + $0x30] sm:$0xff]  ;;  %v2625_v26 = vld [vmem:[%s3131_s1 + $0xa8] sm:$0xff] }
  0x29   : > { %381 = vmatpush.bf16.msra.mxu1 %v2508_v37  ;;  %v1965_v37 = vld [vmem:[%s2746_s6 + $0x4] sm:$0x3]  ;;  %v2626_v22 = vld [vmem:[%s3131_s1 + $0xb0] sm:$0xff]  ;;  %v2633_v27 = vld [vmem:[%s3131_s1 + $0xe8] sm:$0xff] }
  0x2a   : > { %461 = vmatpush.bf16.msra.mxu2 %v2524_v40  ;;  %v2585_v40 = vld [vmem:[%s3131_s1 + $0x68] sm:$0xff]  ;;  %v2634_v23 = vld [vmem:[%s3131_s1 + $0xf0] sm:$0xff] }
  0x2b   : > { %552 = vmatpush.bf16.msra.mxu3 %v2532_v41  ;;  %321 = vmatmul.bf16.vlgmr.msra.gmra.mxu0 %v263_v50  ;;  %v2577_v41 = vld [vmem:[%s3131_s1 + $0x28] sm:$0xff]  ;;  %v2583_v50 = vld [vmem:[%s3131_s1 + $0x58] sm:$0xff] }
  0x2c   : > { %673 = vmatpush.bf16.msrb.mxu0 %v2555_v44  ;;  %382 = vmatmul.bf16.vlgmr.msra.gmra.mxu1 %v219_v53  ;;  %v2584_v44 = vld [vmem:[%s3131_s1 + $0x60] sm:$0xff]  ;;  %v2591_v53 = vld [vmem:[%s3131_s1 + $0x98] sm:$0xff] }
  0x2d   : > { %734 = vmatpush.bf16.msrb.mxu1 %v2547_v45  ;;  %462 = vmatmul.bf16.vlgmr.msra.gmra.mxu2 %v1867_v49  ;;  %v2576_v45 = vld [vmem:[%s3131_s1 + $0x20] sm:$0xff]  ;;  %v2146_v49 = vld [vmem:[%s2746_s6 + $0x8] sm:$0x7] }
  0x2e   : > { %813 = vmatpush.bf16.msrb.mxu2 %v2563_v46  ;;  %553 = vmatmul.bf16.vlgmr.msra.gmra.mxu3 %v495_v48  ;;  %v2592_v46 = vld [vmem:[%s3131_s1 + $0xa0] sm:$0xff]  ;;  %v2276_v48 = vld [vmem:[%s2746_s6 + $0xc] sm:$0x7] }
  0x2f   : > { %903 = vmatpush.bf16.msrb.mxu3 %v2571_v47  ;;  %v2600_v47 = vld [vmem:[%s3131_s1 + $0xe0] sm:$0xff] }
  0x30   : > { %674 = vmatpush.bf16.msrb.mxu0 %v2554_v51  ;;  %v2575_v51 = vld [vmem:[%s3131_s1 + $0x18] sm:$0xff] }
  0x31   : > { %735 = vmatpush.bf16.msrb.mxu1 %v2546_v52  ;;  %v1205_v52 = vunpack.c.l.b16 %v2276_v48  ;;  %v2605_v48 = vld [vmem:[%s3131_s1 + $0x8] sm:$0xff] }
  0x32   : > { %814 = vmatpush.bf16.msrb.mxu2 %v2562_v54  ;;  %v2599_v54 = vld [vmem:[%s3131_s1 + $0xd8] sm:$0xff] }
  0x33   : > { %904 = vmatpush.bf16.msrb.mxu3 %v2570_v55  ;;  %v975_v55 = vunpack.c.l.b16 %v2146_v49 }
  0x34   : > { %675 = vmatpush.bf16.msrb.mxu0 %v2553_v56  ;;  %v2582_v56 = vld [vmem:[%s3131_s1 + $0x50] sm:$0xff] }
  0x35   : > { %736 = vmatpush.bf16.msrb.mxu1 %v2545_v57  ;;  %v2574_v57 = vld [vmem:[%s3131_s1 + $0x10] sm:$0xff] }
  0x36   : > { %815 = vmatpush.bf16.msrb.mxu2 %v2561_v58  ;;  %v1206_v58 = vpack.c.b16 %v1205_v52, %v1205_v52 }
  0x37   : > { %905 = vmatpush.bf16.msrb.mxu3 %v2569_v59  ;;  %v2590_v59 = vld [vmem:[%s3131_s1 + $0x90] sm:$0xff] }
  0x38   : > { %676 = vmatpush.bf16.msrb.mxu0 %v2552_v60  ;;  %v2598_v60 = vld [vmem:[%s3131_s1 + $0xd0] sm:$0xff]  ;;  %v1210_v0 = vshll.u32 %v1206_v58, 16 }
  0x39   : > { %737 = vmatpush.bf16.msrb.mxu1 %v2544_v61  ;;  %v976_v61 = vpack.c.b16 %v975_v55, %v975_v55  ;;  %v2604_v55 = vld [vmem:[%s3131_s1] sm:$0xff] }
  0x3a   : > { %816 = vmatpush.bf16.msrb.mxu2 %v2560_v62  ;;  %v2581_v62 = vld [vmem:[%s3131_s1 + $0x48] sm:$0xff]  ;;  %v1212_v7 = vrot.slane %v1210_v0, 1 }
  0x3b   : > { %906 = vmatpush.bf16.msrb.mxu3 %v2568_v63  ;;  %v2573_v63 = vld [vmem:[%s3131_s1 + $0x8] sm:$0xff]  ;;  %v978_v10 = vshrl.u32 %v976_v61, 16 }
  0x3c   : > { %677 = vmatpush.bf16.msrb.mxu0 %v2551_v2  ;;  %v2597_v2 = vld [vmem:[%s3131_s1 + $0xc8] sm:$0xff] }
  0x3d   : > { %738 = vmatpush.bf16.msrb.mxu1 %v2543_v3  ;;  %v980_v3 = vshll.u32 %v976_v61, 16  ;;  %v2325_v61 = vld [vmem:[%s2746_s6 + $0xc] sm:$0x3] }
  0x3e   : > { %817 = vmatpush.bf16.msrb.mxu2 %v2559_v5  ;;  %v2572_v5 = vld [vmem:[%s3131_s1] sm:$0xff] }
  0x3f   : > { %907 = vmatpush.bf16.msrb.mxu3 %v2567_v6  ;;  %v1208_v6 = vshrl.u32 %v1206_v58, 16  ;;  %v2620_v58 = vld [vmem:[%s3131_s1 + $0x80] sm:$0xff] }
  0x40   : > { %678 = vmatpush.bf16.msrb.mxu0 %v2550_v8  ;;  %v2588_v8 = vld [vmem:[%s3131_s1 + $0x80] sm:$0xff] }
  0x41   : > { %739 = vmatpush.bf16.msrb.mxu1 %v2542_v9  ;;  %v2596_v9 = vld [vmem:[%s3131_s1 + $0xc0] sm:$0xff]  ;;  %v1213_v16 = vor.u32 %v1212_v7, %v1208_v6 }
  0x42   : > { %818 = vmatpush.bf16.msrb.mxu2 %v2558_v11  ;;  %v982_v11 = vrot.slane %v980_v3, 1 }
  0x43   : > { %908 = vmatpush.bf16.msrb.mxu3 %v2566_v12  ;;  %v2619_v12 = vld [vmem:[%s3131_s1 + $0x78] sm:$0xff] }
  0x44   : > { %679 = vmatpush.bf16.msrb.mxu0 %v2549_v14  ;;  %v2627_v14 = vld [vmem:[%s3131_s1 + $0xb8] sm:$0xff] }
  0x45   : > { %740 = vmatpush.bf16.msrb.mxu1 %v2541_v15  ;;  %v2635_v15 = vld [vmem:[%s3131_s1 + $0xf8] sm:$0xff] }
  0x46   : > { %819 = vmatpush.bf16.msrb.mxu2 %v2557_v17  ;;  %v2227_v17 = vld [vmem:[%s2746_s6 + $0xc] sm:$0x3] }
  0x47   : > { %909 = vmatpush.bf16.msrb.mxu3 %v2565_v18  ;;  %v983_v18 = vor.u32 %v982_v11, %v978_v10 }
  0x48   : > { %680 = vmatpush.bf16.msrb.mxu0 %v2548_v20  ;;  %v2610_v20 = vld [vmem:[%s3131_s1 + $0x30] sm:$0xff] }
  0x49   : > { %741 = vmatpush.bf16.msrb.mxu1 %v2540_v21  ;;  %v2145_v21 = vld [vmem:[%s2746_s6 + $0x8] sm:$0x3] }
  0x4a   : > { %820 = vmatpush.bf16.msrb.mxu2 %v2556_v24  ;;  %v2617_v24 = vld [vmem:[%s3131_s1 + $0x68] sm:$0xff] }
  0x4b   : > { %910 = vmatpush.bf16.msrb.mxu3 %v2564_v25  ;;  %681 = vmatmul.bf16.vlgmr.msrb.gmra.mxu0 %v623_v34  ;;  %v2609_v25 = vld [vmem:[%s3131_s1 + $0x28] sm:$0xff] }
  0x4c   : > { %1033 = vmatpush.bf16.msra.mxu0 %v2587_v28  ;;  %742 = vmatmul.bf16.vlgmr.msrb.gmra.mxu1 %v1965_v37  ;;  %v2616_v28 = vld [vmem:[%s3131_s1 + $0x60] sm:$0xff] }
  0x4d   : > { %1094 = vmatpush.bf16.msra.mxu1 %v2579_v29  ;;  %821 = vmatmul.bf16.vlgmr.msrb.gmra.mxu2 %v2047_v33  ;;  %v2608_v29 = vld [vmem:[%s3131_s1 + $0x20] sm:$0xff]  ;;  %v2456_v33 = vld [vmem:[%s2746_s6 + $0x10] sm:$0x7] }
  0x4e   : > { %1173 = vmatpush.bf16.msra.mxu2 %v2595_v30  ;;  %911 = vmatmul.bf16.vlgmr.msrb.gmra.mxu3 %v853_v32  ;;  %v2326_v30 = vld [vmem:[%s2746_s6 + $0xc] sm:$0x7]  ;;  %v2632_v32 = vld [vmem:[%s3131_s1 + $0xe0] sm:$0xff]  ;;  %v1561_v37 = vunpack.c.l.b16 %v2456_v33 }
  0x4f   : > { %1263 = vmatpush.bf16.msra.mxu3 %v2603_v31  ;;  %v2624_v31 = vld [vmem:[%s3131_s1 + $0xa0] sm:$0xff]  ;;  %v1331_v34 = vunpack.c.l.b16 %v2326_v30 }
  0x50   : > { %1034 = vmatpush.bf16.msra.mxu0 %v2586_v35  ;;  %v2615_v35 = vld [vmem:[%s3131_s1 + $0x58] sm:$0xff] }
  0x51   : > { %1095 = vmatpush.bf16.msra.mxu1 %v2578_v36  ;;  %v2607_v36 = vld [vmem:[%s3131_s1 + $0x18] sm:$0xff] }
  0x52   : > { %1174 = vmatpush.bf16.msra.mxu2 %v2594_v38  ;;  %v2623_v38 = vld [vmem:[%s3131_s1 + $0x98] sm:$0xff] }
  0x53   : > { %1264 = vmatpush.bf16.msra.mxu3 %v2602_v39  ;;  %v2631_v39 = vld [vmem:[%s3131_s1 + $0xd8] sm:$0xff] }
  0x54   : > { %1035 = vmatpush.bf16.msra.mxu0 %v2585_v40  ;;  %v1332_v40 = vpack.c.b16 %v1331_v34, %v1331_v34 }
  0x55   : > { %1096 = vmatpush.bf16.msra.mxu1 %v2577_v41  ;;  %v2614_v41 = vld [vmem:[%s3131_s1 + $0x50] sm:$0xff] }
  0x56   : > { %1175 = vmatpush.bf16.msra.mxu2 %v2593_v42  ;;  %v2606_v42 = vld [vmem:[%s3131_s1 + $0x10] sm:$0xff]  ;;  %v1334_v52 = vshrl.u32 %v1332_v40, 16 }
  0x57   : > { %1265 = vmatpush.bf16.msra.mxu3 %v2601_v43  ;;  %v1562_v43 = vpack.c.b16 %v1561_v37, %v1561_v37 }
  0x58   : > { %1036 = vmatpush.bf16.msra.mxu0 %v2584_v44  ;;  %v2622_v44 = vld [vmem:[%s3131_s1 + $0x90] sm:$0xff] }
  0x59   : > { %1097 = vmatpush.bf16.msra.mxu1 %v2576_v45  ;;  %v2630_v45 = vld [vmem:[%s3131_s1 + $0xd0] sm:$0xff]  ;;  %v1566_v49 = vshll.u32 %v1562_v43, 16 }
  0x5a   : > { %1176 = vmatpush.bf16.msra.mxu2 %v2592_v46  ;;  %v1336_v46 = vshll.u32 %v1332_v40, 16 }
  0x5b   : > { %1266 = vmatpush.bf16.msra.mxu3 %v2600_v47  ;;  %v2613_v47 = vld [vmem:[%s3131_s1 + $0x48] sm:$0xff] }
  0x5c   : > { %1037 = vmatpush.bf16.msra.mxu0 %v2583_v50  ;;  %v2621_v50 = vld [vmem:[%s3131_s1 + $0x88] sm:$0xff] }
  0x5d   : > { %1098 = vmatpush.bf16.msra.mxu1 %v2575_v51  ;;  %v2629_v51 = vld [vmem:[%s3131_s1 + $0xc8] sm:$0xff] }
  0x5e   : > { %1177 = vmatpush.bf16.msra.mxu2 %v2591_v53  ;;  %v1338_v53 = vrot.slane %v1336_v46, 1 }
  0x5f   : > { %1267 = vmatpush.bf16.msra.mxu3 %v2599_v54  ;;  %v2612_v54 = vld [vmem:[%s3131_s1 + $0x40] sm:$0xff] }
  0x60   : > { %1038 = vmatpush.bf16.msra.mxu0 %v2582_v56  ;;  %v1564_v56 = vshrl.u32 %v1562_v43, 16 }
  0x61   : > { %1099 = vmatpush.bf16.msra.mxu1 %v2574_v57  ;;  %v1568_v57 = vrot.slane %v1566_v49, 1 }
  0x62   : > { %1178 = vmatpush.bf16.msra.mxu2 %v2590_v59  ;;  %v2628_v59 = vld [vmem:[%s3131_s1 + $0xc0] sm:$0xff] }
  0x63   : > { %1268 = vmatpush.bf16.msra.mxu3 %v2598_v60  ;;  %v1339_v60 = vor.u32 %v1338_v53, %v1334_v52 }
  0x64   : > { %1039 = vmatpush.bf16.msra.mxu0 %v2581_v62  ;;  %v1569_v62 = vor.u32 %v1568_v57, %v1564_v56 }
  0x65   : > { %1100 = vmatpush.bf16.msra.mxu1 %v2573_v63  ;;  %v2407_v63 = vld [vmem:[%s2746_s6 + $0x10] sm:$0x3]  ;;  %s3101_s6 = scalar_lea.vmem %s3132_s2, %s3095_s22 }
  0x66   : > { %1179 = vmatpush.bf16.msra.mxu2 %v2589_v1 }
  0x67   : > { %1269 = vmatpush.bf16.msra.mxu3 %v2597_v2 }
  0x68   : > { %1040 = vmatpush.bf16.msra.mxu0 %v2580_v4 }
  0x69   : > { %1101 = vmatpush.bf16.msra.mxu1 %v2572_v5 }
  0x6a   : > { %1180 = vmatpush.bf16.msra.mxu2 %v2588_v8 }
  0x6b   : > { %1270 = vmatpush.bf16.msra.mxu3 %v2596_v9  ;;  %1041 = vmatmul.bf16.vlgmr.msra.gmra.mxu0 %v983_v18 }
  0x6c   : > { %1389 = vmatpush.bf16.msrb.mxu0 %v2619_v12  ;;  %1102 = vmatmul.bf16.vlgmr.msra.gmra.mxu1 %v2145_v21 }
  0x6d   : > { %1450 = vmatpush.bf16.msrb.mxu1 %v2611_v13  ;;  %1181 = vmatmul.bf16.vlgmr.msra.gmra.mxu2 %v2227_v17 }
  0x6e   : > { %1529 = vmatpush.bf16.msrb.mxu2 %v2627_v14  ;;  %1271 = vmatmul.bf16.vlgmr.msra.gmra.mxu3 %v1213_v16 }
  0x6f   : > { %1619 = vmatpush.bf16.msrb.mxu3 %v2635_v15 }
  0x70   : > { %1390 = vmatpush.bf16.msrb.mxu0 %v2618_v19 }
  0x71   : > { %1451 = vmatpush.bf16.msrb.mxu1 %v2610_v20 }
  0x72   : > { %1530 = vmatpush.bf16.msrb.mxu2 %v2626_v22 }
  0x73   : > { %1620 = vmatpush.bf16.msrb.mxu3 %v2634_v23 }
  0x74   : > { %1391 = vmatpush.bf16.msrb.mxu0 %v2617_v24 }
  0x75   : > { %1452 = vmatpush.bf16.msrb.mxu1 %v2609_v25 }
  0x76   : > { %1531 = vmatpush.bf16.msrb.mxu2 %v2625_v26 }
  0x77   : > { %1621 = vmatpush.bf16.msrb.mxu3 %v2633_v27 }
  0x78   : > { %1392 = vmatpush.bf16.msrb.mxu0 %v2616_v28 }
  0x79   : > { %1453 = vmatpush.bf16.msrb.mxu1 %v2608_v29 }
  0x7a   : > { %1532 = vmatpush.bf16.msrb.mxu2 %v2624_v31 }
  0x7b   : > { %1622 = vmatpush.bf16.msrb.mxu3 %v2632_v32 }
  0x7c   : > { %1393 = vmatpush.bf16.msrb.mxu0 %v2615_v35 }
  0x7d   : > { %1454 = vmatpush.bf16.msrb.mxu1 %v2607_v36 }
  0x7e   : > { %1533 = vmatpush.bf16.msrb.mxu2 %v2623_v38 }
  0x7f   : > { %1623 = vmatpush.bf16.msrb.mxu3 %v2631_v39 }
  0x80   : > { %1394 = vmatpush.bf16.msrb.mxu0 %v2614_v41 }
  0x81   : > { %1455 = vmatpush.bf16.msrb.mxu1 %v2606_v42 }
  0x82   : > { %1534 = vmatpush.bf16.msrb.mxu2 %v2622_v44 }
  0x83   : > { %1624 = vmatpush.bf16.msrb.mxu3 %v2630_v45 }
  0x84   : > { %1395 = vmatpush.bf16.msrb.mxu0 %v2613_v47 }
  0x85   : > { %1456 = vmatpush.bf16.msrb.mxu1 %v2605_v48 }
  0x86   : > { %1535 = vmatpush.bf16.msrb.mxu2 %v2621_v50 }
  0x87   : > { %1625 = vmatpush.bf16.msrb.mxu3 %v2629_v51 }
  0x88   : > { %1396 = vmatpush.bf16.msrb.mxu0 %v2612_v54 }
  0x89   : > { %1457 = vmatpush.bf16.msrb.mxu1 %v2604_v55 }
  0x8a   : > { %1536 = vmatpush.bf16.msrb.mxu2 %v2620_v58 }
  0x8b   : > { %1626 = vmatpush.bf16.msrb.mxu3 %v2628_v59  ;;  %1397 = vmatmul.bf16.vlgmr.msrb.gmra.mxu0 %v1339_v60 }
  0x8c   : > { %1458 = vmatmul.bf16.vlgmr.msrb.gmra.mxu1 %v2325_v61 }
  0x8d   : > { %1537 = vmatmul.bf16.vlgmr.msrb.gmra.mxu2 %v2407_v63 }
  0x8e   : > { %1627 = vmatmul.bf16.vlgmr.msrb.gmra.mxu3 %v1569_v62 }
  0xa8   : > { %v322_v0 = vpop.f32.mrf.mxu0 }
  0xa9   : > { %v383_v1 = vpop.f32.mrf.mxu1 }
  0xaa   : > { %v384_v2 = vadd.f32 %v383_v1, %v322_v0 }
  0xb0   : > { %v463_v3 = vpop.f32.mrf.mxu2  ;;  %v324_v7 = vpop.f32.mrf.mxu0 }
  0xb1   : > { %v554_v4 = vpop.f32.mrf.mxu3  ;;  %v467_v5 = vadd.f32 %v463_v3, %v384_v2  ;;  %v385_v8 = vpop.f32.mrf.mxu1 }
  0xb3   : > { %v558_v6 = vadd.f32 %v554_v4, %v467_v5 }
  0xb5   : > { %v559_v9 = vpack.c.bf16 %v558_v6, %v558_v6  ;;  %v571_v38 = vmul.f32 %v558_v6, %v558_v6  ;;  %v563_v41 = vsel %vm562_vm2, %v558_v6, 0.0 }
  0xb6   : > { %v564_v46 = vrot.slane %v563_v41, 4 }
  0xb7   : > { %561 = vst.msk [vmem:[%s3101_s6] sm:$0x3] %vm560_vm0, %v559_v9  ;;  %v572_v44 = vsel %vm562_vm2, %v571_v38, 0.0 }
  0xb8   : > { %v465_v10 = vpop.f32.mrf.mxu2  ;;  %v573_v50 = vrot.slane %v572_v44, 4  ;;  %v565_v55 = vadd.f32 %v564_v46, %v563_v41 }
  0xb9   : > { %v556_v11 = vpop.f32.mrf.mxu3 }
  0xba   : > { %v574_v58 = vadd.f32 %v573_v50, %v572_v44  ;;  %v566_v62 = vrot.slane %v565_v55, 2 }
  0xbc   : > { %v575_v3 = vrot.slane %v574_v58, 2  ;;  %v567_v9 = vadd.f32 %v566_v62, %v565_v55 }
  0xc8   : > { %v682_v12 = vpop.f32.mrf.mxu0 }
  0xc9   : > { %v743_v13 = vpop.f32.mrf.mxu1 }
  0xca   : > { %v744_v14 = vadd.f32 %v743_v13, %v682_v12  ;;  %v576_v13 = vadd.f32 %v575_v3, %v574_v58 }
  0xd0   : > { %v822_v15 = vpop.f32.mrf.mxu2  ;;  %v684_v19 = vpop.f32.mrf.mxu0 }
  0xd1   : > { %v912_v16 = vpop.f32.mrf.mxu3  ;;  %v826_v17 = vadd.f32 %v822_v15, %v744_v14  ;;  %v745_v20 = vpop.f32.mrf.mxu1 }
  0xd2   : > { %v568_v20 = vrot.slane %v567_v9, 1 }
  0xd3   : > { %v916_v18 = vadd.f32 %v912_v16, %v826_v17 }
  0xd5   : > { %v917_v21 = vpack.c.bf16 %v916_v18, %v916_v18  ;;  %v931_v37 = vmul.f32 %v916_v18, %v916_v18  ;;  %v923_v39 = vsel %vm562_vm2, %v916_v18, 0.0 }
  0xd6   : > { %v924_v45 = vrot.slane %v923_v39, 4 }
  0xd7   : > { %v919_v22 = vrot.slane %v917_v21, 6  ;;  %v932_v42 = vsel %vm562_vm2, %v931_v37, 0.0 }
  0xd8   : > { %v824_v23 = vpop.f32.mrf.mxu2  ;;  %v933_v48 = vrot.slane %v932_v42, 4  ;;  %v925_v53 = vadd.f32 %v924_v45, %v923_v39 }
  0xd9   : > { %v914_v24 = vpop.f32.mrf.mxu3  ;;  %922 = vst.msk [vmem:[%s3101_s6] sm:$0xc] %vm921_vm1, %v919_v22 }
  0xda   : > { %v934_v56 = vadd.f32 %v933_v48, %v932_v42  ;;  %v926_v60 = vrot.slane %v925_v53, 2 }
  0xdc   : > { %v935_v63 = vrot.slane %v934_v56, 2  ;;  %v927_v7 = vadd.f32 %v926_v60, %v925_v53 }
  0xde   : > { %v936_v11 = vadd.f32 %v935_v63, %v934_v56  ;;  %v928_v17 = vrot.slane %v927_v7, 1 }
  0xe0   : > { %v937_v23 = vrot.slane %v936_v11, 1 }
  0xe8   : > { %v1042_v25 = vpop.f32.mrf.mxu0 }
  0xe9   : > { %v1103_v26 = vpop.f32.mrf.mxu1 }
  0xea   : > { %v1104_v27 = vadd.f32 %v1103_v26, %v1042_v25 }
  0xf0   : > { %v1182_v28 = vpop.f32.mrf.mxu2  ;;  %v1044_v32 = vpop.f32.mrf.mxu0 }
  0xf1   : > { %v1272_v29 = vpop.f32.mrf.mxu3  ;;  %v1186_v30 = vadd.f32 %v1182_v28, %v1104_v27  ;;  %v1105_v33 = vpop.f32.mrf.mxu1 }
  0xf3   : > { %v1276_v31 = vadd.f32 %v1272_v29, %v1186_v30  ;;  %v577_v29 = vrot.slane %v576_v13, 1  ;;  %v929_v30 = vadd.f32 %v928_v17, %v927_v7 }
  0xf5   : > { %v1277_v34 = vpack.c.bf16 %v1276_v31, %v1276_v31  ;;  %v1287_v40 = vmul.f32 %v1276_v31, %v1276_v31  ;;  %v1279_v43 = vsel %vm562_vm2, %v1276_v31, 0.0  ;;  %v578_v39 = vadd.f32 %v577_v29, %v576_v13 }
  0xf6   : > { %v1280_v49 = vrot.slane %v1279_v43, 4 }
  0xf7   : > { %1278 = vst.msk [vmem:[%s3101_s6 + $0x4] sm:$0x3] %vm560_vm0, %v1277_v34  ;;  %v1288_v47 = vsel %vm562_vm2, %v1287_v40, 0.0  ;;  %v569_v34 = vadd.f32 %v568_v20, %v567_v9 }
  0xf8   : > { %v1184_v35 = vpop.f32.mrf.mxu2  ;;  %v1289_v54 = vrot.slane %v1288_v47, 4  ;;  %v1281_v57 = vadd.f32 %v1280_v49, %v1279_v43 }
  0xf9   : > { %v1274_v36 = vpop.f32.mrf.mxu3  ;;  %v938_v35 = vadd.f32 %v937_v23, %v936_v11  ;;  %v930_v40 = vadd.f32 %v929_v30, %v569_v34 }
  0xfa   : > { %v1290_v61 = vadd.f32 %v1289_v54, %v1288_v47  ;;  %v1282_v0 = vrot.slane %v1281_v57, 2 }
  0xfb   : > { %v939_v44 = vadd.f32 %v938_v35, %v578_v39 }
  0xfc   : > { %v1291_v8 = vrot.slane %v1290_v61, 2  ;;  %v1283_v12 = vadd.f32 %v1282_v0, %v1281_v57 }
  0xfe   : > { %v1292_v18 = vadd.f32 %v1291_v8, %v1290_v61  ;;  %v1284_v24 = vrot.slane %v1283_v12, 1 }
 0x100   : > { %v1293_v31 = vrot.slane %v1292_v18, 1  ;;  %v1285_v36 = vadd.f32 %v1284_v24, %v1283_v12 }
 0x102   : > { %v1294_v41 = vadd.f32 %v1293_v31, %v1292_v18  ;;  %v1286_v45 = vadd.f32 %v1285_v36, %v930_v40 }
 0x104   : > { %v1295_v48 = vadd.f32 %v1294_v41, %v939_v44 }
 0x108   : > { %v1398_v51 = vpop.f32.mrf.mxu0 }
 0x109   : > { %v1459_v52 = vpop.f32.mrf.mxu1 }
 0x10a   : > { %v1460_v59 = vadd.f32 %v1459_v52, %v1398_v51 }
 0x110   : > { %v1538_v1 = vpop.f32.mrf.mxu2  ;;  %v1400_v5 = vpop.f32.mrf.mxu0 }
 0x111   : > { %v1628_v2 = vpop.f32.mrf.mxu3  ;;  %v1542_v4 = vadd.f32 %v1538_v1, %v1460_v59  ;;  %v1461_v6 = vpop.f32.mrf.mxu1 }
 0x113   : > { %v1632_v10 = vadd.f32 %v1628_v2, %v1542_v4 }
 0x115   : > { %v1633_v14 = vpack.c.bf16 %v1632_v10, %v1632_v10  ;;  %v1638_v15 = vsel %vm562_vm2, %v1632_v10, 0.0  ;;  %v1646_v16 = vmul.f32 %v1632_v10, %v1632_v10 }
 0x116   : > { %v1639_v19 = vrot.slane %v1638_v15, 4 }
 0x117   : > { %v1635_v21 = vrot.slane %v1633_v14, 6  ;;  %v1647_v22 = vsel %vm562_vm2, %v1646_v16, 0.0 }
 0x118   : > { %v1640_v25 = vadd.f32 %v1639_v19, %v1638_v15  ;;  %v1648_v26 = vrot.slane %v1647_v22, 4  ;;  %v1540_v27 = vpop.f32.mrf.mxu2 }
 0x119   : > { %v1630_v28 = vpop.f32.mrf.mxu3  ;;  %1637 = vst.msk [vmem:[%s3101_s6 + $0x4] sm:$0xc] %vm921_vm1, %v1635_v21 }
 0x11a   : > { %v1641_v32 = vrot.slane %v1640_v25, 2  ;;  %v1649_v33 = vadd.f32 %v1648_v26, %v1647_v22 }
 0x11c   : > { %v1642_v37 = vadd.f32 %v1641_v32, %v1640_v25  ;;  %v1650_v38 = vrot.slane %v1649_v33, 2 }
 0x11e   : > { %v1643_v42 = vrot.slane %v1642_v37, 1  ;;  %v1651_v43 = vadd.f32 %v1650_v38, %v1649_v33 }
 0x120   : > { %v1644_v46 = vadd.f32 %v1643_v42, %v1642_v37  ;;  %v1652_v47 = vrot.slane %v1651_v43, 1 }
 0x122   : > { %v1645_v49 = vadd.f32 %v1644_v46, %v1286_v45  ;;  %v1653_v50 = vadd.f32 %v1652_v47, %v1651_v43 }
 0x124   : > { %v1654_v51 = vadd.f32 %v1653_v50, %v1295_v48  ;;  %v1655_v52 = vmul.f32 0.125, %v1645_v49 }
 0x126   : > { %1657 = vst.msk [vmem:[%s214_s26] sm:$0xff] %vm1656_vm3, %v1655_v52  ;;  %v1658_v53 = vmul.f32 0.125, %v1654_v51 }
 0x128   : > { %1659 = vst.msk [vmem:[%s218_s29] sm:$0xff] %vm1656_vm3, %v1658_v53 }
 0x129 PF: > { %s15_s15 = sadd.s32 1, %s2651_s15  }
 0x12a   : > { %p12_p4 = scmp.ge.s32.totalorder %s15_s15, 4  }
 0x12c   :  { %14 = sbr.rel (!%p12_p4) target bundleno = 1 (0x1), region = 89 }

// kernel: discriminator_forward.9
= control target key start
LH: loop header
LB: loop body
LE: loop exit
PB: predicated region body
PF: predicated region fallthrough
CT: control target
= control target key end

     0   :  { %s1361_s14 = smov 0   ;;  %s1579_s0 = inlined_call_operand.vmem [shape: bf16[2,2,2,256], index: 0, kind: input, shape index: {}]   ;;  %s1580_s1 = inlined_call_operand.vmem [shape: bf16[4,256,1], index: 1, kind: input, shape index: {}]   ;;  %s1581_s2 = inlined_call_operand.<no memory space> [shape: f32[1,1], index: 2, kind: input, shape index: {}]   ;;  %s1582_s3 = inlined_call_operand.vmem [shape: f32[2,1,1], index: 3, kind: output, shape index: {}]  }
   0x1   :  { %v8_v0 = vstv %s1581_s2 }
   0x2   :  { %9 = vst [vmem:[#allocation2] sm:$0x1] %v8_v0 }
   0x3 LB: > { %s892_s15 = sadd.s32 4294967295, %s1336_s14   ;;  %p896_p0 = scmp.ge.s32.totalorder %s1336_s14, 1  ;;  %s1336_s14 = sphi %s1361_s14, %s15_s14  }
   0x4   : > { %p138_p1 = scmp.lt.s32.totalorder %s1336_s14, 3 }
   0x6   : > { %p139_p2 = pnand %p896_p0, %p138_p1 }
   0x7   : > { %p159_p3 = scmp.lt.s32.totalorder (!%p139_p2), %s892_s15, 1 }
   0x8   : > { %142 = sbr.rel (%p139_p2) target bundleno = 249 (0xf9), region = 32 }
   0xd   : > { %v1277_v1 = vld [vmem:[%s1580_s1 + $0xb8] sm:$0xff]  ;;  %v1276_v5 = vld [vmem:[%s1580_s1 + $0xb0] sm:$0xff]  ;;  %s1584_s15 = smov (!%p159_p3, %s892_s15), 1  ;;  %v1275_v9 = vld [vmem:[%s1580_s1 + $0xa8] sm:$0xff]  ;;  %vm843_vm3 = vcmask 0  }
   0xe   : > { %v1285_v2 = vld [vmem:[%s1580_s1 + $0xf8] sm:$0xff]  ;;  %339 = vmatpush.bf16.msra.mxu0 %v1277_v1  ;;  %v1284_v6 = vld [vmem:[%s1580_s1 + $0xf0] sm:$0xff]  ;;  %v1283_v10 = vld [vmem:[%s1580_s1 + $0xe8] sm:$0xff]  ;;  %s897_s12 = sshll.u32 %s1584_s15, 2  ;;  %s165_s21 = scalar_lea.vmem %s1582_s3, %s1584_s15 }
   0xf   : > { %v1261_v3 = vld [vmem:[%s1580_s1 + $0x38] sm:$0xff]  ;;  %352 = vmatpush.bf16.msra.mxu1 %v1285_v2  ;;  %v1260_v7 = vld [vmem:[%s1580_s1 + $0x30] sm:$0xff]  ;;  %v1259_v11 = vld [vmem:[%s1580_s1 + $0x28] sm:$0xff]  ;;  %s1417_s20 = scalar_lea.vmem %s1579_s0, %s897_s12 }
  0x10   : > { %v1269_v4 = vld [vmem:[%s1580_s1 + $0x78] sm:$0xff]  ;;  %466 = vmatpush.bf16.msra.mxu2 %v1261_v3  ;;  %v1268_v8 = vld [vmem:[%s1580_s1 + $0x70] sm:$0xff]  ;;  %v1267_v12 = vld [vmem:[%s1580_s1 + $0x68] sm:$0xff] }
  0x11   : > { %479 = vmatpush.bf16.msra.mxu3 %v1269_v4  ;;  %v1274_v13 = vld [vmem:[%s1580_s1 + $0xa0] sm:$0xff]  ;;  %v1273_v18 = vld [vmem:[%s1580_s1 + $0x98] sm:$0xff]  ;;  %v1272_v22 = vld [vmem:[%s1580_s1 + $0x90] sm:$0xff] }
  0x12   : > { %340 = vmatpush.bf16.msra.mxu0 %v1276_v5  ;;  %v1282_v14 = vld [vmem:[%s1580_s1 + $0xe0] sm:$0xff]  ;;  %v1281_v19 = vld [vmem:[%s1580_s1 + $0xd8] sm:$0xff]  ;;  %v1280_v23 = vld [vmem:[%s1580_s1 + $0xd0] sm:$0xff] }
  0x13   : > { %353 = vmatpush.bf16.msra.mxu1 %v1284_v6  ;;  %v1258_v15 = vld [vmem:[%s1580_s1 + $0x20] sm:$0xff]  ;;  %v1257_v20 = vld [vmem:[%s1580_s1 + $0x18] sm:$0xff]  ;;  %v1256_v24 = vld [vmem:[%s1580_s1 + $0x10] sm:$0xff] }
  0x14   : > { %467 = vmatpush.bf16.msra.mxu2 %v1260_v7  ;;  %v1266_v16 = vld [vmem:[%s1580_s1 + $0x60] sm:$0xff]  ;;  %v1265_v21 = vld [vmem:[%s1580_s1 + $0x58] sm:$0xff]  ;;  %v1264_v25 = vld [vmem:[%s1580_s1 + $0x50] sm:$0xff] }
  0x15   : > { %480 = vmatpush.bf16.msra.mxu3 %v1268_v8  ;;  %v167_v17 = vld [vmem:[%s1417_s20] sm:$0x3]  ;;  %v1271_v28 = vld [vmem:[%s1580_s1 + $0x88] sm:$0xff]  ;;  %v1058_v36 = vld [vmem:[%s1417_s20 + $0x2] sm:$0x3] }
  0x16   : > { %341 = vmatpush.bf16.msra.mxu0 %v1275_v9  ;;  %234 = vst [vmem:[#allocation1] ss:$9 sm:$0xff] %v167_v17  ;;  %v1279_v29 = vld [vmem:[%s1580_s1 + $0xc8] sm:$0xff]  ;;  %v1270_v32 = vld [vmem:[%s1580_s1 + $0x80] sm:$0xff]  ;;  %v1293_v37 = vld [vmem:[%s1580_s1 + $0x138] sm:$0xff] }
  0x17   : > { %354 = vmatpush.bf16.msra.mxu1 %v1283_v10  ;;  %v1255_v30 = vld [vmem:[%s1580_s1 + $0x8] sm:$0xff]  ;;  %v1278_v33 = vld [vmem:[%s1580_s1 + $0xc0] sm:$0xff]  ;;  %v1301_v38 = vld [vmem:[%s1580_s1 + $0x178] sm:$0xff] }
  0x18   : > { %468 = vmatpush.bf16.msra.mxu2 %v1259_v11  ;;  %v1263_v31 = vld [vmem:[%s1580_s1 + $0x48] sm:$0xff]  ;;  %v1254_v34 = vld [vmem:[%s1580_s1] sm:$0xff]  ;;  %v1309_v39 = vld [vmem:[%s1580_s1 + $0x1b8] sm:$0xff] }
  0x19   : > { %481 = vmatpush.bf16.msra.mxu3 %v1267_v12  ;;  %v1262_v35 = vld [vmem:[%s1580_s1 + $0x40] sm:$0xff]  ;;  %v1317_v40 = vld [vmem:[%s1580_s1 + $0x1f8] sm:$0xff]  ;;  %v1292_v45 = vld [vmem:[%s1580_s1 + $0x130] sm:$0xff] }
  0x1a   : > { %342 = vmatpush.bf16.msra.mxu0 %v1274_v13  ;;  %v1300_v46 = vld [vmem:[%s1580_s1 + $0x170] sm:$0xff]  ;;  %v1155_v49 = vld [vmem:[%s1417_s20 + $0x2] sm:$0x3]  ;;  %v1291_v50 = vld [vmem:[%s1580_s1 + $0x128] sm:$0xff] }
  0x1b   : > { %355 = vmatpush.bf16.msra.mxu1 %v1282_v14  ;;  %v1308_v47 = vld [vmem:[%s1580_s1 + $0x1b0] sm:$0xff]  ;;  %v1299_v51 = vld [vmem:[%s1580_s1 + $0x168] sm:$0xff]  ;;  %v1290_v56 = vld [vmem:[%s1580_s1 + $0x120] sm:$0xff] }
  0x1c   : > { %469 = vmatpush.bf16.msra.mxu2 %v1258_v15  ;;  %v1316_v48 = vld [vmem:[%s1580_s1 + $0x1f0] sm:$0xff]  ;;  %v1307_v52 = vld [vmem:[%s1580_s1 + $0x1a8] sm:$0xff]  ;;  %v1298_v57 = vld [vmem:[%s1580_s1 + $0x160] sm:$0xff] }
  0x1d   : > { %482 = vmatpush.bf16.msra.mxu3 %v1266_v16  ;;  %v235_v26 = vld [vmem:[#allocation1] sm:$0xff]  ;;  %v236_v27 = vld [vmem:[#allocation1 + $0x9] sm:$0xff]  ;;  %v1289_v60 = vld [vmem:[%s1580_s1 + $0x118] sm:$0xff] }
  0x1e   : > { %343 = vmatpush.bf16.msra.mxu0 %v1273_v18  ;;  %365 = vst [vmem:[#allocation1] ss:$9 sm:$0xff] %v167_v17  ;;  %v237_v43 = vshrl.u32 %v235_v26, 16  ;;  %v239_v44 = vshrl.u32 %v236_v27, 16  ;;  %v1315_v53 = vld [vmem:[%s1580_s1 + $0x1e8] sm:$0xff]  ;;  %v1306_v58 = vld [vmem:[%s1580_s1 + $0x1a0] sm:$0xff] }
  0x1f   : > { %356 = vmatpush.bf16.msra.mxu1 %v1281_v19  ;;  %v1314_v59 = vld [vmem:[%s1580_s1 + $0x1e0] sm:$0xff]  ;;  %v1297_v61 = vld [vmem:[%s1580_s1 + $0x158] sm:$0xff]  ;;  %v1288_v0 = vld [vmem:[%s1580_s1 + $0x110] sm:$0xff] }
  0x20   : > { %470 = vmatpush.bf16.msra.mxu2 %v1257_v20  ;;  %v1305_v62 = vld [vmem:[%s1580_s1 + $0x198] sm:$0xff]  ;;  %v1296_v1 = vld [vmem:[%s1580_s1 + $0x150] sm:$0xff]  ;;  %v1287_v4 = vld [vmem:[%s1580_s1 + $0x108] sm:$0xff] }
  0x21   : > { %483 = vmatpush.bf16.msra.mxu3 %v1265_v21  ;;  %v1313_v63 = vld [vmem:[%s1580_s1 + $0x1d8] sm:$0xff]  ;;  %v1304_v2 = vld [vmem:[%s1580_s1 + $0x190] sm:$0xff]  ;;  %v1295_v5 = vld [vmem:[%s1580_s1 + $0x148] sm:$0xff] }
  0x22   : > { %344 = vmatpush.bf16.msra.mxu0 %v1272_v22  ;;  %v1312_v3 = vld [vmem:[%s1580_s1 + $0x1d0] sm:$0xff]  ;;  %v1303_v6 = vld [vmem:[%s1580_s1 + $0x188] sm:$0xff]  ;;  %v1286_v8 = vld [vmem:[%s1580_s1 + $0x100] sm:$0xff] }
  0x23   : > { %357 = vmatpush.bf16.msra.mxu1 %v1280_v23  ;;  %v1311_v7 = vld [vmem:[%s1580_s1 + $0x1c8] sm:$0xff]  ;;  %v1294_v9 = vld [vmem:[%s1580_s1 + $0x140] sm:$0xff] }
  0x24   : > { %471 = vmatpush.bf16.msra.mxu2 %v1256_v24  ;;  %v1302_v10 = vld [vmem:[%s1580_s1 + $0x180] sm:$0xff] }
  0x25   : > { %484 = vmatpush.bf16.msra.mxu3 %v1264_v25  ;;  %v366_v41 = vld [vmem:[#allocation1] sm:$0xff]  ;;  %v367_v42 = vld [vmem:[#allocation1 + $0x9] sm:$0xff] }
  0x26   : > { %345 = vmatpush.bf16.msra.mxu0 %v1271_v28  ;;  %528 = vst [vmem:[#allocation1] ss:$9 sm:$0xff] %v1058_v36  ;;  %v1310_v11 = vld [vmem:[%s1580_s1 + $0x1c0] sm:$0xff]  ;;  %v166_v36 = vld [vmem:[#allocation2] sm:$0x1] }
  0x27   : > { %358 = vmatpush.bf16.msra.mxu1 %v1279_v29 }
  0x28   : > { %472 = vmatpush.bf16.msra.mxu2 %v1255_v30 }
  0x29   : > { %485 = vmatpush.bf16.msra.mxu3 %v1263_v31 }
  0x2a   : > { %346 = vmatpush.bf16.msra.mxu0 %v1270_v32 }
  0x2b   : > { %359 = vmatpush.bf16.msra.mxu1 %v1278_v33 }
  0x2c   : > { %473 = vmatpush.bf16.msra.mxu2 %v1254_v34 }
  0x2d   : > { %486 = vmatpush.bf16.msra.mxu3 %v1262_v35  ;;  %347 = vmatmul.bf16.vlgmr.msra.gmra.mxu0 %v237_v43  ;;  %v529_v54 = vld [vmem:[#allocation1] sm:$0xff]  ;;  %v530_v55 = vld [vmem:[#allocation1 + $0x9] sm:$0xff] }
  0x2e   : > { %629 = vmatpush.bf16.msrb.mxu0 %v1293_v37  ;;  %360 = vmatmul.bf16.vlgmr.msra.gmra.mxu1 %v239_v44  ;;  %691 = vst [vmem:[#allocation1] ss:$9 sm:$0xff] %v1155_v49 }
  0x2f   : > { %642 = vmatpush.bf16.msrb.mxu1 %v1301_v38  ;;  %474 = vmatmul.bf16.vlgmr.msra.gmra.mxu2 %v366_v41 }
  0x30   : > { %796 = vmatpush.bf16.msrb.mxu2 %v1309_v39  ;;  %487 = vmatmul.bf16.vlgmr.msra.gmra.mxu3 %v367_v42 }
  0x31   : > { %809 = vmatpush.bf16.msrb.mxu3 %v1317_v40 }
  0x32   : > { %630 = vmatpush.bf16.msrb.mxu0 %v1292_v45 }
  0x33   : > { %643 = vmatpush.bf16.msrb.mxu1 %v1300_v46 }
  0x34   : > { %797 = vmatpush.bf16.msrb.mxu2 %v1308_v47 }
  0x35   : > { %810 = vmatpush.bf16.msrb.mxu3 %v1316_v48  ;;  %v692_v12 = vld [vmem:[#allocation1] sm:$0xff]  ;;  %v693_v13 = vld [vmem:[#allocation1 + $0x9] sm:$0xff] }
  0x36   : > { %631 = vmatpush.bf16.msrb.mxu0 %v1291_v50  ;;  %v694_v14 = vshrl.u32 %v692_v12, 16  ;;  %v696_v15 = vshrl.u32 %v693_v13, 16 }
  0x37   : > { %644 = vmatpush.bf16.msrb.mxu1 %v1299_v51 }
  0x38   : > { %798 = vmatpush.bf16.msrb.mxu2 %v1307_v52 }
  0x39   : > { %811 = vmatpush.bf16.msrb.mxu3 %v1315_v53 }
  0x3a   : > { %632 = vmatpush.bf16.msrb.mxu0 %v1290_v56 }
  0x3b   : > { %645 = vmatpush.bf16.msrb.mxu1 %v1298_v57 }
  0x3c   : > { %799 = vmatpush.bf16.msrb.mxu2 %v1306_v58 }
  0x3d   : > { %812 = vmatpush.bf16.msrb.mxu3 %v1314_v59 }
  0x3e   : > { %633 = vmatpush.bf16.msrb.mxu0 %v1289_v60 }
  0x3f   : > { %646 = vmatpush.bf16.msrb.mxu1 %v1297_v61 }
  0x40   : > { %800 = vmatpush.bf16.msrb.mxu2 %v1305_v62 }
  0x41   : > { %813 = vmatpush.bf16.msrb.mxu3 %v1313_v63 }
  0x42   : > { %634 = vmatpush.bf16.msrb.mxu0 %v1288_v0 }
  0x43   : > { %647 = vmatpush.bf16.msrb.mxu1 %v1296_v1 }
  0x44   : > { %801 = vmatpush.bf16.msrb.mxu2 %v1304_v2 }
  0x45   : > { %814 = vmatpush.bf16.msrb.mxu3 %v1312_v3 }
  0x46   : > { %635 = vmatpush.bf16.msrb.mxu0 %v1287_v4 }
  0x47   : > { %648 = vmatpush.bf16.msrb.mxu1 %v1295_v5 }
  0x48   : > { %802 = vmatpush.bf16.msrb.mxu2 %v1303_v6 }
  0x49   : > { %815 = vmatpush.bf16.msrb.mxu3 %v1311_v7 }
  0x4a   : > { %636 = vmatpush.bf16.msrb.mxu0 %v1286_v8 }
  0x4b   : > { %649 = vmatpush.bf16.msrb.mxu1 %v1294_v9 }
  0x4c   : > { %803 = vmatpush.bf16.msrb.mxu2 %v1302_v10 }
  0x4d   : > { %816 = vmatpush.bf16.msrb.mxu3 %v1310_v11  ;;  %637 = vmatmul.bf16.vlgmr.msrb.gmra.mxu0 %v529_v54 }
  0x4e   : > { %650 = vmatmul.bf16.vlgmr.msrb.gmra.mxu1 %v530_v55 }
  0x4f   : > { %804 = vmatmul.bf16.vlgmr.msrb.gmra.mxu2 %v694_v14 }
  0x50   : > { %817 = vmatmul.bf16.vlgmr.msrb.gmra.mxu3 %v696_v15 }
  0xaa   : > { %v348_v16 = vpop.f32.mrf.mxu0 }
  0xab   : > { %v361_v17 = vpop.f32.mrf.mxu1 }
  0xac   : > { %v362_v24 = vadd.f32 %v361_v17, %v348_v16 }
  0xb2   : > { %v475_v18 = vpop.f32.mrf.mxu2  ;;  %v350_v20 = vpop.f32.mrf.mxu0 }
  0xb3   : > { %v488_v19 = vpop.f32.mrf.mxu3  ;;  %v363_v21 = vpop.f32.mrf.mxu1  ;;  %v476_v27 = vadd.f32 %v475_v18, %v362_v24 }
  0xb5   : > { %v489_v29 = vadd.f32 %v488_v19, %v476_v27 }
  0xba   : > { %v477_v22 = vpop.f32.mrf.mxu2 }
  0xbb   : > { %v490_v23 = vpop.f32.mrf.mxu3 }
  0xca   : > { %v638_v25 = vpop.f32.mrf.mxu0 }
  0xcb   : > { %v651_v26 = vpop.f32.mrf.mxu1 }
  0xcc   : > { %v652_v28 = vadd.f32 %v651_v26, %v638_v25 }
  0xce   : > { %v655_v32 = vadd.f32 %v652_v28, %v489_v29 }
  0xd2   : > { %v805_v30 = vpop.f32.mrf.mxu2  ;;  %v640_v34 = vpop.f32.mrf.mxu0 }
  0xd3   : > { %v818_v31 = vpop.f32.mrf.mxu3  ;;  %v653_v35 = vpop.f32.mrf.mxu1 }
  0xd4   : > { %v819_v33 = vadd.f32 %v818_v31, %v805_v30 }
  0xd6   : > { %v822_v37 = vadd.f32 %v819_v33, %v655_v32 }
  0xd8   : > { %v823_v38 = vadd.f32 %v822_v37, %v166_v36 }
  0xda   : > { %v824_v39 = vsub.f32 0.0, %v823_v38  ;;  %v807_v40 = vpop.f32.mrf.mxu2 }
  0xdb   : > { %v820_v41 = vpop.f32.mrf.mxu3 }
  0xdc   : > { %v825_v42 = vmul.f32 1.442695, %v824_v39 }
  0xde   : > { %1326 = vpow2.f32 %v825_v42 }
  0xe4   : > { %v1327_v43 = vpop.eup %1326 }
  0xe5   : > { %v827_v44 = vadd.f32 1.0, %v1327_v43 }
  0xe7   : > { %1328 = vrcp.f32 %v827_v44  ;;  %v839_v48 = vand.u32 2147483648, %v827_v44  ;;  %v837_v50 = vand.u32 2147483647, %v827_v44  ;;  %vm833_vm1 = vweird.f32 %v827_v44 }
  0xe9   : > { %v840_v52 = vor.u32 1.1754944e-38, %v839_v48  ;;  %vm838_vm4 = vcmp.eq.f32.partialorder %v837_v50, 8.507059e+37 }
  0xed   : > { %v1329_v45 = vpop.eup %1328 }
  0xee   : > { %v829_v46 = vmul.f32 %v1329_v45, %v827_v44  ;;  %vm834_vm0 = vweird.f32 %v1329_v45 }
  0xef   : > { %vm835_vm2 = vmor %vm833_vm1, %vm834_vm0 }
  0xf0   : > { %v830_v47 = vsub.f32 1.0, %v829_v46 }
  0xf2   : > { %v831_v49 = vmul.f32 %v1329_v45, %v830_v47 }
  0xf4   : > { %v832_v51 = vadd.f32 %v1329_v45, %v831_v49 }
  0xf6   : > { %v836_v53 = vsel %vm835_vm2, %v1329_v45, %v832_v51 }
  0xf7   : > { %v841_v54 = vsel %vm838_vm4, %v840_v52, %v836_v53 }
  0xf8   : > { %844 = vst.msk [vmem:[%s165_s21] sm:$0x1] %vm843_vm3, %v841_v54 }
  0xf9 PF: > { %s15_s14 = sadd.s32 1, %s1336_s14  }
  0xfa   : > { %p12_p4 = scmp.ge.s32.totalorder %s15_s14, 4  }
  0xfc   :  { %14 = sbr.rel (!%p12_p4) target bundleno = 3 (0x3), region = 66 }

</bundles_post_ra>
